<compile_context>
chip_gen: v7x
topology: tpu7x:2x2x1
jax: 0.10.0
libtpu: 0.0.40
codegen_flags: <defaults>
</compile_context>

<pallas_src>
import functools

import jax
import jax.numpy as jnp
from jax import lax
from jax.experimental import pallas as pl


# ---------------------------------------------------------------------------
# Pallas kernels
# ---------------------------------------------------------------------------

def _matmul_bias_act_kernel(a_ref, w_ref, b_ref, o_ref, *, apply_relu):
    # a_ref: (M, K), w_ref: (K, N), b_ref: (1, N), o_ref: (M, N) -- all VMEM.
    acc = jnp.dot(a_ref[...], w_ref[...], preferred_element_type=jnp.float32)
    acc = acc + b_ref[...]                       # (1, N) broadcasts over rows
    if apply_relu:
        acc = jnp.maximum(acc, 0.0)
    o_ref[...] = acc.astype(o_ref.dtype)


def matmul_bias_act(a, w, b, *, apply_relu):
    """o = relu?(a @ w + b).  Single-block pallas_call (whole arrays in VMEM)."""
    m, k = a.shape
    k2, n = w.shape
    assert k == k2, (a.shape, w.shape)
    kernel = functools.partial(_matmul_bias_act_kernel, apply_relu=apply_relu)
    return pl.pallas_call(
        kernel,
        out_shape=jax.ShapeDtypeStruct((m, n), a.dtype),
    )(a, w, b.reshape(1, n))


def _max4_kernel(a_ref, b_ref, c_ref, d_ref, o_ref):
    # Elementwise max of the four 2x2-window candidates (lane-dense 2-D slabs).
    o_ref[...] = jnp.maximum(jnp.maximum(a_ref[...], b_ref[...]),
                             jnp.maximum(c_ref[...], d_ref[...]))


def max4(a, b, c, d):
    return pl.pallas_call(
        _max4_kernel,
        out_shape=jax.ShapeDtypeStruct(a.shape, a.dtype),
    )(a, b, c, d)


# ---------------------------------------------------------------------------
# Layer wrappers (layout plumbing in XLA, compute in Pallas)
# ---------------------------------------------------------------------------

def conv2d_relu(x, wt, b):
    """5x5 conv, stride 1, pad 2, fused ReLU.  x: NCHW, wt: (Cout, C, 5, 5)."""
    n, c, h, w = x.shape
    cout, cin, kh, kw = wt.shape
    assert cin == c
    xp = jnp.pad(x, ((0, 0), (0, 0), (kh // 2, kh // 2), (kw // 2, kw // 2)))
    # im2col: feature order (c, ki, kj) to match the PyTorch OIHW weight layout.
    taps = [xp[:, :, ki:ki + h, kj:kj + w]
            for ki in range(kh) for kj in range(kw)]
    patches = jnp.stack(taps, axis=2)                       # (N, C, KH*KW, H, W)
    patches = patches.transpose(0, 3, 4, 1, 2).reshape(n * h * w, c * kh * kw)
    w_mat = wt.reshape(cout, c * kh * kw).T                 # (C*KH*KW, Cout)
    y = matmul_bias_act(patches, w_mat, b, apply_relu=True)  # (N*H*W, Cout) on MXU
    return y.reshape(n, h, w, cout).transpose(0, 3, 1, 2)    # back to NCHW


def maxpool2x2(x):
    """2x2 max pool (stride 2) on NCHW input.

    Returns the result already flattened to (N, C*Hp*Wp) in torch .view(N, -1)
    order (c, h, w) -- so the FlattenLayer costs nothing.
    """
    n, c, h, w = x.shape
    hp, wp = h // 2, w // 2
    flat = c * hp * wp
    a = x[:, :, 0::2, 0::2].reshape(n, flat)
    b = x[:, :, 0::2, 1::2].reshape(n, flat)
    cc = x[:, :, 1::2, 0::2].reshape(n, flat)
    d = x[:, :, 1::2, 1::2].reshape(n, flat)
    return max4(a, b, cc, d)


@jax.jit
def lenet_forward(x, params):
    n = x.shape[0]
    h1 = conv2d_relu(x, params["w1"], params["b1"])        # (N, 20, 28, 28)
    p1 = maxpool2x2(h1).reshape(n, 20, 14, 14)             # reshape is free
    h2 = conv2d_relu(p1, params["w2"], params["b2"])       # (N, 50, 14, 14)
    p2 = maxpool2x2(h2)                                    # (N, 2450) == flatten
    f1 = matmul_bias_act(p2, params["w3"], params["b3"], apply_relu=True)
    out = matmul_bias_act(f1, params["w4"], params["b4"], apply_relu=False)
    return out                                             # (N, num_classes)


# ---------------------------------------------------------------------------
# Pure-JAX reference (independent path: lax.conv + reshape-max pooling)
# ---------------------------------------------------------------------------

def lenet_reference(x, params):
    hp = lax.Precision.HIGHEST

    def conv(x, w, b):
        y = lax.conv_general_dilated(
            x, w, window_strides=(1, 1), padding=((2, 2), (2, 2)),
            dimension_numbers=("NCHW", "OIHW", "NCHW"), precision=hp)
        return jnp.maximum(y + b[None, :, None, None], 0.0)

    def pool(x):
        n, c, h, w = x.shape
        return x.reshape(n, c, h // 2, 2, w // 2, 2).max(axis=(3, 5))

    h1 = pool(conv(x, params["w1"], params["b1"]))
    h2 = pool(conv(h1, params["w2"], params["b2"]))
    f = h2.reshape(x.shape[0], -1)
    f1 = jnp.maximum(jnp.dot(f, params["w3"], precision=hp) + params["b3"], 0.0)
    return jnp.dot(f1, params["w4"], precision=hp) + params["b4"]


# ---------------------------------------------------------------------------
# Main
# ---------------------------------------------------------------------------

if __name__ == "__main__":
    key = jax.random.PRNGKey(0)
    keys = jax.random.split(key, 9)

    # LeNet's fc expects 2450 = 50 * 7 * 7 features => 28x28 spatial input.
    N, DIM, HW, NUM_CLASSES = 2, 1, 28, 10

    def u(k, shape, fan_in):
        bound = 1.0 / float(fan_in) ** 0.5
        return jax.random.uniform(k, shape, jnp.float32, -bound, bound)

    params = {
        "w1": u(keys[0], (20, DIM, 5, 5), DIM * 25),
        "b1": u(keys[1], (20,), DIM * 25),
        "w2": u(keys[2], (50, 20, 5, 5), 20 * 25),
        "b2": u(keys[3], (50,), 20 * 25),
        "w3": u(keys[4], (2450, 500), 2450),   # fc1 weight, stored (K, N)
        "b3": u(keys[5], (500,), 2450),
        "w4": u(keys[6], (500, NUM_CLASSES), 500),
        "b4": u(keys[7], (NUM_CLASSES,), 500),
    }
    x = jax.random.normal(keys[8], (N, DIM, HW, HW), dtype=jnp.float32)

    out = jax.block_until_ready(lenet_forward(x, params))
    ref = jax.block_until_ready(lenet_reference(x, params))

    assert out.shape == (N, NUM_CLASSES), out.shape
    assert out.dtype == jnp.float32, out.dtype
    max_err = float(jnp.max(jnp.abs(out - ref)))
    assert bool(jnp.allclose(out, ref, atol=1e-2, rtol=1e-2)), \
        f"mismatch vs reference LeNet forward (max abs err {max_err})"

    print("KERNEL_OK")
</pallas_src>

<mosaic_0001>
module attributes {stable_mosaic.version = 11 : i64} {
  func.func @_matmul_bias_act_kernel(%arg0: memref<1568x25xf32, #tpu.memory_space<vmem>>, %arg1: memref<25x20xf32, #tpu.memory_space<vmem>>, %arg2: memref<1x20xf32, #tpu.memory_space<vmem>>, %arg3: memref<1568x20xf32, #tpu.memory_space<vmem>>) attributes {dimension_semantics = [], scalar_prefetch = 0 : i64, scratch_operands = 0 : i64, tpu.core_type = #tpu.core_type<tc>} {
    %c0 = arith.constant 0 : index
    %c0_0 = arith.constant 0 : index
    %0 = vector.load %arg0[%c0, %c0_0] : memref<1568x25xf32, #tpu.memory_space<vmem>>, vector<1568x25xf32>
    %c0_1 = arith.constant 0 : index
    %c0_2 = arith.constant 0 : index
    %1 = vector.load %arg1[%c0_1, %c0_2] : memref<25x20xf32, #tpu.memory_space<vmem>>, vector<25x20xf32>
    %cst = arith.constant dense<0.000000e+00> : vector<1568x20xf32>
    %2 = tpu.matmul %0, %1, %cst {dimension_numbers = #tpu.dot_dimension_numbers<[1], [0], [0], [1], [0, 0, 1, 1], [], []>} : vector<1568x25xf32>, vector<25x20xf32>, vector<1568x20xf32> -> vector<1568x20xf32>
    %c0_3 = arith.constant 0 : index
    %c0_4 = arith.constant 0 : index
    %3 = vector.load %arg2[%c0_3, %c0_4] : memref<1x20xf32, #tpu.memory_space<vmem>>, vector<1x20xf32>
    %4 = vector.broadcast %3 : vector<1x20xf32> to vector<1568x20xf32>
    %5 = arith.addf %2, %4 : vector<1568x20xf32>
    %cst_5 = arith.constant 0.000000e+00 : f32
    %6 = vector.broadcast %cst_5 : f32 to vector<1568x20xf32>
    %7 = arith.maximumf %5, %6 : vector<1568x20xf32>
    %c0_6 = arith.constant 0 : index
    %c0_7 = arith.constant 0 : index
    %8 = vector.load %arg3[%c0_6, %c0_7] : memref<1568x20xf32, #tpu.memory_space<vmem>>, vector<1568x20xf32>
    tpu.vector_store %arg3[%c0_6, %c0_7], %7 {strides = array<i32>} : memref<1568x20xf32, #tpu.memory_space<vmem>>, vector<1568x20xf32>,
    return
  }
}

module attributes {stable_mosaic.version = 11 : i64} {
  func.func @_max4_kernel(%arg0: memref<2x3920xf32, #tpu.memory_space<vmem>>, %arg1: memref<2x3920xf32, #tpu.memory_space<vmem>>, %arg2: memref<2x3920xf32, #tpu.memory_space<vmem>>, %arg3: memref<2x3920xf32, #tpu.memory_space<vmem>>, %arg4: memref<2x3920xf32, #tpu.memory_space<vmem>>) attributes {dimension_semantics = [], scalar_prefetch = 0 : i64, scratch_operands = 0 : i64, tpu.core_type = #tpu.core_type<tc>} {
    %c0 = arith.constant 0 : index
    %c0_0 = arith.constant 0 : index
    %0 = vector.load %arg0[%c0, %c0_0] : memref<2x3920xf32, #tpu.memory_space<vmem>>, vector<2x3920xf32>
    %c0_1 = arith.constant 0 : index
    %c0_2 = arith.constant 0 : index
    %1 = vector.load %arg1[%c0_1, %c0_2] : memref<2x3920xf32, #tpu.memory_space<vmem>>, vector<2x3920xf32>
    %2 = arith.maximumf %0, %1 : vector<2x3920xf32>
    %c0_3 = arith.constant 0 : index
    %c0_4 = arith.constant 0 : index
    %3 = vector.load %arg2[%c0_3, %c0_4] : memref<2x3920xf32, #tpu.memory_space<vmem>>, vector<2x3920xf32>
    %c0_5 = arith.constant 0 : index
    %c0_6 = arith.constant 0 : index
    %4 = vector.load %arg3[%c0_5, %c0_6] : memref<2x3920xf32, #tpu.memory_space<vmem>>, vector<2x3920xf32>
    %5 = arith.maximumf %3, %4 : vector<2x3920xf32>
    %6 = arith.maximumf %2, %5 : vector<2x3920xf32>
    %c0_7 = arith.constant 0 : index
    %c0_8 = arith.constant 0 : index
    %7 = vector.load %arg4[%c0_7, %c0_8] : memref<2x3920xf32, #tpu.memory_space<vmem>>, vector<2x3920xf32>
    tpu.vector_store %arg4[%c0_7, %c0_8], %6 {strides = array<i32>} : memref<2x3920xf32, #tpu.memory_space<vmem>>, vector<2x3920xf32>,
    return
  }
}

module attributes {stable_mosaic.version = 11 : i64} {
  func.func @_matmul_bias_act_kernel(%arg0: memref<392x500xf32, #tpu.memory_space<vmem>>, %arg1: memref<500x50xf32, #tpu.memory_space<vmem>>, %arg2: memref<1x50xf32, #tpu.memory_space<vmem>>, %arg3: memref<392x50xf32, #tpu.memory_space<vmem>>) attributes {dimension_semantics = [], scalar_prefetch = 0 : i64, scratch_operands = 0 : i64, tpu.core_type = #tpu.core_type<tc>} {
    %c0 = arith.constant 0 : index
    %c0_0 = arith.constant 0 : index
    %0 = vector.load %arg0[%c0, %c0_0] : memref<392x500xf32, #tpu.memory_space<vmem>>, vector<392x500xf32>
    %c0_1 = arith.constant 0 : index
    %c0_2 = arith.constant 0 : index
    %1 = vector.load %arg1[%c0_1, %c0_2] : memref<500x50xf32, #tpu.memory_space<vmem>>, vector<500x50xf32>
    %cst = arith.constant dense<0.000000e+00> : vector<392x50xf32>
    %2 = tpu.matmul %0, %1, %cst {dimension_numbers = #tpu.dot_dimension_numbers<[1], [0], [0], [1], [0, 0, 1, 1], [], []>} : vector<392x500xf32>, vector<500x50xf32>, vector<392x50xf32> -> vector<392x50xf32>
    %c0_3 = arith.constant 0 : index
    %c0_4 = arith.constant 0 : index
    %3 = vector.load %arg2[%c0_3, %c0_4] : memref<1x50xf32, #tpu.memory_space<vmem>>, vector<1x50xf32>
    %4 = vector.broadcast %3 : vector<1x50xf32> to vector<392x50xf32>
    %5 = arith.addf %2, %4 : vector<392x50xf32>
    %cst_5 = arith.constant 0.000000e+00 : f32
    %6 = vector.broadcast %cst_5 : f32 to vector<392x50xf32>
    %7 = arith.maximumf %5, %6 : vector<392x50xf32>
    %c0_6 = arith.constant 0 : index
    %c0_7 = arith.constant 0 : index
    %8 = vector.load %arg3[%c0_6, %c0_7] : memref<392x50xf32, #tpu.memory_space<vmem>>, vector<392x50xf32>
    tpu.vector_store %arg3[%c0_6, %c0_7], %7 {strides = array<i32>} : memref<392x50xf32, #tpu.memory_space<vmem>>, vector<392x50xf32>,
    return
  }
}

module attributes {stable_mosaic.version = 11 : i64} {
  func.func @_max4_kernel(%arg0: memref<2x2450xf32, #tpu.memory_space<vmem>>, %arg1: memref<2x2450xf32, #tpu.memory_space<vmem>>, %arg2: memref<2x2450xf32, #tpu.memory_space<vmem>>, %arg3: memref<2x2450xf32, #tpu.memory_space<vmem>>, %arg4: memref<2x2450xf32, #tpu.memory_space<vmem>>) attributes {dimension_semantics = [], scalar_prefetch = 0 : i64, scratch_operands = 0 : i64, tpu.core_type = #tpu.core_type<tc>} {
    %c0 = arith.constant 0 : index
    %c0_0 = arith.constant 0 : index
    %0 = vector.load %arg0[%c0, %c0_0] : memref<2x2450xf32, #tpu.memory_space<vmem>>, vector<2x2450xf32>
    %c0_1 = arith.constant 0 : index
    %c0_2 = arith.constant 0 : index
    %1 = vector.load %arg1[%c0_1, %c0_2] : memref<2x2450xf32, #tpu.memory_space<vmem>>, vector<2x2450xf32>
    %2 = arith.maximumf %0, %1 : vector<2x2450xf32>
    %c0_3 = arith.constant 0 : index
    %c0_4 = arith.constant 0 : index
    %3 = vector.load %arg2[%c0_3, %c0_4] : memref<2x2450xf32, #tpu.memory_space<vmem>>, vector<2x2450xf32>
    %c0_5 = arith.constant 0 : index
    %c0_6 = arith.constant 0 : index
    %4 = vector.load %arg3[%c0_5, %c0_6] : memref<2x2450xf32, #tpu.memory_space<vmem>>, vector<2x2450xf32>
    %5 = arith.maximumf %3, %4 : vector<2x2450xf32>
    %6 = arith.maximumf %2, %5 : vector<2x2450xf32>
    %c0_7 = arith.constant 0 : index
    %c0_8 = arith.constant 0 : index
    %7 = vector.load %arg4[%c0_7, %c0_8] : memref<2x2450xf32, #tpu.memory_space<vmem>>, vector<2x2450xf32>
    tpu.vector_store %arg4[%c0_7, %c0_8], %6 {strides = array<i32>} : memref<2x2450xf32, #tpu.memory_space<vmem>>, vector<2x2450xf32>,
    return
  }
}

module attributes {stable_mosaic.version = 11 : i64} {
  func.func @_matmul_bias_act_kernel(%arg0: memref<2x2450xf32, #tpu.memory_space<vmem>>, %arg1: memref<2450x500xf32, #tpu.memory_space<vmem>>, %arg2: memref<1x500xf32, #tpu.memory_space<vmem>>, %arg3: memref<2x500xf32, #tpu.memory_space<vmem>>) attributes {dimension_semantics = [], scalar_prefetch = 0 : i64, scratch_operands = 0 : i64, tpu.core_type = #tpu.core_type<tc>} {
    %c0 = arith.constant 0 : index
    %c0_0 = arith.constant 0 : index
    %0 = vector.load %arg0[%c0, %c0_0] : memref<2x2450xf32, #tpu.memory_space<vmem>>, vector<2x2450xf32>
    %c0_1 = arith.constant 0 : index
    %c0_2 = arith.constant 0 : index
    %1 = vector.load %arg1[%c0_1, %c0_2] : memref<2450x500xf32, #tpu.memory_space<vmem>>, vector<2450x500xf32>
    %cst = arith.constant dense<0.000000e+00> : vector<2x500xf32>
    %2 = tpu.matmul %0, %1, %cst {dimension_numbers = #tpu.dot_dimension_numbers<[1], [0], [0], [1], [0, 0, 1, 1], [], []>} : vector<2x2450xf32>, vector<2450x500xf32>, vector<2x500xf32> -> vector<2x500xf32>
    %c0_3 = arith.constant 0 : index
    %c0_4 = arith.constant 0 : index
    %3 = vector.load %arg2[%c0_3, %c0_4] : memref<1x500xf32, #tpu.memory_space<vmem>>, vector<1x500xf32>
    %4 = vector.broadcast %3 : vector<1x500xf32> to vector<2x500xf32>
    %5 = arith.addf %2, %4 : vector<2x500xf32>
    %cst_5 = arith.constant 0.000000e+00 : f32
    %6 = vector.broadcast %cst_5 : f32 to vector<2x500xf32>
    %7 = arith.maximumf %5, %6 : vector<2x500xf32>
    %c0_6 = arith.constant 0 : index
    %c0_7 = arith.constant 0 : index
    %8 = vector.load %arg3[%c0_6, %c0_7] : memref<2x500xf32, #tpu.memory_space<vmem>>, vector<2x500xf32>
    tpu.vector_store %arg3[%c0_6, %c0_7], %7 {strides = array<i32>} : memref<2x500xf32, #tpu.memory_space<vmem>>, vector<2x500xf32>,
    return
  }
}

module attributes {stable_mosaic.version = 11 : i64} {
  func.func @_matmul_bias_act_kernel(%arg0: memref<2x500xf32, #tpu.memory_space<vmem>>, %arg1: memref<500x10xf32, #tpu.memory_space<vmem>>, %arg2: memref<1x10xf32, #tpu.memory_space<vmem>>, %arg3: memref<2x10xf32, #tpu.memory_space<vmem>>) attributes {dimension_semantics = [], scalar_prefetch = 0 : i64, scratch_operands = 0 : i64, tpu.core_type = #tpu.core_type<tc>} {
    %c0 = arith.constant 0 : index
    %c0_0 = arith.constant 0 : index
    %0 = vector.load %arg0[%c0, %c0_0] : memref<2x500xf32, #tpu.memory_space<vmem>>, vector<2x500xf32>
    %c0_1 = arith.constant 0 : index
    %c0_2 = arith.constant 0 : index
    %1 = vector.load %arg1[%c0_1, %c0_2] : memref<500x10xf32, #tpu.memory_space<vmem>>, vector<500x10xf32>
    %cst = arith.constant dense<0.000000e+00> : vector<2x10xf32>
    %2 = tpu.matmul %0, %1, %cst {dimension_numbers = #tpu.dot_dimension_numbers<[1], [0], [0], [1], [0, 0, 1, 1], [], []>} : vector<2x500xf32>, vector<500x10xf32>, vector<2x10xf32> -> vector<2x10xf32>
    %c0_3 = arith.constant 0 : index
    %c0_4 = arith.constant 0 : index
    %3 = vector.load %arg2[%c0_3, %c0_4] : memref<1x10xf32, #tpu.memory_space<vmem>>, vector<1x10xf32>
    %4 = vector.broadcast %3 : vector<1x10xf32> to vector<2x10xf32>
    %5 = arith.addf %2, %4 : vector<2x10xf32>
    %c0_5 = arith.constant 0 : index
    %c0_6 = arith.constant 0 : index
    %6 = vector.load %arg3[%c0_5, %c0_6] : memref<2x10xf32, #tpu.memory_space<vmem>>, vector<2x10xf32>
    tpu.vector_store %arg3[%c0_5, %c0_6], %5 {strides = array<i32>} : memref<2x10xf32, #tpu.memory_space<vmem>>, vector<2x10xf32>,
    return
  }
}

</mosaic_0001>

<bundles_post_ra>
// kernel: lenet_forward.6
= control target key start
LH: loop header
LB: loop body
LE: loop exit
PB: predicated region body
PF: predicated region fallthrough
CT: control target
= control target key end

     0   :  { %vm810_vm0 = vcmask 1040384   ;;  %vm221_vm1 = vcmask 203776   ;;  %vm2972_vm2 = vmmov 1   ;;  %vm2055_vm4 = vcmask 162816   ;;  %s4779_s1 = inlined_call_operand.vmem [shape: f32[25,20], index: 1, kind: input, shape index: {}]   ;;  %s4780_s0 = inlined_call_operand.vmem [shape: f32[1568,25], index: 0, kind: input, shape index: {}]   ;;  %s4781_s2 = inlined_call_operand.vmem [shape: f32[1,20], index: 2, kind: input, shape index: {}]   ;;  %s4782_s3 = inlined_call_operand.vmem [shape: f32[1568,20], index: 3, kind: output, shape index: {}]  }
   0x1   :  { %v210_v0 = vld [vmem:[%s4779_s1] sm:$0xff]  ;;  %v211_v1 = vld [vmem:[%s4779_s1 + $0x8] sm:$0xff]  ;;  %v212_v2 = vld [vmem:[%s4779_s1 + $0x10] sm:$0xff] }
   0x2   :  { %v2956_v3 = vpack.c.bf16 %v211_v1, %v210_v0  ;;  %v213_v4 = vld [vmem:[%s4779_s1 + $0x18] sm:$0x1]  ;;  %v14_v5 = vld [vmem:[%s4780_s0] sm:$0xff]  ;;  %vm2961_vm3 = vmpackc.low %vm810_vm0, %vm2972_vm2 }
   0x3   :  { %v2960_v6 = vpack.c.bf16 %v213_v4, %v212_v2  ;;  %2662 = vmatprep.mubr.msk.f32.mxu0 %vm221_vm1, %v14_v5  ;;  %v112_v7 = vld [vmem:[%s4780_s0 + $0x310] sm:$0xff]  ;;  %v15_v8 = vld [vmem:[%s4780_s0 + $0x8] sm:$0xff]  ;;  %v113_v9 = vld [vmem:[%s4780_s0 + $0x318] sm:$0xff] }
   0x4   :  { %2957 = vmatprep.subr.bf16.mxu0 %v2956_v3  ;;  %2966 = vmatprep.subr.bf16.mxu1 %v2956_v3  ;;  %v16_v10 = vld [vmem:[%s4780_s0 + $0x10] sm:$0xff]  ;;  %v114_v11 = vld [vmem:[%s4780_s0 + $0x320] sm:$0xff]  ;;  %v17_v12 = vld [vmem:[%s4780_s0 + $0x18] sm:$0xff] }
   0x5   :  { %2959 = vmatpush3.bf16.msra.mxu0 %v2956_v3  ;;  %2968 = vmatpush3.bf16.msra.mxu1 %v2956_v3  ;;  %v115_v13 = vld [vmem:[%s4780_s0 + $0x328] sm:$0xff]  ;;  %v18_v14 = vld [vmem:[%s4780_s0 + $0x20] sm:$0xff]  ;;  %v116_v15 = vld [vmem:[%s4780_s0 + $0x330] sm:$0xff] }
   0x6   :  { %2962 = vmatprep.subr.msk.bf16.mxu0 %vm2961_vm3, %v2960_v6  ;;  %2967 = vmatprep.subr.msk.bf16.mxu1 %vm2961_vm3, %v2960_v6  ;;  %v19_v16 = vld [vmem:[%s4780_s0 + $0x28] sm:$0xff]  ;;  %v117_v17 = vld [vmem:[%s4780_s0 + $0x338] sm:$0xff]  ;;  %v20_v18 = vld [vmem:[%s4780_s0 + $0x30] sm:$0xff] }
   0x7   :  { %2809 = vmatprep.mubr.msk.f32.mxu1 %vm221_vm1, %v112_v7  ;;  %v118_v19 = vld [vmem:[%s4780_s0 + $0x340] sm:$0xff]  ;;  %v21_v20 = vld [vmem:[%s4780_s0 + $0x38] sm:$0xff]  ;;  %v119_v21 = vld [vmem:[%s4780_s0 + $0x348] sm:$0xff] }
   0x8   :  { %v22_v22 = vld [vmem:[%s4780_s0 + $0x40] sm:$0xff]  ;;  %v120_v23 = vld [vmem:[%s4780_s0 + $0x350] sm:$0xff]  ;;  %v23_v24 = vld [vmem:[%s4780_s0 + $0x48] sm:$0xff] }
   0x9   :  { %2965 = vmatpush3.bf16.msk.msra.mxu0 %vm2961_vm3, %v2960_v6  ;;  %2969 = vmatpush3.bf16.msk.msra.mxu1 %vm2961_vm3, %v2960_v6  ;;  %v121_v25 = vld [vmem:[%s4780_s0 + $0x358] sm:$0xff]  ;;  %v24_v26 = vld [vmem:[%s4780_s0 + $0x50] sm:$0xff]  ;;  %v122_v27 = vld [vmem:[%s4780_s0 + $0x360] sm:$0xff] }
   0xa   :  { %v25_v28 = vld [vmem:[%s4780_s0 + $0x58] sm:$0xff]  ;;  %v123_v29 = vld [vmem:[%s4780_s0 + $0x368] sm:$0xff]  ;;  %v26_v30 = vld [vmem:[%s4780_s0 + $0x60] sm:$0xff] }
   0xb   :  { %v124_v31 = vld [vmem:[%s4780_s0 + $0x370] sm:$0xff]  ;;  %v27_v32 = vld [vmem:[%s4780_s0 + $0x68] sm:$0xff]  ;;  %v125_v33 = vld [vmem:[%s4780_s0 + $0x378] sm:$0xff] }
   0xc   :  { %2663 = vmatmul.mubr.msk.f32.vlgmr.msra.gmra.mrb[0].mxu0 %vm221_vm1, %v15_v8  ;;  %2810 = vmatmul.mubr.msk.f32.vlgmr.msra.gmra.mrb[0].mxu1 %vm221_vm1, %v113_v9  ;;  %v28_v34 = vld [vmem:[%s4780_s0 + $0x70] sm:$0xff]  ;;  %v126_v35 = vld [vmem:[%s4780_s0 + $0x380] sm:$0xff]  ;;  %v29_v36 = vld [vmem:[%s4780_s0 + $0x78] sm:$0xff] }
   0xd   :  { %2665 = vmatprep.mubr.msk.f32.mxu0 %vm221_vm1, %v16_v10  ;;  %2812 = vmatprep.mubr.msk.f32.mxu1 %vm221_vm1, %v114_v11  ;;  %v127_v37 = vld [vmem:[%s4780_s0 + $0x388] sm:$0xff]  ;;  %v30_v38 = vld [vmem:[%s4780_s0 + $0x80] sm:$0xff]  ;;  %v128_v39 = vld [vmem:[%s4780_s0 + $0x390] sm:$0xff] }
   0xe   :  { %v31_v40 = vld [vmem:[%s4780_s0 + $0x88] sm:$0xff]  ;;  %v129_v41 = vld [vmem:[%s4780_s0 + $0x398] sm:$0xff]  ;;  %v32_v42 = vld [vmem:[%s4780_s0 + $0x90] sm:$0xff] }
   0xf   :  { %v130_v43 = vld [vmem:[%s4780_s0 + $0x3a0] sm:$0xff]  ;;  %v33_v44 = vld [vmem:[%s4780_s0 + $0x98] sm:$0xff]  ;;  %v131_v45 = vld [vmem:[%s4780_s0 + $0x3a8] sm:$0xff] }
  0x10   :  { %2666 = vmatmul.mubr.msk.f32.gmra.mrb[2].mxu0 %vm221_vm1, %v17_v12  ;;  %2813 = vmatmul.mubr.msk.f32.gmra.mrb[2].mxu1 %vm221_vm1, %v115_v13  ;;  %v34_v46 = vld [vmem:[%s4780_s0 + $0xa0] sm:$0xff]  ;;  %v132_v47 = vld [vmem:[%s4780_s0 + $0x3b0] sm:$0xff]  ;;  %v35_v48 = vld [vmem:[%s4780_s0 + $0xa8] sm:$0xff] }
  0x11   :  { %2668 = vmatprep.mubr.msk.f32.mxu0 %vm221_vm1, %v18_v14  ;;  %2815 = vmatprep.mubr.msk.f32.mxu1 %vm221_vm1, %v116_v15  ;;  %v133_v49 = vld [vmem:[%s4780_s0 + $0x3b8] sm:$0xff]  ;;  %v36_v50 = vld [vmem:[%s4780_s0 + $0xb0] sm:$0xff]  ;;  %v134_v51 = vld [vmem:[%s4780_s0 + $0x3c0] sm:$0xff] }
  0x12   :  { %v37_v52 = vld [vmem:[%s4780_s0 + $0xb8] sm:$0xff]  ;;  %v135_v53 = vld [vmem:[%s4780_s0 + $0x3c8] sm:$0xff]  ;;  %v38_v54 = vld [vmem:[%s4780_s0 + $0xc0] sm:$0xff] }
  0x13   :  { %v136_v55 = vld [vmem:[%s4780_s0 + $0x3d0] sm:$0xff]  ;;  %v39_v56 = vld [vmem:[%s4780_s0 + $0xc8] sm:$0xff]  ;;  %v137_v57 = vld [vmem:[%s4780_s0 + $0x3d8] sm:$0xff] }
  0x14   :  { %2669 = vmatmul.mubr.msk.f32.gmra.mrb[4].mxu0 %vm221_vm1, %v19_v16  ;;  %2816 = vmatmul.mubr.msk.f32.gmra.mrb[4].mxu1 %vm221_vm1, %v117_v17  ;;  %v40_v58 = vld [vmem:[%s4780_s0 + $0xd0] sm:$0xff]  ;;  %v138_v59 = vld [vmem:[%s4780_s0 + $0x3e0] sm:$0xff]  ;;  %v41_v60 = vld [vmem:[%s4780_s0 + $0xd8] sm:$0xff] }
  0x15   :  { %2671 = vmatprep.mubr.msk.f32.mxu0 %vm221_vm1, %v20_v18  ;;  %2818 = vmatprep.mubr.msk.f32.mxu1 %vm221_vm1, %v118_v19  ;;  %v139_v61 = vld [vmem:[%s4780_s0 + $0x3e8] sm:$0xff]  ;;  %v42_v62 = vld [vmem:[%s4780_s0 + $0xe0] sm:$0xff]  ;;  %v140_v63 = vld [vmem:[%s4780_s0 + $0x3f0] sm:$0xff] }
  0x16   :  { %v43_v0 = vld [vmem:[%s4780_s0 + $0xe8] sm:$0xff]  ;;  %v141_v1 = vld [vmem:[%s4780_s0 + $0x3f8] sm:$0xff]  ;;  %v44_v2 = vld [vmem:[%s4780_s0 + $0xf0] sm:$0xff] }
  0x17   :  { %v142_v3 = vld [vmem:[%s4780_s0 + $0x400] sm:$0xff]  ;;  %v45_v4 = vld [vmem:[%s4780_s0 + $0xf8] sm:$0xff]  ;;  %v143_v5 = vld [vmem:[%s4780_s0 + $0x408] sm:$0xff] }
  0x18   :  { %2672 = vmatmul.mubr.msk.f32.gmra.mrb[6].mxu0 %vm221_vm1, %v21_v20  ;;  %2819 = vmatmul.mubr.msk.f32.gmra.mrb[6].mxu1 %vm221_vm1, %v119_v21  ;;  %v46_v6 = vld [vmem:[%s4780_s0 + $0x100] sm:$0xff]  ;;  %v144_v7 = vld [vmem:[%s4780_s0 + $0x410] sm:$0xff]  ;;  %v47_v8 = vld [vmem:[%s4780_s0 + $0x108] sm:$0xff] }
  0x19   :  { %2674 = vmatprep.mubr.msk.f32.mxu0 %vm221_vm1, %v22_v22  ;;  %2821 = vmatprep.mubr.msk.f32.mxu1 %vm221_vm1, %v120_v23  ;;  %v145_v9 = vld [vmem:[%s4780_s0 + $0x418] sm:$0xff]  ;;  %v48_v10 = vld [vmem:[%s4780_s0 + $0x110] sm:$0xff]  ;;  %v146_v11 = vld [vmem:[%s4780_s0 + $0x420] sm:$0xff] }
  0x1a   :  { %v49_v12 = vld [vmem:[%s4780_s0 + $0x118] sm:$0xff]  ;;  %v147_v13 = vld [vmem:[%s4780_s0 + $0x428] sm:$0xff]  ;;  %v50_v14 = vld [vmem:[%s4780_s0 + $0x120] sm:$0xff] }
  0x1b   :  { %v148_v15 = vld [vmem:[%s4780_s0 + $0x430] sm:$0xff]  ;;  %v51_v16 = vld [vmem:[%s4780_s0 + $0x128] sm:$0xff]  ;;  %v149_v17 = vld [vmem:[%s4780_s0 + $0x438] sm:$0xff] }
  0x1c   :  { %2675 = vmatmul.mubr.msk.f32.gmra.mrb[8].mxu0 %vm221_vm1, %v23_v24  ;;  %2822 = vmatmul.mubr.msk.f32.gmra.mrb[8].mxu1 %vm221_vm1, %v121_v25  ;;  %v52_v18 = vld [vmem:[%s4780_s0 + $0x130] sm:$0xff]  ;;  %v150_v19 = vld [vmem:[%s4780_s0 + $0x440] sm:$0xff]  ;;  %v53_v20 = vld [vmem:[%s4780_s0 + $0x138] sm:$0xff] }
  0x1d   :  { %2677 = vmatprep.mubr.msk.f32.mxu0 %vm221_vm1, %v24_v26  ;;  %2824 = vmatprep.mubr.msk.f32.mxu1 %vm221_vm1, %v122_v27  ;;  %v151_v21 = vld [vmem:[%s4780_s0 + $0x448] sm:$0xff]  ;;  %v54_v22 = vld [vmem:[%s4780_s0 + $0x140] sm:$0xff]  ;;  %v152_v23 = vld [vmem:[%s4780_s0 + $0x450] sm:$0xff] }
  0x1e   :  { %v55_v24 = vld [vmem:[%s4780_s0 + $0x148] sm:$0xff]  ;;  %v153_v25 = vld [vmem:[%s4780_s0 + $0x458] sm:$0xff]  ;;  %v56_v26 = vld [vmem:[%s4780_s0 + $0x150] sm:$0xff] }
  0x1f   :  { %v154_v27 = vld [vmem:[%s4780_s0 + $0x460] sm:$0xff] }
  0x20   :  { %2678 = vmatmul.mubr.msk.f32.gmra.mrb[10].mxu0 %vm221_vm1, %v25_v28  ;;  %2825 = vmatmul.mubr.msk.f32.gmra.mrb[10].mxu1 %vm221_vm1, %v123_v29  ;;  %v57_v28 = vld [vmem:[%s4780_s0 + $0x158] sm:$0xff]  ;;  %v155_v29 = vld [vmem:[%s4780_s0 + $0x468] sm:$0xff] }
  0x21   :  { %2680 = vmatprep.mubr.msk.f32.mxu0 %vm221_vm1, %v26_v30  ;;  %2827 = vmatprep.mubr.msk.f32.mxu1 %vm221_vm1, %v124_v31  ;;  %v58_v30 = vld [vmem:[%s4780_s0 + $0x160] sm:$0xff]  ;;  %v156_v31 = vld [vmem:[%s4780_s0 + $0x470] sm:$0xff] }
  0x24   :  { %2681 = vmatmul.mubr.msk.f32.gmra.mrb[12].mxu0 %vm221_vm1, %v27_v32  ;;  %2828 = vmatmul.mubr.msk.f32.gmra.mrb[12].mxu1 %vm221_vm1, %v125_v33  ;;  %v59_v32 = vld [vmem:[%s4780_s0 + $0x168] sm:$0xff]  ;;  %v157_v33 = vld [vmem:[%s4780_s0 + $0x478] sm:$0xff] }
  0x25   :  { %2683 = vmatprep.mubr.msk.f32.mxu0 %vm221_vm1, %v28_v34  ;;  %2830 = vmatprep.mubr.msk.f32.mxu1 %vm221_vm1, %v126_v35  ;;  %v60_v34 = vld [vmem:[%s4780_s0 + $0x170] sm:$0xff]  ;;  %v158_v35 = vld [vmem:[%s4780_s0 + $0x480] sm:$0xff] }
  0x28   :  { %2684 = vmatmul.mubr.msk.f32.gmra.mrb[14].mxu0 %vm221_vm1, %v29_v36  ;;  %2831 = vmatmul.mubr.msk.f32.gmra.mrb[14].mxu1 %vm221_vm1, %v127_v37  ;;  %v61_v36 = vld [vmem:[%s4780_s0 + $0x178] sm:$0xff]  ;;  %v159_v37 = vld [vmem:[%s4780_s0 + $0x488] sm:$0xff] }
  0x29   :  { %2686 = vmatprep.mubr.msk.f32.mxu0 %vm221_vm1, %v30_v38  ;;  %2833 = vmatprep.mubr.msk.f32.mxu1 %vm221_vm1, %v128_v39  ;;  %v62_v38 = vld [vmem:[%s4780_s0 + $0x180] sm:$0xff]  ;;  %v160_v39 = vld [vmem:[%s4780_s0 + $0x490] sm:$0xff] }
  0x2c   :  { %2687 = vmatmul.mubr.msk.f32.gmra.mrb[16].mxu0 %vm221_vm1, %v31_v40  ;;  %2834 = vmatmul.mubr.msk.f32.gmra.mrb[16].mxu1 %vm221_vm1, %v129_v41  ;;  %v63_v40 = vld [vmem:[%s4780_s0 + $0x188] sm:$0xff]  ;;  %v161_v41 = vld [vmem:[%s4780_s0 + $0x498] sm:$0xff] }
  0x2d   :  { %2689 = vmatprep.mubr.msk.f32.mxu0 %vm221_vm1, %v32_v42  ;;  %2836 = vmatprep.mubr.msk.f32.mxu1 %vm221_vm1, %v130_v43  ;;  %v64_v42 = vld [vmem:[%s4780_s0 + $0x190] sm:$0xff]  ;;  %v162_v43 = vld [vmem:[%s4780_s0 + $0x4a0] sm:$0xff] }
  0x30   :  { %2690 = vmatmul.mubr.msk.f32.gmra.mrb[18].mxu0 %vm221_vm1, %v33_v44  ;;  %2837 = vmatmul.mubr.msk.f32.gmra.mrb[18].mxu1 %vm221_vm1, %v131_v45  ;;  %v65_v44 = vld [vmem:[%s4780_s0 + $0x198] sm:$0xff]  ;;  %v163_v45 = vld [vmem:[%s4780_s0 + $0x4a8] sm:$0xff] }
  0x31   :  { %2692 = vmatprep.mubr.msk.f32.mxu0 %vm221_vm1, %v34_v46  ;;  %2839 = vmatprep.mubr.msk.f32.mxu1 %vm221_vm1, %v132_v47  ;;  %v66_v46 = vld [vmem:[%s4780_s0 + $0x1a0] sm:$0xff]  ;;  %v164_v47 = vld [vmem:[%s4780_s0 + $0x4b0] sm:$0xff] }
  0x34   :  { %2693 = vmatmul.mubr.msk.f32.gmra.mrb[20].mxu0 %vm221_vm1, %v35_v48  ;;  %2840 = vmatmul.mubr.msk.f32.gmra.mrb[20].mxu1 %vm221_vm1, %v133_v49  ;;  %v67_v48 = vld [vmem:[%s4780_s0 + $0x1a8] sm:$0xff]  ;;  %v165_v49 = vld [vmem:[%s4780_s0 + $0x4b8] sm:$0xff] }
  0x35   :  { %2695 = vmatprep.mubr.msk.f32.mxu0 %vm221_vm1, %v36_v50  ;;  %2842 = vmatprep.mubr.msk.f32.mxu1 %vm221_vm1, %v134_v51  ;;  %v68_v50 = vld [vmem:[%s4780_s0 + $0x1b0] sm:$0xff]  ;;  %v166_v51 = vld [vmem:[%s4780_s0 + $0x4c0] sm:$0xff] }
  0x38   :  { %2696 = vmatmul.mubr.msk.f32.gmra.mrb[22].mxu0 %vm221_vm1, %v37_v52  ;;  %2843 = vmatmul.mubr.msk.f32.gmra.mrb[22].mxu1 %vm221_vm1, %v135_v53  ;;  %v69_v52 = vld [vmem:[%s4780_s0 + $0x1b8] sm:$0xff]  ;;  %v167_v53 = vld [vmem:[%s4780_s0 + $0x4c8] sm:$0xff] }
  0x39   :  { %2698 = vmatprep.mubr.msk.f32.mxu0 %vm221_vm1, %v38_v54  ;;  %2845 = vmatprep.mubr.msk.f32.mxu1 %vm221_vm1, %v136_v55  ;;  %v70_v54 = vld [vmem:[%s4780_s0 + $0x1c0] sm:$0xff]  ;;  %v168_v55 = vld [vmem:[%s4780_s0 + $0x4d0] sm:$0xff] }
  0x3c   :  { %2699 = vmatmul.mubr.msk.f32.gmra.mrb[24].mxu0 %vm221_vm1, %v39_v56  ;;  %2846 = vmatmul.mubr.msk.f32.gmra.mrb[24].mxu1 %vm221_vm1, %v137_v57  ;;  %v71_v56 = vld [vmem:[%s4780_s0 + $0x1c8] sm:$0xff]  ;;  %v169_v57 = vld [vmem:[%s4780_s0 + $0x4d8] sm:$0xff] }
  0x3d   :  { %2701 = vmatprep.mubr.msk.f32.mxu0 %vm221_vm1, %v40_v58  ;;  %2848 = vmatprep.mubr.msk.f32.mxu1 %vm221_vm1, %v138_v59  ;;  %v72_v58 = vld [vmem:[%s4780_s0 + $0x1d0] sm:$0xff]  ;;  %v170_v59 = vld [vmem:[%s4780_s0 + $0x4e0] sm:$0xff] }
  0x40   :  { %2702 = vmatmul.mubr.msk.f32.gmra.mrb[26].mxu0 %vm221_vm1, %v41_v60  ;;  %2849 = vmatmul.mubr.msk.f32.gmra.mrb[26].mxu1 %vm221_vm1, %v139_v61  ;;  %v73_v60 = vld [vmem:[%s4780_s0 + $0x1d8] sm:$0xff]  ;;  %v171_v61 = vld [vmem:[%s4780_s0 + $0x4e8] sm:$0xff] }
  0x41   :  { %2704 = vmatprep.mubr.msk.f32.mxu0 %vm221_vm1, %v42_v62  ;;  %2851 = vmatprep.mubr.msk.f32.mxu1 %vm221_vm1, %v140_v63  ;;  %v74_v62 = vld [vmem:[%s4780_s0 + $0x1e0] sm:$0xff]  ;;  %v172_v63 = vld [vmem:[%s4780_s0 + $0x4f0] sm:$0xff] }
  0x44   :  { %2705 = vmatmul.mubr.msk.f32.gmra.mrb[28].mxu0 %vm221_vm1, %v43_v0  ;;  %2852 = vmatmul.mubr.msk.f32.gmra.mrb[28].mxu1 %vm221_vm1, %v141_v1  ;;  %v75_v0 = vld [vmem:[%s4780_s0 + $0x1e8] sm:$0xff]  ;;  %v173_v1 = vld [vmem:[%s4780_s0 + $0x4f8] sm:$0xff] }
  0x45   :  { %2707 = vmatprep.mubr.msk.f32.mxu0 %vm221_vm1, %v44_v2  ;;  %2854 = vmatprep.mubr.msk.f32.mxu1 %vm221_vm1, %v142_v3  ;;  %v76_v2 = vld [vmem:[%s4780_s0 + $0x1f0] sm:$0xff]  ;;  %v174_v3 = vld [vmem:[%s4780_s0 + $0x500] sm:$0xff] }
  0x48   :  { %2708 = vmatmul.mubr.msk.f32.gmra.mrb[30].mxu0 %vm221_vm1, %v45_v4  ;;  %2855 = vmatmul.mubr.msk.f32.gmra.mrb[30].mxu1 %vm221_vm1, %v143_v5  ;;  %v77_v4 = vld [vmem:[%s4780_s0 + $0x1f8] sm:$0xff]  ;;  %v175_v5 = vld [vmem:[%s4780_s0 + $0x508] sm:$0xff] }
  0x49   :  { %2710 = vmatprep.mubr.msk.f32.mxu0 %vm221_vm1, %v46_v6  ;;  %2857 = vmatprep.mubr.msk.f32.mxu1 %vm221_vm1, %v144_v7  ;;  %v78_v6 = vld [vmem:[%s4780_s0 + $0x200] sm:$0xff]  ;;  %v176_v7 = vld [vmem:[%s4780_s0 + $0x510] sm:$0xff] }
  0x4c   :  { %2711 = vmatmul.mubr.msk.f32.gmra.mrb[32].mxu0 %vm221_vm1, %v47_v8  ;;  %2858 = vmatmul.mubr.msk.f32.gmra.mrb[32].mxu1 %vm221_vm1, %v145_v9  ;;  %v79_v8 = vld [vmem:[%s4780_s0 + $0x208] sm:$0xff]  ;;  %v177_v9 = vld [vmem:[%s4780_s0 + $0x518] sm:$0xff] }
  0x4d   :  { %2713 = vmatprep.mubr.msk.f32.mxu0 %vm221_vm1, %v48_v10  ;;  %2860 = vmatprep.mubr.msk.f32.mxu1 %vm221_vm1, %v146_v11  ;;  %v80_v10 = vld [vmem:[%s4780_s0 + $0x210] sm:$0xff]  ;;  %v178_v11 = vld [vmem:[%s4780_s0 + $0x520] sm:$0xff] }
  0x50   :  { %2714 = vmatmul.mubr.msk.f32.gmra.mrb[34].mxu0 %vm221_vm1, %v49_v12  ;;  %2861 = vmatmul.mubr.msk.f32.gmra.mrb[34].mxu1 %vm221_vm1, %v147_v13  ;;  %v81_v12 = vld [vmem:[%s4780_s0 + $0x218] sm:$0xff]  ;;  %v179_v13 = vld [vmem:[%s4780_s0 + $0x528] sm:$0xff] }
  0x51   :  { %2716 = vmatprep.mubr.msk.f32.mxu0 %vm221_vm1, %v50_v14  ;;  %2863 = vmatprep.mubr.msk.f32.mxu1 %vm221_vm1, %v148_v15  ;;  %v82_v14 = vld [vmem:[%s4780_s0 + $0x220] sm:$0xff]  ;;  %v180_v15 = vld [vmem:[%s4780_s0 + $0x530] sm:$0xff] }
  0x54   :  { %2717 = vmatmul.mubr.msk.f32.gmra.mrb[36].mxu0 %vm221_vm1, %v51_v16  ;;  %2864 = vmatmul.mubr.msk.f32.gmra.mrb[36].mxu1 %vm221_vm1, %v149_v17  ;;  %v83_v16 = vld [vmem:[%s4780_s0 + $0x228] sm:$0xff]  ;;  %v181_v17 = vld [vmem:[%s4780_s0 + $0x538] sm:$0xff] }
  0x55   :  { %2719 = vmatprep.mubr.msk.f32.mxu0 %vm221_vm1, %v52_v18  ;;  %2866 = vmatprep.mubr.msk.f32.mxu1 %vm221_vm1, %v150_v19  ;;  %v84_v18 = vld [vmem:[%s4780_s0 + $0x230] sm:$0xff]  ;;  %v182_v19 = vld [vmem:[%s4780_s0 + $0x540] sm:$0xff] }
  0x58   :  { %2720 = vmatmul.mubr.msk.f32.gmra.mrb[38].mxu0 %vm221_vm1, %v53_v20  ;;  %2867 = vmatmul.mubr.msk.f32.gmra.mrb[38].mxu1 %vm221_vm1, %v151_v21  ;;  %v85_v20 = vld [vmem:[%s4780_s0 + $0x238] sm:$0xff]  ;;  %v183_v21 = vld [vmem:[%s4780_s0 + $0x548] sm:$0xff] }
  0x59   :  { %2722 = vmatprep.mubr.msk.f32.mxu0 %vm221_vm1, %v54_v22  ;;  %2869 = vmatprep.mubr.msk.f32.mxu1 %vm221_vm1, %v152_v23  ;;  %v86_v22 = vld [vmem:[%s4780_s0 + $0x240] sm:$0xff]  ;;  %v184_v23 = vld [vmem:[%s4780_s0 + $0x550] sm:$0xff] }
  0x5c   :  { %2723 = vmatmul.mubr.msk.f32.gmra.mrb[40].mxu0 %vm221_vm1, %v55_v24  ;;  %2870 = vmatmul.mubr.msk.f32.gmra.mrb[40].mxu1 %vm221_vm1, %v153_v25  ;;  %v87_v24 = vld [vmem:[%s4780_s0 + $0x248] sm:$0xff]  ;;  %v185_v25 = vld [vmem:[%s4780_s0 + $0x558] sm:$0xff] }
  0x5d   :  { %2725 = vmatprep.mubr.msk.f32.mxu0 %vm221_vm1, %v56_v26  ;;  %2872 = vmatprep.mubr.msk.f32.mxu1 %vm221_vm1, %v154_v27  ;;  %v88_v26 = vld [vmem:[%s4780_s0 + $0x250] sm:$0xff]  ;;  %v186_v27 = vld [vmem:[%s4780_s0 + $0x560] sm:$0xff] }
  0x60   :  { %2726 = vmatmul.mubr.msk.f32.gmra.mrb[42].mxu0 %vm221_vm1, %v57_v28  ;;  %2873 = vmatmul.mubr.msk.f32.gmra.mrb[42].mxu1 %vm221_vm1, %v155_v29  ;;  %v89_v28 = vld [vmem:[%s4780_s0 + $0x258] sm:$0xff]  ;;  %v187_v29 = vld [vmem:[%s4780_s0 + $0x568] sm:$0xff] }
  0x61   :  { %2728 = vmatprep.mubr.msk.f32.mxu0 %vm221_vm1, %v58_v30  ;;  %2875 = vmatprep.mubr.msk.f32.mxu1 %vm221_vm1, %v156_v31  ;;  %v90_v30 = vld [vmem:[%s4780_s0 + $0x260] sm:$0xff]  ;;  %v188_v31 = vld [vmem:[%s4780_s0 + $0x570] sm:$0xff] }
  0x64   :  { %2729 = vmatmul.mubr.msk.f32.gmra.mrb[44].mxu0 %vm221_vm1, %v59_v32  ;;  %2876 = vmatmul.mubr.msk.f32.gmra.mrb[44].mxu1 %vm221_vm1, %v157_v33  ;;  %v91_v32 = vld [vmem:[%s4780_s0 + $0x268] sm:$0xff]  ;;  %v189_v33 = vld [vmem:[%s4780_s0 + $0x578] sm:$0xff] }
  0x65   :  { %2731 = vmatprep.mubr.msk.f32.mxu0 %vm221_vm1, %v60_v34  ;;  %2878 = vmatprep.mubr.msk.f32.mxu1 %vm221_vm1, %v158_v35  ;;  %v92_v34 = vld [vmem:[%s4780_s0 + $0x270] sm:$0xff]  ;;  %v190_v35 = vld [vmem:[%s4780_s0 + $0x580] sm:$0xff] }
  0x68   :  { %2732 = vmatmul.mubr.msk.f32.gmra.mrb[46].mxu0 %vm221_vm1, %v61_v36  ;;  %2879 = vmatmul.mubr.msk.f32.gmra.mrb[46].mxu1 %vm221_vm1, %v159_v37  ;;  %v93_v36 = vld [vmem:[%s4780_s0 + $0x278] sm:$0xff]  ;;  %v191_v37 = vld [vmem:[%s4780_s0 + $0x588] sm:$0xff] }
  0x69   :  { %2734 = vmatprep.mubr.msk.f32.mxu0 %vm221_vm1, %v62_v38  ;;  %2881 = vmatprep.mubr.msk.f32.mxu1 %vm221_vm1, %v160_v39  ;;  %v94_v38 = vld [vmem:[%s4780_s0 + $0x280] sm:$0xff]  ;;  %v192_v39 = vld [vmem:[%s4780_s0 + $0x590] sm:$0xff] }
  0x6c   :  { %2735 = vmatmul.mubr.msk.f32.gmra.mrb[48].mxu0 %vm221_vm1, %v63_v40  ;;  %2882 = vmatmul.mubr.msk.f32.gmra.mrb[48].mxu1 %vm221_vm1, %v161_v41  ;;  %v95_v40 = vld [vmem:[%s4780_s0 + $0x288] sm:$0xff]  ;;  %v193_v41 = vld [vmem:[%s4780_s0 + $0x598] sm:$0xff] }
  0x6d   :  { %2737 = vmatprep.mubr.msk.f32.mxu0 %vm221_vm1, %v64_v42  ;;  %2884 = vmatprep.mubr.msk.f32.mxu1 %vm221_vm1, %v162_v43  ;;  %v96_v42 = vld [vmem:[%s4780_s0 + $0x290] sm:$0xff]  ;;  %v194_v43 = vld [vmem:[%s4780_s0 + $0x5a0] sm:$0xff] }
  0x70   :  { %2738 = vmatmul.mubr.msk.f32.gmra.mrb[50].mxu0 %vm221_vm1, %v65_v44  ;;  %2885 = vmatmul.mubr.msk.f32.gmra.mrb[50].mxu1 %vm221_vm1, %v163_v45  ;;  %v97_v44 = vld [vmem:[%s4780_s0 + $0x298] sm:$0xff]  ;;  %v195_v45 = vld [vmem:[%s4780_s0 + $0x5a8] sm:$0xff] }
  0x71   :  { %2740 = vmatprep.mubr.msk.f32.mxu0 %vm221_vm1, %v66_v46  ;;  %2887 = vmatprep.mubr.msk.f32.mxu1 %vm221_vm1, %v164_v47  ;;  %v98_v46 = vld [vmem:[%s4780_s0 + $0x2a0] sm:$0xff]  ;;  %v196_v47 = vld [vmem:[%s4780_s0 + $0x5b0] sm:$0xff] }
  0x74   :  { %2741 = vmatmul.mubr.msk.f32.gmra.mrb[52].mxu0 %vm221_vm1, %v67_v48  ;;  %2888 = vmatmul.mubr.msk.f32.gmra.mrb[52].mxu1 %vm221_vm1, %v165_v49  ;;  %v99_v48 = vld [vmem:[%s4780_s0 + $0x2a8] sm:$0xff]  ;;  %v197_v49 = vld [vmem:[%s4780_s0 + $0x5b8] sm:$0xff] }
  0x75   :  { %2743 = vmatprep.mubr.msk.f32.mxu0 %vm221_vm1, %v68_v50  ;;  %2890 = vmatprep.mubr.msk.f32.mxu1 %vm221_vm1, %v166_v51  ;;  %v100_v50 = vld [vmem:[%s4780_s0 + $0x2b0] sm:$0xff]  ;;  %v198_v51 = vld [vmem:[%s4780_s0 + $0x5c0] sm:$0xff] }
  0x78   :  { %2744 = vmatmul.mubr.msk.f32.gmra.mrb[54].mxu0 %vm221_vm1, %v69_v52  ;;  %2891 = vmatmul.mubr.msk.f32.gmra.mrb[54].mxu1 %vm221_vm1, %v167_v53  ;;  %v101_v52 = vld [vmem:[%s4780_s0 + $0x2b8] sm:$0xff]  ;;  %v199_v53 = vld [vmem:[%s4780_s0 + $0x5c8] sm:$0xff] }
  0x79   :  { %2746 = vmatprep.mubr.msk.f32.mxu0 %vm221_vm1, %v70_v54  ;;  %2893 = vmatprep.mubr.msk.f32.mxu1 %vm221_vm1, %v168_v55  ;;  %v102_v54 = vld [vmem:[%s4780_s0 + $0x2c0] sm:$0xff]  ;;  %v200_v55 = vld [vmem:[%s4780_s0 + $0x5d0] sm:$0xff] }
  0x7c   :  { %2747 = vmatmul.mubr.msk.f32.gmra.mrb[56].mxu0 %vm221_vm1, %v71_v56  ;;  %2894 = vmatmul.mubr.msk.f32.gmra.mrb[56].mxu1 %vm221_vm1, %v169_v57  ;;  %v103_v56 = vld [vmem:[%s4780_s0 + $0x2c8] sm:$0xff]  ;;  %v201_v57 = vld [vmem:[%s4780_s0 + $0x5d8] sm:$0xff] }
  0x7d   :  { %2749 = vmatprep.mubr.msk.f32.mxu0 %vm221_vm1, %v72_v58  ;;  %2896 = vmatprep.mubr.msk.f32.mxu1 %vm221_vm1, %v170_v59  ;;  %v104_v58 = vld [vmem:[%s4780_s0 + $0x2d0] sm:$0xff]  ;;  %v202_v59 = vld [vmem:[%s4780_s0 + $0x5e0] sm:$0xff] }
  0x80   :  { %2750 = vmatmul.mubr.msk.f32.gmra.mrb[58].mxu0 %vm221_vm1, %v73_v60  ;;  %2897 = vmatmul.mubr.msk.f32.gmra.mrb[58].mxu1 %vm221_vm1, %v171_v61  ;;  %v105_v60 = vld [vmem:[%s4780_s0 + $0x2d8] sm:$0xff]  ;;  %v203_v61 = vld [vmem:[%s4780_s0 + $0x5e8] sm:$0xff] }
  0x81   :  { %2752 = vmatprep.mubr.msk.f32.mxu0 %vm221_vm1, %v74_v62  ;;  %2899 = vmatprep.mubr.msk.f32.mxu1 %vm221_vm1, %v172_v63  ;;  %v106_v62 = vld [vmem:[%s4780_s0 + $0x2e0] sm:$0xff]  ;;  %v204_v63 = vld [vmem:[%s4780_s0 + $0x5f0] sm:$0xff] }
  0x84   :  { %2753 = vmatmul.mubr.msk.f32.gmra.mrb[60].mxu0 %vm221_vm1, %v75_v0  ;;  %2900 = vmatmul.mubr.msk.f32.gmra.mrb[60].mxu1 %vm221_vm1, %v173_v1  ;;  %v107_v0 = vld [vmem:[%s4780_s0 + $0x2e8] sm:$0xff]  ;;  %v205_v1 = vld [vmem:[%s4780_s0 + $0x5f8] sm:$0xff] }
  0x85   :  { %2755 = vmatprep.mubr.msk.f32.mxu0 %vm221_vm1, %v76_v2  ;;  %2902 = vmatprep.mubr.msk.f32.mxu1 %vm221_vm1, %v174_v3  ;;  %v108_v2 = vld [vmem:[%s4780_s0 + $0x2f0] sm:$0xff]  ;;  %v206_v3 = vld [vmem:[%s4780_s0 + $0x600] sm:$0xff] }
  0x88   :  { %2756 = vmatmul.mubr.msk.f32.gmra.mrb[62].mxu0 %vm221_vm1, %v77_v4  ;;  %2903 = vmatmul.mubr.msk.f32.gmra.mrb[62].mxu1 %vm221_vm1, %v175_v5  ;;  %v109_v4 = vld [vmem:[%s4780_s0 + $0x2f8] sm:$0xff]  ;;  %v207_v5 = vld [vmem:[%s4780_s0 + $0x608] sm:$0xff] }
  0x89   :  { %2758 = vmatprep.mubr.msk.f32.mxu0 %vm221_vm1, %v78_v6  ;;  %2905 = vmatprep.mubr.msk.f32.mxu1 %vm221_vm1, %v176_v7  ;;  %v110_v6 = vld [vmem:[%s4780_s0 + $0x300] sm:$0xff]  ;;  %v208_v7 = vld [vmem:[%s4780_s0 + $0x610] sm:$0xff] }
  0x8c   :  { %2759 = vmatmul.mubr.msk.f32.gmra.mrb[64].mxu0 %vm221_vm1, %v79_v8  ;;  %2906 = vmatmul.mubr.msk.f32.gmra.mrb[64].mxu1 %vm221_vm1, %v177_v9  ;;  %v111_v8 = vld [vmem:[%s4780_s0 + $0x308] sm:$0xff]  ;;  %v209_v9 = vld [vmem:[%s4780_s0 + $0x618] sm:$0xff] }
  0x8d   :  { %2761 = vmatprep.mubr.msk.f32.mxu0 %vm221_vm1, %v80_v10  ;;  %2908 = vmatprep.mubr.msk.f32.mxu1 %vm221_vm1, %v178_v11  ;;  %v3792_v10 = vld [vmem:[%s4781_s2] ss:$0 sm:$0xff] }
  0x90   :  { %2762 = vmatmul.mubr.msk.f32.gmra.mrb[66].mxu0 %vm221_vm1, %v81_v12  ;;  %2909 = vmatmul.mubr.msk.f32.gmra.mrb[66].mxu1 %vm221_vm1, %v179_v13 }
  0x91   :  { %2764 = vmatprep.mubr.msk.f32.mxu0 %vm221_vm1, %v82_v14  ;;  %2911 = vmatprep.mubr.msk.f32.mxu1 %vm221_vm1, %v180_v15 }
  0x94   :  { %2765 = vmatmul.mubr.msk.f32.gmra.mrb[68].mxu0 %vm221_vm1, %v83_v16  ;;  %2912 = vmatmul.mubr.msk.f32.gmra.mrb[68].mxu1 %vm221_vm1, %v181_v17 }
  0x95   :  { %2767 = vmatprep.mubr.msk.f32.mxu0 %vm221_vm1, %v84_v18  ;;  %2914 = vmatprep.mubr.msk.f32.mxu1 %vm221_vm1, %v182_v19 }
  0x98   :  { %2768 = vmatmul.mubr.msk.f32.gmra.mrb[70].mxu0 %vm221_vm1, %v85_v20  ;;  %2915 = vmatmul.mubr.msk.f32.gmra.mrb[70].mxu1 %vm221_vm1, %v183_v21 }
  0x99   :  { %2770 = vmatprep.mubr.msk.f32.mxu0 %vm221_vm1, %v86_v22  ;;  %2917 = vmatprep.mubr.msk.f32.mxu1 %vm221_vm1, %v184_v23 }
  0x9c   :  { %2771 = vmatmul.mubr.msk.f32.gmra.mrb[72].mxu0 %vm221_vm1, %v87_v24  ;;  %2918 = vmatmul.mubr.msk.f32.gmra.mrb[72].mxu1 %vm221_vm1, %v185_v25 }
  0x9d   :  { %2773 = vmatprep.mubr.msk.f32.mxu0 %vm221_vm1, %v88_v26  ;;  %2920 = vmatprep.mubr.msk.f32.mxu1 %vm221_vm1, %v186_v27 }
  0xa0   :  { %2774 = vmatmul.mubr.msk.f32.gmra.mrb[74].mxu0 %vm221_vm1, %v89_v28  ;;  %2921 = vmatmul.mubr.msk.f32.gmra.mrb[74].mxu1 %vm221_vm1, %v187_v29 }
  0xa1   :  { %2776 = vmatprep.mubr.msk.f32.mxu0 %vm221_vm1, %v90_v30  ;;  %2923 = vmatprep.mubr.msk.f32.mxu1 %vm221_vm1, %v188_v31 }
  0xa4   :  { %2777 = vmatmul.mubr.msk.f32.gmra.mrb[76].mxu0 %vm221_vm1, %v91_v32  ;;  %2924 = vmatmul.mubr.msk.f32.gmra.mrb[76].mxu1 %vm221_vm1, %v189_v33 }
  0xa5   :  { %2779 = vmatprep.mubr.msk.f32.mxu0 %vm221_vm1, %v92_v34  ;;  %2926 = vmatprep.mubr.msk.f32.mxu1 %vm221_vm1, %v190_v35 }
  0xa8   :  { %2780 = vmatmul.mubr.msk.f32.gmra.mrb[78].mxu0 %vm221_vm1, %v93_v36  ;;  %2927 = vmatmul.mubr.msk.f32.gmra.mrb[78].mxu1 %vm221_vm1, %v191_v37 }
  0xa9   :  { %2782 = vmatprep.mubr.msk.f32.mxu0 %vm221_vm1, %v94_v38  ;;  %2929 = vmatprep.mubr.msk.f32.mxu1 %vm221_vm1, %v192_v39 }
  0xac   :  { %2783 = vmatmul.mubr.msk.f32.gmra.mrb[80].mxu0 %vm221_vm1, %v95_v40  ;;  %2930 = vmatmul.mubr.msk.f32.gmra.mrb[80].mxu1 %vm221_vm1, %v193_v41 }
  0xad   :  { %2785 = vmatprep.mubr.msk.f32.mxu0 %vm221_vm1, %v96_v42  ;;  %2932 = vmatprep.mubr.msk.f32.mxu1 %vm221_vm1, %v194_v43 }
  0xb0   :  { %2786 = vmatmul.mubr.msk.f32.gmra.mrb[82].mxu0 %vm221_vm1, %v97_v44  ;;  %2933 = vmatmul.mubr.msk.f32.gmra.mrb[82].mxu1 %vm221_vm1, %v195_v45 }
  0xb1   :  { %2788 = vmatprep.mubr.msk.f32.mxu0 %vm221_vm1, %v98_v46  ;;  %2935 = vmatprep.mubr.msk.f32.mxu1 %vm221_vm1, %v196_v47 }
  0xb4   :  { %2789 = vmatmul.mubr.msk.f32.gmra.mrb[84].mxu0 %vm221_vm1, %v99_v48  ;;  %2936 = vmatmul.mubr.msk.f32.gmra.mrb[84].mxu1 %vm221_vm1, %v197_v49 }
  0xb5   :  { %2791 = vmatprep.mubr.msk.f32.mxu0 %vm221_vm1, %v100_v50  ;;  %2938 = vmatprep.mubr.msk.f32.mxu1 %vm221_vm1, %v198_v51 }
  0xb8   :  { %2792 = vmatmul.mubr.msk.f32.gmra.mrb[86].mxu0 %vm221_vm1, %v101_v52  ;;  %2939 = vmatmul.mubr.msk.f32.gmra.mrb[86].mxu1 %vm221_vm1, %v199_v53 }
  0xb9   :  { %2794 = vmatprep.mubr.msk.f32.mxu0 %vm221_vm1, %v102_v54  ;;  %2941 = vmatprep.mubr.msk.f32.mxu1 %vm221_vm1, %v200_v55 }
  0xbc   :  { %2795 = vmatmul.mubr.msk.f32.gmra.mrb[88].mxu0 %vm221_vm1, %v103_v56  ;;  %2942 = vmatmul.mubr.msk.f32.gmra.mrb[88].mxu1 %vm221_vm1, %v201_v57 }
  0xbd   :  { %2797 = vmatprep.mubr.msk.f32.mxu0 %vm221_vm1, %v104_v58  ;;  %2944 = vmatprep.mubr.msk.f32.mxu1 %vm221_vm1, %v202_v59 }
  0xc0   :  { %2798 = vmatmul.mubr.msk.f32.gmra.mrb[90].mxu0 %vm221_vm1, %v105_v60  ;;  %2945 = vmatmul.mubr.msk.f32.gmra.mrb[90].mxu1 %vm221_vm1, %v203_v61 }
  0xc1   :  { %2800 = vmatprep.mubr.msk.f32.mxu0 %vm221_vm1, %v106_v62  ;;  %2947 = vmatprep.mubr.msk.f32.mxu1 %vm221_vm1, %v204_v63 }
  0xc4   :  { %2801 = vmatmul.mubr.msk.f32.gmra.mrb[92].mxu0 %vm221_vm1, %v107_v0  ;;  %2948 = vmatmul.mubr.msk.f32.gmra.mrb[92].mxu1 %vm221_vm1, %v205_v1 }
  0xc5   :  { %2803 = vmatprep.mubr.msk.f32.mxu0 %vm221_vm1, %v108_v2  ;;  %2950 = vmatprep.mubr.msk.f32.mxu1 %vm221_vm1, %v206_v3 }
  0xc8   :  { %2804 = vmatmul.mubr.msk.f32.gmra.mrb[94].mxu0 %vm221_vm1, %v109_v4  ;;  %2951 = vmatmul.mubr.msk.f32.gmra.mrb[94].mxu1 %vm221_vm1, %v207_v5 }
  0xc9   :  { %2806 = vmatprep.mubr.msk.f32.mxu0 %vm221_vm1, %v110_v6  ;;  %2953 = vmatprep.mubr.msk.f32.mxu1 %vm221_vm1, %v208_v7 }
  0xcc   :  { %2807 = vmatmul.mubr.msk.f32.gmra.mrb[96].mxu0 %vm221_vm1, %v111_v8  ;;  %2954 = vmatmul.mubr.msk.f32.gmra.mrb[96].mxu1 %vm221_vm1, %v209_v9 }
  0xdf   :  { %v2664_v11 = vpop.f32.mrb[0].mxu0  ;;  %v2811_v12 = vpop.f32.mrb[0].mxu1 }
  0xe0   :  { %v886_v13 = vadd.f32 %v2664_v11, %v3792_v10  ;;  %v1376_v14 = vadd.f32 %v2811_v12, %v3792_v10  ;;  %v880_v15 = vpop.f32.mrb[1].mxu0  ;;  %v1370_v16 = vpop.f32.mrb[1].mxu1 }
  0xe1   :  { %v881_v17 = vadd.f32 %v3792_v10, %v880_v15  ;;  %v1371_v18 = vadd.f32 %v3792_v10, %v1370_v16 }
  0xe2   :  { %v1860_v19 = vmax.f32 %v886_v13, 0.0  ;;  %v1958_v20 = vmax.f32 %v1376_v14, 0.0 }
  0xe3   :  { %v1859_v21 = vmax.f32 %v881_v17, 0.0  ;;  %v1957_v22 = vmax.f32 %v1371_v18, 0.0  ;;  %v2667_v23 = vpop.f32.mrb[2].mxu0  ;;  %v2814_v24 = vpop.f32.mrb[2].mxu1 }
  0xe4   :  { %2057 = vst.msk [vmem:[%s4782_s3 + $0x8] sm:$0xff] %vm2055_vm4, %v1860_v19  ;;  %2155 = vst.msk [vmem:[%s4782_s3 + $0x318] sm:$0xff] %vm2055_vm4, %v1958_v20  ;;  %v896_v25 = vadd.f32 %v2667_v23, %v3792_v10  ;;  %v1386_v26 = vadd.f32 %v2814_v24, %v3792_v10  ;;  %v890_v27 = vpop.f32.mrb[3].mxu0  ;;  %v1380_v28 = vpop.f32.mrb[3].mxu1 }
  0xe5   :  { %2056 = vst.msk [vmem:[%s4782_s3] sm:$0xff] %vm2055_vm4, %v1859_v21  ;;  %2154 = vst.msk [vmem:[%s4782_s3 + $0x310] sm:$0xff] %vm2055_vm4, %v1957_v22  ;;  %v891_v29 = vadd.f32 %v3792_v10, %v890_v27  ;;  %v1381_v30 = vadd.f32 %v3792_v10, %v1380_v28 }
  0xe6   :  { %v1862_v31 = vmax.f32 %v896_v25, 0.0  ;;  %v1960_v32 = vmax.f32 %v1386_v26, 0.0 }
  0xe7   :  { %v1861_v33 = vmax.f32 %v891_v29, 0.0  ;;  %v1959_v34 = vmax.f32 %v1381_v30, 0.0  ;;  %v2670_v35 = vpop.f32.mrb[4].mxu0  ;;  %v2817_v36 = vpop.f32.mrb[4].mxu1 }
  0xe8   :  { %2059 = vst.msk [vmem:[%s4782_s3 + $0x18] sm:$0xff] %vm2055_vm4, %v1862_v31  ;;  %2157 = vst.msk [vmem:[%s4782_s3 + $0x328] sm:$0xff] %vm2055_vm4, %v1960_v32  ;;  %v906_v37 = vadd.f32 %v2670_v35, %v3792_v10  ;;  %v1396_v38 = vadd.f32 %v2817_v36, %v3792_v10  ;;  %v900_v39 = vpop.f32.mrb[5].mxu0  ;;  %v1390_v40 = vpop.f32.mrb[5].mxu1 }
  0xe9   :  { %2058 = vst.msk [vmem:[%s4782_s3 + $0x10] sm:$0xff] %vm2055_vm4, %v1861_v33  ;;  %2156 = vst.msk [vmem:[%s4782_s3 + $0x320] sm:$0xff] %vm2055_vm4, %v1959_v34  ;;  %v901_v41 = vadd.f32 %v3792_v10, %v900_v39  ;;  %v1391_v42 = vadd.f32 %v3792_v10, %v1390_v40 }
  0xea   :  { %v1864_v43 = vmax.f32 %v906_v37, 0.0  ;;  %v1962_v44 = vmax.f32 %v1396_v38, 0.0 }
  0xeb   :  { %v1863_v45 = vmax.f32 %v901_v41, 0.0  ;;  %v1961_v46 = vmax.f32 %v1391_v42, 0.0  ;;  %v2673_v47 = vpop.f32.mrb[6].mxu0  ;;  %v2820_v48 = vpop.f32.mrb[6].mxu1 }
  0xec   :  { %2061 = vst.msk [vmem:[%s4782_s3 + $0x28] sm:$0xff] %vm2055_vm4, %v1864_v43  ;;  %2159 = vst.msk [vmem:[%s4782_s3 + $0x338] sm:$0xff] %vm2055_vm4, %v1962_v44  ;;  %v916_v49 = vadd.f32 %v2673_v47, %v3792_v10  ;;  %v1406_v50 = vadd.f32 %v2820_v48, %v3792_v10  ;;  %v910_v51 = vpop.f32.mrb[7].mxu0  ;;  %v1400_v52 = vpop.f32.mrb[7].mxu1 }
  0xed   :  { %2060 = vst.msk [vmem:[%s4782_s3 + $0x20] sm:$0xff] %vm2055_vm4, %v1863_v45  ;;  %2158 = vst.msk [vmem:[%s4782_s3 + $0x330] sm:$0xff] %vm2055_vm4, %v1961_v46  ;;  %v911_v53 = vadd.f32 %v3792_v10, %v910_v51  ;;  %v1401_v54 = vadd.f32 %v3792_v10, %v1400_v52 }
  0xee   :  { %v1866_v55 = vmax.f32 %v916_v49, 0.0  ;;  %v1964_v56 = vmax.f32 %v1406_v50, 0.0 }
  0xef   :  { %v1865_v57 = vmax.f32 %v911_v53, 0.0  ;;  %v1963_v58 = vmax.f32 %v1401_v54, 0.0  ;;  %v2676_v59 = vpop.f32.mrb[8].mxu0  ;;  %v2823_v60 = vpop.f32.mrb[8].mxu1 }
  0xf0   :  { %2063 = vst.msk [vmem:[%s4782_s3 + $0x38] sm:$0xff] %vm2055_vm4, %v1866_v55  ;;  %2161 = vst.msk [vmem:[%s4782_s3 + $0x348] sm:$0xff] %vm2055_vm4, %v1964_v56  ;;  %v926_v61 = vadd.f32 %v2676_v59, %v3792_v10  ;;  %v1416_v62 = vadd.f32 %v2823_v60, %v3792_v10  ;;  %v920_v63 = vpop.f32.mrb[9].mxu0  ;;  %v1410_v0 = vpop.f32.mrb[9].mxu1 }
  0xf1   :  { %2062 = vst.msk [vmem:[%s4782_s3 + $0x30] sm:$0xff] %vm2055_vm4, %v1865_v57  ;;  %2160 = vst.msk [vmem:[%s4782_s3 + $0x340] sm:$0xff] %vm2055_vm4, %v1963_v58  ;;  %v921_v1 = vadd.f32 %v3792_v10, %v920_v63  ;;  %v1411_v2 = vadd.f32 %v3792_v10, %v1410_v0 }
  0xf2   :  { %v1868_v3 = vmax.f32 %v926_v61, 0.0  ;;  %v1966_v4 = vmax.f32 %v1416_v62, 0.0 }
  0xf3   :  { %v1867_v5 = vmax.f32 %v921_v1, 0.0  ;;  %v1965_v6 = vmax.f32 %v1411_v2, 0.0  ;;  %v2679_v7 = vpop.f32.mrb[10].mxu0  ;;  %v2826_v8 = vpop.f32.mrb[10].mxu1 }
  0xf4   :  { %2065 = vst.msk [vmem:[%s4782_s3 + $0x48] sm:$0xff] %vm2055_vm4, %v1868_v3  ;;  %2163 = vst.msk [vmem:[%s4782_s3 + $0x358] sm:$0xff] %vm2055_vm4, %v1966_v4  ;;  %v936_v9 = vadd.f32 %v2679_v7, %v3792_v10  ;;  %v1426_v11 = vadd.f32 %v2826_v8, %v3792_v10  ;;  %v930_v12 = vpop.f32.mrb[11].mxu0  ;;  %v1420_v13 = vpop.f32.mrb[11].mxu1 }
  0xf5   :  { %2064 = vst.msk [vmem:[%s4782_s3 + $0x40] sm:$0xff] %vm2055_vm4, %v1867_v5  ;;  %2162 = vst.msk [vmem:[%s4782_s3 + $0x350] sm:$0xff] %vm2055_vm4, %v1965_v6  ;;  %v931_v14 = vadd.f32 %v3792_v10, %v930_v12  ;;  %v1421_v15 = vadd.f32 %v3792_v10, %v1420_v13 }
  0xf6   :  { %v1870_v16 = vmax.f32 %v936_v9, 0.0  ;;  %v1968_v17 = vmax.f32 %v1426_v11, 0.0 }
  0xf7   :  { %v1869_v18 = vmax.f32 %v931_v14, 0.0  ;;  %v1967_v19 = vmax.f32 %v1421_v15, 0.0  ;;  %v2682_v20 = vpop.f32.mrb[12].mxu0  ;;  %v2829_v21 = vpop.f32.mrb[12].mxu1 }
  0xf8   :  { %2067 = vst.msk [vmem:[%s4782_s3 + $0x58] sm:$0xff] %vm2055_vm4, %v1870_v16  ;;  %2165 = vst.msk [vmem:[%s4782_s3 + $0x368] sm:$0xff] %vm2055_vm4, %v1968_v17  ;;  %v946_v22 = vadd.f32 %v2682_v20, %v3792_v10  ;;  %v1436_v23 = vadd.f32 %v2829_v21, %v3792_v10  ;;  %v940_v24 = vpop.f32.mrb[13].mxu0  ;;  %v1430_v25 = vpop.f32.mrb[13].mxu1 }
  0xf9   :  { %2066 = vst.msk [vmem:[%s4782_s3 + $0x50] sm:$0xff] %vm2055_vm4, %v1869_v18  ;;  %2164 = vst.msk [vmem:[%s4782_s3 + $0x360] sm:$0xff] %vm2055_vm4, %v1967_v19  ;;  %v941_v26 = vadd.f32 %v3792_v10, %v940_v24  ;;  %v1431_v27 = vadd.f32 %v3792_v10, %v1430_v25 }
  0xfa   :  { %v1872_v28 = vmax.f32 %v946_v22, 0.0  ;;  %v1970_v29 = vmax.f32 %v1436_v23, 0.0 }
  0xfb   :  { %v1871_v30 = vmax.f32 %v941_v26, 0.0  ;;  %v1969_v31 = vmax.f32 %v1431_v27, 0.0  ;;  %v2685_v32 = vpop.f32.mrb[14].mxu0  ;;  %v2832_v33 = vpop.f32.mrb[14].mxu1 }
  0xfc   :  { %2069 = vst.msk [vmem:[%s4782_s3 + $0x68] sm:$0xff] %vm2055_vm4, %v1872_v28  ;;  %2167 = vst.msk [vmem:[%s4782_s3 + $0x378] sm:$0xff] %vm2055_vm4, %v1970_v29  ;;  %v956_v34 = vadd.f32 %v2685_v32, %v3792_v10  ;;  %v1446_v35 = vadd.f32 %v2832_v33, %v3792_v10  ;;  %v950_v36 = vpop.f32.mrb[15].mxu0  ;;  %v1440_v37 = vpop.f32.mrb[15].mxu1 }
  0xfd   :  { %2068 = vst.msk [vmem:[%s4782_s3 + $0x60] sm:$0xff] %vm2055_vm4, %v1871_v30  ;;  %2166 = vst.msk [vmem:[%s4782_s3 + $0x370] sm:$0xff] %vm2055_vm4, %v1969_v31  ;;  %v951_v38 = vadd.f32 %v3792_v10, %v950_v36  ;;  %v1441_v39 = vadd.f32 %v3792_v10, %v1440_v37 }
  0xfe   :  { %v1874_v40 = vmax.f32 %v956_v34, 0.0  ;;  %v1972_v41 = vmax.f32 %v1446_v35, 0.0 }
  0xff   :  { %v1873_v42 = vmax.f32 %v951_v38, 0.0  ;;  %v1971_v43 = vmax.f32 %v1441_v39, 0.0  ;;  %v2688_v44 = vpop.f32.mrb[16].mxu0  ;;  %v2835_v45 = vpop.f32.mrb[16].mxu1 }
 0x100   :  { %2071 = vst.msk [vmem:[%s4782_s3 + $0x78] sm:$0xff] %vm2055_vm4, %v1874_v40  ;;  %2169 = vst.msk [vmem:[%s4782_s3 + $0x388] sm:$0xff] %vm2055_vm4, %v1972_v41  ;;  %v966_v46 = vadd.f32 %v2688_v44, %v3792_v10  ;;  %v1456_v47 = vadd.f32 %v2835_v45, %v3792_v10  ;;  %v960_v48 = vpop.f32.mrb[17].mxu0  ;;  %v1450_v49 = vpop.f32.mrb[17].mxu1 }
 0x101   :  { %2070 = vst.msk [vmem:[%s4782_s3 + $0x70] sm:$0xff] %vm2055_vm4, %v1873_v42  ;;  %2168 = vst.msk [vmem:[%s4782_s3 + $0x380] sm:$0xff] %vm2055_vm4, %v1971_v43  ;;  %v961_v50 = vadd.f32 %v3792_v10, %v960_v48  ;;  %v1451_v51 = vadd.f32 %v3792_v10, %v1450_v49 }
 0x102   :  { %v1876_v52 = vmax.f32 %v966_v46, 0.0  ;;  %v1974_v53 = vmax.f32 %v1456_v47, 0.0 }
 0x103   :  { %v1875_v54 = vmax.f32 %v961_v50, 0.0  ;;  %v1973_v55 = vmax.f32 %v1451_v51, 0.0  ;;  %v2691_v56 = vpop.f32.mrb[18].mxu0  ;;  %v2838_v57 = vpop.f32.mrb[18].mxu1 }
 0x104   :  { %2073 = vst.msk [vmem:[%s4782_s3 + $0x88] sm:$0xff] %vm2055_vm4, %v1876_v52  ;;  %2171 = vst.msk [vmem:[%s4782_s3 + $0x398] sm:$0xff] %vm2055_vm4, %v1974_v53  ;;  %v976_v58 = vadd.f32 %v2691_v56, %v3792_v10  ;;  %v1466_v59 = vadd.f32 %v2838_v57, %v3792_v10  ;;  %v970_v60 = vpop.f32.mrb[19].mxu0  ;;  %v1460_v61 = vpop.f32.mrb[19].mxu1 }
 0x105   :  { %2072 = vst.msk [vmem:[%s4782_s3 + $0x80] sm:$0xff] %vm2055_vm4, %v1875_v54  ;;  %2170 = vst.msk [vmem:[%s4782_s3 + $0x390] sm:$0xff] %vm2055_vm4, %v1973_v55  ;;  %v971_v62 = vadd.f32 %v3792_v10, %v970_v60  ;;  %v1461_v63 = vadd.f32 %v3792_v10, %v1460_v61 }
 0x106   :  { %v1878_v0 = vmax.f32 %v976_v58, 0.0  ;;  %v1976_v1 = vmax.f32 %v1466_v59, 0.0 }
 0x107   :  { %v1877_v2 = vmax.f32 %v971_v62, 0.0  ;;  %v1975_v3 = vmax.f32 %v1461_v63, 0.0  ;;  %v2694_v4 = vpop.f32.mrb[20].mxu0  ;;  %v2841_v5 = vpop.f32.mrb[20].mxu1 }
 0x108   :  { %2075 = vst.msk [vmem:[%s4782_s3 + $0x98] sm:$0xff] %vm2055_vm4, %v1878_v0  ;;  %2173 = vst.msk [vmem:[%s4782_s3 + $0x3a8] sm:$0xff] %vm2055_vm4, %v1976_v1  ;;  %v986_v6 = vadd.f32 %v2694_v4, %v3792_v10  ;;  %v1476_v7 = vadd.f32 %v2841_v5, %v3792_v10  ;;  %v980_v8 = vpop.f32.mrb[21].mxu0  ;;  %v1470_v9 = vpop.f32.mrb[21].mxu1 }
 0x109   :  { %2074 = vst.msk [vmem:[%s4782_s3 + $0x90] sm:$0xff] %vm2055_vm4, %v1877_v2  ;;  %2172 = vst.msk [vmem:[%s4782_s3 + $0x3a0] sm:$0xff] %vm2055_vm4, %v1975_v3  ;;  %v981_v11 = vadd.f32 %v3792_v10, %v980_v8  ;;  %v1471_v12 = vadd.f32 %v3792_v10, %v1470_v9 }
 0x10a   :  { %v1880_v13 = vmax.f32 %v986_v6, 0.0  ;;  %v1978_v14 = vmax.f32 %v1476_v7, 0.0 }
 0x10b   :  { %v1879_v15 = vmax.f32 %v981_v11, 0.0  ;;  %v1977_v16 = vmax.f32 %v1471_v12, 0.0  ;;  %v2697_v17 = vpop.f32.mrb[22].mxu0  ;;  %v2844_v18 = vpop.f32.mrb[22].mxu1 }
 0x10c   :  { %2077 = vst.msk [vmem:[%s4782_s3 + $0xa8] sm:$0xff] %vm2055_vm4, %v1880_v13  ;;  %2175 = vst.msk [vmem:[%s4782_s3 + $0x3b8] sm:$0xff] %vm2055_vm4, %v1978_v14  ;;  %v996_v19 = vadd.f32 %v2697_v17, %v3792_v10  ;;  %v1486_v20 = vadd.f32 %v2844_v18, %v3792_v10  ;;  %v990_v21 = vpop.f32.mrb[23].mxu0  ;;  %v1480_v22 = vpop.f32.mrb[23].mxu1 }
 0x10d   :  { %2076 = vst.msk [vmem:[%s4782_s3 + $0xa0] sm:$0xff] %vm2055_vm4, %v1879_v15  ;;  %2174 = vst.msk [vmem:[%s4782_s3 + $0x3b0] sm:$0xff] %vm2055_vm4, %v1977_v16  ;;  %v991_v23 = vadd.f32 %v3792_v10, %v990_v21  ;;  %v1481_v24 = vadd.f32 %v3792_v10, %v1480_v22 }
 0x10e   :  { %v1882_v25 = vmax.f32 %v996_v19, 0.0  ;;  %v1980_v26 = vmax.f32 %v1486_v20, 0.0 }
 0x10f   :  { %v1881_v27 = vmax.f32 %v991_v23, 0.0  ;;  %v1979_v28 = vmax.f32 %v1481_v24, 0.0  ;;  %v2700_v29 = vpop.f32.mrb[24].mxu0  ;;  %v2847_v30 = vpop.f32.mrb[24].mxu1 }
 0x110   :  { %2079 = vst.msk [vmem:[%s4782_s3 + $0xb8] sm:$0xff] %vm2055_vm4, %v1882_v25  ;;  %2177 = vst.msk [vmem:[%s4782_s3 + $0x3c8] sm:$0xff] %vm2055_vm4, %v1980_v26  ;;  %v1006_v31 = vadd.f32 %v2700_v29, %v3792_v10  ;;  %v1496_v32 = vadd.f32 %v2847_v30, %v3792_v10  ;;  %v1000_v33 = vpop.f32.mrb[25].mxu0  ;;  %v1490_v34 = vpop.f32.mrb[25].mxu1 }
 0x111   :  { %2078 = vst.msk [vmem:[%s4782_s3 + $0xb0] sm:$0xff] %vm2055_vm4, %v1881_v27  ;;  %2176 = vst.msk [vmem:[%s4782_s3 + $0x3c0] sm:$0xff] %vm2055_vm4, %v1979_v28  ;;  %v1001_v35 = vadd.f32 %v3792_v10, %v1000_v33  ;;  %v1491_v36 = vadd.f32 %v3792_v10, %v1490_v34 }
 0x112   :  { %v1884_v37 = vmax.f32 %v1006_v31, 0.0  ;;  %v1982_v38 = vmax.f32 %v1496_v32, 0.0 }
 0x113   :  { %v1883_v39 = vmax.f32 %v1001_v35, 0.0  ;;  %v1981_v40 = vmax.f32 %v1491_v36, 0.0  ;;  %v2703_v41 = vpop.f32.mrb[26].mxu0  ;;  %v2850_v42 = vpop.f32.mrb[26].mxu1 }
 0x114   :  { %2081 = vst.msk [vmem:[%s4782_s3 + $0xc8] sm:$0xff] %vm2055_vm4, %v1884_v37  ;;  %2179 = vst.msk [vmem:[%s4782_s3 + $0x3d8] sm:$0xff] %vm2055_vm4, %v1982_v38  ;;  %v1016_v43 = vadd.f32 %v2703_v41, %v3792_v10  ;;  %v1506_v44 = vadd.f32 %v2850_v42, %v3792_v10  ;;  %v1010_v45 = vpop.f32.mrb[27].mxu0  ;;  %v1500_v46 = vpop.f32.mrb[27].mxu1 }
 0x115   :  { %2080 = vst.msk [vmem:[%s4782_s3 + $0xc0] sm:$0xff] %vm2055_vm4, %v1883_v39  ;;  %2178 = vst.msk [vmem:[%s4782_s3 + $0x3d0] sm:$0xff] %vm2055_vm4, %v1981_v40  ;;  %v1011_v47 = vadd.f32 %v3792_v10, %v1010_v45  ;;  %v1501_v48 = vadd.f32 %v3792_v10, %v1500_v46 }
 0x116   :  { %v1886_v49 = vmax.f32 %v1016_v43, 0.0  ;;  %v1984_v50 = vmax.f32 %v1506_v44, 0.0 }
 0x117   :  { %v1885_v51 = vmax.f32 %v1011_v47, 0.0  ;;  %v1983_v52 = vmax.f32 %v1501_v48, 0.0  ;;  %v2706_v53 = vpop.f32.mrb[28].mxu0  ;;  %v2853_v54 = vpop.f32.mrb[28].mxu1 }
 0x118   :  { %2083 = vst.msk [vmem:[%s4782_s3 + $0xd8] sm:$0xff] %vm2055_vm4, %v1886_v49  ;;  %2181 = vst.msk [vmem:[%s4782_s3 + $0x3e8] sm:$0xff] %vm2055_vm4, %v1984_v50  ;;  %v1026_v55 = vadd.f32 %v2706_v53, %v3792_v10  ;;  %v1516_v56 = vadd.f32 %v2853_v54, %v3792_v10  ;;  %v1020_v57 = vpop.f32.mrb[29].mxu0  ;;  %v1510_v58 = vpop.f32.mrb[29].mxu1 }
 0x119   :  { %2082 = vst.msk [vmem:[%s4782_s3 + $0xd0] sm:$0xff] %vm2055_vm4, %v1885_v51  ;;  %2180 = vst.msk [vmem:[%s4782_s3 + $0x3e0] sm:$0xff] %vm2055_vm4, %v1983_v52  ;;  %v1021_v59 = vadd.f32 %v3792_v10, %v1020_v57  ;;  %v1511_v60 = vadd.f32 %v3792_v10, %v1510_v58 }
 0x11a   :  { %v1888_v61 = vmax.f32 %v1026_v55, 0.0  ;;  %v1986_v62 = vmax.f32 %v1516_v56, 0.0 }
 0x11b   :  { %v1887_v63 = vmax.f32 %v1021_v59, 0.0  ;;  %v1985_v0 = vmax.f32 %v1511_v60, 0.0  ;;  %v2709_v1 = vpop.f32.mrb[30].mxu0  ;;  %v2856_v2 = vpop.f32.mrb[30].mxu1 }
 0x11c   :  { %2085 = vst.msk [vmem:[%s4782_s3 + $0xe8] sm:$0xff] %vm2055_vm4, %v1888_v61  ;;  %2183 = vst.msk [vmem:[%s4782_s3 + $0x3f8] sm:$0xff] %vm2055_vm4, %v1986_v62  ;;  %v1036_v3 = vadd.f32 %v2709_v1, %v3792_v10  ;;  %v1526_v4 = vadd.f32 %v2856_v2, %v3792_v10  ;;  %v1030_v5 = vpop.f32.mrb[31].mxu0  ;;  %v1520_v6 = vpop.f32.mrb[31].mxu1 }
 0x11d   :  { %2084 = vst.msk [vmem:[%s4782_s3 + $0xe0] sm:$0xff] %vm2055_vm4, %v1887_v63  ;;  %2182 = vst.msk [vmem:[%s4782_s3 + $0x3f0] sm:$0xff] %vm2055_vm4, %v1985_v0  ;;  %v1031_v7 = vadd.f32 %v3792_v10, %v1030_v5  ;;  %v1521_v8 = vadd.f32 %v3792_v10, %v1520_v6 }
 0x11e   :  { %v1890_v9 = vmax.f32 %v1036_v3, 0.0  ;;  %v1988_v11 = vmax.f32 %v1526_v4, 0.0 }
 0x11f   :  { %v1889_v12 = vmax.f32 %v1031_v7, 0.0  ;;  %v1987_v13 = vmax.f32 %v1521_v8, 0.0  ;;  %v2712_v14 = vpop.f32.mrb[32].mxu0  ;;  %v2859_v15 = vpop.f32.mrb[32].mxu1 }
 0x120   :  { %2087 = vst.msk [vmem:[%s4782_s3 + $0xf8] sm:$0xff] %vm2055_vm4, %v1890_v9  ;;  %2185 = vst.msk [vmem:[%s4782_s3 + $0x408] sm:$0xff] %vm2055_vm4, %v1988_v11  ;;  %v1046_v16 = vadd.f32 %v2712_v14, %v3792_v10  ;;  %v1536_v17 = vadd.f32 %v2859_v15, %v3792_v10  ;;  %v1040_v18 = vpop.f32.mrb[33].mxu0  ;;  %v1530_v19 = vpop.f32.mrb[33].mxu1 }
 0x121   :  { %2086 = vst.msk [vmem:[%s4782_s3 + $0xf0] sm:$0xff] %vm2055_vm4, %v1889_v12  ;;  %2184 = vst.msk [vmem:[%s4782_s3 + $0x400] sm:$0xff] %vm2055_vm4, %v1987_v13  ;;  %v1041_v20 = vadd.f32 %v3792_v10, %v1040_v18  ;;  %v1531_v21 = vadd.f32 %v3792_v10, %v1530_v19 }
 0x122   :  { %v1892_v22 = vmax.f32 %v1046_v16, 0.0  ;;  %v1990_v23 = vmax.f32 %v1536_v17, 0.0 }
 0x123   :  { %v1891_v24 = vmax.f32 %v1041_v20, 0.0  ;;  %v1989_v25 = vmax.f32 %v1531_v21, 0.0  ;;  %v2715_v26 = vpop.f32.mrb[34].mxu0  ;;  %v2862_v27 = vpop.f32.mrb[34].mxu1 }
 0x124   :  { %2089 = vst.msk [vmem:[%s4782_s3 + $0x108] sm:$0xff] %vm2055_vm4, %v1892_v22  ;;  %2187 = vst.msk [vmem:[%s4782_s3 + $0x418] sm:$0xff] %vm2055_vm4, %v1990_v23  ;;  %v1056_v28 = vadd.f32 %v2715_v26, %v3792_v10  ;;  %v1546_v29 = vadd.f32 %v2862_v27, %v3792_v10  ;;  %v1050_v30 = vpop.f32.mrb[35].mxu0  ;;  %v1540_v31 = vpop.f32.mrb[35].mxu1 }
 0x125   :  { %2088 = vst.msk [vmem:[%s4782_s3 + $0x100] sm:$0xff] %vm2055_vm4, %v1891_v24  ;;  %2186 = vst.msk [vmem:[%s4782_s3 + $0x410] sm:$0xff] %vm2055_vm4, %v1989_v25  ;;  %v1051_v32 = vadd.f32 %v3792_v10, %v1050_v30  ;;  %v1541_v33 = vadd.f32 %v3792_v10, %v1540_v31 }
 0x126   :  { %v1894_v34 = vmax.f32 %v1056_v28, 0.0  ;;  %v1992_v35 = vmax.f32 %v1546_v29, 0.0 }
 0x127   :  { %v1893_v36 = vmax.f32 %v1051_v32, 0.0  ;;  %v1991_v37 = vmax.f32 %v1541_v33, 0.0  ;;  %v2718_v38 = vpop.f32.mrb[36].mxu0  ;;  %v2865_v39 = vpop.f32.mrb[36].mxu1 }
 0x128   :  { %2091 = vst.msk [vmem:[%s4782_s3 + $0x118] sm:$0xff] %vm2055_vm4, %v1894_v34  ;;  %2189 = vst.msk [vmem:[%s4782_s3 + $0x428] sm:$0xff] %vm2055_vm4, %v1992_v35  ;;  %v1066_v40 = vadd.f32 %v2718_v38, %v3792_v10  ;;  %v1556_v41 = vadd.f32 %v2865_v39, %v3792_v10  ;;  %v1060_v42 = vpop.f32.mrb[37].mxu0  ;;  %v1550_v43 = vpop.f32.mrb[37].mxu1 }
 0x129   :  { %2090 = vst.msk [vmem:[%s4782_s3 + $0x110] sm:$0xff] %vm2055_vm4, %v1893_v36  ;;  %2188 = vst.msk [vmem:[%s4782_s3 + $0x420] sm:$0xff] %vm2055_vm4, %v1991_v37  ;;  %v1061_v44 = vadd.f32 %v3792_v10, %v1060_v42  ;;  %v1551_v45 = vadd.f32 %v3792_v10, %v1550_v43 }
 0x12a   :  { %v1896_v46 = vmax.f32 %v1066_v40, 0.0  ;;  %v1994_v47 = vmax.f32 %v1556_v41, 0.0 }
 0x12b   :  { %v1895_v48 = vmax.f32 %v1061_v44, 0.0  ;;  %v1993_v49 = vmax.f32 %v1551_v45, 0.0  ;;  %v2721_v50 = vpop.f32.mrb[38].mxu0  ;;  %v2868_v51 = vpop.f32.mrb[38].mxu1 }
 0x12c   :  { %2093 = vst.msk [vmem:[%s4782_s3 + $0x128] sm:$0xff] %vm2055_vm4, %v1896_v46  ;;  %2191 = vst.msk [vmem:[%s4782_s3 + $0x438] sm:$0xff] %vm2055_vm4, %v1994_v47  ;;  %v1076_v52 = vadd.f32 %v2721_v50, %v3792_v10  ;;  %v1566_v53 = vadd.f32 %v2868_v51, %v3792_v10  ;;  %v1070_v54 = vpop.f32.mrb[39].mxu0  ;;  %v1560_v55 = vpop.f32.mrb[39].mxu1 }
 0x12d   :  { %2092 = vst.msk [vmem:[%s4782_s3 + $0x120] sm:$0xff] %vm2055_vm4, %v1895_v48  ;;  %2190 = vst.msk [vmem:[%s4782_s3 + $0x430] sm:$0xff] %vm2055_vm4, %v1993_v49  ;;  %v1071_v56 = vadd.f32 %v3792_v10, %v1070_v54  ;;  %v1561_v57 = vadd.f32 %v3792_v10, %v1560_v55 }
 0x12e   :  { %v1898_v58 = vmax.f32 %v1076_v52, 0.0  ;;  %v1996_v59 = vmax.f32 %v1566_v53, 0.0 }
 0x12f   :  { %v1897_v60 = vmax.f32 %v1071_v56, 0.0  ;;  %v1995_v61 = vmax.f32 %v1561_v57, 0.0  ;;  %v2724_v62 = vpop.f32.mrb[40].mxu0  ;;  %v2871_v63 = vpop.f32.mrb[40].mxu1 }
 0x130   :  { %2095 = vst.msk [vmem:[%s4782_s3 + $0x138] sm:$0xff] %vm2055_vm4, %v1898_v58  ;;  %2193 = vst.msk [vmem:[%s4782_s3 + $0x448] sm:$0xff] %vm2055_vm4, %v1996_v59  ;;  %v1086_v0 = vadd.f32 %v2724_v62, %v3792_v10  ;;  %v1576_v1 = vadd.f32 %v2871_v63, %v3792_v10  ;;  %v1080_v2 = vpop.f32.mrb[41].mxu0  ;;  %v1570_v3 = vpop.f32.mrb[41].mxu1 }
 0x131   :  { %2094 = vst.msk [vmem:[%s4782_s3 + $0x130] sm:$0xff] %vm2055_vm4, %v1897_v60  ;;  %2192 = vst.msk [vmem:[%s4782_s3 + $0x440] sm:$0xff] %vm2055_vm4, %v1995_v61  ;;  %v1081_v4 = vadd.f32 %v3792_v10, %v1080_v2  ;;  %v1571_v5 = vadd.f32 %v3792_v10, %v1570_v3 }
 0x132   :  { %v1900_v6 = vmax.f32 %v1086_v0, 0.0  ;;  %v1998_v7 = vmax.f32 %v1576_v1, 0.0 }
 0x133   :  { %v1899_v8 = vmax.f32 %v1081_v4, 0.0  ;;  %v1997_v9 = vmax.f32 %v1571_v5, 0.0  ;;  %v2727_v11 = vpop.f32.mrb[42].mxu0  ;;  %v2874_v12 = vpop.f32.mrb[42].mxu1 }
 0x134   :  { %2097 = vst.msk [vmem:[%s4782_s3 + $0x148] sm:$0xff] %vm2055_vm4, %v1900_v6  ;;  %2195 = vst.msk [vmem:[%s4782_s3 + $0x458] sm:$0xff] %vm2055_vm4, %v1998_v7  ;;  %v1096_v13 = vadd.f32 %v2727_v11, %v3792_v10  ;;  %v1586_v14 = vadd.f32 %v2874_v12, %v3792_v10  ;;  %v1090_v15 = vpop.f32.mrb[43].mxu0  ;;  %v1580_v16 = vpop.f32.mrb[43].mxu1 }
 0x135   :  { %2096 = vst.msk [vmem:[%s4782_s3 + $0x140] sm:$0xff] %vm2055_vm4, %v1899_v8  ;;  %2194 = vst.msk [vmem:[%s4782_s3 + $0x450] sm:$0xff] %vm2055_vm4, %v1997_v9  ;;  %v1091_v17 = vadd.f32 %v3792_v10, %v1090_v15  ;;  %v1581_v18 = vadd.f32 %v3792_v10, %v1580_v16 }
 0x136   :  { %v1902_v19 = vmax.f32 %v1096_v13, 0.0  ;;  %v2000_v20 = vmax.f32 %v1586_v14, 0.0 }
 0x137   :  { %v1901_v21 = vmax.f32 %v1091_v17, 0.0  ;;  %v1999_v22 = vmax.f32 %v1581_v18, 0.0  ;;  %v2730_v23 = vpop.f32.mrb[44].mxu0  ;;  %v2877_v24 = vpop.f32.mrb[44].mxu1 }
 0x138   :  { %2099 = vst.msk [vmem:[%s4782_s3 + $0x158] sm:$0xff] %vm2055_vm4, %v1902_v19  ;;  %2197 = vst.msk [vmem:[%s4782_s3 + $0x468] sm:$0xff] %vm2055_vm4, %v2000_v20  ;;  %v1106_v25 = vadd.f32 %v2730_v23, %v3792_v10  ;;  %v1596_v26 = vadd.f32 %v2877_v24, %v3792_v10  ;;  %v1100_v27 = vpop.f32.mrb[45].mxu0  ;;  %v1590_v28 = vpop.f32.mrb[45].mxu1 }
 0x139   :  { %2098 = vst.msk [vmem:[%s4782_s3 + $0x150] sm:$0xff] %vm2055_vm4, %v1901_v21  ;;  %2196 = vst.msk [vmem:[%s4782_s3 + $0x460] sm:$0xff] %vm2055_vm4, %v1999_v22  ;;  %v1101_v29 = vadd.f32 %v3792_v10, %v1100_v27  ;;  %v1591_v30 = vadd.f32 %v3792_v10, %v1590_v28 }
 0x13a   :  { %v1904_v31 = vmax.f32 %v1106_v25, 0.0  ;;  %v2002_v32 = vmax.f32 %v1596_v26, 0.0 }
 0x13b   :  { %v1903_v33 = vmax.f32 %v1101_v29, 0.0  ;;  %v2001_v34 = vmax.f32 %v1591_v30, 0.0  ;;  %v2733_v35 = vpop.f32.mrb[46].mxu0  ;;  %v2880_v36 = vpop.f32.mrb[46].mxu1 }
 0x13c   :  { %2101 = vst.msk [vmem:[%s4782_s3 + $0x168] sm:$0xff] %vm2055_vm4, %v1904_v31  ;;  %2199 = vst.msk [vmem:[%s4782_s3 + $0x478] sm:$0xff] %vm2055_vm4, %v2002_v32  ;;  %v1116_v37 = vadd.f32 %v2733_v35, %v3792_v10  ;;  %v1606_v38 = vadd.f32 %v2880_v36, %v3792_v10  ;;  %v1110_v39 = vpop.f32.mrb[47].mxu0  ;;  %v1600_v40 = vpop.f32.mrb[47].mxu1 }
 0x13d   :  { %2100 = vst.msk [vmem:[%s4782_s3 + $0x160] sm:$0xff] %vm2055_vm4, %v1903_v33  ;;  %2198 = vst.msk [vmem:[%s4782_s3 + $0x470] sm:$0xff] %vm2055_vm4, %v2001_v34  ;;  %v1111_v41 = vadd.f32 %v3792_v10, %v1110_v39  ;;  %v1601_v42 = vadd.f32 %v3792_v10, %v1600_v40 }
 0x13e   :  { %v1906_v43 = vmax.f32 %v1116_v37, 0.0  ;;  %v2004_v44 = vmax.f32 %v1606_v38, 0.0 }
 0x13f   :  { %v1905_v45 = vmax.f32 %v1111_v41, 0.0  ;;  %v2003_v46 = vmax.f32 %v1601_v42, 0.0  ;;  %v2736_v47 = vpop.f32.mrb[48].mxu0  ;;  %v2883_v48 = vpop.f32.mrb[48].mxu1 }
 0x140   :  { %2103 = vst.msk [vmem:[%s4782_s3 + $0x178] sm:$0xff] %vm2055_vm4, %v1906_v43  ;;  %2201 = vst.msk [vmem:[%s4782_s3 + $0x488] sm:$0xff] %vm2055_vm4, %v2004_v44  ;;  %v1126_v49 = vadd.f32 %v2736_v47, %v3792_v10  ;;  %v1616_v50 = vadd.f32 %v2883_v48, %v3792_v10  ;;  %v1120_v51 = vpop.f32.mrb[49].mxu0  ;;  %v1610_v52 = vpop.f32.mrb[49].mxu1 }
 0x141   :  { %2102 = vst.msk [vmem:[%s4782_s3 + $0x170] sm:$0xff] %vm2055_vm4, %v1905_v45  ;;  %2200 = vst.msk [vmem:[%s4782_s3 + $0x480] sm:$0xff] %vm2055_vm4, %v2003_v46  ;;  %v1121_v53 = vadd.f32 %v3792_v10, %v1120_v51  ;;  %v1611_v54 = vadd.f32 %v3792_v10, %v1610_v52 }
 0x142   :  { %v1908_v55 = vmax.f32 %v1126_v49, 0.0  ;;  %v2006_v56 = vmax.f32 %v1616_v50, 0.0 }
 0x143   :  { %v1907_v57 = vmax.f32 %v1121_v53, 0.0  ;;  %v2005_v58 = vmax.f32 %v1611_v54, 0.0  ;;  %v2739_v59 = vpop.f32.mrb[50].mxu0  ;;  %v2886_v60 = vpop.f32.mrb[50].mxu1 }
 0x144   :  { %2105 = vst.msk [vmem:[%s4782_s3 + $0x188] sm:$0xff] %vm2055_vm4, %v1908_v55  ;;  %2203 = vst.msk [vmem:[%s4782_s3 + $0x498] sm:$0xff] %vm2055_vm4, %v2006_v56  ;;  %v1136_v61 = vadd.f32 %v2739_v59, %v3792_v10  ;;  %v1626_v62 = vadd.f32 %v2886_v60, %v3792_v10  ;;  %v1130_v63 = vpop.f32.mrb[51].mxu0  ;;  %v1620_v0 = vpop.f32.mrb[51].mxu1 }
 0x145   :  { %2104 = vst.msk [vmem:[%s4782_s3 + $0x180] sm:$0xff] %vm2055_vm4, %v1907_v57  ;;  %2202 = vst.msk [vmem:[%s4782_s3 + $0x490] sm:$0xff] %vm2055_vm4, %v2005_v58  ;;  %v1131_v1 = vadd.f32 %v3792_v10, %v1130_v63  ;;  %v1621_v2 = vadd.f32 %v3792_v10, %v1620_v0 }
 0x146   :  { %v1910_v3 = vmax.f32 %v1136_v61, 0.0  ;;  %v2008_v4 = vmax.f32 %v1626_v62, 0.0 }
 0x147   :  { %v1909_v5 = vmax.f32 %v1131_v1, 0.0  ;;  %v2007_v6 = vmax.f32 %v1621_v2, 0.0  ;;  %v2742_v7 = vpop.f32.mrb[52].mxu0  ;;  %v2889_v8 = vpop.f32.mrb[52].mxu1 }
 0x148   :  { %2107 = vst.msk [vmem:[%s4782_s3 + $0x198] sm:$0xff] %vm2055_vm4, %v1910_v3  ;;  %2205 = vst.msk [vmem:[%s4782_s3 + $0x4a8] sm:$0xff] %vm2055_vm4, %v2008_v4  ;;  %v1146_v9 = vadd.f32 %v2742_v7, %v3792_v10  ;;  %v1636_v11 = vadd.f32 %v2889_v8, %v3792_v10  ;;  %v1140_v12 = vpop.f32.mrb[53].mxu0  ;;  %v1630_v13 = vpop.f32.mrb[53].mxu1 }
 0x149   :  { %2106 = vst.msk [vmem:[%s4782_s3 + $0x190] sm:$0xff] %vm2055_vm4, %v1909_v5  ;;  %2204 = vst.msk [vmem:[%s4782_s3 + $0x4a0] sm:$0xff] %vm2055_vm4, %v2007_v6  ;;  %v1141_v14 = vadd.f32 %v3792_v10, %v1140_v12  ;;  %v1631_v15 = vadd.f32 %v3792_v10, %v1630_v13 }
 0x14a   :  { %v1912_v16 = vmax.f32 %v1146_v9, 0.0  ;;  %v2010_v17 = vmax.f32 %v1636_v11, 0.0 }
 0x14b   :  { %v1911_v18 = vmax.f32 %v1141_v14, 0.0  ;;  %v2009_v19 = vmax.f32 %v1631_v15, 0.0  ;;  %v2745_v20 = vpop.f32.mrb[54].mxu0  ;;  %v2892_v21 = vpop.f32.mrb[54].mxu1 }
 0x14c   :  { %2109 = vst.msk [vmem:[%s4782_s3 + $0x1a8] sm:$0xff] %vm2055_vm4, %v1912_v16  ;;  %2207 = vst.msk [vmem:[%s4782_s3 + $0x4b8] sm:$0xff] %vm2055_vm4, %v2010_v17  ;;  %v1156_v22 = vadd.f32 %v2745_v20, %v3792_v10  ;;  %v1646_v23 = vadd.f32 %v2892_v21, %v3792_v10  ;;  %v1150_v24 = vpop.f32.mrb[55].mxu0  ;;  %v1640_v25 = vpop.f32.mrb[55].mxu1 }
 0x14d   :  { %2108 = vst.msk [vmem:[%s4782_s3 + $0x1a0] sm:$0xff] %vm2055_vm4, %v1911_v18  ;;  %2206 = vst.msk [vmem:[%s4782_s3 + $0x4b0] sm:$0xff] %vm2055_vm4, %v2009_v19  ;;  %v1151_v26 = vadd.f32 %v3792_v10, %v1150_v24  ;;  %v1641_v27 = vadd.f32 %v3792_v10, %v1640_v25 }
 0x14e   :  { %v1914_v28 = vmax.f32 %v1156_v22, 0.0  ;;  %v2012_v29 = vmax.f32 %v1646_v23, 0.0 }
 0x14f   :  { %v1913_v30 = vmax.f32 %v1151_v26, 0.0  ;;  %v2011_v31 = vmax.f32 %v1641_v27, 0.0  ;;  %v2748_v32 = vpop.f32.mrb[56].mxu0  ;;  %v2895_v33 = vpop.f32.mrb[56].mxu1 }
 0x150   :  { %2111 = vst.msk [vmem:[%s4782_s3 + $0x1b8] sm:$0xff] %vm2055_vm4, %v1914_v28  ;;  %2209 = vst.msk [vmem:[%s4782_s3 + $0x4c8] sm:$0xff] %vm2055_vm4, %v2012_v29  ;;  %v1166_v34 = vadd.f32 %v2748_v32, %v3792_v10  ;;  %v1656_v35 = vadd.f32 %v2895_v33, %v3792_v10  ;;  %v1160_v36 = vpop.f32.mrb[57].mxu0  ;;  %v1650_v37 = vpop.f32.mrb[57].mxu1 }
 0x151   :  { %2110 = vst.msk [vmem:[%s4782_s3 + $0x1b0] sm:$0xff] %vm2055_vm4, %v1913_v30  ;;  %2208 = vst.msk [vmem:[%s4782_s3 + $0x4c0] sm:$0xff] %vm2055_vm4, %v2011_v31  ;;  %v1161_v38 = vadd.f32 %v3792_v10, %v1160_v36  ;;  %v1651_v39 = vadd.f32 %v3792_v10, %v1650_v37 }
 0x152   :  { %v1916_v40 = vmax.f32 %v1166_v34, 0.0  ;;  %v2014_v41 = vmax.f32 %v1656_v35, 0.0 }
 0x153   :  { %v1915_v42 = vmax.f32 %v1161_v38, 0.0  ;;  %v2013_v43 = vmax.f32 %v1651_v39, 0.0  ;;  %v2751_v44 = vpop.f32.mrb[58].mxu0  ;;  %v2898_v45 = vpop.f32.mrb[58].mxu1 }
 0x154   :  { %2113 = vst.msk [vmem:[%s4782_s3 + $0x1c8] sm:$0xff] %vm2055_vm4, %v1916_v40  ;;  %2211 = vst.msk [vmem:[%s4782_s3 + $0x4d8] sm:$0xff] %vm2055_vm4, %v2014_v41  ;;  %v1176_v46 = vadd.f32 %v2751_v44, %v3792_v10  ;;  %v1666_v47 = vadd.f32 %v2898_v45, %v3792_v10  ;;  %v1170_v48 = vpop.f32.mrb[59].mxu0  ;;  %v1660_v49 = vpop.f32.mrb[59].mxu1 }
 0x155   :  { %2112 = vst.msk [vmem:[%s4782_s3 + $0x1c0] sm:$0xff] %vm2055_vm4, %v1915_v42  ;;  %2210 = vst.msk [vmem:[%s4782_s3 + $0x4d0] sm:$0xff] %vm2055_vm4, %v2013_v43  ;;  %v1171_v50 = vadd.f32 %v3792_v10, %v1170_v48  ;;  %v1661_v51 = vadd.f32 %v3792_v10, %v1660_v49 }
 0x156   :  { %v1918_v52 = vmax.f32 %v1176_v46, 0.0  ;;  %v2016_v53 = vmax.f32 %v1666_v47, 0.0 }
 0x157   :  { %v1917_v54 = vmax.f32 %v1171_v50, 0.0  ;;  %v2015_v55 = vmax.f32 %v1661_v51, 0.0  ;;  %v2754_v56 = vpop.f32.mrb[60].mxu0  ;;  %v2901_v57 = vpop.f32.mrb[60].mxu1 }
 0x158   :  { %2115 = vst.msk [vmem:[%s4782_s3 + $0x1d8] sm:$0xff] %vm2055_vm4, %v1918_v52  ;;  %2213 = vst.msk [vmem:[%s4782_s3 + $0x4e8] sm:$0xff] %vm2055_vm4, %v2016_v53  ;;  %v1186_v58 = vadd.f32 %v2754_v56, %v3792_v10  ;;  %v1676_v59 = vadd.f32 %v2901_v57, %v3792_v10  ;;  %v1180_v60 = vpop.f32.mrb[61].mxu0  ;;  %v1670_v61 = vpop.f32.mrb[61].mxu1 }
 0x159   :  { %2114 = vst.msk [vmem:[%s4782_s3 + $0x1d0] sm:$0xff] %vm2055_vm4, %v1917_v54  ;;  %2212 = vst.msk [vmem:[%s4782_s3 + $0x4e0] sm:$0xff] %vm2055_vm4, %v2015_v55  ;;  %v1181_v62 = vadd.f32 %v3792_v10, %v1180_v60  ;;  %v1671_v63 = vadd.f32 %v3792_v10, %v1670_v61 }
 0x15a   :  { %v1920_v0 = vmax.f32 %v1186_v58, 0.0  ;;  %v2018_v1 = vmax.f32 %v1676_v59, 0.0 }
 0x15b   :  { %v1919_v2 = vmax.f32 %v1181_v62, 0.0  ;;  %v2017_v3 = vmax.f32 %v1671_v63, 0.0  ;;  %v2757_v4 = vpop.f32.mrb[62].mxu0  ;;  %v2904_v5 = vpop.f32.mrb[62].mxu1 }
 0x15c   :  { %2117 = vst.msk [vmem:[%s4782_s3 + $0x1e8] sm:$0xff] %vm2055_vm4, %v1920_v0  ;;  %2215 = vst.msk [vmem:[%s4782_s3 + $0x4f8] sm:$0xff] %vm2055_vm4, %v2018_v1  ;;  %v1196_v6 = vadd.f32 %v2757_v4, %v3792_v10  ;;  %v1686_v7 = vadd.f32 %v2904_v5, %v3792_v10  ;;  %v1190_v8 = vpop.f32.mrb[63].mxu0  ;;  %v1680_v9 = vpop.f32.mrb[63].mxu1 }
 0x15d   :  { %2116 = vst.msk [vmem:[%s4782_s3 + $0x1e0] sm:$0xff] %vm2055_vm4, %v1919_v2  ;;  %2214 = vst.msk [vmem:[%s4782_s3 + $0x4f0] sm:$0xff] %vm2055_vm4, %v2017_v3  ;;  %v1191_v11 = vadd.f32 %v3792_v10, %v1190_v8  ;;  %v1681_v12 = vadd.f32 %v3792_v10, %v1680_v9  ;;  %v4429_v10 = vld [vmem:[%s4781_s2] ss:$0 sm:$0xff] }
 0x15e   :  { %v1922_v13 = vmax.f32 %v1196_v6, 0.0  ;;  %v2020_v14 = vmax.f32 %v1686_v7, 0.0 }
 0x15f   :  { %v1921_v15 = vmax.f32 %v1191_v11, 0.0  ;;  %v2019_v16 = vmax.f32 %v1681_v12, 0.0  ;;  %v2760_v17 = vpop.f32.mrb[64].mxu0  ;;  %v2907_v18 = vpop.f32.mrb[64].mxu1 }
 0x160   :  { %2119 = vst.msk [vmem:[%s4782_s3 + $0x1f8] sm:$0xff] %vm2055_vm4, %v1922_v13  ;;  %2217 = vst.msk [vmem:[%s4782_s3 + $0x508] sm:$0xff] %vm2055_vm4, %v2020_v14  ;;  %v1206_v19 = vadd.f32 %v4429_v10, %v2760_v17  ;;  %v1696_v20 = vadd.f32 %v4429_v10, %v2907_v18  ;;  %v1200_v21 = vpop.f32.mrb[65].mxu0  ;;  %v1690_v22 = vpop.f32.mrb[65].mxu1 }
 0x161   :  { %2118 = vst.msk [vmem:[%s4782_s3 + $0x1f0] sm:$0xff] %vm2055_vm4, %v1921_v15  ;;  %2216 = vst.msk [vmem:[%s4782_s3 + $0x500] sm:$0xff] %vm2055_vm4, %v2019_v16  ;;  %v1201_v23 = vadd.f32 %v4429_v10, %v1200_v21  ;;  %v1691_v24 = vadd.f32 %v4429_v10, %v1690_v22 }
 0x162   :  { %v1924_v25 = vmax.f32 %v1206_v19, 0.0  ;;  %v2022_v26 = vmax.f32 %v1696_v20, 0.0 }
 0x163   :  { %v1923_v27 = vmax.f32 %v1201_v23, 0.0  ;;  %v2021_v28 = vmax.f32 %v1691_v24, 0.0  ;;  %v2763_v29 = vpop.f32.mrb[66].mxu0  ;;  %v2910_v30 = vpop.f32.mrb[66].mxu1 }
 0x164   :  { %2121 = vst.msk [vmem:[%s4782_s3 + $0x208] sm:$0xff] %vm2055_vm4, %v1924_v25  ;;  %2219 = vst.msk [vmem:[%s4782_s3 + $0x518] sm:$0xff] %vm2055_vm4, %v2022_v26  ;;  %v1216_v31 = vadd.f32 %v4429_v10, %v2763_v29  ;;  %v1706_v32 = vadd.f32 %v4429_v10, %v2910_v30  ;;  %v1210_v33 = vpop.f32.mrb[67].mxu0  ;;  %v1700_v34 = vpop.f32.mrb[67].mxu1 }
 0x165   :  { %2120 = vst.msk [vmem:[%s4782_s3 + $0x200] sm:$0xff] %vm2055_vm4, %v1923_v27  ;;  %2218 = vst.msk [vmem:[%s4782_s3 + $0x510] sm:$0xff] %vm2055_vm4, %v2021_v28  ;;  %v1211_v35 = vadd.f32 %v4429_v10, %v1210_v33  ;;  %v1701_v36 = vadd.f32 %v4429_v10, %v1700_v34 }
 0x166   :  { %v1926_v37 = vmax.f32 %v1216_v31, 0.0  ;;  %v2024_v38 = vmax.f32 %v1706_v32, 0.0 }
 0x167   :  { %v1925_v39 = vmax.f32 %v1211_v35, 0.0  ;;  %v2023_v40 = vmax.f32 %v1701_v36, 0.0  ;;  %v2766_v41 = vpop.f32.mrb[68].mxu0  ;;  %v2913_v42 = vpop.f32.mrb[68].mxu1 }
 0x168   :  { %2123 = vst.msk [vmem:[%s4782_s3 + $0x218] sm:$0xff] %vm2055_vm4, %v1926_v37  ;;  %2221 = vst.msk [vmem:[%s4782_s3 + $0x528] sm:$0xff] %vm2055_vm4, %v2024_v38  ;;  %v1226_v43 = vadd.f32 %v4429_v10, %v2766_v41  ;;  %v1716_v44 = vadd.f32 %v4429_v10, %v2913_v42  ;;  %v1220_v45 = vpop.f32.mrb[69].mxu0  ;;  %v1710_v46 = vpop.f32.mrb[69].mxu1 }
 0x169   :  { %2122 = vst.msk [vmem:[%s4782_s3 + $0x210] sm:$0xff] %vm2055_vm4, %v1925_v39  ;;  %2220 = vst.msk [vmem:[%s4782_s3 + $0x520] sm:$0xff] %vm2055_vm4, %v2023_v40  ;;  %v1221_v47 = vadd.f32 %v4429_v10, %v1220_v45  ;;  %v1711_v48 = vadd.f32 %v4429_v10, %v1710_v46 }
 0x16a   :  { %v1928_v49 = vmax.f32 %v1226_v43, 0.0  ;;  %v2026_v50 = vmax.f32 %v1716_v44, 0.0 }
 0x16b   :  { %v1927_v51 = vmax.f32 %v1221_v47, 0.0  ;;  %v2025_v52 = vmax.f32 %v1711_v48, 0.0  ;;  %v2769_v53 = vpop.f32.mrb[70].mxu0  ;;  %v2916_v54 = vpop.f32.mrb[70].mxu1 }
 0x16c   :  { %2125 = vst.msk [vmem:[%s4782_s3 + $0x228] sm:$0xff] %vm2055_vm4, %v1928_v49  ;;  %2223 = vst.msk [vmem:[%s4782_s3 + $0x538] sm:$0xff] %vm2055_vm4, %v2026_v50  ;;  %v1236_v55 = vadd.f32 %v4429_v10, %v2769_v53  ;;  %v1726_v56 = vadd.f32 %v4429_v10, %v2916_v54  ;;  %v1230_v57 = vpop.f32.mrb[71].mxu0  ;;  %v1720_v58 = vpop.f32.mrb[71].mxu1 }
 0x16d   :  { %2124 = vst.msk [vmem:[%s4782_s3 + $0x220] sm:$0xff] %vm2055_vm4, %v1927_v51  ;;  %2222 = vst.msk [vmem:[%s4782_s3 + $0x530] sm:$0xff] %vm2055_vm4, %v2025_v52  ;;  %v1231_v59 = vadd.f32 %v4429_v10, %v1230_v57  ;;  %v1721_v60 = vadd.f32 %v4429_v10, %v1720_v58 }
 0x16e   :  { %v1930_v61 = vmax.f32 %v1236_v55, 0.0  ;;  %v2028_v62 = vmax.f32 %v1726_v56, 0.0 }
 0x16f   :  { %v1929_v63 = vmax.f32 %v1231_v59, 0.0  ;;  %v2027_v0 = vmax.f32 %v1721_v60, 0.0  ;;  %v2772_v1 = vpop.f32.mrb[72].mxu0  ;;  %v2919_v2 = vpop.f32.mrb[72].mxu1 }
 0x170   :  { %2127 = vst.msk [vmem:[%s4782_s3 + $0x238] sm:$0xff] %vm2055_vm4, %v1930_v61  ;;  %2225 = vst.msk [vmem:[%s4782_s3 + $0x548] sm:$0xff] %vm2055_vm4, %v2028_v62  ;;  %v1246_v3 = vadd.f32 %v4429_v10, %v2772_v1  ;;  %v1736_v4 = vadd.f32 %v4429_v10, %v2919_v2  ;;  %v1240_v5 = vpop.f32.mrb[73].mxu0  ;;  %v1730_v6 = vpop.f32.mrb[73].mxu1 }
 0x171   :  { %2126 = vst.msk [vmem:[%s4782_s3 + $0x230] sm:$0xff] %vm2055_vm4, %v1929_v63  ;;  %2224 = vst.msk [vmem:[%s4782_s3 + $0x540] sm:$0xff] %vm2055_vm4, %v2027_v0  ;;  %v1241_v7 = vadd.f32 %v4429_v10, %v1240_v5  ;;  %v1731_v8 = vadd.f32 %v4429_v10, %v1730_v6 }
 0x172   :  { %v1932_v9 = vmax.f32 %v1246_v3, 0.0  ;;  %v2030_v11 = vmax.f32 %v1736_v4, 0.0 }
 0x173   :  { %v1931_v12 = vmax.f32 %v1241_v7, 0.0  ;;  %v2029_v13 = vmax.f32 %v1731_v8, 0.0  ;;  %v2775_v14 = vpop.f32.mrb[74].mxu0  ;;  %v2922_v15 = vpop.f32.mrb[74].mxu1 }
 0x174   :  { %2129 = vst.msk [vmem:[%s4782_s3 + $0x248] sm:$0xff] %vm2055_vm4, %v1932_v9  ;;  %2227 = vst.msk [vmem:[%s4782_s3 + $0x558] sm:$0xff] %vm2055_vm4, %v2030_v11  ;;  %v1256_v16 = vadd.f32 %v4429_v10, %v2775_v14  ;;  %v1746_v17 = vadd.f32 %v4429_v10, %v2922_v15  ;;  %v1250_v18 = vpop.f32.mrb[75].mxu0  ;;  %v1740_v19 = vpop.f32.mrb[75].mxu1 }
 0x175   :  { %2128 = vst.msk [vmem:[%s4782_s3 + $0x240] sm:$0xff] %vm2055_vm4, %v1931_v12  ;;  %2226 = vst.msk [vmem:[%s4782_s3 + $0x550] sm:$0xff] %vm2055_vm4, %v2029_v13  ;;  %v1251_v20 = vadd.f32 %v4429_v10, %v1250_v18  ;;  %v1741_v21 = vadd.f32 %v4429_v10, %v1740_v19 }
 0x176   :  { %v1934_v22 = vmax.f32 %v1256_v16, 0.0  ;;  %v2032_v23 = vmax.f32 %v1746_v17, 0.0 }
 0x177   :  { %v1933_v24 = vmax.f32 %v1251_v20, 0.0  ;;  %v2031_v25 = vmax.f32 %v1741_v21, 0.0  ;;  %v2778_v26 = vpop.f32.mrb[76].mxu0  ;;  %v2925_v27 = vpop.f32.mrb[76].mxu1 }
 0x178   :  { %2131 = vst.msk [vmem:[%s4782_s3 + $0x258] sm:$0xff] %vm2055_vm4, %v1934_v22  ;;  %2229 = vst.msk [vmem:[%s4782_s3 + $0x568] sm:$0xff] %vm2055_vm4, %v2032_v23  ;;  %v1266_v28 = vadd.f32 %v4429_v10, %v2778_v26  ;;  %v1756_v29 = vadd.f32 %v4429_v10, %v2925_v27  ;;  %v1260_v30 = vpop.f32.mrb[77].mxu0  ;;  %v1750_v31 = vpop.f32.mrb[77].mxu1 }
 0x179   :  { %2130 = vst.msk [vmem:[%s4782_s3 + $0x250] sm:$0xff] %vm2055_vm4, %v1933_v24  ;;  %2228 = vst.msk [vmem:[%s4782_s3 + $0x560] sm:$0xff] %vm2055_vm4, %v2031_v25  ;;  %v1261_v32 = vadd.f32 %v4429_v10, %v1260_v30  ;;  %v1751_v33 = vadd.f32 %v4429_v10, %v1750_v31 }
 0x17a   :  { %v1936_v34 = vmax.f32 %v1266_v28, 0.0  ;;  %v2034_v35 = vmax.f32 %v1756_v29, 0.0 }
 0x17b   :  { %v1935_v36 = vmax.f32 %v1261_v32, 0.0  ;;  %v2033_v37 = vmax.f32 %v1751_v33, 0.0  ;;  %v2781_v38 = vpop.f32.mrb[78].mxu0  ;;  %v2928_v39 = vpop.f32.mrb[78].mxu1 }
 0x17c   :  { %2133 = vst.msk [vmem:[%s4782_s3 + $0x268] sm:$0xff] %vm2055_vm4, %v1936_v34  ;;  %2231 = vst.msk [vmem:[%s4782_s3 + $0x578] sm:$0xff] %vm2055_vm4, %v2034_v35  ;;  %v1276_v40 = vadd.f32 %v4429_v10, %v2781_v38  ;;  %v1766_v41 = vadd.f32 %v4429_v10, %v2928_v39  ;;  %v1270_v42 = vpop.f32.mrb[79].mxu0  ;;  %v1760_v43 = vpop.f32.mrb[79].mxu1 }
 0x17d   :  { %2132 = vst.msk [vmem:[%s4782_s3 + $0x260] sm:$0xff] %vm2055_vm4, %v1935_v36  ;;  %2230 = vst.msk [vmem:[%s4782_s3 + $0x570] sm:$0xff] %vm2055_vm4, %v2033_v37  ;;  %v1271_v44 = vadd.f32 %v4429_v10, %v1270_v42  ;;  %v1761_v45 = vadd.f32 %v4429_v10, %v1760_v43 }
 0x17e   :  { %v1938_v46 = vmax.f32 %v1276_v40, 0.0  ;;  %v2036_v47 = vmax.f32 %v1766_v41, 0.0 }
 0x17f   :  { %v1937_v48 = vmax.f32 %v1271_v44, 0.0  ;;  %v2035_v49 = vmax.f32 %v1761_v45, 0.0  ;;  %v2784_v50 = vpop.f32.mrb[80].mxu0  ;;  %v2931_v51 = vpop.f32.mrb[80].mxu1 }
 0x180   :  { %2135 = vst.msk [vmem:[%s4782_s3 + $0x278] sm:$0xff] %vm2055_vm4, %v1938_v46  ;;  %2233 = vst.msk [vmem:[%s4782_s3 + $0x588] sm:$0xff] %vm2055_vm4, %v2036_v47  ;;  %v1286_v52 = vadd.f32 %v4429_v10, %v2784_v50  ;;  %v1776_v53 = vadd.f32 %v4429_v10, %v2931_v51  ;;  %v1280_v54 = vpop.f32.mrb[81].mxu0  ;;  %v1770_v55 = vpop.f32.mrb[81].mxu1 }
 0x181   :  { %2134 = vst.msk [vmem:[%s4782_s3 + $0x270] sm:$0xff] %vm2055_vm4, %v1937_v48  ;;  %2232 = vst.msk [vmem:[%s4782_s3 + $0x580] sm:$0xff] %vm2055_vm4, %v2035_v49  ;;  %v1281_v56 = vadd.f32 %v4429_v10, %v1280_v54  ;;  %v1771_v57 = vadd.f32 %v4429_v10, %v1770_v55 }
 0x182   :  { %v1940_v58 = vmax.f32 %v1286_v52, 0.0  ;;  %v2038_v59 = vmax.f32 %v1776_v53, 0.0 }
 0x183   :  { %v1939_v60 = vmax.f32 %v1281_v56, 0.0  ;;  %v2037_v61 = vmax.f32 %v1771_v57, 0.0  ;;  %v2787_v62 = vpop.f32.mrb[82].mxu0  ;;  %v2934_v63 = vpop.f32.mrb[82].mxu1 }
 0x184   :  { %2137 = vst.msk [vmem:[%s4782_s3 + $0x288] sm:$0xff] %vm2055_vm4, %v1940_v58  ;;  %2235 = vst.msk [vmem:[%s4782_s3 + $0x598] sm:$0xff] %vm2055_vm4, %v2038_v59  ;;  %v1296_v0 = vadd.f32 %v4429_v10, %v2787_v62  ;;  %v1786_v1 = vadd.f32 %v4429_v10, %v2934_v63  ;;  %v1290_v2 = vpop.f32.mrb[83].mxu0  ;;  %v1780_v3 = vpop.f32.mrb[83].mxu1 }
 0x185   :  { %2136 = vst.msk [vmem:[%s4782_s3 + $0x280] sm:$0xff] %vm2055_vm4, %v1939_v60  ;;  %2234 = vst.msk [vmem:[%s4782_s3 + $0x590] sm:$0xff] %vm2055_vm4, %v2037_v61  ;;  %v1291_v4 = vadd.f32 %v4429_v10, %v1290_v2  ;;  %v1781_v5 = vadd.f32 %v4429_v10, %v1780_v3 }
 0x186   :  { %v1942_v6 = vmax.f32 %v1296_v0, 0.0  ;;  %v2040_v7 = vmax.f32 %v1786_v1, 0.0 }
 0x187   :  { %v1941_v8 = vmax.f32 %v1291_v4, 0.0  ;;  %v2039_v9 = vmax.f32 %v1781_v5, 0.0  ;;  %v2790_v11 = vpop.f32.mrb[84].mxu0  ;;  %v2937_v12 = vpop.f32.mrb[84].mxu1 }
 0x188   :  { %2139 = vst.msk [vmem:[%s4782_s3 + $0x298] sm:$0xff] %vm2055_vm4, %v1942_v6  ;;  %2237 = vst.msk [vmem:[%s4782_s3 + $0x5a8] sm:$0xff] %vm2055_vm4, %v2040_v7  ;;  %v1306_v13 = vadd.f32 %v4429_v10, %v2790_v11  ;;  %v1796_v14 = vadd.f32 %v4429_v10, %v2937_v12  ;;  %v1300_v15 = vpop.f32.mrb[85].mxu0  ;;  %v1790_v16 = vpop.f32.mrb[85].mxu1 }
 0x189   :  { %2138 = vst.msk [vmem:[%s4782_s3 + $0x290] sm:$0xff] %vm2055_vm4, %v1941_v8  ;;  %2236 = vst.msk [vmem:[%s4782_s3 + $0x5a0] sm:$0xff] %vm2055_vm4, %v2039_v9  ;;  %v1301_v17 = vadd.f32 %v4429_v10, %v1300_v15  ;;  %v1791_v18 = vadd.f32 %v4429_v10, %v1790_v16 }
 0x18a   :  { %v1944_v19 = vmax.f32 %v1306_v13, 0.0  ;;  %v2042_v20 = vmax.f32 %v1796_v14, 0.0 }
 0x18b   :  { %v1943_v21 = vmax.f32 %v1301_v17, 0.0  ;;  %v2041_v22 = vmax.f32 %v1791_v18, 0.0  ;;  %v2793_v23 = vpop.f32.mrb[86].mxu0  ;;  %v2940_v24 = vpop.f32.mrb[86].mxu1 }
 0x18c   :  { %2141 = vst.msk [vmem:[%s4782_s3 + $0x2a8] sm:$0xff] %vm2055_vm4, %v1944_v19  ;;  %2239 = vst.msk [vmem:[%s4782_s3 + $0x5b8] sm:$0xff] %vm2055_vm4, %v2042_v20  ;;  %v1316_v25 = vadd.f32 %v4429_v10, %v2793_v23  ;;  %v1806_v26 = vadd.f32 %v4429_v10, %v2940_v24  ;;  %v1310_v27 = vpop.f32.mrb[87].mxu0  ;;  %v1800_v28 = vpop.f32.mrb[87].mxu1 }
 0x18d   :  { %2140 = vst.msk [vmem:[%s4782_s3 + $0x2a0] sm:$0xff] %vm2055_vm4, %v1943_v21  ;;  %2238 = vst.msk [vmem:[%s4782_s3 + $0x5b0] sm:$0xff] %vm2055_vm4, %v2041_v22  ;;  %v1311_v29 = vadd.f32 %v4429_v10, %v1310_v27  ;;  %v1801_v30 = vadd.f32 %v4429_v10, %v1800_v28 }
 0x18e   :  { %v1946_v31 = vmax.f32 %v1316_v25, 0.0  ;;  %v2044_v32 = vmax.f32 %v1806_v26, 0.0 }
 0x18f   :  { %v1945_v33 = vmax.f32 %v1311_v29, 0.0  ;;  %v2043_v34 = vmax.f32 %v1801_v30, 0.0  ;;  %v2796_v35 = vpop.f32.mrb[88].mxu0  ;;  %v2943_v36 = vpop.f32.mrb[88].mxu1 }
 0x190   :  { %2143 = vst.msk [vmem:[%s4782_s3 + $0x2b8] sm:$0xff] %vm2055_vm4, %v1946_v31  ;;  %2241 = vst.msk [vmem:[%s4782_s3 + $0x5c8] sm:$0xff] %vm2055_vm4, %v2044_v32  ;;  %v1326_v37 = vadd.f32 %v4429_v10, %v2796_v35  ;;  %v1816_v38 = vadd.f32 %v4429_v10, %v2943_v36  ;;  %v1320_v39 = vpop.f32.mrb[89].mxu0  ;;  %v1810_v40 = vpop.f32.mrb[89].mxu1 }
 0x191   :  { %2142 = vst.msk [vmem:[%s4782_s3 + $0x2b0] sm:$0xff] %vm2055_vm4, %v1945_v33  ;;  %2240 = vst.msk [vmem:[%s4782_s3 + $0x5c0] sm:$0xff] %vm2055_vm4, %v2043_v34  ;;  %v1321_v41 = vadd.f32 %v4429_v10, %v1320_v39  ;;  %v1811_v42 = vadd.f32 %v4429_v10, %v1810_v40 }
 0x192   :  { %v1948_v43 = vmax.f32 %v1326_v37, 0.0  ;;  %v2046_v44 = vmax.f32 %v1816_v38, 0.0 }
 0x193   :  { %v1947_v45 = vmax.f32 %v1321_v41, 0.0  ;;  %v2045_v46 = vmax.f32 %v1811_v42, 0.0  ;;  %v2799_v47 = vpop.f32.mrb[90].mxu0  ;;  %v2946_v48 = vpop.f32.mrb[90].mxu1 }
 0x194   :  { %2145 = vst.msk [vmem:[%s4782_s3 + $0x2c8] sm:$0xff] %vm2055_vm4, %v1948_v43  ;;  %2243 = vst.msk [vmem:[%s4782_s3 + $0x5d8] sm:$0xff] %vm2055_vm4, %v2046_v44  ;;  %v1336_v49 = vadd.f32 %v4429_v10, %v2799_v47  ;;  %v1826_v50 = vadd.f32 %v4429_v10, %v2946_v48  ;;  %v1330_v51 = vpop.f32.mrb[91].mxu0  ;;  %v1820_v52 = vpop.f32.mrb[91].mxu1 }
 0x195   :  { %2144 = vst.msk [vmem:[%s4782_s3 + $0x2c0] sm:$0xff] %vm2055_vm4, %v1947_v45  ;;  %2242 = vst.msk [vmem:[%s4782_s3 + $0x5d0] sm:$0xff] %vm2055_vm4, %v2045_v46  ;;  %v1331_v53 = vadd.f32 %v4429_v10, %v1330_v51  ;;  %v1821_v54 = vadd.f32 %v4429_v10, %v1820_v52 }
 0x196   :  { %v1950_v55 = vmax.f32 %v1336_v49, 0.0  ;;  %v2048_v56 = vmax.f32 %v1826_v50, 0.0 }
 0x197   :  { %v1949_v57 = vmax.f32 %v1331_v53, 0.0  ;;  %v2047_v58 = vmax.f32 %v1821_v54, 0.0  ;;  %v2802_v59 = vpop.f32.mrb[92].mxu0  ;;  %v2949_v60 = vpop.f32.mrb[92].mxu1 }
 0x198   :  { %2147 = vst.msk [vmem:[%s4782_s3 + $0x2d8] sm:$0xff] %vm2055_vm4, %v1950_v55  ;;  %2245 = vst.msk [vmem:[%s4782_s3 + $0x5e8] sm:$0xff] %vm2055_vm4, %v2048_v56  ;;  %v1346_v61 = vadd.f32 %v4429_v10, %v2802_v59  ;;  %v1836_v62 = vadd.f32 %v4429_v10, %v2949_v60  ;;  %v1340_v63 = vpop.f32.mrb[93].mxu0  ;;  %v1830_v0 = vpop.f32.mrb[93].mxu1 }
 0x199   :  { %2146 = vst.msk [vmem:[%s4782_s3 + $0x2d0] sm:$0xff] %vm2055_vm4, %v1949_v57  ;;  %2244 = vst.msk [vmem:[%s4782_s3 + $0x5e0] sm:$0xff] %vm2055_vm4, %v2047_v58  ;;  %v1341_v1 = vadd.f32 %v4429_v10, %v1340_v63  ;;  %v1831_v2 = vadd.f32 %v4429_v10, %v1830_v0 }
 0x19a   :  { %v1952_v3 = vmax.f32 %v1346_v61, 0.0  ;;  %v2050_v4 = vmax.f32 %v1836_v62, 0.0 }
 0x19b   :  { %v1951_v5 = vmax.f32 %v1341_v1, 0.0  ;;  %v2049_v6 = vmax.f32 %v1831_v2, 0.0  ;;  %v2805_v7 = vpop.f32.mrb[94].mxu0  ;;  %v2952_v8 = vpop.f32.mrb[94].mxu1 }
 0x19c   :  { %2149 = vst.msk [vmem:[%s4782_s3 + $0x2e8] sm:$0xff] %vm2055_vm4, %v1952_v3  ;;  %2247 = vst.msk [vmem:[%s4782_s3 + $0x5f8] sm:$0xff] %vm2055_vm4, %v2050_v4  ;;  %v1356_v9 = vadd.f32 %v4429_v10, %v2805_v7  ;;  %v1846_v11 = vadd.f32 %v4429_v10, %v2952_v8  ;;  %v1350_v12 = vpop.f32.mrb[95].mxu0  ;;  %v1840_v13 = vpop.f32.mrb[95].mxu1 }
 0x19d   :  { %2148 = vst.msk [vmem:[%s4782_s3 + $0x2e0] sm:$0xff] %vm2055_vm4, %v1951_v5  ;;  %2246 = vst.msk [vmem:[%s4782_s3 + $0x5f0] sm:$0xff] %vm2055_vm4, %v2049_v6  ;;  %v1351_v14 = vadd.f32 %v4429_v10, %v1350_v12  ;;  %v1841_v15 = vadd.f32 %v4429_v10, %v1840_v13 }
 0x19e   :  { %v1954_v16 = vmax.f32 %v1356_v9, 0.0  ;;  %v2052_v17 = vmax.f32 %v1846_v11, 0.0 }
 0x19f   :  { %v1953_v18 = vmax.f32 %v1351_v14, 0.0  ;;  %v2051_v19 = vmax.f32 %v1841_v15, 0.0  ;;  %v2808_v20 = vpop.f32.mrb[96].mxu0  ;;  %v2955_v21 = vpop.f32.mrb[96].mxu1 }
 0x1a0   :  { %2151 = vst.msk [vmem:[%s4782_s3 + $0x2f8] sm:$0xff] %vm2055_vm4, %v1954_v16  ;;  %2249 = vst.msk [vmem:[%s4782_s3 + $0x608] sm:$0xff] %vm2055_vm4, %v2052_v17  ;;  %v1366_v22 = vadd.f32 %v4429_v10, %v2808_v20  ;;  %v1856_v23 = vadd.f32 %v4429_v10, %v2955_v21  ;;  %v1360_v24 = vpop.f32.mrb[97].mxu0  ;;  %v1850_v25 = vpop.f32.mrb[97].mxu1 }
 0x1a1   :  { %2150 = vst.msk [vmem:[%s4782_s3 + $0x2f0] sm:$0xff] %vm2055_vm4, %v1953_v18  ;;  %2248 = vst.msk [vmem:[%s4782_s3 + $0x600] sm:$0xff] %vm2055_vm4, %v2051_v19  ;;  %v1361_v26 = vadd.f32 %v4429_v10, %v1360_v24  ;;  %v1851_v27 = vadd.f32 %v4429_v10, %v1850_v25 }
 0x1a2   :  { %v1956_v28 = vmax.f32 %v1366_v22, 0.0  ;;  %v2054_v29 = vmax.f32 %v1856_v23, 0.0 }
 0x1a3   :  { %v1955_v30 = vmax.f32 %v1361_v26, 0.0  ;;  %v2053_v31 = vmax.f32 %v1851_v27, 0.0 }
 0x1a4   :  { %2153 = vst.msk [vmem:[%s4782_s3 + $0x308] sm:$0xff] %vm2055_vm4, %v1956_v28  ;;  %2251 = vst.msk [vmem:[%s4782_s3 + $0x618] sm:$0xff] %vm2055_vm4, %v2054_v29 }
 0x1a5   :  { %2152 = vst.msk [vmem:[%s4782_s3 + $0x300] sm:$0xff] %vm2055_vm4, %v1955_v30  ;;  %2250 = vst.msk [vmem:[%s4782_s3 + $0x610] sm:$0xff] %vm2055_vm4, %v2053_v31 }

// kernel: lenet_forward.7
= control target key start
LH: loop header
LB: loop body
LE: loop exit
PB: predicated region body
PF: predicated region fallthrough
CT: control target
= control target key end

     0   :  { %vm80_vm0 = vcmask 1041408   ;;  %vm81_vm1 = vcmask 1043458   ;;  %vm83_vm2 = vcmask 652292   ;;  %s237_s0 = inlined_call_operand.vmem [shape: f32[2,3920], index: 0, kind: input, shape index: {}]   ;;  %s238_s1 = inlined_call_operand.vmem [shape: f32[2,3920], index: 1, kind: input, shape index: {}]   ;;  %s239_s2 = inlined_call_operand.vmem [shape: f32[2,3920], index: 2, kind: input, shape index: {}]   ;;  %s240_s3 = inlined_call_operand.vmem [shape: f32[2,3920], index: 3, kind: input, shape index: {}]   ;;  %s241_s4 = inlined_call_operand.vmem [shape: f32[2,3920], index: 4, kind: output, shape index: {}]  }
   0x1   :  { %v17_v0 = vld [vmem:[%s237_s0] sm:$0xff]  ;;  %v18_v5 = vld [vmem:[%s237_s0 + $0x8] sm:$0xff]  ;;  %v19_v11 = vld [vmem:[%s237_s0 + $0x10] sm:$0xff] }
   0x2   :  { %v25_v1 = vld [vmem:[%s238_s1] sm:$0xff]  ;;  %v26_v6 = vld [vmem:[%s238_s1 + $0x8] sm:$0xff]  ;;  %v27_v13 = vld [vmem:[%s238_s1 + $0x10] sm:$0xff] }
   0x3   :  { %v41_v2 = vld [vmem:[%s239_s2] sm:$0xff]  ;;  %v33_v3 = vmax.f32 %v17_v0, %v25_v1  ;;  %v34_v8 = vmax.f32 %v18_v5, %v26_v6  ;;  %v42_v9 = vld [vmem:[%s239_s2 + $0x8] sm:$0xff]  ;;  %v43_v14 = vld [vmem:[%s239_s2 + $0x10] sm:$0xff]  ;;  %v35_v17 = vmax.f32 %v19_v11, %v27_v13 }
   0x4   :  { %v49_v4 = vld [vmem:[%s240_s3] sm:$0xff]  ;;  %v50_v10 = vld [vmem:[%s240_s3 + $0x8] sm:$0xff]  ;;  %v51_v15 = vld [vmem:[%s240_s3 + $0x10] sm:$0xff] }
   0x5   :  { %v57_v7 = vmax.f32 %v41_v2, %v49_v4  ;;  %v58_v12 = vmax.f32 %v42_v9, %v50_v10  ;;  %v59_v18 = vmax.f32 %v43_v14, %v51_v15  ;;  %v20_v19 = vld [vmem:[%s237_s0 + $0x18] sm:$0xff]  ;;  %v21_v25 = vld [vmem:[%s237_s0 + $0x20] sm:$0xff]  ;;  %v22_v32 = vld [vmem:[%s237_s0 + $0x28] sm:$0xff] }
   0x6   :  { %v28_v20 = vld [vmem:[%s238_s1 + $0x18] sm:$0xff]  ;;  %v29_v26 = vld [vmem:[%s238_s1 + $0x20] sm:$0xff]  ;;  %v30_v34 = vld [vmem:[%s238_s1 + $0x28] sm:$0xff] }
   0x7   :  { %v65_v16 = vmax.f32 %v33_v3, %v57_v7  ;;  %v44_v21 = vld [vmem:[%s239_s2 + $0x18] sm:$0xff]  ;;  %v66_v22 = vmax.f32 %v34_v8, %v58_v12  ;;  %v36_v23 = vmax.f32 %v20_v19, %v28_v20  ;;  %v67_v27 = vmax.f32 %v35_v17, %v59_v18  ;;  %v45_v30 = vld [vmem:[%s239_s2 + $0x20] sm:$0xff]  ;;  %v46_v35 = vld [vmem:[%s239_s2 + $0x28] sm:$0xff] }
   0x8   :  { %v52_v24 = vld [vmem:[%s240_s3 + $0x18] sm:$0xff]  ;;  %v37_v29 = vmax.f32 %v21_v25, %v29_v26  ;;  %v53_v31 = vld [vmem:[%s240_s3 + $0x20] sm:$0xff]  ;;  %v54_v36 = vld [vmem:[%s240_s3 + $0x28] sm:$0xff]  ;;  %v38_v38 = vmax.f32 %v22_v32, %v30_v34 }
   0x9   :  { %73 = vst [vmem:[%s241_s4] sm:$0xff] %v65_v16  ;;  %v60_v28 = vmax.f32 %v44_v21, %v52_v24  ;;  %74 = vst [vmem:[%s241_s4 + $0x8] sm:$0xff] %v66_v22  ;;  %v61_v33 = vmax.f32 %v45_v30, %v53_v31  ;;  %v62_v39 = vmax.f32 %v46_v35, %v54_v36  ;;  %v23_v40 = vld [vmem:[%s237_s0 + $0x30] sm:$0xff]  ;;  %v24_v46 = vld [vmem:[%s237_s0 + $0x38] sm:$0x3f] }
   0xa   :  { %75 = vst [vmem:[%s241_s4 + $0x10] sm:$0xff] %v67_v27  ;;  %v31_v41 = vld [vmem:[%s238_s1 + $0x30] sm:$0xff]  ;;  %v32_v47 = vld [vmem:[%s238_s1 + $0x38] sm:$0x3f]  ;;  %vm82_vm3 = vmor %vm81_vm1, %vm80_vm0 }
   0xb   :  { %v68_v37 = vmax.f32 %v36_v23, %v60_v28  ;;  %v47_v42 = vld [vmem:[%s239_s2 + $0x30] sm:$0xff]  ;;  %v69_v43 = vmax.f32 %v37_v29, %v61_v33  ;;  %v39_v44 = vmax.f32 %v23_v40, %v31_v41  ;;  %v70_v48 = vmax.f32 %v38_v38, %v62_v39  ;;  %v48_v51 = vld [vmem:[%s239_s2 + $0x38] sm:$0x3f]  ;;  %vm84_vm4 = vmor %vm83_vm2, %vm82_vm3 }
   0xc   :  { %v55_v45 = vld [vmem:[%s240_s3 + $0x30] sm:$0xff]  ;;  %v40_v50 = vmax.f32 %v24_v46, %v32_v47  ;;  %v56_v52 = vld [vmem:[%s240_s3 + $0x38] sm:$0x3f] }
   0xd   :  { %76 = vst [vmem:[%s241_s4 + $0x18] sm:$0xff] %v68_v37  ;;  %v63_v49 = vmax.f32 %v47_v42, %v55_v45  ;;  %77 = vst [vmem:[%s241_s4 + $0x20] sm:$0xff] %v69_v43  ;;  %v64_v53 = vmax.f32 %v48_v51, %v56_v52 }
   0xe   :  { %78 = vst [vmem:[%s241_s4 + $0x28] sm:$0xff] %v70_v48 }
   0xf   :  { %v71_v54 = vmax.f32 %v39_v44, %v63_v49  ;;  %v72_v55 = vmax.f32 %v40_v50, %v64_v53 }
  0x11   :  { %79 = vst [vmem:[%s241_s4 + $0x30] sm:$0xff] %v71_v54  ;;  %85 = vst.msk [vmem:[%s241_s4 + $0x38] sm:$0x3f] %vm84_vm4, %v72_v55 }

// kernel: lenet_forward.8
= control target key start
LH: loop header
LB: loop body
LE: loop exit
PB: predicated region body
PF: predicated region fallthrough
CT: control target
= control target key end

     0   :  { %v1399_v0 = vmov 0.0|0.0   ;;  %vm280_vm0 = vcmask 949248   ;;  %vm428_vm1 = vcmask 1043456   ;;  %vm1101_vm2 = vcmask 408576   ;;  %s2528_s1 = inlined_call_operand.vmem [shape: f32[500,50], index: 1, kind: input, shape index: {}]   ;;  %s2529_s0 = inlined_call_operand.vmem [shape: f32[392,500], index: 0, kind: input, shape index: {}]   ;;  %s2530_s2 = inlined_call_operand.vmem [shape: f32[1,50], index: 2, kind: input, shape index: {}]   ;;  %s2531_s3 = inlined_call_operand.vmem [shape: f32[392,50], index: 3, kind: output, shape index: {}]  }
   0x1   :  { %1206 = vmatprep.subr.bf16.mxu1 %v1399_v0  ;;  %v210_v1 = vld [vmem:[%s2528_s1] sm:$0xff]  ;;  %v211_v2 = vld [vmem:[%s2528_s1 + $0x8] sm:$0xff]  ;;  %1254 = vmatprep.subr.bf16.mxu0 %v1399_v0  ;;  %v212_v6 = vld [vmem:[%s2528_s1 + $0x10] sm:$0xff] }
   0x2   :  { %v242_v3 = vld [vmem:[%s2528_s1 + $0x100] sm:$0xff]  ;;  %v1207_v4 = vpack.c.bf16 %v211_v2, %v210_v1  ;;  %v243_v5 = vld [vmem:[%s2528_s1 + $0x108] sm:$0xff]  ;;  %v213_v7 = vld [vmem:[%s2528_s1 + $0x18] sm:$0xff] }
   0x3   :  { %v1255_v8 = vpack.c.bf16 %v243_v5, %v242_v3  ;;  %v244_v9 = vld [vmem:[%s2528_s1 + $0x110] sm:$0xff]  ;;  %v245_v10 = vld [vmem:[%s2528_s1 + $0x118] sm:$0xff]  ;;  %v1210_v11 = vpack.c.bf16 %v213_v7, %v212_v6  ;;  %v214_v13 = vld [vmem:[%s2528_s1 + $0x20] sm:$0xff] }
   0x4   :  { %1208 = vmatpush1.bf16.msra.mxu1 %v1207_v4  ;;  %v1258_v12 = vpack.c.bf16 %v245_v10, %v244_v9  ;;  %v215_v14 = vld [vmem:[%s2528_s1 + $0x28] sm:$0xff]  ;;  %v246_v15 = vld [vmem:[%s2528_s1 + $0x120] sm:$0xff]  ;;  %v216_v19 = vld [vmem:[%s2528_s1 + $0x30] sm:$0xff] }
   0x5   :  { %1209 = vmatprep.subr.bf16.mxu1 %v1399_v0  ;;  %1256 = vmatpush1.bf16.msra.mxu0 %v1255_v8  ;;  %v247_v16 = vld [vmem:[%s2528_s1 + $0x128] sm:$0xff]  ;;  %v1213_v17 = vpack.c.bf16 %v215_v14, %v214_v13  ;;  %v217_v20 = vld [vmem:[%s2528_s1 + $0x38] sm:$0xff]  ;;  %v248_v21 = vld [vmem:[%s2528_s1 + $0x130] sm:$0xff] }
   0x6   :  { %1257 = vmatprep.subr.bf16.mxu0 %v1399_v0  ;;  %v1261_v18 = vpack.c.bf16 %v247_v16, %v246_v15  ;;  %v249_v22 = vld [vmem:[%s2528_s1 + $0x138] sm:$0xff]  ;;  %v1216_v23 = vpack.c.bf16 %v217_v20, %v216_v19  ;;  %v218_v25 = vld [vmem:[%s2528_s1 + $0x40] sm:$0xff]  ;;  %v219_v26 = vld [vmem:[%s2528_s1 + $0x48] sm:$0xff] }
   0x7   :  { %v1264_v24 = vpack.c.bf16 %v249_v22, %v248_v21  ;;  %v250_v27 = vld [vmem:[%s2528_s1 + $0x140] sm:$0xff]  ;;  %v251_v28 = vld [vmem:[%s2528_s1 + $0x148] sm:$0xff]  ;;  %v1219_v29 = vpack.c.bf16 %v219_v26, %v218_v25  ;;  %v220_v31 = vld [vmem:[%s2528_s1 + $0x50] sm:$0xff] }
   0x8   :  { %1211 = vmatpush1.bf16.msra.mxu1 %v1210_v11  ;;  %v1267_v30 = vpack.c.bf16 %v251_v28, %v250_v27  ;;  %v221_v32 = vld [vmem:[%s2528_s1 + $0x58] sm:$0xff]  ;;  %v252_v33 = vld [vmem:[%s2528_s1 + $0x150] sm:$0xff]  ;;  %v222_v37 = vld [vmem:[%s2528_s1 + $0x60] sm:$0xff] }
   0x9   :  { %1212 = vmatprep.subr.bf16.mxu1 %v1399_v0  ;;  %1259 = vmatpush1.bf16.msra.mxu0 %v1258_v12  ;;  %v253_v34 = vld [vmem:[%s2528_s1 + $0x158] sm:$0xff]  ;;  %v1222_v35 = vpack.c.bf16 %v221_v32, %v220_v31  ;;  %v223_v38 = vld [vmem:[%s2528_s1 + $0x68] sm:$0xff]  ;;  %v254_v40 = vld [vmem:[%s2528_s1 + $0x160] sm:$0xff] }
   0xa   :  { %1260 = vmatprep.subr.bf16.mxu0 %v1399_v0  ;;  %v1270_v36 = vpack.c.bf16 %v253_v34, %v252_v33  ;;  %v15_v39 = vld [vmem:[%s2529_s0 + $0x8] sm:$0xff]  ;;  %v17_v42 = vld [vmem:[%s2529_s0 + $0x18] sm:$0xff]  ;;  %v1225_v43 = vpack.c.bf16 %v223_v38, %v222_v37  ;;  %v224_v45 = vld [vmem:[%s2528_s1 + $0x70] sm:$0xff]  ;;  %v1400_v33 = vmov 0.0  }
   0xb   :  { %v255_v41 = vld [vmem:[%s2528_s1 + $0x168] sm:$0xff]  ;;  %496 = vmatprep.mubr.f32.mxu1 %v15_v39  ;;  %1157 = vmatprep.mubr.msk.f32.mxu0 %vm280_vm0, %v17_v42  ;;  %v225_v46 = vld [vmem:[%s2528_s1 + $0x78] sm:$0xff]  ;;  %v256_v47 = vld [vmem:[%s2528_s1 + $0x170] sm:$0xff] }
   0xc   :  { %1214 = vmatpush1.bf16.msra.mxu1 %v1213_v17  ;;  %v1273_v44 = vpack.c.bf16 %v255_v41, %v254_v40  ;;  %v257_v48 = vld [vmem:[%s2528_s1 + $0x178] sm:$0xff]  ;;  %v1228_v49 = vpack.c.bf16 %v225_v46, %v224_v45  ;;  %v226_v51 = vld [vmem:[%s2528_s1 + $0x80] sm:$0xff]  ;;  %v227_v52 = vld [vmem:[%s2528_s1 + $0x88] sm:$0xff] }
   0xd   :  { %1215 = vmatprep.subr.bf16.mxu1 %v1399_v0  ;;  %1262 = vmatpush1.bf16.msra.mxu0 %v1261_v18  ;;  %v1276_v50 = vpack.c.bf16 %v257_v48, %v256_v47  ;;  %v258_v53 = vld [vmem:[%s2528_s1 + $0x180] sm:$0xff]  ;;  %v259_v54 = vld [vmem:[%s2528_s1 + $0x188] sm:$0xff]  ;;  %v1231_v55 = vpack.c.bf16 %v227_v52, %v226_v51  ;;  %v228_v57 = vld [vmem:[%s2528_s1 + $0x90] sm:$0xff] }
   0xe   :  { %1263 = vmatprep.subr.bf16.mxu0 %v1399_v0  ;;  %v1279_v56 = vpack.c.bf16 %v259_v54, %v258_v53  ;;  %v229_v58 = vld [vmem:[%s2528_s1 + $0x98] sm:$0xff]  ;;  %v260_v59 = vld [vmem:[%s2528_s1 + $0x190] sm:$0xff]  ;;  %v230_v63 = vld [vmem:[%s2528_s1 + $0xa0] sm:$0xff] }
   0xf   :  { %v261_v60 = vld [vmem:[%s2528_s1 + $0x198] sm:$0xff]  ;;  %v1234_v61 = vpack.c.bf16 %v229_v58, %v228_v57  ;;  %v231_v1 = vld [vmem:[%s2528_s1 + $0xa8] sm:$0xff]  ;;  %v262_v2 = vld [vmem:[%s2528_s1 + $0x1a0] sm:$0xff] }
  0x10   :  { %1217 = vmatpush1.bf16.msra.mxu1 %v1216_v23  ;;  %v1282_v62 = vpack.c.bf16 %v261_v60, %v260_v59  ;;  %v263_v3 = vld [vmem:[%s2528_s1 + $0x1a8] sm:$0xff]  ;;  %v1237_v4 = vpack.c.bf16 %v231_v1, %v230_v63  ;;  %v232_v6 = vld [vmem:[%s2528_s1 + $0xb0] sm:$0xff]  ;;  %v233_v7 = vld [vmem:[%s2528_s1 + $0xb8] sm:$0xff] }
  0x11   :  { %1218 = vmatprep.subr.bf16.mxu1 %v1399_v0  ;;  %1265 = vmatpush1.bf16.msra.mxu0 %v1264_v24  ;;  %v1285_v5 = vpack.c.bf16 %v263_v3, %v262_v2  ;;  %v264_v8 = vld [vmem:[%s2528_s1 + $0x1b0] sm:$0xff]  ;;  %v265_v9 = vld [vmem:[%s2528_s1 + $0x1b8] sm:$0xff]  ;;  %v1240_v10 = vpack.c.bf16 %v233_v7, %v232_v6  ;;  %v234_v12 = vld [vmem:[%s2528_s1 + $0xc0] sm:$0xff] }
  0x12   :  { %1266 = vmatprep.subr.bf16.mxu0 %v1399_v0  ;;  %v1288_v11 = vpack.c.bf16 %v265_v9, %v264_v8  ;;  %v235_v13 = vld [vmem:[%s2528_s1 + $0xc8] sm:$0xff]  ;;  %v266_v14 = vld [vmem:[%s2528_s1 + $0x1c0] sm:$0xff]  ;;  %v236_v18 = vld [vmem:[%s2528_s1 + $0xd0] sm:$0xff] }
  0x13   :  { %v267_v15 = vld [vmem:[%s2528_s1 + $0x1c8] sm:$0xff]  ;;  %v1243_v16 = vpack.c.bf16 %v235_v13, %v234_v12  ;;  %v237_v19 = vld [vmem:[%s2528_s1 + $0xd8] sm:$0xff]  ;;  %v268_v20 = vld [vmem:[%s2528_s1 + $0x1d0] sm:$0xff] }
  0x14   :  { %1220 = vmatpush1.bf16.msra.mxu1 %v1219_v29  ;;  %v1291_v17 = vpack.c.bf16 %v267_v15, %v266_v14  ;;  %v269_v21 = vld [vmem:[%s2528_s1 + $0x1d8] sm:$0xff]  ;;  %v1246_v22 = vpack.c.bf16 %v237_v19, %v236_v18  ;;  %v238_v24 = vld [vmem:[%s2528_s1 + $0xe0] sm:$0xff]  ;;  %v239_v25 = vld [vmem:[%s2528_s1 + $0xe8] sm:$0xff] }
  0x15   :  { %1221 = vmatprep.subr.bf16.mxu1 %v1399_v0  ;;  %1268 = vmatpush1.bf16.msra.mxu0 %v1267_v30  ;;  %v1294_v23 = vpack.c.bf16 %v269_v21, %v268_v20  ;;  %v270_v26 = vld [vmem:[%s2528_s1 + $0x1e0] sm:$0xff]  ;;  %v271_v27 = vld [vmem:[%s2528_s1 + $0x1e8] sm:$0xff]  ;;  %v1249_v28 = vpack.c.bf16 %v239_v25, %v238_v24  ;;  %v240_v30 = vld [vmem:[%s2528_s1 + $0xf0] sm:$0xff] }
  0x16   :  { %1269 = vmatprep.subr.bf16.mxu0 %v1399_v0  ;;  %v1297_v29 = vpack.c.bf16 %v271_v27, %v270_v26  ;;  %v241_v31 = vld [vmem:[%s2528_s1 + $0xf8] sm:$0xff]  ;;  %v272_v34 = vld [vmem:[%s2528_s1 + $0x1f0] sm:$0xf]  ;;  %v19_v37 = vld [vmem:[%s2529_s0 + $0x28] sm:$0xff] }
  0x17   :  { %v1252_v32 = vpack.c.bf16 %v241_v31, %v240_v30  ;;  %v20_v38 = vld [vmem:[%s2529_s0 + $0x30] sm:$0xff]  ;;  %v18_v39 = vld [vmem:[%s2529_s0 + $0x20] sm:$0xff]  ;;  %v25_v40 = vld [vmem:[%s2529_s0 + $0x58] sm:$0xff] }
  0x18   :  { %1223 = vmatpush1.bf16.msra.mxu1 %v1222_v35  ;;  %v16_v35 = vld [vmem:[%s2529_s0 + $0x10] sm:$0xff]  ;;  %v23_v41 = vld [vmem:[%s2529_s0 + $0x48] sm:$0xff]  ;;  %v26_v47 = vld [vmem:[%s2529_s0 + $0x60] sm:$0xff] }
  0x19   :  { %1224 = vmatprep.subr.bf16.mxu1 %v1399_v0  ;;  %1271 = vmatpush1.bf16.msra.mxu0 %v1270_v36  ;;  %v14_v36 = vld [vmem:[%s2529_s0] sm:$0xff]  ;;  %v24_v42 = vld [vmem:[%s2529_s0 + $0x50] sm:$0xff]  ;;  %v27_v45 = vld [vmem:[%s2529_s0 + $0x68] sm:$0xff] }
  0x1a   :  { %1272 = vmatprep.subr.bf16.mxu0 %v1399_v0  ;;  %v28_v46 = vld [vmem:[%s2529_s0 + $0x70] sm:$0xff]  ;;  %v33_v48 = vld [vmem:[%s2529_s0 + $0x98] sm:$0xff]  ;;  %v30_v51 = vld [vmem:[%s2529_s0 + $0x80] sm:$0xff] }
  0x1b   :  { %v37_v52 = vld [vmem:[%s2529_s0 + $0xb8] sm:$0xff]  ;;  %v35_v53 = vld [vmem:[%s2529_s0 + $0xa8] sm:$0xff]  ;;  %v36_v54 = vld [vmem:[%s2529_s0 + $0xb0] sm:$0xff] }
  0x1c   :  { %1226 = vmatpush1.bf16.msra.mxu1 %v1225_v43  ;;  %v22_v43 = vld [vmem:[%s2529_s0 + $0x40] sm:$0xff]  ;;  %v39_v57 = vld [vmem:[%s2529_s0 + $0xc8] sm:$0xff]  ;;  %v40_v58 = vld [vmem:[%s2529_s0 + $0xd0] sm:$0xff] }
  0x1d   :  { %1227 = vmatprep.subr.bf16.mxu1 %v1399_v0  ;;  %1274 = vmatpush1.bf16.msra.mxu0 %v1273_v44  ;;  %v29_v44 = vld [vmem:[%s2529_s0 + $0x78] sm:$0xff]  ;;  %v38_v59 = vld [vmem:[%s2529_s0 + $0xc0] sm:$0xff]  ;;  %v47_v2 = vld [vmem:[%s2529_s0 + $0x108] sm:$0xff] }
  0x1e   :  { %1275 = vmatprep.subr.bf16.mxu0 %v1399_v0  ;;  %v45_v60 = vld [vmem:[%s2529_s0 + $0xf8] sm:$0xff]  ;;  %v42_v63 = vld [vmem:[%s2529_s0 + $0xe0] sm:$0xff]  ;;  %v48_v3 = vld [vmem:[%s2529_s0 + $0x110] sm:$0xff] }
  0x1f   :  { %v49_v1 = vld [vmem:[%s2529_s0 + $0x118] sm:$0xff]  ;;  %v51_v6 = vld [vmem:[%s2529_s0 + $0x128] sm:$0xff]  ;;  %v52_v7 = vld [vmem:[%s2529_s0 + $0x130] sm:$0xff] }
  0x20   :  { %1229 = vmatpush1.bf16.msra.mxu1 %v1228_v49  ;;  %v31_v49 = vld [vmem:[%s2529_s0 + $0x88] sm:$0xff]  ;;  %v50_v8 = vld [vmem:[%s2529_s0 + $0x120] sm:$0xff]  ;;  %v57_v9 = vld [vmem:[%s2529_s0 + $0x158] sm:$0xff] }
  0x21   :  { %1230 = vmatprep.subr.bf16.mxu1 %v1399_v0  ;;  %1277 = vmatpush1.bf16.msra.mxu0 %v1276_v50  ;;  %v32_v50 = vld [vmem:[%s2529_s0 + $0x90] sm:$0xff]  ;;  %v54_v12 = vld [vmem:[%s2529_s0 + $0x140] sm:$0xff]  ;;  %v61_v13 = vld [vmem:[%s2529_s0 + $0x178] sm:$0xff] }
  0x22   :  { %1278 = vmatprep.subr.bf16.mxu0 %v1399_v0  ;;  %v59_v14 = vld [vmem:[%s2529_s0 + $0x168] sm:$0xff]  ;;  %v60_v15 = vld [vmem:[%s2529_s0 + $0x170] sm:$0xff]  ;;  %v62_v20 = vld [vmem:[%s2529_s0 + $0x180] sm:$0xff] }
  0x23   :  { %v63_v18 = vld [vmem:[%s2529_s0 + $0x188] sm:$0xff]  ;;  %v64_v19 = vld [vmem:[%s2529_s0 + $0x190] sm:$0xff]  ;;  %v69_v21 = vld [vmem:[%s2529_s0 + $0x1b8] sm:$0xff] }
  0x24   :  { %1232 = vmatpush1.bf16.msra.mxu1 %v1231_v55  ;;  %v34_v55 = vld [vmem:[%s2529_s0 + $0xa0] sm:$0xff]  ;;  %v73_v25 = vld [vmem:[%s2529_s0 + $0x1d8] sm:$0xff]  ;;  %v71_v26 = vld [vmem:[%s2529_s0 + $0x1c8] sm:$0xff] }
  0x25   :  { %1233 = vmatprep.subr.bf16.mxu1 %v1399_v0  ;;  %1280 = vmatpush1.bf16.msra.mxu0 %v1279_v56  ;;  %v41_v56 = vld [vmem:[%s2529_s0 + $0xd8] sm:$0xff]  ;;  %v66_v24 = vld [vmem:[%s2529_s0 + $0x1a0] sm:$0xff]  ;;  %v72_v27 = vld [vmem:[%s2529_s0 + $0x1d0] sm:$0xff] }
  0x26   :  { %1281 = vmatprep.subr.bf16.mxu0 %v1399_v0  ;;  %v75_v30 = vld [vmem:[%s2529_s0 + $0x1e8] sm:$0xff]  ;;  %v76_v31 = vld [vmem:[%s2529_s0 + $0x1f0] sm:$0xff] }
  0x28   :  { %1235 = vmatpush1.bf16.msra.mxu1 %v1234_v61  ;;  %v43_v61 = vld [vmem:[%s2529_s0 + $0xe8] sm:$0xff] }
  0x29   :  { %1236 = vmatprep.subr.bf16.mxu1 %v1399_v0  ;;  %1283 = vmatpush1.bf16.msra.mxu0 %v1282_v62  ;;  %v44_v62 = vld [vmem:[%s2529_s0 + $0xf0] sm:$0xff] }
  0x2a   :  { %1284 = vmatprep.subr.bf16.mxu0 %v1399_v0 }
  0x2c   :  { %1238 = vmatpush1.bf16.msra.mxu1 %v1237_v4  ;;  %v46_v4 = vld [vmem:[%s2529_s0 + $0x100] sm:$0xff] }
  0x2d   :  { %1239 = vmatprep.subr.bf16.mxu1 %v1399_v0  ;;  %1286 = vmatpush1.bf16.msra.mxu0 %v1285_v5  ;;  %v53_v5 = vld [vmem:[%s2529_s0 + $0x138] sm:$0xff] }
  0x2e   :  { %1287 = vmatprep.subr.bf16.mxu0 %v1399_v0 }
  0x30   :  { %1241 = vmatpush1.bf16.msra.mxu1 %v1240_v10  ;;  %v55_v10 = vld [vmem:[%s2529_s0 + $0x148] sm:$0xff] }
  0x31   :  { %1242 = vmatprep.subr.bf16.mxu1 %v1399_v0  ;;  %1289 = vmatpush1.bf16.msra.mxu0 %v1288_v11  ;;  %v56_v11 = vld [vmem:[%s2529_s0 + $0x150] sm:$0xff] }
  0x32   :  { %1290 = vmatprep.subr.bf16.mxu0 %v1399_v0 }
  0x34   :  { %1244 = vmatpush1.bf16.msra.mxu1 %v1243_v16  ;;  %v58_v16 = vld [vmem:[%s2529_s0 + $0x160] sm:$0xff] }
  0x35   :  { %1245 = vmatprep.subr.bf16.mxu1 %v1399_v0  ;;  %1292 = vmatpush1.bf16.msra.mxu0 %v1291_v17  ;;  %v65_v17 = vld [vmem:[%s2529_s0 + $0x198] sm:$0xff] }
  0x36   :  { %1293 = vmatprep.subr.bf16.mxu0 %v1399_v0 }
  0x38   :  { %1247 = vmatpush1.bf16.msra.mxu1 %v1246_v22  ;;  %v67_v22 = vld [vmem:[%s2529_s0 + $0x1a8] sm:$0xff] }
  0x39   :  { %1248 = vmatprep.subr.bf16.mxu1 %v1399_v0  ;;  %1295 = vmatpush1.bf16.msra.mxu0 %v1294_v23  ;;  %v68_v23 = vld [vmem:[%s2529_s0 + $0x1b0] sm:$0xff] }
  0x3a   :  { %1296 = vmatprep.subr.bf16.mxu0 %v1399_v0 }
  0x3c   :  { %1250 = vmatpush1.bf16.msra.mxu1 %v1249_v28  ;;  %v70_v28 = vld [vmem:[%s2529_s0 + $0x1c0] sm:$0xff] }
  0x3d   :  { %1251 = vmatprep.subr.bf16.mxu1 %v1399_v0  ;;  %1298 = vmatpush1.bf16.msra.mxu0 %v1297_v29  ;;  %v21_v0 = vld [vmem:[%s2529_s0 + $0x38] sm:$0xff] }
  0x3e   :  { %802 = vmatprep.subr.mxu0 %v1400_v33  ;;  %v77_v29 = vld [vmem:[%s2529_s0 + $0x1f8] sm:$0xff] }
  0x3f   :  { %v81_v33 = vld [vmem:[%s2529_s0 + $0x218] sm:$0xff] }
  0x40   :  { %1253 = vmatpush1.bf16.msra.mxu1 %v1252_v32  ;;  %v74_v32 = vld [vmem:[%s2529_s0 + $0x1e0] sm:$0xff] }
  0x41   :  { %1156 = vmatpush1.msk.msra.mxu0 %vm428_vm1, %v272_v34  ;;  %v79_v34 = vld [vmem:[%s2529_s0 + $0x208] sm:$0xff] }
  0x42   :  { %807 = vmatmul.mubr.f32.vlgmr.msra.gmra.mrb[0].mxu0 %v16_v35  ;;  %v80_v35 = vld [vmem:[%s2529_s0 + $0x210] sm:$0xff] }
  0x43   :  { %497 = vmatmul.mubr.f32.vlgmr.msra.gmra.mrb[0].mxu1 %v14_v36  ;;  %1158 = vmatprep.mubr.msk.f32.mxu0 %vm280_vm0, %v21_v0  ;;  %v78_v36 = vld [vmem:[%s2529_s0 + $0x200] sm:$0xff]  ;;  %v85_v0 = vld [vmem:[%s2529_s0 + $0x238] sm:$0xff] }
  0x44   :  { %501 = vmatprep.mubr.f32.mxu1 %v19_v37  ;;  %v83_v37 = vld [vmem:[%s2529_s0 + $0x228] sm:$0xff] }
  0x46   :  { %812 = vmatmul.mubr.f32.gmra.mrb[2].mxu0 %v20_v38  ;;  %v84_v38 = vld [vmem:[%s2529_s0 + $0x230] sm:$0xff] }
  0x47   :  { %502 = vmatmul.mubr.f32.gmra.mrb[2].mxu1 %v18_v39  ;;  %1159 = vmatprep.mubr.msk.f32.mxu0 %vm280_vm0, %v25_v40  ;;  %v82_v39 = vld [vmem:[%s2529_s0 + $0x220] sm:$0xff]  ;;  %v89_v40 = vld [vmem:[%s2529_s0 + $0x258] sm:$0xff] }
  0x48   :  { %506 = vmatprep.mubr.f32.mxu1 %v23_v41  ;;  %v87_v41 = vld [vmem:[%s2529_s0 + $0x248] sm:$0xff] }
  0x4a   :  { %817 = vmatmul.mubr.f32.gmra.mrb[4].mxu0 %v24_v42  ;;  %v88_v42 = vld [vmem:[%s2529_s0 + $0x250] sm:$0xff] }
  0x4b   :  { %507 = vmatmul.mubr.f32.gmra.mrb[4].mxu1 %v22_v43  ;;  %1160 = vmatprep.mubr.msk.f32.mxu0 %vm280_vm0, %v29_v44  ;;  %v86_v43 = vld [vmem:[%s2529_s0 + $0x240] sm:$0xff]  ;;  %v93_v44 = vld [vmem:[%s2529_s0 + $0x278] sm:$0xff] }
  0x4c   :  { %511 = vmatprep.mubr.f32.mxu1 %v27_v45  ;;  %v91_v45 = vld [vmem:[%s2529_s0 + $0x268] sm:$0xff] }
  0x4e   :  { %822 = vmatmul.mubr.f32.gmra.mrb[6].mxu0 %v28_v46  ;;  %v92_v46 = vld [vmem:[%s2529_s0 + $0x270] sm:$0xff] }
  0x4f   :  { %512 = vmatmul.mubr.f32.gmra.mrb[6].mxu1 %v26_v47  ;;  %1161 = vmatprep.mubr.msk.f32.mxu0 %vm280_vm0, %v33_v48  ;;  %v90_v47 = vld [vmem:[%s2529_s0 + $0x260] sm:$0xff]  ;;  %v97_v48 = vld [vmem:[%s2529_s0 + $0x298] sm:$0xff] }
  0x50   :  { %516 = vmatprep.mubr.f32.mxu1 %v31_v49  ;;  %v95_v49 = vld [vmem:[%s2529_s0 + $0x288] sm:$0xff] }
  0x52   :  { %827 = vmatmul.mubr.f32.gmra.mrb[8].mxu0 %v32_v50  ;;  %v96_v50 = vld [vmem:[%s2529_s0 + $0x290] sm:$0xff] }
  0x53   :  { %517 = vmatmul.mubr.f32.gmra.mrb[8].mxu1 %v30_v51  ;;  %1162 = vmatprep.mubr.msk.f32.mxu0 %vm280_vm0, %v37_v52  ;;  %v94_v51 = vld [vmem:[%s2529_s0 + $0x280] sm:$0xff]  ;;  %v101_v52 = vld [vmem:[%s2529_s0 + $0x2b8] sm:$0xff] }
  0x54   :  { %521 = vmatprep.mubr.f32.mxu1 %v35_v53  ;;  %v99_v53 = vld [vmem:[%s2529_s0 + $0x2a8] sm:$0xff] }
  0x56   :  { %832 = vmatmul.mubr.f32.gmra.mrb[10].mxu0 %v36_v54  ;;  %v100_v54 = vld [vmem:[%s2529_s0 + $0x2b0] sm:$0xff] }
  0x57   :  { %522 = vmatmul.mubr.f32.gmra.mrb[10].mxu1 %v34_v55  ;;  %1163 = vmatprep.mubr.msk.f32.mxu0 %vm280_vm0, %v41_v56  ;;  %v98_v55 = vld [vmem:[%s2529_s0 + $0x2a0] sm:$0xff]  ;;  %v105_v56 = vld [vmem:[%s2529_s0 + $0x2d8] sm:$0xff] }
  0x58   :  { %526 = vmatprep.mubr.f32.mxu1 %v39_v57  ;;  %v103_v57 = vld [vmem:[%s2529_s0 + $0x2c8] sm:$0xff] }
  0x5a   :  { %837 = vmatmul.mubr.f32.gmra.mrb[12].mxu0 %v40_v58  ;;  %v104_v58 = vld [vmem:[%s2529_s0 + $0x2d0] sm:$0xff] }
  0x5b   :  { %527 = vmatmul.mubr.f32.gmra.mrb[12].mxu1 %v38_v59  ;;  %1164 = vmatprep.mubr.msk.f32.mxu0 %vm280_vm0, %v45_v60  ;;  %v102_v59 = vld [vmem:[%s2529_s0 + $0x2c0] sm:$0xff]  ;;  %v109_v60 = vld [vmem:[%s2529_s0 + $0x2f8] sm:$0xff] }
  0x5c   :  { %531 = vmatprep.mubr.f32.mxu1 %v43_v61  ;;  %v107_v61 = vld [vmem:[%s2529_s0 + $0x2e8] sm:$0xff] }
  0x5e   :  { %842 = vmatmul.mubr.f32.gmra.mrb[14].mxu0 %v44_v62  ;;  %v108_v62 = vld [vmem:[%s2529_s0 + $0x2f0] sm:$0xff] }
  0x5f   :  { %532 = vmatmul.mubr.f32.gmra.mrb[14].mxu1 %v42_v63  ;;  %1165 = vmatprep.mubr.msk.f32.mxu0 %vm280_vm0, %v49_v1  ;;  %v106_v63 = vld [vmem:[%s2529_s0 + $0x2e0] sm:$0xff]  ;;  %v113_v1 = vld [vmem:[%s2529_s0 + $0x318] sm:$0xff] }
  0x60   :  { %536 = vmatprep.mubr.f32.mxu1 %v47_v2  ;;  %v111_v2 = vld [vmem:[%s2529_s0 + $0x308] sm:$0xff] }
  0x62   :  { %847 = vmatmul.mubr.f32.gmra.mrb[16].mxu0 %v48_v3  ;;  %v112_v3 = vld [vmem:[%s2529_s0 + $0x310] sm:$0xff] }
  0x63   :  { %537 = vmatmul.mubr.f32.gmra.mrb[16].mxu1 %v46_v4  ;;  %1166 = vmatprep.mubr.msk.f32.mxu0 %vm280_vm0, %v53_v5  ;;  %v110_v4 = vld [vmem:[%s2529_s0 + $0x300] sm:$0xff]  ;;  %v117_v5 = vld [vmem:[%s2529_s0 + $0x338] sm:$0xff] }
  0x64   :  { %541 = vmatprep.mubr.f32.mxu1 %v51_v6  ;;  %v115_v6 = vld [vmem:[%s2529_s0 + $0x328] sm:$0xff] }
  0x66   :  { %852 = vmatmul.mubr.f32.gmra.mrb[18].mxu0 %v52_v7  ;;  %v116_v7 = vld [vmem:[%s2529_s0 + $0x330] sm:$0xff] }
  0x67   :  { %542 = vmatmul.mubr.f32.gmra.mrb[18].mxu1 %v50_v8  ;;  %1167 = vmatprep.mubr.msk.f32.mxu0 %vm280_vm0, %v57_v9  ;;  %v114_v8 = vld [vmem:[%s2529_s0 + $0x320] sm:$0xff]  ;;  %v121_v9 = vld [vmem:[%s2529_s0 + $0x358] sm:$0xff] }
  0x68   :  { %546 = vmatprep.mubr.f32.mxu1 %v55_v10  ;;  %v119_v10 = vld [vmem:[%s2529_s0 + $0x348] sm:$0xff] }
  0x6a   :  { %857 = vmatmul.mubr.f32.gmra.mrb[20].mxu0 %v56_v11  ;;  %v120_v11 = vld [vmem:[%s2529_s0 + $0x350] sm:$0xff] }
  0x6b   :  { %547 = vmatmul.mubr.f32.gmra.mrb[20].mxu1 %v54_v12  ;;  %1168 = vmatprep.mubr.msk.f32.mxu0 %vm280_vm0, %v61_v13  ;;  %v118_v12 = vld [vmem:[%s2529_s0 + $0x340] sm:$0xff]  ;;  %v125_v13 = vld [vmem:[%s2529_s0 + $0x378] sm:$0xff] }
  0x6c   :  { %551 = vmatprep.mubr.f32.mxu1 %v59_v14  ;;  %v123_v14 = vld [vmem:[%s2529_s0 + $0x368] sm:$0xff] }
  0x6e   :  { %862 = vmatmul.mubr.f32.gmra.mrb[22].mxu0 %v60_v15  ;;  %v124_v15 = vld [vmem:[%s2529_s0 + $0x370] sm:$0xff] }
  0x6f   :  { %552 = vmatmul.mubr.f32.gmra.mrb[22].mxu1 %v58_v16  ;;  %1169 = vmatprep.mubr.msk.f32.mxu0 %vm280_vm0, %v65_v17  ;;  %v122_v16 = vld [vmem:[%s2529_s0 + $0x360] sm:$0xff]  ;;  %v129_v17 = vld [vmem:[%s2529_s0 + $0x398] sm:$0xff] }
  0x70   :  { %556 = vmatprep.mubr.f32.mxu1 %v63_v18  ;;  %v127_v18 = vld [vmem:[%s2529_s0 + $0x388] sm:$0xff] }
  0x72   :  { %867 = vmatmul.mubr.f32.gmra.mrb[24].mxu0 %v64_v19  ;;  %v128_v19 = vld [vmem:[%s2529_s0 + $0x390] sm:$0xff] }
  0x73   :  { %557 = vmatmul.mubr.f32.gmra.mrb[24].mxu1 %v62_v20  ;;  %1170 = vmatprep.mubr.msk.f32.mxu0 %vm280_vm0, %v69_v21  ;;  %v126_v20 = vld [vmem:[%s2529_s0 + $0x380] sm:$0xff]  ;;  %v133_v21 = vld [vmem:[%s2529_s0 + $0x3b8] sm:$0xff] }
  0x74   :  { %561 = vmatprep.mubr.f32.mxu1 %v67_v22  ;;  %v131_v22 = vld [vmem:[%s2529_s0 + $0x3a8] sm:$0xff] }
  0x76   :  { %872 = vmatmul.mubr.f32.gmra.mrb[26].mxu0 %v68_v23  ;;  %v132_v23 = vld [vmem:[%s2529_s0 + $0x3b0] sm:$0xff] }
  0x77   :  { %562 = vmatmul.mubr.f32.gmra.mrb[26].mxu1 %v66_v24  ;;  %1171 = vmatprep.mubr.msk.f32.mxu0 %vm280_vm0, %v73_v25  ;;  %v130_v24 = vld [vmem:[%s2529_s0 + $0x3a0] sm:$0xff]  ;;  %v137_v25 = vld [vmem:[%s2529_s0 + $0x3d8] sm:$0xff] }
  0x78   :  { %566 = vmatprep.mubr.f32.mxu1 %v71_v26  ;;  %v135_v26 = vld [vmem:[%s2529_s0 + $0x3c8] sm:$0xff] }
  0x7a   :  { %877 = vmatmul.mubr.f32.gmra.mrb[28].mxu0 %v72_v27  ;;  %v136_v27 = vld [vmem:[%s2529_s0 + $0x3d0] sm:$0xff] }
  0x7b   :  { %567 = vmatmul.mubr.f32.gmra.mrb[28].mxu1 %v70_v28  ;;  %1172 = vmatprep.mubr.msk.f32.mxu0 %vm280_vm0, %v77_v29  ;;  %v134_v28 = vld [vmem:[%s2529_s0 + $0x3c0] sm:$0xff]  ;;  %v141_v29 = vld [vmem:[%s2529_s0 + $0x3f8] sm:$0xff] }
  0x7c   :  { %571 = vmatprep.mubr.f32.mxu1 %v75_v30  ;;  %v139_v30 = vld [vmem:[%s2529_s0 + $0x3e8] sm:$0xff] }
  0x7e   :  { %882 = vmatmul.mubr.f32.gmra.mrb[30].mxu0 %v76_v31  ;;  %v140_v31 = vld [vmem:[%s2529_s0 + $0x3f0] sm:$0xff] }
  0x7f   :  { %572 = vmatmul.mubr.f32.gmra.mrb[30].mxu1 %v74_v32  ;;  %1173 = vmatprep.mubr.msk.f32.mxu0 %vm280_vm0, %v81_v33  ;;  %v138_v32 = vld [vmem:[%s2529_s0 + $0x3e0] sm:$0xff]  ;;  %v145_v33 = vld [vmem:[%s2529_s0 + $0x418] sm:$0xff] }
  0x80   :  { %576 = vmatprep.mubr.f32.mxu1 %v79_v34  ;;  %v143_v34 = vld [vmem:[%s2529_s0 + $0x408] sm:$0xff] }
  0x82   :  { %887 = vmatmul.mubr.f32.gmra.mrb[32].mxu0 %v80_v35  ;;  %v144_v35 = vld [vmem:[%s2529_s0 + $0x410] sm:$0xff] }
  0x83   :  { %577 = vmatmul.mubr.f32.gmra.mrb[32].mxu1 %v78_v36  ;;  %1174 = vmatprep.mubr.msk.f32.mxu0 %vm280_vm0, %v85_v0  ;;  %v142_v36 = vld [vmem:[%s2529_s0 + $0x400] sm:$0xff]  ;;  %v149_v0 = vld [vmem:[%s2529_s0 + $0x438] sm:$0xff] }
  0x84   :  { %581 = vmatprep.mubr.f32.mxu1 %v83_v37  ;;  %v147_v37 = vld [vmem:[%s2529_s0 + $0x428] sm:$0xff] }
  0x86   :  { %892 = vmatmul.mubr.f32.gmra.mrb[34].mxu0 %v84_v38  ;;  %v148_v38 = vld [vmem:[%s2529_s0 + $0x430] sm:$0xff] }
  0x87   :  { %582 = vmatmul.mubr.f32.gmra.mrb[34].mxu1 %v82_v39  ;;  %1175 = vmatprep.mubr.msk.f32.mxu0 %vm280_vm0, %v89_v40  ;;  %v146_v39 = vld [vmem:[%s2529_s0 + $0x420] sm:$0xff]  ;;  %v153_v40 = vld [vmem:[%s2529_s0 + $0x458] sm:$0xff] }
  0x88   :  { %586 = vmatprep.mubr.f32.mxu1 %v87_v41  ;;  %v151_v41 = vld [vmem:[%s2529_s0 + $0x448] sm:$0xff] }
  0x8a   :  { %897 = vmatmul.mubr.f32.gmra.mrb[36].mxu0 %v88_v42  ;;  %v152_v42 = vld [vmem:[%s2529_s0 + $0x450] sm:$0xff] }
  0x8b   :  { %587 = vmatmul.mubr.f32.gmra.mrb[36].mxu1 %v86_v43  ;;  %1176 = vmatprep.mubr.msk.f32.mxu0 %vm280_vm0, %v93_v44  ;;  %v150_v43 = vld [vmem:[%s2529_s0 + $0x440] sm:$0xff]  ;;  %v157_v44 = vld [vmem:[%s2529_s0 + $0x478] sm:$0xff] }
  0x8c   :  { %591 = vmatprep.mubr.f32.mxu1 %v91_v45  ;;  %v155_v45 = vld [vmem:[%s2529_s0 + $0x468] sm:$0xff] }
  0x8e   :  { %902 = vmatmul.mubr.f32.gmra.mrb[38].mxu0 %v92_v46  ;;  %v156_v46 = vld [vmem:[%s2529_s0 + $0x470] sm:$0xff] }
  0x8f   :  { %592 = vmatmul.mubr.f32.gmra.mrb[38].mxu1 %v90_v47  ;;  %1177 = vmatprep.mubr.msk.f32.mxu0 %vm280_vm0, %v97_v48  ;;  %v154_v47 = vld [vmem:[%s2529_s0 + $0x460] sm:$0xff]  ;;  %v161_v48 = vld [vmem:[%s2529_s0 + $0x498] sm:$0xff] }
  0x90   :  { %596 = vmatprep.mubr.f32.mxu1 %v95_v49  ;;  %v159_v49 = vld [vmem:[%s2529_s0 + $0x488] sm:$0xff] }
  0x92   :  { %907 = vmatmul.mubr.f32.gmra.mrb[40].mxu0 %v96_v50  ;;  %v160_v50 = vld [vmem:[%s2529_s0 + $0x490] sm:$0xff] }
  0x93   :  { %597 = vmatmul.mubr.f32.gmra.mrb[40].mxu1 %v94_v51  ;;  %1178 = vmatprep.mubr.msk.f32.mxu0 %vm280_vm0, %v101_v52  ;;  %v158_v51 = vld [vmem:[%s2529_s0 + $0x480] sm:$0xff]  ;;  %v165_v52 = vld [vmem:[%s2529_s0 + $0x4b8] sm:$0xff] }
  0x94   :  { %601 = vmatprep.mubr.f32.mxu1 %v99_v53  ;;  %v163_v53 = vld [vmem:[%s2529_s0 + $0x4a8] sm:$0xff] }
  0x96   :  { %912 = vmatmul.mubr.f32.gmra.mrb[42].mxu0 %v100_v54  ;;  %v164_v54 = vld [vmem:[%s2529_s0 + $0x4b0] sm:$0xff] }
  0x97   :  { %602 = vmatmul.mubr.f32.gmra.mrb[42].mxu1 %v98_v55  ;;  %1179 = vmatprep.mubr.msk.f32.mxu0 %vm280_vm0, %v105_v56  ;;  %v162_v55 = vld [vmem:[%s2529_s0 + $0x4a0] sm:$0xff]  ;;  %v169_v56 = vld [vmem:[%s2529_s0 + $0x4d8] sm:$0xff] }
  0x98   :  { %606 = vmatprep.mubr.f32.mxu1 %v103_v57  ;;  %v167_v57 = vld [vmem:[%s2529_s0 + $0x4c8] sm:$0xff] }
  0x9a   :  { %917 = vmatmul.mubr.f32.gmra.mrb[44].mxu0 %v104_v58  ;;  %v168_v58 = vld [vmem:[%s2529_s0 + $0x4d0] sm:$0xff] }
  0x9b   :  { %607 = vmatmul.mubr.f32.gmra.mrb[44].mxu1 %v102_v59  ;;  %1180 = vmatprep.mubr.msk.f32.mxu0 %vm280_vm0, %v109_v60  ;;  %v166_v59 = vld [vmem:[%s2529_s0 + $0x4c0] sm:$0xff]  ;;  %v173_v60 = vld [vmem:[%s2529_s0 + $0x4f8] sm:$0xff] }
  0x9c   :  { %611 = vmatprep.mubr.f32.mxu1 %v107_v61  ;;  %v171_v61 = vld [vmem:[%s2529_s0 + $0x4e8] sm:$0xff] }
  0x9e   :  { %922 = vmatmul.mubr.f32.gmra.mrb[46].mxu0 %v108_v62  ;;  %v172_v62 = vld [vmem:[%s2529_s0 + $0x4f0] sm:$0xff] }
  0x9f   :  { %612 = vmatmul.mubr.f32.gmra.mrb[46].mxu1 %v106_v63  ;;  %1181 = vmatprep.mubr.msk.f32.mxu0 %vm280_vm0, %v113_v1  ;;  %v170_v63 = vld [vmem:[%s2529_s0 + $0x4e0] sm:$0xff]  ;;  %v177_v1 = vld [vmem:[%s2529_s0 + $0x518] sm:$0xff] }
  0xa0   :  { %616 = vmatprep.mubr.f32.mxu1 %v111_v2  ;;  %v175_v2 = vld [vmem:[%s2529_s0 + $0x508] sm:$0xff] }
  0xa2   :  { %927 = vmatmul.mubr.f32.gmra.mrb[48].mxu0 %v112_v3  ;;  %v176_v3 = vld [vmem:[%s2529_s0 + $0x510] sm:$0xff] }
  0xa3   :  { %617 = vmatmul.mubr.f32.gmra.mrb[48].mxu1 %v110_v4  ;;  %1182 = vmatprep.mubr.msk.f32.mxu0 %vm280_vm0, %v117_v5  ;;  %v174_v4 = vld [vmem:[%s2529_s0 + $0x500] sm:$0xff]  ;;  %v181_v5 = vld [vmem:[%s2529_s0 + $0x538] sm:$0xff] }
  0xa4   :  { %621 = vmatprep.mubr.f32.mxu1 %v115_v6  ;;  %v179_v6 = vld [vmem:[%s2529_s0 + $0x528] sm:$0xff] }
  0xa6   :  { %932 = vmatmul.mubr.f32.gmra.mrb[50].mxu0 %v116_v7  ;;  %v180_v7 = vld [vmem:[%s2529_s0 + $0x530] sm:$0xff] }
  0xa7   :  { %622 = vmatmul.mubr.f32.gmra.mrb[50].mxu1 %v114_v8  ;;  %1183 = vmatprep.mubr.msk.f32.mxu0 %vm280_vm0, %v121_v9  ;;  %v178_v8 = vld [vmem:[%s2529_s0 + $0x520] sm:$0xff]  ;;  %v185_v9 = vld [vmem:[%s2529_s0 + $0x558] sm:$0xff] }
  0xa8   :  { %626 = vmatprep.mubr.f32.mxu1 %v119_v10  ;;  %v183_v10 = vld [vmem:[%s2529_s0 + $0x548] sm:$0xff] }
  0xaa   :  { %937 = vmatmul.mubr.f32.gmra.mrb[52].mxu0 %v120_v11  ;;  %v184_v11 = vld [vmem:[%s2529_s0 + $0x550] sm:$0xff] }
  0xab   :  { %627 = vmatmul.mubr.f32.gmra.mrb[52].mxu1 %v118_v12  ;;  %1184 = vmatprep.mubr.msk.f32.mxu0 %vm280_vm0, %v125_v13  ;;  %v182_v12 = vld [vmem:[%s2529_s0 + $0x540] sm:$0xff]  ;;  %v189_v13 = vld [vmem:[%s2529_s0 + $0x578] sm:$0xff] }
  0xac   :  { %631 = vmatprep.mubr.f32.mxu1 %v123_v14  ;;  %v187_v14 = vld [vmem:[%s2529_s0 + $0x568] sm:$0xff] }
  0xae   :  { %942 = vmatmul.mubr.f32.gmra.mrb[54].mxu0 %v124_v15  ;;  %v188_v15 = vld [vmem:[%s2529_s0 + $0x570] sm:$0xff] }
  0xaf   :  { %632 = vmatmul.mubr.f32.gmra.mrb[54].mxu1 %v122_v16  ;;  %1185 = vmatprep.mubr.msk.f32.mxu0 %vm280_vm0, %v129_v17  ;;  %v186_v16 = vld [vmem:[%s2529_s0 + $0x560] sm:$0xff]  ;;  %v193_v17 = vld [vmem:[%s2529_s0 + $0x598] sm:$0xff] }
  0xb0   :  { %636 = vmatprep.mubr.f32.mxu1 %v127_v18  ;;  %v191_v18 = vld [vmem:[%s2529_s0 + $0x588] sm:$0xff] }
  0xb2   :  { %947 = vmatmul.mubr.f32.gmra.mrb[56].mxu0 %v128_v19  ;;  %v192_v19 = vld [vmem:[%s2529_s0 + $0x590] sm:$0xff] }
  0xb3   :  { %637 = vmatmul.mubr.f32.gmra.mrb[56].mxu1 %v126_v20  ;;  %1186 = vmatprep.mubr.msk.f32.mxu0 %vm280_vm0, %v133_v21  ;;  %v190_v20 = vld [vmem:[%s2529_s0 + $0x580] sm:$0xff]  ;;  %v197_v21 = vld [vmem:[%s2529_s0 + $0x5b8] sm:$0xff] }
  0xb4   :  { %641 = vmatprep.mubr.f32.mxu1 %v131_v22  ;;  %v195_v22 = vld [vmem:[%s2529_s0 + $0x5a8] sm:$0xff] }
  0xb6   :  { %952 = vmatmul.mubr.f32.gmra.mrb[58].mxu0 %v132_v23  ;;  %v196_v23 = vld [vmem:[%s2529_s0 + $0x5b0] sm:$0xff] }
  0xb7   :  { %642 = vmatmul.mubr.f32.gmra.mrb[58].mxu1 %v130_v24  ;;  %1187 = vmatprep.mubr.msk.f32.mxu0 %vm280_vm0, %v137_v25  ;;  %v194_v24 = vld [vmem:[%s2529_s0 + $0x5a0] sm:$0xff]  ;;  %v201_v25 = vld [vmem:[%s2529_s0 + $0x5d8] sm:$0xff] }
  0xb8   :  { %646 = vmatprep.mubr.f32.mxu1 %v135_v26  ;;  %v199_v26 = vld [vmem:[%s2529_s0 + $0x5c8] sm:$0xff] }
  0xba   :  { %957 = vmatmul.mubr.f32.gmra.mrb[60].mxu0 %v136_v27  ;;  %v200_v27 = vld [vmem:[%s2529_s0 + $0x5d0] sm:$0xff] }
  0xbb   :  { %647 = vmatmul.mubr.f32.gmra.mrb[60].mxu1 %v134_v28  ;;  %1188 = vmatprep.mubr.msk.f32.mxu0 %vm280_vm0, %v141_v29  ;;  %v198_v28 = vld [vmem:[%s2529_s0 + $0x5c0] sm:$0xff]  ;;  %v205_v29 = vld [vmem:[%s2529_s0 + $0x5f8] sm:$0xff] }
  0xbc   :  { %651 = vmatprep.mubr.f32.mxu1 %v139_v30  ;;  %v203_v30 = vld [vmem:[%s2529_s0 + $0x5e8] sm:$0xff] }
  0xbe   :  { %962 = vmatmul.mubr.f32.gmra.mrb[62].mxu0 %v140_v31  ;;  %v204_v31 = vld [vmem:[%s2529_s0 + $0x5f0] sm:$0xff] }
  0xbf   :  { %652 = vmatmul.mubr.f32.gmra.mrb[62].mxu1 %v138_v32  ;;  %1189 = vmatprep.mubr.msk.f32.mxu0 %vm280_vm0, %v145_v33  ;;  %v202_v32 = vld [vmem:[%s2529_s0 + $0x5e0] sm:$0xff]  ;;  %v209_v33 = vld [vmem:[%s2529_s0 + $0x618] sm:$0xff] }
  0xc0   :  { %656 = vmatprep.mubr.f32.mxu1 %v143_v34  ;;  %v207_v34 = vld [vmem:[%s2529_s0 + $0x608] sm:$0xff] }
  0xc2   :  { %967 = vmatmul.mubr.f32.gmra.mrb[64].mxu0 %v144_v35  ;;  %v208_v35 = vld [vmem:[%s2529_s0 + $0x610] sm:$0xff] }
  0xc3   :  { %657 = vmatmul.mubr.f32.gmra.mrb[64].mxu1 %v142_v36  ;;  %1190 = vmatprep.mubr.msk.f32.mxu0 %vm280_vm0, %v149_v0  ;;  %v206_v36 = vld [vmem:[%s2529_s0 + $0x600] sm:$0xff] }
  0xc4   :  { %661 = vmatprep.mubr.f32.mxu1 %v147_v37  ;;  %v2281_v0 = vld [vmem:[%s2530_s2] ss:$0 sm:$0xff] }
  0xc6   :  { %972 = vmatmul.mubr.f32.gmra.mrb[66].mxu0 %v148_v38 }
  0xc7   :  { %662 = vmatmul.mubr.f32.gmra.mrb[66].mxu1 %v146_v39  ;;  %1191 = vmatprep.mubr.msk.f32.mxu0 %vm280_vm0, %v153_v40 }
  0xc8   :  { %666 = vmatprep.mubr.f32.mxu1 %v151_v41 }
  0xca   :  { %977 = vmatmul.mubr.f32.gmra.mrb[68].mxu0 %v152_v42 }
  0xcb   :  { %667 = vmatmul.mubr.f32.gmra.mrb[68].mxu1 %v150_v43  ;;  %1192 = vmatprep.mubr.msk.f32.mxu0 %vm280_vm0, %v157_v44 }
  0xcc   :  { %671 = vmatprep.mubr.f32.mxu1 %v155_v45 }
  0xce   :  { %982 = vmatmul.mubr.f32.gmra.mrb[70].mxu0 %v156_v46 }
  0xcf   :  { %672 = vmatmul.mubr.f32.gmra.mrb[70].mxu1 %v154_v47  ;;  %1193 = vmatprep.mubr.msk.f32.mxu0 %vm280_vm0, %v161_v48 }
  0xd0   :  { %676 = vmatprep.mubr.f32.mxu1 %v159_v49 }
  0xd2   :  { %987 = vmatmul.mubr.f32.gmra.mrb[72].mxu0 %v160_v50 }
  0xd3   :  { %677 = vmatmul.mubr.f32.gmra.mrb[72].mxu1 %v158_v51  ;;  %1194 = vmatprep.mubr.msk.f32.mxu0 %vm280_vm0, %v165_v52 }
  0xd4   :  { %681 = vmatprep.mubr.f32.mxu1 %v163_v53 }
  0xd6   :  { %992 = vmatmul.mubr.f32.gmra.mrb[74].mxu0 %v164_v54 }
  0xd7   :  { %682 = vmatmul.mubr.f32.gmra.mrb[74].mxu1 %v162_v55  ;;  %1195 = vmatprep.mubr.msk.f32.mxu0 %vm280_vm0, %v169_v56 }
  0xd8   :  { %686 = vmatprep.mubr.f32.mxu1 %v167_v57 }
  0xda   :  { %997 = vmatmul.mubr.f32.gmra.mrb[76].mxu0 %v168_v58 }
  0xdb   :  { %687 = vmatmul.mubr.f32.gmra.mrb[76].mxu1 %v166_v59  ;;  %1196 = vmatprep.mubr.msk.f32.mxu0 %vm280_vm0, %v173_v60 }
  0xdc   :  { %691 = vmatprep.mubr.f32.mxu1 %v171_v61 }
  0xde   :  { %1002 = vmatmul.mubr.f32.gmra.mrb[78].mxu0 %v172_v62 }
  0xdf   :  { %692 = vmatmul.mubr.f32.gmra.mrb[78].mxu1 %v170_v63  ;;  %1197 = vmatprep.mubr.msk.f32.mxu0 %vm280_vm0, %v177_v1 }
  0xe0   :  { %696 = vmatprep.mubr.f32.mxu1 %v175_v2 }
  0xe2   :  { %1007 = vmatmul.mubr.f32.gmra.mrb[80].mxu0 %v176_v3 }
  0xe3   :  { %697 = vmatmul.mubr.f32.gmra.mrb[80].mxu1 %v174_v4  ;;  %1198 = vmatprep.mubr.msk.f32.mxu0 %vm280_vm0, %v181_v5 }
  0xe4   :  { %701 = vmatprep.mubr.f32.mxu1 %v179_v6 }
  0xe6   :  { %1012 = vmatmul.mubr.f32.gmra.mrb[82].mxu0 %v180_v7 }
  0xe7   :  { %702 = vmatmul.mubr.f32.gmra.mrb[82].mxu1 %v178_v8  ;;  %1199 = vmatprep.mubr.msk.f32.mxu0 %vm280_vm0, %v185_v9 }
  0xe8   :  { %706 = vmatprep.mubr.f32.mxu1 %v183_v10 }
  0xea   :  { %1017 = vmatmul.mubr.f32.gmra.mrb[84].mxu0 %v184_v11 }
  0xeb   :  { %707 = vmatmul.mubr.f32.gmra.mrb[84].mxu1 %v182_v12  ;;  %1200 = vmatprep.mubr.msk.f32.mxu0 %vm280_vm0, %v189_v13 }
  0xec   :  { %711 = vmatprep.mubr.f32.mxu1 %v187_v14 }
  0xee   :  { %1022 = vmatmul.mubr.f32.gmra.mrb[86].mxu0 %v188_v15 }
  0xef   :  { %712 = vmatmul.mubr.f32.gmra.mrb[86].mxu1 %v186_v16  ;;  %1201 = vmatprep.mubr.msk.f32.mxu0 %vm280_vm0, %v193_v17 }
  0xf0   :  { %716 = vmatprep.mubr.f32.mxu1 %v191_v18 }
  0xf2   :  { %1027 = vmatmul.mubr.f32.gmra.mrb[88].mxu0 %v192_v19 }
  0xf3   :  { %717 = vmatmul.mubr.f32.gmra.mrb[88].mxu1 %v190_v20  ;;  %1202 = vmatprep.mubr.msk.f32.mxu0 %vm280_vm0, %v197_v21 }
  0xf4   :  { %721 = vmatprep.mubr.f32.mxu1 %v195_v22 }
  0xf6   :  { %1032 = vmatmul.mubr.f32.gmra.mrb[90].mxu0 %v196_v23 }
  0xf7   :  { %722 = vmatmul.mubr.f32.gmra.mrb[90].mxu1 %v194_v24  ;;  %1203 = vmatprep.mubr.msk.f32.mxu0 %vm280_vm0, %v201_v25 }
  0xf8   :  { %726 = vmatprep.mubr.f32.mxu1 %v199_v26 }
  0xfa   :  { %1037 = vmatmul.mubr.f32.gmra.mrb[92].mxu0 %v200_v27 }
  0xfb   :  { %727 = vmatmul.mubr.f32.gmra.mrb[92].mxu1 %v198_v28  ;;  %1204 = vmatprep.mubr.msk.f32.mxu0 %vm280_vm0, %v205_v29 }
  0xfc   :  { %731 = vmatprep.mubr.f32.mxu1 %v203_v30 }
  0xfe   :  { %1042 = vmatmul.mubr.f32.gmra.mrb[94].mxu0 %v204_v31 }
  0xff   :  { %732 = vmatmul.mubr.f32.gmra.mrb[94].mxu1 %v202_v32  ;;  %1205 = vmatprep.mubr.msk.f32.mxu0 %vm280_vm0, %v209_v33 }
 0x100   :  { %736 = vmatprep.mubr.f32.mxu1 %v207_v34 }
 0x102   :  { %1047 = vmatmul.mubr.f32.gmra.mrb[96].mxu0 %v208_v35 }
 0x103   :  { %737 = vmatmul.mubr.f32.gmra.mrb[96].mxu1 %v206_v36 }
 0x115   :  { %v808_v37 = vpop.f32.mrb[0].mxu0 }
 0x116   :  { %v498_v38 = vpop.f32.mrb[0].mxu1  ;;  %v810_v39 = vpop.f32.mrb[1].mxu0 }
 0x117   :  { %v499_v40 = vadd.f32 %v2281_v0, %v498_v38  ;;  %v500_v41 = vpop.f32.mrb[1].mxu1 }
 0x119   :  { %v809_v42 = vadd.f32 %v808_v37, %v499_v40  ;;  %v813_v43 = vpop.f32.mrb[2].mxu0 }
 0x11a   :  { %v503_v44 = vpop.f32.mrb[2].mxu1  ;;  %v815_v45 = vpop.f32.mrb[3].mxu0 }
 0x11b   :  { %v1052_v46 = vmax.f32 %v809_v42, 0.0  ;;  %v504_v47 = vadd.f32 %v2281_v0, %v503_v44  ;;  %v505_v48 = vpop.f32.mrb[3].mxu1 }
 0x11d   :  { %1102 = vst.msk [vmem:[%s2531_s3] sm:$0xff] %vm1101_vm2, %v1052_v46  ;;  %v814_v49 = vadd.f32 %v813_v43, %v504_v47  ;;  %v818_v50 = vpop.f32.mrb[4].mxu0 }
 0x11e   :  { %v508_v51 = vpop.f32.mrb[4].mxu1  ;;  %v820_v52 = vpop.f32.mrb[5].mxu0 }
 0x11f   :  { %v1053_v53 = vmax.f32 %v814_v49, 0.0  ;;  %v509_v54 = vadd.f32 %v2281_v0, %v508_v51  ;;  %v510_v55 = vpop.f32.mrb[5].mxu1 }
 0x121   :  { %1103 = vst.msk [vmem:[%s2531_s3 + $0x8] sm:$0xff] %vm1101_vm2, %v1053_v53  ;;  %v819_v56 = vadd.f32 %v818_v50, %v509_v54  ;;  %v823_v57 = vpop.f32.mrb[6].mxu0 }
 0x122   :  { %v513_v58 = vpop.f32.mrb[6].mxu1  ;;  %v825_v59 = vpop.f32.mrb[7].mxu0 }
 0x123   :  { %v1054_v60 = vmax.f32 %v819_v56, 0.0  ;;  %v514_v61 = vadd.f32 %v2281_v0, %v513_v58  ;;  %v515_v62 = vpop.f32.mrb[7].mxu1 }
 0x125   :  { %1104 = vst.msk [vmem:[%s2531_s3 + $0x10] sm:$0xff] %vm1101_vm2, %v1054_v60  ;;  %v824_v63 = vadd.f32 %v823_v57, %v514_v61  ;;  %v828_v1 = vpop.f32.mrb[8].mxu0 }
 0x126   :  { %v518_v2 = vpop.f32.mrb[8].mxu1  ;;  %v830_v3 = vpop.f32.mrb[9].mxu0 }
 0x127   :  { %v1055_v4 = vmax.f32 %v824_v63, 0.0  ;;  %v519_v5 = vadd.f32 %v2281_v0, %v518_v2  ;;  %v520_v6 = vpop.f32.mrb[9].mxu1 }
 0x129   :  { %1105 = vst.msk [vmem:[%s2531_s3 + $0x18] sm:$0xff] %vm1101_vm2, %v1055_v4  ;;  %v829_v7 = vadd.f32 %v828_v1, %v519_v5  ;;  %v833_v8 = vpop.f32.mrb[10].mxu0 }
 0x12a   :  { %v523_v9 = vpop.f32.mrb[10].mxu1  ;;  %v835_v10 = vpop.f32.mrb[11].mxu0 }
 0x12b   :  { %v1056_v11 = vmax.f32 %v829_v7, 0.0  ;;  %v524_v12 = vadd.f32 %v2281_v0, %v523_v9  ;;  %v525_v13 = vpop.f32.mrb[11].mxu1 }
 0x12d   :  { %1106 = vst.msk [vmem:[%s2531_s3 + $0x20] sm:$0xff] %vm1101_vm2, %v1056_v11  ;;  %v834_v14 = vadd.f32 %v833_v8, %v524_v12  ;;  %v838_v15 = vpop.f32.mrb[12].mxu0 }
 0x12e   :  { %v528_v16 = vpop.f32.mrb[12].mxu1  ;;  %v840_v17 = vpop.f32.mrb[13].mxu0 }
 0x12f   :  { %v1057_v18 = vmax.f32 %v834_v14, 0.0  ;;  %v529_v19 = vadd.f32 %v2281_v0, %v528_v16  ;;  %v530_v20 = vpop.f32.mrb[13].mxu1 }
 0x131   :  { %1107 = vst.msk [vmem:[%s2531_s3 + $0x28] sm:$0xff] %vm1101_vm2, %v1057_v18  ;;  %v839_v21 = vadd.f32 %v838_v15, %v529_v19  ;;  %v843_v22 = vpop.f32.mrb[14].mxu0 }
 0x132   :  { %v533_v23 = vpop.f32.mrb[14].mxu1  ;;  %v845_v24 = vpop.f32.mrb[15].mxu0 }
 0x133   :  { %v1058_v25 = vmax.f32 %v839_v21, 0.0  ;;  %v534_v26 = vadd.f32 %v2281_v0, %v533_v23  ;;  %v535_v27 = vpop.f32.mrb[15].mxu1 }
 0x135   :  { %1108 = vst.msk [vmem:[%s2531_s3 + $0x30] sm:$0xff] %vm1101_vm2, %v1058_v25  ;;  %v844_v28 = vadd.f32 %v843_v22, %v534_v26  ;;  %v848_v29 = vpop.f32.mrb[16].mxu0 }
 0x136   :  { %v538_v30 = vpop.f32.mrb[16].mxu1  ;;  %v850_v31 = vpop.f32.mrb[17].mxu0 }
 0x137   :  { %v1059_v32 = vmax.f32 %v844_v28, 0.0  ;;  %v539_v33 = vadd.f32 %v2281_v0, %v538_v30  ;;  %v540_v34 = vpop.f32.mrb[17].mxu1 }
 0x139   :  { %1109 = vst.msk [vmem:[%s2531_s3 + $0x38] sm:$0xff] %vm1101_vm2, %v1059_v32  ;;  %v849_v35 = vadd.f32 %v848_v29, %v539_v33  ;;  %v853_v36 = vpop.f32.mrb[18].mxu0 }
 0x13a   :  { %v543_v37 = vpop.f32.mrb[18].mxu1  ;;  %v855_v38 = vpop.f32.mrb[19].mxu0 }
 0x13b   :  { %v1060_v39 = vmax.f32 %v849_v35, 0.0  ;;  %v544_v40 = vadd.f32 %v2281_v0, %v543_v37  ;;  %v545_v41 = vpop.f32.mrb[19].mxu1 }
 0x13d   :  { %1110 = vst.msk [vmem:[%s2531_s3 + $0x40] sm:$0xff] %vm1101_vm2, %v1060_v39  ;;  %v854_v42 = vadd.f32 %v853_v36, %v544_v40  ;;  %v858_v43 = vpop.f32.mrb[20].mxu0 }
 0x13e   :  { %v548_v44 = vpop.f32.mrb[20].mxu1  ;;  %v860_v45 = vpop.f32.mrb[21].mxu0 }
 0x13f   :  { %v1061_v46 = vmax.f32 %v854_v42, 0.0  ;;  %v549_v47 = vadd.f32 %v2281_v0, %v548_v44  ;;  %v550_v48 = vpop.f32.mrb[21].mxu1 }
 0x141   :  { %1111 = vst.msk [vmem:[%s2531_s3 + $0x48] sm:$0xff] %vm1101_vm2, %v1061_v46  ;;  %v859_v49 = vadd.f32 %v858_v43, %v549_v47  ;;  %v863_v50 = vpop.f32.mrb[22].mxu0 }
 0x142   :  { %v553_v51 = vpop.f32.mrb[22].mxu1  ;;  %v865_v52 = vpop.f32.mrb[23].mxu0 }
 0x143   :  { %v1062_v53 = vmax.f32 %v859_v49, 0.0  ;;  %v554_v54 = vadd.f32 %v2281_v0, %v553_v51  ;;  %v555_v55 = vpop.f32.mrb[23].mxu1 }
 0x145   :  { %1112 = vst.msk [vmem:[%s2531_s3 + $0x50] sm:$0xff] %vm1101_vm2, %v1062_v53  ;;  %v864_v56 = vadd.f32 %v863_v50, %v554_v54  ;;  %v868_v57 = vpop.f32.mrb[24].mxu0 }
 0x146   :  { %v558_v58 = vpop.f32.mrb[24].mxu1  ;;  %v870_v59 = vpop.f32.mrb[25].mxu0 }
 0x147   :  { %v1063_v60 = vmax.f32 %v864_v56, 0.0  ;;  %v559_v61 = vadd.f32 %v2281_v0, %v558_v58  ;;  %v560_v62 = vpop.f32.mrb[25].mxu1 }
 0x149   :  { %1113 = vst.msk [vmem:[%s2531_s3 + $0x58] sm:$0xff] %vm1101_vm2, %v1063_v60  ;;  %v869_v63 = vadd.f32 %v868_v57, %v559_v61  ;;  %v873_v1 = vpop.f32.mrb[26].mxu0 }
 0x14a   :  { %v563_v2 = vpop.f32.mrb[26].mxu1  ;;  %v875_v3 = vpop.f32.mrb[27].mxu0 }
 0x14b   :  { %v1064_v4 = vmax.f32 %v869_v63, 0.0  ;;  %v564_v5 = vadd.f32 %v2281_v0, %v563_v2  ;;  %v565_v6 = vpop.f32.mrb[27].mxu1 }
 0x14d   :  { %1114 = vst.msk [vmem:[%s2531_s3 + $0x60] sm:$0xff] %vm1101_vm2, %v1064_v4  ;;  %v874_v7 = vadd.f32 %v873_v1, %v564_v5  ;;  %v878_v8 = vpop.f32.mrb[28].mxu0 }
 0x14e   :  { %v568_v9 = vpop.f32.mrb[28].mxu1  ;;  %v880_v10 = vpop.f32.mrb[29].mxu0 }
 0x14f   :  { %v1065_v11 = vmax.f32 %v874_v7, 0.0  ;;  %v569_v12 = vadd.f32 %v2281_v0, %v568_v9  ;;  %v570_v13 = vpop.f32.mrb[29].mxu1 }
 0x151   :  { %1115 = vst.msk [vmem:[%s2531_s3 + $0x68] sm:$0xff] %vm1101_vm2, %v1065_v11  ;;  %v879_v14 = vadd.f32 %v878_v8, %v569_v12  ;;  %v883_v15 = vpop.f32.mrb[30].mxu0 }
 0x152   :  { %v573_v16 = vpop.f32.mrb[30].mxu1  ;;  %v885_v17 = vpop.f32.mrb[31].mxu0 }
 0x153   :  { %v1066_v18 = vmax.f32 %v879_v14, 0.0  ;;  %v574_v19 = vadd.f32 %v2281_v0, %v573_v16  ;;  %v575_v20 = vpop.f32.mrb[31].mxu1 }
 0x155   :  { %1116 = vst.msk [vmem:[%s2531_s3 + $0x70] sm:$0xff] %vm1101_vm2, %v1066_v18  ;;  %v884_v21 = vadd.f32 %v883_v15, %v574_v19  ;;  %v888_v22 = vpop.f32.mrb[32].mxu0 }
 0x156   :  { %v578_v23 = vpop.f32.mrb[32].mxu1  ;;  %v890_v24 = vpop.f32.mrb[33].mxu0 }
 0x157   :  { %v1067_v25 = vmax.f32 %v884_v21, 0.0  ;;  %v579_v26 = vadd.f32 %v2281_v0, %v578_v23  ;;  %v580_v27 = vpop.f32.mrb[33].mxu1 }
 0x159   :  { %1117 = vst.msk [vmem:[%s2531_s3 + $0x78] sm:$0xff] %vm1101_vm2, %v1067_v25  ;;  %v889_v28 = vadd.f32 %v888_v22, %v579_v26  ;;  %v893_v29 = vpop.f32.mrb[34].mxu0 }
 0x15a   :  { %v583_v30 = vpop.f32.mrb[34].mxu1  ;;  %v895_v31 = vpop.f32.mrb[35].mxu0 }
 0x15b   :  { %v1068_v32 = vmax.f32 %v889_v28, 0.0  ;;  %v584_v33 = vadd.f32 %v2281_v0, %v583_v30  ;;  %v585_v34 = vpop.f32.mrb[35].mxu1 }
 0x15d   :  { %1118 = vst.msk [vmem:[%s2531_s3 + $0x80] sm:$0xff] %vm1101_vm2, %v1068_v32  ;;  %v894_v35 = vadd.f32 %v893_v29, %v584_v33  ;;  %v898_v36 = vpop.f32.mrb[36].mxu0 }
 0x15e   :  { %v588_v37 = vpop.f32.mrb[36].mxu1  ;;  %v900_v38 = vpop.f32.mrb[37].mxu0 }
 0x15f   :  { %v1069_v39 = vmax.f32 %v894_v35, 0.0  ;;  %v589_v40 = vadd.f32 %v2281_v0, %v588_v37  ;;  %v590_v41 = vpop.f32.mrb[37].mxu1 }
 0x161   :  { %1119 = vst.msk [vmem:[%s2531_s3 + $0x88] sm:$0xff] %vm1101_vm2, %v1069_v39  ;;  %v899_v42 = vadd.f32 %v898_v36, %v589_v40  ;;  %v903_v43 = vpop.f32.mrb[38].mxu0 }
 0x162   :  { %v593_v44 = vpop.f32.mrb[38].mxu1  ;;  %v905_v45 = vpop.f32.mrb[39].mxu0 }
 0x163   :  { %v1070_v46 = vmax.f32 %v899_v42, 0.0  ;;  %v594_v47 = vadd.f32 %v2281_v0, %v593_v44  ;;  %v595_v48 = vpop.f32.mrb[39].mxu1 }
 0x165   :  { %1120 = vst.msk [vmem:[%s2531_s3 + $0x90] sm:$0xff] %vm1101_vm2, %v1070_v46  ;;  %v904_v49 = vadd.f32 %v903_v43, %v594_v47  ;;  %v908_v50 = vpop.f32.mrb[40].mxu0 }
 0x166   :  { %v598_v51 = vpop.f32.mrb[40].mxu1  ;;  %v910_v52 = vpop.f32.mrb[41].mxu0 }
 0x167   :  { %v1071_v53 = vmax.f32 %v904_v49, 0.0  ;;  %v599_v54 = vadd.f32 %v2281_v0, %v598_v51  ;;  %v600_v55 = vpop.f32.mrb[41].mxu1 }
 0x169   :  { %1121 = vst.msk [vmem:[%s2531_s3 + $0x98] sm:$0xff] %vm1101_vm2, %v1071_v53  ;;  %v909_v56 = vadd.f32 %v908_v50, %v599_v54  ;;  %v913_v57 = vpop.f32.mrb[42].mxu0 }
 0x16a   :  { %v603_v58 = vpop.f32.mrb[42].mxu1  ;;  %v915_v59 = vpop.f32.mrb[43].mxu0 }
 0x16b   :  { %v1072_v60 = vmax.f32 %v909_v56, 0.0  ;;  %v604_v61 = vadd.f32 %v2281_v0, %v603_v58  ;;  %v605_v62 = vpop.f32.mrb[43].mxu1 }
 0x16d   :  { %1122 = vst.msk [vmem:[%s2531_s3 + $0xa0] sm:$0xff] %vm1101_vm2, %v1072_v60  ;;  %v914_v63 = vadd.f32 %v913_v57, %v604_v61  ;;  %v918_v1 = vpop.f32.mrb[44].mxu0 }
 0x16e   :  { %v608_v2 = vpop.f32.mrb[44].mxu1  ;;  %v920_v3 = vpop.f32.mrb[45].mxu0 }
 0x16f   :  { %v1073_v4 = vmax.f32 %v914_v63, 0.0  ;;  %v609_v5 = vadd.f32 %v2281_v0, %v608_v2  ;;  %v610_v6 = vpop.f32.mrb[45].mxu1 }
 0x171   :  { %1123 = vst.msk [vmem:[%s2531_s3 + $0xa8] sm:$0xff] %vm1101_vm2, %v1073_v4  ;;  %v919_v7 = vadd.f32 %v918_v1, %v609_v5  ;;  %v923_v8 = vpop.f32.mrb[46].mxu0 }
 0x172   :  { %v613_v9 = vpop.f32.mrb[46].mxu1  ;;  %v925_v10 = vpop.f32.mrb[47].mxu0 }
 0x173   :  { %v1074_v11 = vmax.f32 %v919_v7, 0.0  ;;  %v614_v12 = vadd.f32 %v2281_v0, %v613_v9  ;;  %v615_v13 = vpop.f32.mrb[47].mxu1 }
 0x175   :  { %1124 = vst.msk [vmem:[%s2531_s3 + $0xb0] sm:$0xff] %vm1101_vm2, %v1074_v11  ;;  %v924_v14 = vadd.f32 %v923_v8, %v614_v12  ;;  %v928_v15 = vpop.f32.mrb[48].mxu0 }
 0x176   :  { %v618_v16 = vpop.f32.mrb[48].mxu1  ;;  %v930_v17 = vpop.f32.mrb[49].mxu0 }
 0x177   :  { %v1075_v18 = vmax.f32 %v924_v14, 0.0  ;;  %v619_v19 = vadd.f32 %v2281_v0, %v618_v16  ;;  %v620_v20 = vpop.f32.mrb[49].mxu1 }
 0x179   :  { %1125 = vst.msk [vmem:[%s2531_s3 + $0xb8] sm:$0xff] %vm1101_vm2, %v1075_v18  ;;  %v929_v21 = vadd.f32 %v928_v15, %v619_v19  ;;  %v933_v22 = vpop.f32.mrb[50].mxu0 }
 0x17a   :  { %v623_v23 = vpop.f32.mrb[50].mxu1  ;;  %v935_v24 = vpop.f32.mrb[51].mxu0 }
 0x17b   :  { %v1076_v25 = vmax.f32 %v929_v21, 0.0  ;;  %v624_v26 = vadd.f32 %v2281_v0, %v623_v23  ;;  %v625_v27 = vpop.f32.mrb[51].mxu1 }
 0x17d   :  { %1126 = vst.msk [vmem:[%s2531_s3 + $0xc0] sm:$0xff] %vm1101_vm2, %v1076_v25  ;;  %v934_v28 = vadd.f32 %v933_v22, %v624_v26  ;;  %v938_v29 = vpop.f32.mrb[52].mxu0 }
 0x17e   :  { %v628_v30 = vpop.f32.mrb[52].mxu1  ;;  %v940_v31 = vpop.f32.mrb[53].mxu0 }
 0x17f   :  { %v1077_v32 = vmax.f32 %v934_v28, 0.0  ;;  %v629_v33 = vadd.f32 %v2281_v0, %v628_v30  ;;  %v630_v34 = vpop.f32.mrb[53].mxu1 }
 0x181   :  { %1127 = vst.msk [vmem:[%s2531_s3 + $0xc8] sm:$0xff] %vm1101_vm2, %v1077_v32  ;;  %v939_v35 = vadd.f32 %v938_v29, %v629_v33  ;;  %v943_v36 = vpop.f32.mrb[54].mxu0 }
 0x182   :  { %v633_v37 = vpop.f32.mrb[54].mxu1  ;;  %v945_v38 = vpop.f32.mrb[55].mxu0 }
 0x183   :  { %v1078_v39 = vmax.f32 %v939_v35, 0.0  ;;  %v634_v40 = vadd.f32 %v2281_v0, %v633_v37  ;;  %v635_v41 = vpop.f32.mrb[55].mxu1 }
 0x185   :  { %1128 = vst.msk [vmem:[%s2531_s3 + $0xd0] sm:$0xff] %vm1101_vm2, %v1078_v39  ;;  %v944_v42 = vadd.f32 %v943_v36, %v634_v40  ;;  %v948_v43 = vpop.f32.mrb[56].mxu0 }
 0x186   :  { %v638_v44 = vpop.f32.mrb[56].mxu1  ;;  %v950_v45 = vpop.f32.mrb[57].mxu0 }
 0x187   :  { %v1079_v46 = vmax.f32 %v944_v42, 0.0  ;;  %v639_v47 = vadd.f32 %v2281_v0, %v638_v44  ;;  %v640_v48 = vpop.f32.mrb[57].mxu1 }
 0x189   :  { %1129 = vst.msk [vmem:[%s2531_s3 + $0xd8] sm:$0xff] %vm1101_vm2, %v1079_v46  ;;  %v949_v49 = vadd.f32 %v948_v43, %v639_v47  ;;  %v953_v50 = vpop.f32.mrb[58].mxu0 }
 0x18a   :  { %v643_v51 = vpop.f32.mrb[58].mxu1  ;;  %v955_v52 = vpop.f32.mrb[59].mxu0 }
 0x18b   :  { %v1080_v53 = vmax.f32 %v949_v49, 0.0  ;;  %v644_v54 = vadd.f32 %v2281_v0, %v643_v51  ;;  %v645_v55 = vpop.f32.mrb[59].mxu1 }
 0x18d   :  { %1130 = vst.msk [vmem:[%s2531_s3 + $0xe0] sm:$0xff] %vm1101_vm2, %v1080_v53  ;;  %v954_v56 = vadd.f32 %v953_v50, %v644_v54  ;;  %v958_v57 = vpop.f32.mrb[60].mxu0 }
 0x18e   :  { %v648_v58 = vpop.f32.mrb[60].mxu1  ;;  %v960_v59 = vpop.f32.mrb[61].mxu0 }
 0x18f   :  { %v1081_v60 = vmax.f32 %v954_v56, 0.0  ;;  %v649_v61 = vadd.f32 %v2281_v0, %v648_v58  ;;  %v650_v62 = vpop.f32.mrb[61].mxu1 }
 0x191   :  { %1131 = vst.msk [vmem:[%s2531_s3 + $0xe8] sm:$0xff] %vm1101_vm2, %v1081_v60  ;;  %v959_v63 = vadd.f32 %v958_v57, %v649_v61  ;;  %v963_v1 = vpop.f32.mrb[62].mxu0 }
 0x192   :  { %v653_v2 = vpop.f32.mrb[62].mxu1  ;;  %v965_v3 = vpop.f32.mrb[63].mxu0 }
 0x193   :  { %v1082_v4 = vmax.f32 %v959_v63, 0.0  ;;  %v654_v5 = vadd.f32 %v2281_v0, %v653_v2  ;;  %v655_v6 = vpop.f32.mrb[63].mxu1 }
 0x195   :  { %1132 = vst.msk [vmem:[%s2531_s3 + $0xf0] sm:$0xff] %vm1101_vm2, %v1082_v4  ;;  %v964_v7 = vadd.f32 %v963_v1, %v654_v5  ;;  %v968_v8 = vpop.f32.mrb[64].mxu0 }
 0x196   :  { %v658_v9 = vpop.f32.mrb[64].mxu1  ;;  %v970_v10 = vpop.f32.mrb[65].mxu0 }
 0x197   :  { %v1083_v11 = vmax.f32 %v964_v7, 0.0  ;;  %v659_v12 = vadd.f32 %v2281_v0, %v658_v9  ;;  %v660_v13 = vpop.f32.mrb[65].mxu1 }
 0x199   :  { %1133 = vst.msk [vmem:[%s2531_s3 + $0xf8] sm:$0xff] %vm1101_vm2, %v1083_v11  ;;  %v969_v14 = vadd.f32 %v968_v8, %v659_v12  ;;  %v973_v15 = vpop.f32.mrb[66].mxu0 }
 0x19a   :  { %v663_v16 = vpop.f32.mrb[66].mxu1  ;;  %v975_v17 = vpop.f32.mrb[67].mxu0 }
 0x19b   :  { %v1084_v18 = vmax.f32 %v969_v14, 0.0  ;;  %v664_v19 = vadd.f32 %v2281_v0, %v663_v16  ;;  %v665_v20 = vpop.f32.mrb[67].mxu1 }
 0x19d   :  { %1134 = vst.msk [vmem:[%s2531_s3 + $0x100] sm:$0xff] %vm1101_vm2, %v1084_v18  ;;  %v974_v21 = vadd.f32 %v973_v15, %v664_v19  ;;  %v978_v22 = vpop.f32.mrb[68].mxu0 }
 0x19e   :  { %v668_v23 = vpop.f32.mrb[68].mxu1  ;;  %v980_v24 = vpop.f32.mrb[69].mxu0 }
 0x19f   :  { %v1085_v25 = vmax.f32 %v974_v21, 0.0  ;;  %v669_v26 = vadd.f32 %v2281_v0, %v668_v23  ;;  %v670_v27 = vpop.f32.mrb[69].mxu1 }
 0x1a1   :  { %1135 = vst.msk [vmem:[%s2531_s3 + $0x108] sm:$0xff] %vm1101_vm2, %v1085_v25  ;;  %v979_v28 = vadd.f32 %v978_v22, %v669_v26  ;;  %v983_v29 = vpop.f32.mrb[70].mxu0 }
 0x1a2   :  { %v673_v30 = vpop.f32.mrb[70].mxu1  ;;  %v985_v31 = vpop.f32.mrb[71].mxu0 }
 0x1a3   :  { %v1086_v32 = vmax.f32 %v979_v28, 0.0  ;;  %v674_v33 = vadd.f32 %v2281_v0, %v673_v30  ;;  %v675_v34 = vpop.f32.mrb[71].mxu1 }
 0x1a5   :  { %1136 = vst.msk [vmem:[%s2531_s3 + $0x110] sm:$0xff] %vm1101_vm2, %v1086_v32  ;;  %v984_v35 = vadd.f32 %v983_v29, %v674_v33  ;;  %v988_v36 = vpop.f32.mrb[72].mxu0 }
 0x1a6   :  { %v678_v37 = vpop.f32.mrb[72].mxu1  ;;  %v990_v38 = vpop.f32.mrb[73].mxu0 }
 0x1a7   :  { %v1087_v39 = vmax.f32 %v984_v35, 0.0  ;;  %v679_v40 = vadd.f32 %v2281_v0, %v678_v37  ;;  %v680_v41 = vpop.f32.mrb[73].mxu1 }
 0x1a9   :  { %1137 = vst.msk [vmem:[%s2531_s3 + $0x118] sm:$0xff] %vm1101_vm2, %v1087_v39  ;;  %v989_v42 = vadd.f32 %v988_v36, %v679_v40  ;;  %v993_v43 = vpop.f32.mrb[74].mxu0 }
 0x1aa   :  { %v683_v44 = vpop.f32.mrb[74].mxu1  ;;  %v995_v45 = vpop.f32.mrb[75].mxu0 }
 0x1ab   :  { %v1088_v46 = vmax.f32 %v989_v42, 0.0  ;;  %v684_v47 = vadd.f32 %v2281_v0, %v683_v44  ;;  %v685_v48 = vpop.f32.mrb[75].mxu1 }
 0x1ad   :  { %1138 = vst.msk [vmem:[%s2531_s3 + $0x120] sm:$0xff] %vm1101_vm2, %v1088_v46  ;;  %v994_v49 = vadd.f32 %v993_v43, %v684_v47  ;;  %v998_v50 = vpop.f32.mrb[76].mxu0 }
 0x1ae   :  { %v688_v51 = vpop.f32.mrb[76].mxu1  ;;  %v1000_v52 = vpop.f32.mrb[77].mxu0 }
 0x1af   :  { %v1089_v53 = vmax.f32 %v994_v49, 0.0  ;;  %v689_v54 = vadd.f32 %v2281_v0, %v688_v51  ;;  %v690_v55 = vpop.f32.mrb[77].mxu1 }
 0x1b1   :  { %1139 = vst.msk [vmem:[%s2531_s3 + $0x128] sm:$0xff] %vm1101_vm2, %v1089_v53  ;;  %v999_v56 = vadd.f32 %v998_v50, %v689_v54  ;;  %v1003_v57 = vpop.f32.mrb[78].mxu0 }
 0x1b2   :  { %v693_v58 = vpop.f32.mrb[78].mxu1  ;;  %v1005_v59 = vpop.f32.mrb[79].mxu0 }
 0x1b3   :  { %v1090_v60 = vmax.f32 %v999_v56, 0.0  ;;  %v694_v61 = vadd.f32 %v2281_v0, %v693_v58  ;;  %v695_v62 = vpop.f32.mrb[79].mxu1 }
 0x1b5   :  { %1140 = vst.msk [vmem:[%s2531_s3 + $0x130] sm:$0xff] %vm1101_vm2, %v1090_v60  ;;  %v1004_v63 = vadd.f32 %v1003_v57, %v694_v61  ;;  %v1008_v1 = vpop.f32.mrb[80].mxu0 }
 0x1b6   :  { %v698_v2 = vpop.f32.mrb[80].mxu1  ;;  %v1010_v3 = vpop.f32.mrb[81].mxu0 }
 0x1b7   :  { %v1091_v4 = vmax.f32 %v1004_v63, 0.0  ;;  %v699_v5 = vadd.f32 %v2281_v0, %v698_v2  ;;  %v700_v6 = vpop.f32.mrb[81].mxu1 }
 0x1b9   :  { %1141 = vst.msk [vmem:[%s2531_s3 + $0x138] sm:$0xff] %vm1101_vm2, %v1091_v4  ;;  %v1009_v7 = vadd.f32 %v1008_v1, %v699_v5  ;;  %v1013_v8 = vpop.f32.mrb[82].mxu0 }
 0x1ba   :  { %v703_v9 = vpop.f32.mrb[82].mxu1  ;;  %v1015_v10 = vpop.f32.mrb[83].mxu0 }
 0x1bb   :  { %v1092_v11 = vmax.f32 %v1009_v7, 0.0  ;;  %v704_v12 = vadd.f32 %v2281_v0, %v703_v9  ;;  %v705_v13 = vpop.f32.mrb[83].mxu1 }
 0x1bd   :  { %1142 = vst.msk [vmem:[%s2531_s3 + $0x140] sm:$0xff] %vm1101_vm2, %v1092_v11  ;;  %v1014_v14 = vadd.f32 %v1013_v8, %v704_v12  ;;  %v1018_v15 = vpop.f32.mrb[84].mxu0 }
 0x1be   :  { %v708_v16 = vpop.f32.mrb[84].mxu1  ;;  %v1020_v17 = vpop.f32.mrb[85].mxu0 }
 0x1bf   :  { %v1093_v18 = vmax.f32 %v1014_v14, 0.0  ;;  %v709_v19 = vadd.f32 %v2281_v0, %v708_v16  ;;  %v710_v20 = vpop.f32.mrb[85].mxu1 }
 0x1c1   :  { %1143 = vst.msk [vmem:[%s2531_s3 + $0x148] sm:$0xff] %vm1101_vm2, %v1093_v18  ;;  %v1019_v21 = vadd.f32 %v1018_v15, %v709_v19  ;;  %v1023_v22 = vpop.f32.mrb[86].mxu0 }
 0x1c2   :  { %v713_v23 = vpop.f32.mrb[86].mxu1  ;;  %v1025_v24 = vpop.f32.mrb[87].mxu0 }
 0x1c3   :  { %v1094_v25 = vmax.f32 %v1019_v21, 0.0  ;;  %v714_v26 = vadd.f32 %v2281_v0, %v713_v23  ;;  %v715_v27 = vpop.f32.mrb[87].mxu1 }
 0x1c5   :  { %1144 = vst.msk [vmem:[%s2531_s3 + $0x150] sm:$0xff] %vm1101_vm2, %v1094_v25  ;;  %v1024_v28 = vadd.f32 %v1023_v22, %v714_v26  ;;  %v1028_v29 = vpop.f32.mrb[88].mxu0 }
 0x1c6   :  { %v718_v30 = vpop.f32.mrb[88].mxu1  ;;  %v1030_v31 = vpop.f32.mrb[89].mxu0 }
 0x1c7   :  { %v1095_v32 = vmax.f32 %v1024_v28, 0.0  ;;  %v719_v33 = vadd.f32 %v2281_v0, %v718_v30  ;;  %v720_v34 = vpop.f32.mrb[89].mxu1 }
 0x1c9   :  { %1145 = vst.msk [vmem:[%s2531_s3 + $0x158] sm:$0xff] %vm1101_vm2, %v1095_v32  ;;  %v1029_v35 = vadd.f32 %v1028_v29, %v719_v33  ;;  %v1033_v36 = vpop.f32.mrb[90].mxu0 }
 0x1ca   :  { %v723_v37 = vpop.f32.mrb[90].mxu1  ;;  %v1035_v38 = vpop.f32.mrb[91].mxu0 }
 0x1cb   :  { %v1096_v39 = vmax.f32 %v1029_v35, 0.0  ;;  %v724_v40 = vadd.f32 %v2281_v0, %v723_v37  ;;  %v725_v41 = vpop.f32.mrb[91].mxu1 }
 0x1cd   :  { %1146 = vst.msk [vmem:[%s2531_s3 + $0x160] sm:$0xff] %vm1101_vm2, %v1096_v39  ;;  %v1034_v42 = vadd.f32 %v1033_v36, %v724_v40  ;;  %v1038_v43 = vpop.f32.mrb[92].mxu0 }
 0x1ce   :  { %v728_v44 = vpop.f32.mrb[92].mxu1  ;;  %v1040_v45 = vpop.f32.mrb[93].mxu0 }
 0x1cf   :  { %v1097_v46 = vmax.f32 %v1034_v42, 0.0  ;;  %v729_v47 = vadd.f32 %v2281_v0, %v728_v44  ;;  %v730_v48 = vpop.f32.mrb[93].mxu1 }
 0x1d1   :  { %1147 = vst.msk [vmem:[%s2531_s3 + $0x168] sm:$0xff] %vm1101_vm2, %v1097_v46  ;;  %v1039_v49 = vadd.f32 %v1038_v43, %v729_v47  ;;  %v1043_v50 = vpop.f32.mrb[94].mxu0 }
 0x1d2   :  { %v733_v51 = vpop.f32.mrb[94].mxu1  ;;  %v1045_v52 = vpop.f32.mrb[95].mxu0 }
 0x1d3   :  { %v1098_v53 = vmax.f32 %v1039_v49, 0.0  ;;  %v734_v54 = vadd.f32 %v2281_v0, %v733_v51  ;;  %v735_v55 = vpop.f32.mrb[95].mxu1 }
 0x1d5   :  { %1148 = vst.msk [vmem:[%s2531_s3 + $0x170] sm:$0xff] %vm1101_vm2, %v1098_v53  ;;  %v1044_v56 = vadd.f32 %v1043_v50, %v734_v54  ;;  %v1048_v57 = vpop.f32.mrb[96].mxu0 }
 0x1d6   :  { %v738_v58 = vpop.f32.mrb[96].mxu1  ;;  %v1050_v59 = vpop.f32.mrb[97].mxu0 }
 0x1d7   :  { %v1099_v60 = vmax.f32 %v1044_v56, 0.0  ;;  %v739_v61 = vadd.f32 %v2281_v0, %v738_v58  ;;  %v740_v62 = vpop.f32.mrb[97].mxu1 }
 0x1d9   :  { %1149 = vst.msk [vmem:[%s2531_s3 + $0x178] sm:$0xff] %vm1101_vm2, %v1099_v60  ;;  %v1049_v63 = vadd.f32 %v1048_v57, %v739_v61 }
 0x1db   :  { %v1100_v1 = vmax.f32 %v1049_v63, 0.0 }
 0x1dd   :  { %1150 = vst.msk [vmem:[%s2531_s3 + $0x180] sm:$0xff] %vm1101_vm2, %v1100_v1 }

// kernel: lenet_forward.9
= control target key start
LH: loop header
LB: loop body
LE: loop exit
PB: predicated region body
PF: predicated region fallthrough
CT: control target
= control target key end

     0   :  { %vm56_vm0 = vcmask 1041408   ;;  %vm57_vm1 = vcmask 1043458   ;;  %vm59_vm2 = vcmask 1045508   ;;  %vm61_vm3 = vcmask 146438   ;;  %s171_s0 = inlined_call_operand.vmem [shape: f32[2,2450], index: 0, kind: input, shape index: {}]   ;;  %s172_s1 = inlined_call_operand.vmem [shape: f32[2,2450], index: 1, kind: input, shape index: {}]   ;;  %s173_s2 = inlined_call_operand.vmem [shape: f32[2,2450], index: 2, kind: input, shape index: {}]   ;;  %s174_s3 = inlined_call_operand.vmem [shape: f32[2,2450], index: 3, kind: input, shape index: {}]   ;;  %s175_s4 = inlined_call_operand.vmem [shape: f32[2,2450], index: 4, kind: output, shape index: {}]  }
   0x1   :  { %v17_v0 = vld [vmem:[%s171_s0] sm:$0xff]  ;;  %v18_v5 = vld [vmem:[%s171_s0 + $0x8] sm:$0xff]  ;;  %v19_v11 = vld [vmem:[%s171_s0 + $0x10] sm:$0xff] }
   0x2   :  { %v22_v1 = vld [vmem:[%s172_s1] sm:$0xff]  ;;  %v23_v6 = vld [vmem:[%s172_s1 + $0x8] sm:$0xff]  ;;  %v24_v13 = vld [vmem:[%s172_s1 + $0x10] sm:$0xff] }
   0x3   :  { %v32_v2 = vld [vmem:[%s173_s2] sm:$0xff]  ;;  %v27_v3 = vmax.f32 %v17_v0, %v22_v1  ;;  %v28_v8 = vmax.f32 %v18_v5, %v23_v6  ;;  %v33_v9 = vld [vmem:[%s173_s2 + $0x8] sm:$0xff]  ;;  %v34_v14 = vld [vmem:[%s173_s2 + $0x10] sm:$0xff]  ;;  %v29_v17 = vmax.f32 %v19_v11, %v24_v13 }
   0x4   :  { %v37_v4 = vld [vmem:[%s174_s3] sm:$0xff]  ;;  %v38_v10 = vld [vmem:[%s174_s3 + $0x8] sm:$0xff]  ;;  %v39_v15 = vld [vmem:[%s174_s3 + $0x10] sm:$0xff] }
   0x5   :  { %v42_v7 = vmax.f32 %v32_v2, %v37_v4  ;;  %v43_v12 = vmax.f32 %v33_v9, %v38_v10  ;;  %v44_v18 = vmax.f32 %v34_v14, %v39_v15  ;;  %v20_v19 = vld [vmem:[%s171_s0 + $0x18] sm:$0xff]  ;;  %v21_v25 = vld [vmem:[%s171_s0 + $0x20] sm:$0xff]  ;;  %vm58_vm4 = vmor %vm57_vm1, %vm56_vm0 }
   0x6   :  { %v25_v20 = vld [vmem:[%s172_s1 + $0x18] sm:$0xff]  ;;  %v26_v26 = vld [vmem:[%s172_s1 + $0x20] sm:$0xff]  ;;  %vm60_vm5 = vmor %vm59_vm2, %vm58_vm4 }
   0x7   :  { %v47_v16 = vmax.f32 %v27_v3, %v42_v7  ;;  %v35_v21 = vld [vmem:[%s173_s2 + $0x18] sm:$0xff]  ;;  %v48_v22 = vmax.f32 %v28_v8, %v43_v12  ;;  %v30_v23 = vmax.f32 %v20_v19, %v25_v20  ;;  %v49_v27 = vmax.f32 %v29_v17, %v44_v18  ;;  %v36_v30 = vld [vmem:[%s173_s2 + $0x20] sm:$0xff]  ;;  %vm62_vm6 = vmor %vm61_vm3, %vm60_vm5 }
   0x8   :  { %v40_v24 = vld [vmem:[%s174_s3 + $0x18] sm:$0xff]  ;;  %v31_v29 = vmax.f32 %v21_v25, %v26_v26  ;;  %v41_v31 = vld [vmem:[%s174_s3 + $0x20] sm:$0xff] }
   0x9   :  { %52 = vst [vmem:[%s175_s4] sm:$0xff] %v47_v16  ;;  %v45_v28 = vmax.f32 %v35_v21, %v40_v24  ;;  %53 = vst [vmem:[%s175_s4 + $0x8] sm:$0xff] %v48_v22  ;;  %v46_v32 = vmax.f32 %v36_v30, %v41_v31 }
   0xa   :  { %54 = vst [vmem:[%s175_s4 + $0x10] sm:$0xff] %v49_v27 }
   0xb   :  { %v50_v33 = vmax.f32 %v30_v23, %v45_v28  ;;  %v51_v34 = vmax.f32 %v31_v29, %v46_v32 }
   0xd   :  { %55 = vst [vmem:[%s175_s4 + $0x18] sm:$0xff] %v50_v33  ;;  %63 = vst.msk [vmem:[%s175_s4 + $0x20] sm:$0xff] %vm62_vm6, %v51_v34 }

// kernel: lenet_forward.11
= control target key start
LH: loop header
LB: loop body
LE: loop exit
PB: predicated region body
PF: predicated region fallthrough
CT: control target
= control target key end

     0   :  { %v414_v3 = vmov 0.0|0.0   ;;  %v415_v29 = vmov 1983009808   ;;  %v91_v31 = vlaneseq  ;;  %s665_s0 = inlined_call_operand.vmem [shape: f32[2,500], index: 0, kind: input, shape index: {}]   ;;  %s666_s1 = inlined_call_operand.vmem [shape: f32[500,10], index: 1, kind: input, shape index: {}]   ;;  %s667_s2 = inlined_call_operand.vmem [shape: f32[1,10], index: 2, kind: input, shape index: {}]   ;;  %s668_s3 = inlined_call_operand.hbm [shape: f32[2,10], index: 3, kind: output, shape index: {}]  }
   0x1   :  { %v48_v0 = vld [vmem:[%s666_s1 + $0x100] sm:$0xff]  ;;  %v49_v1 = vld [vmem:[%s666_s1 + $0x108] sm:$0xff]  ;;  %v50_v2 = vld [vmem:[%s666_s1 + $0x110] sm:$0xff]  ;;  %340 = vmatprep.subr.bf16.mxu1 %v414_v3  ;;  %v89_v30 = vunpack.c.l.s4 %v415_v29 }
   0x2   :  { %v341_v4 = vpack.c.bf16 %v49_v1, %v48_v0  ;;  %v51_v5 = vld [vmem:[%s666_s1 + $0x118] sm:$0xff]  ;;  %v52_v7 = vld [vmem:[%s666_s1 + $0x120] sm:$0xff]  ;;  %v53_v8 = vld [vmem:[%s666_s1 + $0x128] sm:$0xff]  ;;  %v92_v42 = vshrl.u32 %v91_v31, 7 }
   0x3   :  { %v344_v6 = vpack.c.bf16 %v51_v5, %v50_v2  ;;  %v32_v9 = vld [vmem:[%s666_s1 + $0x80] sm:$0xff]  ;;  %v33_v10 = vld [vmem:[%s666_s1 + $0x88] sm:$0xff]  ;;  %v34_v15 = vld [vmem:[%s666_s1 + $0x90] sm:$0xff]  ;;  %v347_v18 = vpack.c.bf16 %v53_v8, %v52_v7  ;;  %v90_v41 = vunpack.c.0.s8 %v89_v30 }
   0x4   :  { %342 = vmatpush1.bf16.msra.mxu1 %v341_v4  ;;  %v16_v11 = vld [vmem:[%s666_s1] sm:$0xff]  ;;  %v308_v12 = vpack.c.bf16 %v33_v10, %v32_v9  ;;  %v17_v13 = vld [vmem:[%s666_s1 + $0x8] sm:$0xff]  ;;  %v35_v16 = vld [vmem:[%s666_s1 + $0x98] sm:$0xff] }
   0x5   :  { %343 = vmatprep.subr.bf16.mxu1 %v414_v3  ;;  %v310_v14 = vpack.c.bf16 %v17_v13, %v16_v11  ;;  %v18_v17 = vld [vmem:[%s666_s1 + $0x10] sm:$0xff]  ;;  %v312_v20 = vpack.c.bf16 %v35_v16, %v34_v15  ;;  %v19_v21 = vld [vmem:[%s666_s1 + $0x18] sm:$0xff]  ;;  %v36_v24 = vld [vmem:[%s666_s1 + $0xa0] sm:$0xff]  ;;  %v93_v52 = vsub.s32 %v90_v41, %v92_v42 }
   0x6   :  { %v54_v19 = vld [vmem:[%s666_s1 + $0x130] sm:$0xff]  ;;  %309 = vmatprep.subr.bf16.mxu0 %v308_v12  ;;  %v55_v22 = vld [vmem:[%s666_s1 + $0x138] sm:$0xff]  ;;  %v314_v23 = vpack.c.bf16 %v19_v21, %v18_v17  ;;  %v37_v25 = vld [vmem:[%s666_s1 + $0xa8] sm:$0xff] }
   0x7   :  { %311 = vmatpush3.bf16.msra.mxu0 %v310_v14  ;;  %v316_v26 = vpack.c.bf16 %v37_v25, %v36_v24  ;;  %v20_v27 = vld [vmem:[%s666_s1 + $0x20] sm:$0xff]  ;;  %v21_v28 = vld [vmem:[%s666_s1 + $0x28] sm:$0xff]  ;;  %v38_v32 = vld [vmem:[%s666_s1 + $0xb0] sm:$0xff]  ;;  %v350_v34 = vpack.c.bf16 %v55_v22, %v54_v19 }
   0x8   :  { %345 = vmatpush1.bf16.msra.mxu1 %v344_v6  ;;  %313 = vmatprep.subr.bf16.mxu0 %v312_v20  ;;  %v39_v33 = vld [vmem:[%s666_s1 + $0xb8] sm:$0xff]  ;;  %v56_v35 = vld [vmem:[%s666_s1 + $0x140] sm:$0xff]  ;;  %v57_v36 = vld [vmem:[%s666_s1 + $0x148] sm:$0xff]  ;;  %v318_v37 = vpack.c.bf16 %v21_v28, %v20_v27 }
   0x9   :  { %346 = vmatprep.subr.bf16.mxu1 %v414_v3  ;;  %v320_v38 = vpack.c.bf16 %v39_v33, %v38_v32  ;;  %v22_v39 = vld [vmem:[%s666_s1 + $0x30] sm:$0xff]  ;;  %v23_v40 = vld [vmem:[%s666_s1 + $0x38] sm:$0xff]  ;;  %v40_v43 = vld [vmem:[%s666_s1 + $0xc0] sm:$0xff]  ;;  %v353_v45 = vpack.c.bf16 %v57_v36, %v56_v35 }
   0xa   :  { %v41_v44 = vld [vmem:[%s666_s1 + $0xc8] sm:$0xff]  ;;  %v58_v46 = vld [vmem:[%s666_s1 + $0x150] sm:$0xff]  ;;  %v59_v47 = vld [vmem:[%s666_s1 + $0x158] sm:$0xff]  ;;  %v322_v48 = vpack.c.bf16 %v23_v40, %v22_v39 }
   0xb   :  { %315 = vmatpush3.bf16.msra.mxu0 %v314_v23  ;;  %v324_v49 = vpack.c.bf16 %v41_v44, %v40_v43  ;;  %v24_v50 = vld [vmem:[%s666_s1 + $0x40] sm:$0xff]  ;;  %v25_v51 = vld [vmem:[%s666_s1 + $0x48] sm:$0xff]  ;;  %v42_v53 = vld [vmem:[%s666_s1 + $0xd0] sm:$0xff]  ;;  %v356_v55 = vpack.c.bf16 %v59_v47, %v58_v46 }
   0xc   :  { %348 = vmatpush1.bf16.msra.mxu1 %v347_v18  ;;  %317 = vmatprep.subr.bf16.mxu0 %v316_v26  ;;  %v43_v54 = vld [vmem:[%s666_s1 + $0xd8] sm:$0xff]  ;;  %v60_v56 = vld [vmem:[%s666_s1 + $0x160] sm:$0xff]  ;;  %v61_v57 = vld [vmem:[%s666_s1 + $0x168] sm:$0xff]  ;;  %v326_v58 = vpack.c.bf16 %v25_v51, %v24_v50 }
   0xd   :  { %349 = vmatprep.subr.bf16.mxu1 %v414_v3  ;;  %v15_v59 = vld [vmem:[%s665_s0] sm:$0xff]  ;;  %v328_v60 = vpack.c.bf16 %v43_v54, %v42_v53  ;;  %v26_v61 = vld [vmem:[%s666_s1 + $0x50] sm:$0xff]  ;;  %v27_v62 = vld [vmem:[%s666_s1 + $0x58] sm:$0xff] }
   0xe   :  { %v87_v63 = vcombine.high %v15_v59, %v15_v59  ;;  %v94_v0 = vrot.slane %v15_v59, %v93_v52 }
   0xf   :  { %319 = vmatpush3.bf16.msra.mxu0 %v318_v37 }
  0x10   :  { %351 = vmatpush1.bf16.msra.mxu1 %v350_v34  ;;  %321 = vmatprep.subr.bf16.mxu0 %v320_v38 }
  0x11   :  { %352 = vmatprep.subr.bf16.mxu1 %v414_v3 }
  0x13   :  { %323 = vmatpush3.bf16.msra.mxu0 %v322_v48 }
  0x14   :  { %354 = vmatpush1.bf16.msra.mxu1 %v353_v45  ;;  %325 = vmatprep.subr.bf16.mxu0 %v324_v49 }
  0x15   :  { %355 = vmatprep.subr.bf16.mxu1 %v414_v3 }
  0x16   :  { %8 = vsyncpa [#allocation3], 0  ;;  %v44_v1 = vld [vmem:[%s666_s1 + $0xe0] sm:$0xff]  ;;  %v45_v2 = vld [vmem:[%s666_s1 + $0xe8] sm:$0xff]  ;;  %v359_v4 = vpack.c.bf16 %v61_v57, %v60_v56  ;;  %v102_v5 = vcombine.high %v94_v0, %v94_v0  ;;  %v567_v6 = vrot.slane %v87_v63, %v93_v52  ;;  %v330_v9 = vpack.c.bf16 %v27_v62, %v26_v61  ;;  %s417_s5 = smov [#allocation2]  }
  0x17   :  { %v62_v7 = vld [vmem:[%s666_s1 + $0x170] sm:$0xff]  ;;  %v63_v8 = vld [vmem:[%s666_s1 + $0x178] sm:$0xff]  ;;  %327 = vmatpush3.bf16.msra.mxu0 %v326_v58  ;;  %vm107_vm0 = vcmask 949248   ;;  %v332_v10 = vpack.c.bf16 %v45_v2, %v44_v1  ;;  %v28_v11 = vld [vmem:[%s666_s1 + $0x60] sm:$0xff]  ;;  %v416_v43 = vmov 0.0   ;;  %vm110_vm1 = vcmask 1043456  }
  0x18   :  { %357 = vmatpush1.bf16.msra.mxu1 %v356_v55  ;;  %329 = vmatprep.subr.bf16.mxu0 %v328_v60  ;;  %v29_v12 = vld [vmem:[%s666_s1 + $0x68] sm:$0xff]  ;;  %v103_v13 = vcombine.high %v567_v6, %v567_v6  ;;  %v46_v14 = vld [vmem:[%s666_s1 + $0xf0] sm:$0xff]  ;;  %v47_v15 = vld [vmem:[%s666_s1 + $0xf8] sm:$0xff]  ;;  %v362_v16 = vpack.c.bf16 %v63_v8, %v62_v7  ;;  %s262_s6 = sshll.u32 %s417_s5, 4  ;;  %vm254_vm2 = vcmask 74752   ;;  %s263_s6 = int_to_ptr.vmem [resolvable:$true] %s262_s6 }
  0x19   :  { %358 = vmatprep.subr.bf16.mxu1 %v414_v3  ;;  %178 = vmatprep.mubr.f32.mxu0 %v102_v5  ;;  %v64_v17 = vld [vmem:[%s666_s1 + $0x180] sm:$0xff]  ;;  %v65_v18 = vld [vmem:[%s666_s1 + $0x188] sm:$0xff]  ;;  %v334_v19 = vpack.c.bf16 %v29_v12, %v28_v11  ;;  %v336_v20 = vpack.c.bf16 %v47_v15, %v46_v14  ;;  %v30_v21 = vld [vmem:[%s666_s1 + $0x70] sm:$0xff]  ;;  %p395_p1 = scmp.lt.s32.totalorder %s263_s6, %s263_s6 }
  0x1a   :  { %272 = vmatprep.mubr.msk.f32.mxu1 %vm107_vm0, %v103_v13  ;;  %v31_v22 = vld [vmem:[%s666_s1 + $0x78] sm:$0xff]  ;;  %v365_v23 = vpack.c.bf16 %v65_v18, %v64_v17  ;;  %v66_v24 = vld [vmem:[%s666_s1 + $0x190] sm:$0xff]  ;;  %v68_v28 = vld [vmem:[%s666_s1 + $0x1a0] sm:$0xff] }
  0x1b   :  { %331 = vmatpush3.bf16.msra.mxu0 %v330_v9  ;;  %v67_v25 = vld [vmem:[%s666_s1 + $0x198] sm:$0xff]  ;;  %v338_v26 = vpack.c.bf16 %v31_v22, %v30_v21  ;;  %v69_v29 = vld [vmem:[%s666_s1 + $0x1a8] sm:$0xff]  ;;  %v70_v31 = vld [vmem:[%s666_s1 + $0x1b0] sm:$0xff] }
  0x1c   :  { %360 = vmatpush1.bf16.msra.mxu1 %v359_v4  ;;  %333 = vmatprep.subr.bf16.mxu0 %v332_v10  ;;  %v368_v27 = vpack.c.bf16 %v67_v25, %v66_v24  ;;  %v371_v30 = vpack.c.bf16 %v69_v29, %v68_v28  ;;  %v71_v32 = vld [vmem:[%s666_s1 + $0x1b8] sm:$0xff]  ;;  %v72_v34 = vld [vmem:[%s666_s1 + $0x1c0] sm:$0xff]  ;;  %v73_v35 = vld [vmem:[%s666_s1 + $0x1c8] sm:$0xff] }
  0x1d   :  { %361 = vmatprep.subr.bf16.mxu1 %v414_v3  ;;  %v374_v33 = vpack.c.bf16 %v71_v32, %v70_v31  ;;  %v377_v36 = vpack.c.bf16 %v73_v35, %v72_v34  ;;  %v74_v37 = vld [vmem:[%s666_s1 + $0x1d0] sm:$0xff]  ;;  %v75_v38 = vld [vmem:[%s666_s1 + $0x1d8] sm:$0xff]  ;;  %v76_v40 = vld [vmem:[%s666_s1 + $0x1e0] sm:$0xff] }
  0x1e   :  { %v380_v39 = vpack.c.bf16 %v75_v38, %v74_v37  ;;  %v77_v41 = vld [vmem:[%s666_s1 + $0x1e8] sm:$0xff]  ;;  %v78_v44 = vld [vmem:[%s666_s1 + $0x1f0] sm:$0xf]  ;;  %v270_v48 = vld [vmem:[%s667_s2] ss:$0 sm:$0xff]  ;;  %s390_s1 = scalar_lea.vmem %s263_s6, 32 }
  0x1f   :  { %335 = vmatpush3.bf16.msra.mxu0 %v334_v19  ;;  %v383_v42 = vpack.c.bf16 %v77_v41, %v76_v40  ;;  %p391_p0 = scmp.ne.s32.totalorder %s263_s6, %s390_s1  ;;  %p396_p2 = scmp.lt.s32.totalorder %s390_s1, %s390_s1 }
  0x20   :  { %363 = vmatpush1.bf16.msra.mxu1 %v362_v16  ;;  %337 = vmatprep.subr.bf16.mxu0 %v336_v20 }
  0x21   :  { %364 = vmatprep.subr.bf16.mxu1 %v414_v3  ;;  %p397_p3 = por %p396_p2, %p395_p1 }
  0x23   :  { %339 = vmatpush3.bf16.msra.mxu0 %v338_v26  ;;  %p398_p4 = pnand %p397_p3, %p391_p0 }
  0x24   :  { %366 = vmatpush1.bf16.msra.mxu1 %v365_v23 }
  0x25   :  { %367 = vmatprep.subr.bf16.mxu1 %v414_v3 }
  0x26   :  { %179 = vmatmul.mubr.f32.vlgmr.msra.gmra.mrb[0].mxu0 %v94_v0 }
  0x28   :  { %369 = vmatpush1.bf16.msra.mxu1 %v368_v27 }
  0x29   :  { %370 = vmatprep.subr.bf16.mxu1 %v414_v3 }
  0x2c   :  { %372 = vmatpush1.bf16.msra.mxu1 %v371_v30 }
  0x2d   :  { %373 = vmatprep.subr.bf16.mxu1 %v414_v3 }
  0x30   :  { %375 = vmatpush1.bf16.msra.mxu1 %v374_v33 }
  0x31   :  { %376 = vmatprep.subr.bf16.mxu1 %v414_v3 }
  0x34   :  { %378 = vmatpush1.bf16.msra.mxu1 %v377_v36 }
  0x35   :  { %379 = vmatprep.subr.bf16.mxu1 %v414_v3 }
  0x38   :  { %381 = vmatpush1.bf16.msra.mxu1 %v380_v39 }
  0x39   :  { %382 = vmatprep.subr.bf16.mxu1 %v414_v3 }
  0x3c   :  { %384 = vmatpush1.bf16.msra.mxu1 %v383_v42 }
  0x3d   :  { %244 = vmatprep.subr.mxu1 %v416_v43 }
  0x40   :  { %271 = vmatpush1.msk.msra.mxu1 %vm110_vm1, %v78_v44 }
  0x41   :  { %249 = vmatmul.mubr.f32.vlgmr.msra.gmra.mrb[0].mxu1 %v567_v6 }
  0xf9   :  { %v305_v45 = vpop.f32.mrb[0].mxu0 }
  0xfa   :  { %v306_v46 = vpop.f32.mrb[1].mxu0 }
  0xfb   :  { %v307_v47 = vadd.f32 %v306_v46, %v305_v45 }
  0xfd   :  { %v181_v49 = vadd.f32 %v307_v47, %v270_v48 }
 0x114   :  { %v250_v3 = vpop.f32.mrb[0].mxu1 }
 0x115   :  { %v251_v50 = vadd.f32 %v250_v3, %v181_v49  ;;  %v252_v51 = vpop.f32.mrb[1].mxu1 }
 0x117   :  { %255 = vst.msk [vmem:[#allocation2] sm:$0x3] %vm254_vm2, %v251_v50 }
 0x118   :  { %401 = shalt.err (!%p398_p4)
}
 0x119   :  { %s402_s2 = scalar_lea.hbm %s668_s3, 32 }
 0x11a   :  { %p403_p5 = scmp.ne.s32.totalorder %s668_s3, %s402_s2  ;;  %p406_p6 = scmp.lt.u32.totalorder %s402_s2, %s668_s3 }
 0x11c   :  { %p408_p7 = pnand %p406_p6, %p403_p5 }
 0x11e   :  { %411 = shalt.err (!%p408_p7)
}
 0x11f   :  { %265 = dma.vmem_to_hbm [thread:$0]  %s263_s6, 32, %s668_s3, [#allocation3]  }
 0x120   :  { %412 = dma.done.wait [#allocation3], 32  }
 0x121   :  { %413 = vsyncadd [#allocation3], 4294967264 }
 0x122   :  { %269 = vsyncpa [#allocation3], 1 }

// kernel: lenet_forward.10
= control target key start
LH: loop header
LB: loop body
LE: loop exit
PB: predicated region body
PF: predicated region fallthrough
CT: control target
= control target key end

     0   :  { %vm1378_vm0 = vcmask 146432   ;;  %vm1381_vm1 = vcmask 1041408   ;;  %vm2840_vm2 = vcmask 1043458   ;;  %vm2842_vm4 = vcmask 1045508   ;;  %s7966_s1 = inlined_call_operand.vmem [shape: f32[2450,500], index: 1, kind: input, shape index: {}]   ;;  %s7967_s0 = inlined_call_operand.vmem [shape: f32[2,2450], index: 0, kind: input, shape index: {}]   ;;  %s7968_s2 = inlined_call_operand.vmem [shape: f32[1,500], index: 2, kind: input, shape index: {}]   ;;  %s7969_s3 = inlined_call_operand.vmem [shape: f32[2,500], index: 3, kind: output, shape index: {}]  }
   0x1   :  { %v20_v0 = vld [vmem:[%s7966_s1 + $0x8] sm:$0xff]  ;;  %v22_v2 = vld [vmem:[%s7966_s1 + $0x18] sm:$0xff]  ;;  %v19_v5 = vld [vmem:[%s7966_s1] sm:$0xff]  ;;  %vm2844_vm6 = vcmask 949254  }
   0x2   :  { %v24_v1 = vld [vmem:[%s7966_s1 + $0x28] sm:$0xff]  ;;  %v26_v4 = vld [vmem:[%s7966_s1 + $0x38] sm:$0xff]  ;;  %v23_v6 = vld [vmem:[%s7966_s1 + $0x20] sm:$0xff] }
   0x3   :  { %v2857_v3 = vpack.c.bf16 %v24_v1, %v20_v0  ;;  %v3469_v7 = vpack.c.bf16 %v26_v4, %v22_v2  ;;  %v2859_v8 = vpack.c.bf16 %v23_v6, %v19_v5  ;;  %v21_v9 = vld [vmem:[%s7966_s1 + $0x10] sm:$0xff]  ;;  %v28_v11 = vld [vmem:[%s7966_s1 + $0x48] sm:$0xff]  ;;  %v30_v14 = vld [vmem:[%s7966_s1 + $0x58] sm:$0xff] }
   0x4   :  { %v25_v10 = vld [vmem:[%s7966_s1 + $0x30] sm:$0xff]  ;;  %v32_v13 = vld [vmem:[%s7966_s1 + $0x68] sm:$0xff]  ;;  %v34_v15 = vld [vmem:[%s7966_s1 + $0x78] sm:$0xff] }
   0x5   :  { %2858 = vmatprep.subr.bf16.mxu0 %v2857_v3  ;;  %v3471_v12 = vpack.c.bf16 %v25_v10, %v21_v9  ;;  %3470 = vmatprep.subr.bf16.mxu1 %v3469_v7  ;;  %v2861_v16 = vpack.c.bf16 %v32_v13, %v28_v11  ;;  %v3473_v17 = vpack.c.bf16 %v34_v15, %v30_v14  ;;  %v27_v18 = vld [vmem:[%s7966_s1 + $0x40] sm:$0xff]  ;;  %v29_v20 = vld [vmem:[%s7966_s1 + $0x50] sm:$0xff]  ;;  %v36_v23 = vld [vmem:[%s7966_s1 + $0x88] sm:$0xff] }
   0x6   :  { %2860 = vmatpush1.bf16.msra.mxu0 %v2859_v8  ;;  %v31_v19 = vld [vmem:[%s7966_s1 + $0x60] sm:$0xff]  ;;  %v33_v22 = vld [vmem:[%s7966_s1 + $0x70] sm:$0xff]  ;;  %v40_v24 = vld [vmem:[%s7966_s1 + $0xa8] sm:$0xff] }
   0x7   :  { %3472 = vmatpush1.bf16.msra.mxu1 %v3471_v12  ;;  %v2863_v21 = vpack.c.bf16 %v31_v19, %v27_v18  ;;  %2862 = vmatprep.subr.bf16.mxu0 %v2861_v16  ;;  %v3475_v25 = vpack.c.bf16 %v33_v22, %v29_v20  ;;  %v2865_v26 = vpack.c.bf16 %v40_v24, %v36_v23  ;;  %v38_v27 = vld [vmem:[%s7966_s1 + $0x98] sm:$0xff]  ;;  %v35_v29 = vld [vmem:[%s7966_s1 + $0x80] sm:$0xff]  ;;  %v37_v32 = vld [vmem:[%s7966_s1 + $0x90] sm:$0xff] }
   0x8   :  { %3474 = vmatprep.subr.bf16.mxu1 %v3473_v17  ;;  %v42_v28 = vld [vmem:[%s7966_s1 + $0xb8] sm:$0xff]  ;;  %v39_v31 = vld [vmem:[%s7966_s1 + $0xa0] sm:$0xff]  ;;  %v41_v33 = vld [vmem:[%s7966_s1 + $0xb0] sm:$0xff] }
   0x9   :  { %v3477_v30 = vpack.c.bf16 %v42_v28, %v38_v27  ;;  %v2867_v34 = vpack.c.bf16 %v39_v31, %v35_v29  ;;  %v44_v35 = vld [vmem:[%s7966_s1 + $0xc8] sm:$0xff]  ;;  %v46_v37 = vld [vmem:[%s7966_s1 + $0xd8] sm:$0xff]  ;;  %v3479_v38 = vpack.c.bf16 %v41_v33, %v37_v32  ;;  %v43_v41 = vld [vmem:[%s7966_s1 + $0xc0] sm:$0xff] }
   0xa   :  { %2864 = vmatpush1.bf16.msra.mxu0 %v2863_v21  ;;  %v48_v36 = vld [vmem:[%s7966_s1 + $0xe8] sm:$0xff]  ;;  %v50_v40 = vld [vmem:[%s7966_s1 + $0xf8] sm:$0xff]  ;;  %v47_v42 = vld [vmem:[%s7966_s1 + $0xe0] sm:$0xff] }
   0xb   :  { %3476 = vmatpush1.bf16.msra.mxu1 %v3475_v25  ;;  %2866 = vmatprep.subr.bf16.mxu0 %v2865_v26  ;;  %v2869_v39 = vpack.c.bf16 %v48_v36, %v44_v35  ;;  %v3481_v43 = vpack.c.bf16 %v50_v40, %v46_v37  ;;  %v45_v44 = vld [vmem:[%s7966_s1 + $0xd0] sm:$0xff]  ;;  %v52_v46 = vld [vmem:[%s7966_s1 + $0x108] sm:$0xff]  ;;  %v54_v48 = vld [vmem:[%s7966_s1 + $0x118] sm:$0xff]  ;;  %v2871_v50 = vpack.c.bf16 %v47_v42, %v43_v41 }
   0xc   :  { %3478 = vmatprep.subr.bf16.mxu1 %v3477_v30  ;;  %v49_v45 = vld [vmem:[%s7966_s1 + $0xf0] sm:$0xff]  ;;  %v56_v47 = vld [vmem:[%s7966_s1 + $0x128] sm:$0xff]  ;;  %v58_v49 = vld [vmem:[%s7966_s1 + $0x138] sm:$0xff] }
   0xd   :  { %v3483_v51 = vpack.c.bf16 %v49_v45, %v45_v44  ;;  %v2873_v52 = vpack.c.bf16 %v56_v47, %v52_v46  ;;  %v51_v53 = vld [vmem:[%s7966_s1 + $0x100] sm:$0xff]  ;;  %v53_v55 = vld [vmem:[%s7966_s1 + $0x110] sm:$0xff]  ;;  %v3485_v56 = vpack.c.bf16 %v58_v49, %v54_v48  ;;  %v60_v58 = vld [vmem:[%s7966_s1 + $0x148] sm:$0xff]  ;;  %v1249_v46 = vlaneseq }
   0xe   :  { %2868 = vmatpush1.bf16.msra.mxu0 %v2867_v34  ;;  %v55_v54 = vld [vmem:[%s7966_s1 + $0x120] sm:$0xff]  ;;  %v57_v57 = vld [vmem:[%s7966_s1 + $0x130] sm:$0xff]  ;;  %v64_v59 = vld [vmem:[%s7966_s1 + $0x168] sm:$0xff]  ;;  %v4127_v47 = vmov 1983009808  }
   0xf   :  { %3480 = vmatpush1.bf16.msra.mxu1 %v3479_v38  ;;  %2870 = vmatprep.subr.bf16.mxu0 %v2869_v39  ;;  %v62_v60 = vld [vmem:[%s7966_s1 + $0x158] sm:$0xff]  ;;  %v2875_v62 = vpack.c.bf16 %v55_v54, %v51_v53  ;;  %v3487_v63 = vpack.c.bf16 %v57_v57, %v53_v55  ;;  %v2877_v0 = vpack.c.bf16 %v64_v59, %v60_v58  ;;  %v59_v1 = vld [vmem:[%s7966_s1 + $0x140] sm:$0xff]  ;;  %v61_v3 = vld [vmem:[%s7966_s1 + $0x150] sm:$0xff]  ;;  %v1276_v48 = vunpack.c.l.s4 %v4127_v47 }
  0x10   :  { %3482 = vmatprep.subr.bf16.mxu1 %v3481_v43  ;;  %v66_v61 = vld [vmem:[%s7966_s1 + $0x178] sm:$0xff]  ;;  %v63_v2 = vld [vmem:[%s7966_s1 + $0x160] sm:$0xff]  ;;  %v65_v5 = vld [vmem:[%s7966_s1 + $0x170] sm:$0xff] }
  0x11   :  { %v3489_v4 = vpack.c.bf16 %v66_v61, %v62_v60  ;;  %v68_v6 = vld [vmem:[%s7966_s1 + $0x188] sm:$0xff]  ;;  %v70_v8 = vld [vmem:[%s7966_s1 + $0x198] sm:$0xff]  ;;  %v2879_v10 = vpack.c.bf16 %v63_v2, %v59_v1  ;;  %v3491_v11 = vpack.c.bf16 %v65_v5, %v61_v3  ;;  %v67_v13 = vld [vmem:[%s7966_s1 + $0x180] sm:$0xff]  ;;  %v4400_v61 = vshrl.u32 %v1249_v46, 7 }
  0x12   :  { %2872 = vmatpush1.bf16.msra.mxu0 %v2871_v50  ;;  %v72_v7 = vld [vmem:[%s7966_s1 + $0x1a8] sm:$0xff]  ;;  %v74_v9 = vld [vmem:[%s7966_s1 + $0x1b8] sm:$0xff]  ;;  %v71_v14 = vld [vmem:[%s7966_s1 + $0x1a0] sm:$0xff] }
  0x13   :  { %3484 = vmatpush1.bf16.msra.mxu1 %v3483_v51  ;;  %2874 = vmatprep.subr.bf16.mxu0 %v2873_v52  ;;  %v2881_v12 = vpack.c.bf16 %v72_v7, %v68_v6  ;;  %v69_v15 = vld [vmem:[%s7966_s1 + $0x190] sm:$0xff]  ;;  %v3493_v16 = vpack.c.bf16 %v74_v9, %v70_v8  ;;  %v76_v18 = vld [vmem:[%s7966_s1 + $0x1c8] sm:$0xff]  ;;  %v78_v20 = vld [vmem:[%s7966_s1 + $0x1d8] sm:$0xff]  ;;  %v2883_v22 = vpack.c.bf16 %v71_v14, %v67_v13 }
  0x14   :  { %3486 = vmatprep.subr.bf16.mxu1 %v3485_v56  ;;  %v73_v17 = vld [vmem:[%s7966_s1 + $0x1b0] sm:$0xff]  ;;  %v80_v19 = vld [vmem:[%s7966_s1 + $0x1e8] sm:$0xff]  ;;  %v82_v21 = vld [vmem:[%s7966_s1 + $0x1f8] sm:$0xff] }
  0x15   :  { %v3495_v23 = vpack.c.bf16 %v73_v17, %v69_v15  ;;  %v2885_v24 = vpack.c.bf16 %v80_v19, %v76_v18  ;;  %v75_v25 = vld [vmem:[%s7966_s1 + $0x1c0] sm:$0xff]  ;;  %v77_v27 = vld [vmem:[%s7966_s1 + $0x1d0] sm:$0xff]  ;;  %v3497_v28 = vpack.c.bf16 %v82_v21, %v78_v20  ;;  %v84_v30 = vld [vmem:[%s7966_s1 + $0x208] sm:$0xff] }
  0x16   :  { %2876 = vmatpush1.bf16.msra.mxu0 %v2875_v62  ;;  %v79_v26 = vld [vmem:[%s7966_s1 + $0x1e0] sm:$0xff]  ;;  %v81_v29 = vld [vmem:[%s7966_s1 + $0x1f0] sm:$0xff]  ;;  %v88_v31 = vld [vmem:[%s7966_s1 + $0x228] sm:$0xff]  ;;  %v1277_v62 = vunpack.c.0.s8 %v1276_v48 }
  0x17   :  { %3488 = vmatpush1.bf16.msra.mxu1 %v3487_v63  ;;  %2878 = vmatprep.subr.bf16.mxu0 %v2877_v0  ;;  %v86_v32 = vld [vmem:[%s7966_s1 + $0x218] sm:$0xff]  ;;  %v2887_v34 = vpack.c.bf16 %v79_v26, %v75_v25  ;;  %v3499_v35 = vpack.c.bf16 %v81_v29, %v77_v27  ;;  %v2889_v36 = vpack.c.bf16 %v88_v31, %v84_v30  ;;  %v83_v37 = vld [vmem:[%s7966_s1 + $0x200] sm:$0xff]  ;;  %v85_v39 = vld [vmem:[%s7966_s1 + $0x210] sm:$0xff] }
  0x18   :  { %3490 = vmatprep.subr.bf16.mxu1 %v3489_v4  ;;  %v90_v33 = vld [vmem:[%s7966_s1 + $0x238] sm:$0xff]  ;;  %v87_v38 = vld [vmem:[%s7966_s1 + $0x220] sm:$0xff]  ;;  %v89_v41 = vld [vmem:[%s7966_s1 + $0x230] sm:$0xff] }
  0x19   :  { %v3501_v40 = vpack.c.bf16 %v90_v33, %v86_v32  ;;  %v92_v42 = vld [vmem:[%s7966_s1 + $0x248] sm:$0xff]  ;;  %v94_v44 = vld [vmem:[%s7966_s1 + $0x258] sm:$0xff]  ;;  %v2891_v49 = vpack.c.bf16 %v87_v38, %v83_v37  ;;  %v3503_v50 = vpack.c.bf16 %v89_v41, %v85_v39  ;;  %v91_v52 = vld [vmem:[%s7966_s1 + $0x240] sm:$0xff] }
  0x1a   :  { %2880 = vmatpush1.bf16.msra.mxu0 %v2879_v10  ;;  %v96_v43 = vld [vmem:[%s7966_s1 + $0x268] sm:$0xff]  ;;  %v98_v45 = vld [vmem:[%s7966_s1 + $0x278] sm:$0xff]  ;;  %v95_v53 = vld [vmem:[%s7966_s1 + $0x260] sm:$0xff] }
  0x1b   :  { %3492 = vmatpush1.bf16.msra.mxu1 %v3491_v11  ;;  %2882 = vmatprep.subr.bf16.mxu0 %v2881_v12  ;;  %v2893_v51 = vpack.c.bf16 %v96_v43, %v92_v42  ;;  %v93_v54 = vld [vmem:[%s7966_s1 + $0x250] sm:$0xff]  ;;  %v3505_v55 = vpack.c.bf16 %v98_v45, %v94_v44  ;;  %v100_v57 = vld [vmem:[%s7966_s1 + $0x288] sm:$0xff]  ;;  %v102_v59 = vld [vmem:[%s7966_s1 + $0x298] sm:$0xff]  ;;  %v2895_v63 = vpack.c.bf16 %v95_v53, %v91_v52 }
  0x1c   :  { %3494 = vmatprep.subr.bf16.mxu1 %v3493_v16  ;;  %v97_v56 = vld [vmem:[%s7966_s1 + $0x270] sm:$0xff]  ;;  %v104_v58 = vld [vmem:[%s7966_s1 + $0x2a8] sm:$0xff]  ;;  %v106_v60 = vld [vmem:[%s7966_s1 + $0x2b8] sm:$0xff]  ;;  %v4427_v11 = vsub.s32 %v1277_v62, %v4400_v61 }
  0x1d   :  { %v3507_v0 = vpack.c.bf16 %v97_v56, %v93_v54  ;;  %v2897_v1 = vpack.c.bf16 %v104_v58, %v100_v57  ;;  %v99_v2 = vld [vmem:[%s7966_s1 + $0x280] sm:$0xff]  ;;  %v101_v4 = vld [vmem:[%s7966_s1 + $0x290] sm:$0xff]  ;;  %v3509_v5 = vpack.c.bf16 %v106_v60, %v102_v59  ;;  %v108_v7 = vld [vmem:[%s7966_s1 + $0x2c8] sm:$0xff] }
  0x1e   :  { %2884 = vmatpush1.bf16.msra.mxu0 %v2883_v22  ;;  %v103_v3 = vld [vmem:[%s7966_s1 + $0x2a0] sm:$0xff]  ;;  %v105_v6 = vld [vmem:[%s7966_s1 + $0x2b0] sm:$0xff]  ;;  %v112_v8 = vld [vmem:[%s7966_s1 + $0x2e8] sm:$0xff] }
  0x1f   :  { %3496 = vmatpush1.bf16.msra.mxu1 %v3495_v23  ;;  %2886 = vmatprep.subr.bf16.mxu0 %v2885_v24  ;;  %v110_v9 = vld [vmem:[%s7966_s1 + $0x2d8] sm:$0xff]  ;;  %v2899_v12 = vpack.c.bf16 %v103_v3, %v99_v2  ;;  %v107_v13 = vld [vmem:[%s7966_s1 + $0x2c0] sm:$0xff]  ;;  %v3511_v14 = vpack.c.bf16 %v105_v6, %v101_v4  ;;  %v2901_v15 = vpack.c.bf16 %v112_v8, %v108_v7  ;;  %v109_v17 = vld [vmem:[%s7966_s1 + $0x2d0] sm:$0xff] }
  0x20   :  { %3498 = vmatprep.subr.bf16.mxu1 %v3497_v28  ;;  %v114_v10 = vld [vmem:[%s7966_s1 + $0x2f8] sm:$0xff]  ;;  %v111_v16 = vld [vmem:[%s7966_s1 + $0x2e0] sm:$0xff]  ;;  %v113_v18 = vld [vmem:[%s7966_s1 + $0x2f0] sm:$0xff] }
  0x21   :  { %v3513_v19 = vpack.c.bf16 %v114_v10, %v110_v9  ;;  %v116_v20 = vld [vmem:[%s7966_s1 + $0x308] sm:$0xff]  ;;  %v4450_v22 = vld [vmem:[%s7967_s0] sm:$0xff]  ;;  %v118_v23 = vld [vmem:[%s7966_s1 + $0x318] sm:$0xff]  ;;  %v2903_v26 = vpack.c.bf16 %v111_v16, %v107_v13  ;;  %v3515_v27 = vpack.c.bf16 %v113_v18, %v109_v17 }
  0x22   :  { %2888 = vmatpush1.bf16.msra.mxu0 %v2887_v34  ;;  %v120_v21 = vld [vmem:[%s7966_s1 + $0x328] sm:$0xff]  ;;  %v122_v24 = vld [vmem:[%s7966_s1 + $0x338] sm:$0xff]  ;;  %v4460_v25 = vrot.slane %v4450_v22, %v4427_v11  ;;  %v115_v29 = vld [vmem:[%s7966_s1 + $0x300] sm:$0xff]  ;;  %v1274_v8 = vcombine.high %v4450_v22, %v4450_v22 }
  0x23   :  { %3500 = vmatpush1.bf16.msra.mxu1 %v3499_v35  ;;  %2890 = vmatprep.subr.bf16.mxu0 %v2889_v36  ;;  %v2905_v28 = vpack.c.bf16 %v120_v21, %v116_v20  ;;  %v119_v30 = vld [vmem:[%s7966_s1 + $0x320] sm:$0xff]  ;;  %v117_v31 = vld [vmem:[%s7966_s1 + $0x310] sm:$0xff]  ;;  %v3517_v33 = vpack.c.bf16 %v122_v24, %v118_v23  ;;  %v124_v35 = vld [vmem:[%s7966_s1 + $0x348] sm:$0xff] }
  0x24   :  { %3502 = vmatprep.subr.bf16.mxu1 %v3501_v40  ;;  %v1289_v32 = vcombine.high %v4460_v25, %v4460_v25  ;;  %v121_v34 = vld [vmem:[%s7966_s1 + $0x330] sm:$0xff]  ;;  %v128_v36 = vld [vmem:[%s7966_s1 + $0x368] sm:$0xff]  ;;  %v126_v37 = vld [vmem:[%s7966_s1 + $0x358] sm:$0xff]  ;;  %v2907_v39 = vpack.c.bf16 %v119_v30, %v115_v29  ;;  %v4581_v24 = vrot.slane %v1274_v8, %v4427_v11 }
  0x25   :  { %v130_v38 = vld [vmem:[%s7966_s1 + $0x378] sm:$0xff]  ;;  %v3519_v40 = vpack.c.bf16 %v121_v34, %v117_v31  ;;  %v2909_v41 = vpack.c.bf16 %v128_v36, %v124_v35  ;;  %v123_v42 = vld [vmem:[%s7966_s1 + $0x340] sm:$0xff]  ;;  %v125_v44 = vld [vmem:[%s7966_s1 + $0x350] sm:$0xff] }
  0x26   :  { %2892 = vmatpush1.bf16.msra.mxu0 %v2891_v49  ;;  %1458 = vmatprep.mubr.f32.mxu0 %v1289_v32  ;;  %v127_v43 = vld [vmem:[%s7966_s1 + $0x360] sm:$0xff]  ;;  %v3521_v45 = vpack.c.bf16 %v130_v38, %v126_v37  ;;  %v129_v46 = vld [vmem:[%s7966_s1 + $0x370] sm:$0xff]  ;;  %v132_v47 = vld [vmem:[%s7966_s1 + $0x388] sm:$0xff]  ;;  %v1290_v38 = vcombine.high %v4581_v24, %v4581_v24 }
  0x27   :  { %3504 = vmatpush1.bf16.msra.mxu1 %v3503_v50  ;;  %2894 = vmatprep.subr.bf16.mxu0 %v2893_v51  ;;  %v136_v48 = vld [vmem:[%s7966_s1 + $0x3a8] sm:$0xff]  ;;  %v134_v49 = vld [vmem:[%s7966_s1 + $0x398] sm:$0xff]  ;;  %v2911_v51 = vpack.c.bf16 %v127_v43, %v123_v42  ;;  %v3523_v52 = vpack.c.bf16 %v129_v46, %v125_v44  ;;  %v131_v54 = vld [vmem:[%s7966_s1 + $0x380] sm:$0xff] }
  0x28   :  { %3506 = vmatprep.subr.bf16.mxu1 %v3505_v55  ;;  %2168 = vmatprep.mubr.f32.mxu1 %v1289_v32  ;;  %v138_v50 = vld [vmem:[%s7966_s1 + $0x3b8] sm:$0xff]  ;;  %v2913_v53 = vpack.c.bf16 %v136_v48, %v132_v47  ;;  %v135_v55 = vld [vmem:[%s7966_s1 + $0x3a0] sm:$0xff]  ;;  %v133_v56 = vld [vmem:[%s7966_s1 + $0x390] sm:$0xff] }
  0x29   :  { %v3525_v57 = vpack.c.bf16 %v138_v50, %v134_v49  ;;  %v137_v58 = vld [vmem:[%s7966_s1 + $0x3b0] sm:$0xff]  ;;  %v140_v59 = vld [vmem:[%s7966_s1 + $0x3c8] sm:$0xff]  ;;  %v142_v62 = vld [vmem:[%s7966_s1 + $0x3d8] sm:$0xff] }
  0x2a   :  { %2896 = vmatpush1.bf16.msra.mxu0 %v2895_v63  ;;  %v144_v60 = vld [vmem:[%s7966_s1 + $0x3e8] sm:$0xff]  ;;  %v146_v63 = vld [vmem:[%s7966_s1 + $0x3f8] sm:$0xff]  ;;  %v139_v3 = vld [vmem:[%s7966_s1 + $0x3c0] sm:$0xff] }
  0x2b   :  { %3508 = vmatpush1.bf16.msra.mxu1 %v3507_v0  ;;  %2898 = vmatprep.subr.bf16.mxu0 %v2897_v1  ;;  %v2915_v0 = vpack.c.bf16 %v135_v55, %v131_v54  ;;  %v3527_v1 = vpack.c.bf16 %v137_v58, %v133_v56  ;;  %v2917_v2 = vpack.c.bf16 %v144_v60, %v140_v59  ;;  %v143_v4 = vld [vmem:[%s7966_s1 + $0x3e0] sm:$0xff]  ;;  %v145_v7 = vld [vmem:[%s7966_s1 + $0x3f0] sm:$0xff]  ;;  %v148_v9 = vld [vmem:[%s7966_s1 + $0x408] sm:$0xff] }
  0x2c   :  { %3510 = vmatprep.subr.bf16.mxu1 %v3509_v5  ;;  %v141_v5 = vld [vmem:[%s7966_s1 + $0x3d0] sm:$0xff]  ;;  %v3529_v6 = vpack.c.bf16 %v146_v63, %v142_v62  ;;  %v152_v10 = vld [vmem:[%s7966_s1 + $0x428] sm:$0xff]  ;;  %v154_v13 = vld [vmem:[%s7966_s1 + $0x438] sm:$0xff] }
  0x2d   :  { %v2921_v16 = vpack.c.bf16 %v152_v10, %v148_v9  ;;  %v147_v17 = vld [vmem:[%s7966_s1 + $0x400] sm:$0xff]  ;;  %v153_v21 = vld [vmem:[%s7966_s1 + $0x430] sm:$0xff]  ;;  %v156_v22 = vld [vmem:[%s7966_s1 + $0x448] sm:$0xff] }
  0x2e   :  { %2900 = vmatpush1.bf16.msra.mxu0 %v2899_v12  ;;  %v150_v12 = vld [vmem:[%s7966_s1 + $0x418] sm:$0xff]  ;;  %v151_v18 = vld [vmem:[%s7966_s1 + $0x420] sm:$0xff]  ;;  %v160_v23 = vld [vmem:[%s7966_s1 + $0x468] sm:$0xff] }
  0x2f   :  { %3512 = vmatpush1.bf16.msra.mxu1 %v3511_v14  ;;  %2902 = vmatprep.subr.bf16.mxu0 %v2901_v15  ;;  %v2919_v14 = vpack.c.bf16 %v143_v4, %v139_v3  ;;  %v3531_v15 = vpack.c.bf16 %v145_v7, %v141_v5  ;;  %v3533_v20 = vpack.c.bf16 %v154_v13, %v150_v12  ;;  %v155_v31 = vld [vmem:[%s7966_s1 + $0x440] sm:$0xff]  ;;  %v161_v35 = vld [vmem:[%s7966_s1 + $0x470] sm:$0xff]  ;;  %v164_v36 = vld [vmem:[%s7966_s1 + $0x488] sm:$0xff] }
  0x30   :  { %3514 = vmatprep.subr.bf16.mxu1 %v3513_v19  ;;  %v149_v19 = vld [vmem:[%s7966_s1 + $0x410] sm:$0xff]  ;;  %v2925_v30 = vpack.c.bf16 %v160_v23, %v156_v22  ;;  %v159_v32 = vld [vmem:[%s7966_s1 + $0x460] sm:$0xff]  ;;  %v168_v37 = vld [vmem:[%s7966_s1 + $0x4a8] sm:$0xff] }
  0x31   :  { %v3535_v29 = vpack.c.bf16 %v153_v21, %v149_v19  ;;  %v2929_v43 = vpack.c.bf16 %v168_v37, %v164_v36  ;;  %v163_v44 = vld [vmem:[%s7966_s1 + $0x480] sm:$0xff]  ;;  %v165_v46 = vld [vmem:[%s7966_s1 + $0x490] sm:$0xff]  ;;  %v172_v48 = vld [vmem:[%s7966_s1 + $0x4c8] sm:$0xff] }
  0x32   :  { %2904 = vmatpush1.bf16.msra.mxu0 %v2903_v26  ;;  %v158_v26 = vld [vmem:[%s7966_s1 + $0x458] sm:$0xff]  ;;  %v176_v49 = vld [vmem:[%s7966_s1 + $0x4e8] sm:$0xff]  ;;  %v171_v55 = vld [vmem:[%s7966_s1 + $0x4c0] sm:$0xff] }
  0x33   :  { %3516 = vmatpush1.bf16.msra.mxu1 %v3515_v27  ;;  %2906 = vmatprep.subr.bf16.mxu0 %v2905_v28  ;;  %v162_v27 = vld [vmem:[%s7966_s1 + $0x478] sm:$0xff]  ;;  %v2923_v28 = vpack.c.bf16 %v151_v18, %v147_v17  ;;  %v2933_v54 = vpack.c.bf16 %v176_v49, %v172_v48  ;;  %v175_v56 = vld [vmem:[%s7966_s1 + $0x4e0] sm:$0xff]  ;;  %v177_v59 = vld [vmem:[%s7966_s1 + $0x4f0] sm:$0xff] }
  0x34   :  { %3518 = vmatprep.subr.bf16.mxu1 %v3517_v33  ;;  %v157_v33 = vld [vmem:[%s7966_s1 + $0x450] sm:$0xff]  ;;  %v3537_v34 = vpack.c.bf16 %v162_v27, %v158_v26  ;;  %v174_v50 = vld [vmem:[%s7966_s1 + $0x4d8] sm:$0xff]  ;;  %v180_v60 = vld [vmem:[%s7966_s1 + $0x508] sm:$0xff] }
  0x35   :  { %v3539_v42 = vpack.c.bf16 %v161_v35, %v157_v33  ;;  %v184_v62 = vld [vmem:[%s7966_s1 + $0x528] sm:$0xff]  ;;  %v182_v63 = vld [vmem:[%s7966_s1 + $0x518] sm:$0xff]  ;;  %v179_v4 = vld [vmem:[%s7966_s1 + $0x500] sm:$0xff] }
  0x36   :  { %2908 = vmatpush1.bf16.msra.mxu0 %v2907_v39  ;;  %v166_v39 = vld [vmem:[%s7966_s1 + $0x498] sm:$0xff]  ;;  %v2937_v3 = vpack.c.bf16 %v184_v62, %v180_v60  ;;  %v183_v5 = vld [vmem:[%s7966_s1 + $0x520] sm:$0xff]  ;;  %v185_v8 = vld [vmem:[%s7966_s1 + $0x530] sm:$0xff] }
  0x37   :  { %3520 = vmatpush1.bf16.msra.mxu1 %v3519_v40  ;;  %2910 = vmatprep.subr.bf16.mxu0 %v2909_v41  ;;  %v170_v40 = vld [vmem:[%s7966_s1 + $0x4b8] sm:$0xff]  ;;  %v2927_v41 = vpack.c.bf16 %v159_v32, %v155_v31  ;;  %v188_v9 = vld [vmem:[%s7966_s1 + $0x548] sm:$0xff]  ;;  %v187_v17 = vld [vmem:[%s7966_s1 + $0x540] sm:$0xff] }
  0x38   :  { %3522 = vmatprep.subr.bf16.mxu1 %v3521_v45  ;;  %v167_v45 = vld [vmem:[%s7966_s1 + $0x4a0] sm:$0xff]  ;;  %v3541_v47 = vpack.c.bf16 %v170_v40, %v166_v39  ;;  %v192_v10 = vld [vmem:[%s7966_s1 + $0x568] sm:$0xff]  ;;  %v190_v12 = vld [vmem:[%s7966_s1 + $0x558] sm:$0xff] }
  0x39   :  { %v194_v13 = vld [vmem:[%s7966_s1 + $0x578] sm:$0xff]  ;;  %v191_v18 = vld [vmem:[%s7966_s1 + $0x560] sm:$0xff]  ;;  %v189_v19 = vld [vmem:[%s7966_s1 + $0x550] sm:$0xff] }
  0x3a   :  { %2912 = vmatpush1.bf16.msra.mxu0 %v2911_v51  ;;  %v178_v51 = vld [vmem:[%s7966_s1 + $0x4f8] sm:$0xff]  ;;  %v193_v21 = vld [vmem:[%s7966_s1 + $0x570] sm:$0xff]  ;;  %v196_v22 = vld [vmem:[%s7966_s1 + $0x588] sm:$0xff] }
  0x3b   :  { %3524 = vmatpush1.bf16.msra.mxu1 %v3523_v52  ;;  %2914 = vmatprep.subr.bf16.mxu0 %v2913_v53  ;;  %v2931_v52 = vpack.c.bf16 %v167_v45, %v163_v44  ;;  %v3545_v58 = vpack.c.bf16 %v178_v51, %v174_v50  ;;  %v200_v23 = vld [vmem:[%s7966_s1 + $0x5a8] sm:$0xff]  ;;  %v198_v26 = vld [vmem:[%s7966_s1 + $0x598] sm:$0xff]  ;;  %v195_v31 = vld [vmem:[%s7966_s1 + $0x580] sm:$0xff] }
  0x3c   :  { %3526 = vmatprep.subr.bf16.mxu1 %v3525_v57  ;;  %v173_v57 = vld [vmem:[%s7966_s1 + $0x4d0] sm:$0xff]  ;;  %v202_v27 = vld [vmem:[%s7966_s1 + $0x5b8] sm:$0xff]  ;;  %v199_v32 = vld [vmem:[%s7966_s1 + $0x5a0] sm:$0xff] }
  0x3d   :  { %v197_v33 = vld [vmem:[%s7966_s1 + $0x590] sm:$0xff]  ;;  %v204_v36 = vld [vmem:[%s7966_s1 + $0x5c8] sm:$0xff]  ;;  %v210_v39 = vld [vmem:[%s7966_s1 + $0x5f8] sm:$0xff]  ;;  %v2947_v40 = vpack.c.bf16 %v199_v32, %v195_v31 }
  0x3e   :  { %2916 = vmatpush1.bf16.msra.mxu0 %v2915_v0  ;;  %v186_v0 = vld [vmem:[%s7966_s1 + $0x538] sm:$0xff]  ;;  %v201_v35 = vld [vmem:[%s7966_s1 + $0x5b0] sm:$0xff]  ;;  %v208_v37 = vld [vmem:[%s7966_s1 + $0x5e8] sm:$0xff] }
  0x3f   :  { %3528 = vmatpush1.bf16.msra.mxu1 %v3527_v1  ;;  %2918 = vmatprep.subr.bf16.mxu0 %v2917_v2  ;;  %v2935_v1 = vpack.c.bf16 %v175_v56, %v171_v55  ;;  %v3547_v2 = vpack.c.bf16 %v177_v59, %v173_v57  ;;  %v3549_v7 = vpack.c.bf16 %v186_v0, %v182_v63  ;;  %v207_v44 = vld [vmem:[%s7966_s1 + $0x5e0] sm:$0xff]  ;;  %v205_v45 = vld [vmem:[%s7966_s1 + $0x5d0] sm:$0xff]  ;;  %v216_v48 = vld [vmem:[%s7966_s1 + $0x628] sm:$0xff] }
  0x40   :  { %3530 = vmatprep.subr.bf16.mxu1 %v3529_v6  ;;  %v181_v6 = vld [vmem:[%s7966_s1 + $0x510] sm:$0xff]  ;;  %v214_v49 = vld [vmem:[%s7966_s1 + $0x618] sm:$0xff]  ;;  %v215_v55 = vld [vmem:[%s7966_s1 + $0x620] sm:$0xff] }
  0x41   :  { %v218_v50 = vld [vmem:[%s7966_s1 + $0x638] sm:$0xff]  ;;  %v213_v56 = vld [vmem:[%s7966_s1 + $0x610] sm:$0xff]  ;;  %v220_v59 = vld [vmem:[%s7966_s1 + $0x648] sm:$0xff] }
  0x42   :  { %2920 = vmatpush1.bf16.msra.mxu0 %v2919_v14  ;;  %v2939_v14 = vpack.c.bf16 %v183_v5, %v179_v4  ;;  %v3565_v57 = vpack.c.bf16 %v218_v50, %v214_v49  ;;  %v224_v60 = vld [vmem:[%s7966_s1 + $0x668] sm:$0xff]  ;;  %v222_v62 = vld [vmem:[%s7966_s1 + $0x658] sm:$0xff]  ;;  %v223_v4 = vld [vmem:[%s7966_s1 + $0x660] sm:$0xff] }
  0x43   :  { %3532 = vmatpush1.bf16.msra.mxu1 %v3531_v15  ;;  %2922 = vmatprep.subr.bf16.mxu0 %v2921_v16  ;;  %v3551_v15 = vpack.c.bf16 %v185_v8, %v181_v6  ;;  %v2941_v16 = vpack.c.bf16 %v192_v10, %v188_v9  ;;  %v226_v63 = vld [vmem:[%s7966_s1 + $0x678] sm:$0xff]  ;;  %v221_v5 = vld [vmem:[%s7966_s1 + $0x650] sm:$0xff]  ;;  %v228_v8 = vld [vmem:[%s7966_s1 + $0x688] sm:$0xff] }
  0x44   :  { %3534 = vmatprep.subr.bf16.mxu1 %v3533_v20  ;;  %v3553_v20 = vpack.c.bf16 %v194_v13, %v190_v12  ;;  %v3569_v6 = vpack.c.bf16 %v226_v63, %v222_v62  ;;  %v232_v9 = vld [vmem:[%s7966_s1 + $0x6a8] sm:$0xff]  ;;  %v230_v10 = vld [vmem:[%s7966_s1 + $0x698] sm:$0xff]  ;;  %v239_v31 = vld [vmem:[%s7966_s1 + $0x6e0] sm:$0xff] }
  0x45   :  { %1459 = vmatmul.mubr.f32.vlgmr.msra.gmra.mrb[0].mxu0 %v4460_v25  ;;  %v234_v12 = vld [vmem:[%s7966_s1 + $0x6b8] sm:$0xff]  ;;  %v237_v32 = vld [vmem:[%s7966_s1 + $0x6d0] sm:$0xff]  ;;  %vm2841_vm3 = vmor %vm2840_vm2, %vm1381_vm1 }
  0x46   :  { %2924 = vmatpush1.bf16.msra.mxu0 %v2923_v28  ;;  %2169 = vmatmul.mubr.f32.vlgmr.msra.gmra.mrb[0].mxu1 %v4460_v25  ;;  %v169_v25 = vld [vmem:[%s7966_s1 + $0x4b0] sm:$0xff]  ;;  %v2943_v28 = vpack.c.bf16 %v191_v18, %v187_v17  ;;  %v231_v17 = vld [vmem:[%s7966_s1 + $0x6a0] sm:$0xff]  ;;  %v258_v49 = vld [vmem:[%s7966_s1 + $0x778] sm:$0xff] }
  0x47   :  { %3536 = vmatpush1.bf16.msra.mxu1 %v3535_v29  ;;  %2926 = vmatprep.subr.bf16.mxu0 %v2925_v30  ;;  %v3543_v53 = vpack.c.bf16 %v169_v25, %v165_v46  ;;  %v3555_v29 = vpack.c.bf16 %v193_v21, %v189_v19  ;;  %v2945_v30 = vpack.c.bf16 %v200_v23, %v196_v22  ;;  %v212_v25 = vld [vmem:[%s7966_s1 + $0x608] sm:$0xff]  ;;  %v229_v18 = vld [vmem:[%s7966_s1 + $0x690] sm:$0xff]  ;;  %v238_v23 = vld [vmem:[%s7966_s1 + $0x6d8] sm:$0xff] }
  0x48   :  { %3538 = vmatprep.subr.bf16.mxu1 %v3537_v34  ;;  %1529 = vmatprep.mubr.f32.mxu0 %v1290_v38  ;;  %v3557_v34 = vpack.c.bf16 %v202_v27, %v198_v26  ;;  %v3573_v19 = vpack.c.bf16 %v234_v12, %v230_v10  ;;  %v236_v21 = vld [vmem:[%s7966_s1 + $0x6c8] sm:$0xff]  ;;  %v242_v26 = vld [vmem:[%s7966_s1 + $0x6f8] sm:$0xff]  ;;  %vm2843_vm5 = vmor %vm2842_vm4, %vm2841_vm3 }
  0x49   :  { %2239 = vmatprep.mubr.f32.mxu1 %v1290_v38  ;;  %v206_v38 = vld [vmem:[%s7966_s1 + $0x5d8] sm:$0xff]  ;;  %v240_v22 = vld [vmem:[%s7966_s1 + $0x6e8] sm:$0xff]  ;;  %vm2845_vm7 = vmor %vm2844_vm6, %vm2843_vm5 }
  0x4a   :  { %2928 = vmatpush1.bf16.msra.mxu0 %v2927_v41  ;;  %v3559_v41 = vpack.c.bf16 %v201_v35, %v197_v33  ;;  %v3561_v46 = vpack.c.bf16 %v210_v39, %v206_v38  ;;  %v3577_v33 = vpack.c.bf16 %v242_v26, %v238_v23  ;;  %v244_v35 = vld [vmem:[%s7966_s1 + $0x708] sm:$0xff]  ;;  %v250_v38 = vld [vmem:[%s7966_s1 + $0x738] sm:$0xff] }
  0x4b   :  { %3540 = vmatpush1.bf16.msra.mxu1 %v3539_v42  ;;  %2930 = vmatprep.subr.bf16.mxu0 %v2929_v43  ;;  %v2949_v42 = vpack.c.bf16 %v208_v37, %v204_v36  ;;  %v203_v43 = vld [vmem:[%s7966_s1 + $0x5c0] sm:$0xff]  ;;  %v248_v36 = vld [vmem:[%s7966_s1 + $0x728] sm:$0xff]  ;;  %v246_v37 = vld [vmem:[%s7966_s1 + $0x718] sm:$0xff] }
  0x4c   :  { %3542 = vmatprep.subr.bf16.mxu1 %v3541_v47  ;;  %v209_v47 = vld [vmem:[%s7966_s1 + $0x5f0] sm:$0xff]  ;;  %v2951_v51 = vpack.c.bf16 %v207_v44, %v203_v43  ;;  %v247_v43 = vld [vmem:[%s7966_s1 + $0x720] sm:$0xff]  ;;  %v266_v62 = vld [vmem:[%s7966_s1 + $0x7b8] sm:$0xff] }
  0x4d   :  { %v245_v44 = vld [vmem:[%s7966_s1 + $0x710] sm:$0xff]  ;;  %v274_v10 = vld [vmem:[%s7966_s1 + $0x7f8] sm:$0xff] }
  0x4e   :  { %2932 = vmatpush1.bf16.msra.mxu0 %v2931_v52  ;;  %v3563_v52 = vpack.c.bf16 %v209_v47, %v205_v45  ;;  %v3581_v45 = vpack.c.bf16 %v250_v38, %v246_v37  ;;  %v252_v47 = vld [vmem:[%s7966_s1 + $0x748] sm:$0xff]  ;;  %v282_v23 = vld [vmem:[%s7966_s1 + $0x838] sm:$0xff] }
  0x4f   :  { %3544 = vmatpush1.bf16.msra.mxu1 %v3543_v53  ;;  %2934 = vmatprep.subr.bf16.mxu0 %v2933_v54  ;;  %v2953_v53 = vpack.c.bf16 %v216_v48, %v212_v25  ;;  %v211_v54 = vld [vmem:[%s7966_s1 + $0x600] sm:$0xff]  ;;  %v256_v25 = vld [vmem:[%s7966_s1 + $0x768] sm:$0xff]  ;;  %v254_v48 = vld [vmem:[%s7966_s1 + $0x758] sm:$0xff] }
  0x50   :  { %3546 = vmatprep.subr.bf16.mxu1 %v3545_v58  ;;  %v217_v58 = vld [vmem:[%s7966_s1 + $0x630] sm:$0xff]  ;;  %v2955_v0 = vpack.c.bf16 %v215_v55, %v211_v54  ;;  %v255_v54 = vld [vmem:[%s7966_s1 + $0x760] sm:$0xff]  ;;  %v290_v37 = vld [vmem:[%s7966_s1 + $0x878] sm:$0xff] }
  0x51   :  { %v253_v55 = vld [vmem:[%s7966_s1 + $0x750] sm:$0xff] }
  0x52   :  { %2936 = vmatpush1.bf16.msra.mxu0 %v2935_v1  ;;  %v3567_v1 = vpack.c.bf16 %v217_v58, %v213_v56  ;;  %v3585_v56 = vpack.c.bf16 %v258_v49, %v254_v48  ;;  %v260_v58 = vld [vmem:[%s7966_s1 + $0x788] sm:$0xff]  ;;  %v294_v49 = vld [vmem:[%s7966_s1 + $0x898] sm:$0xff] }
  0x53   :  { %3548 = vmatpush1.bf16.msra.mxu1 %v3547_v2  ;;  %2938 = vmatprep.subr.bf16.mxu0 %v2937_v3  ;;  %v2957_v2 = vpack.c.bf16 %v224_v60, %v220_v59  ;;  %v219_v3 = vld [vmem:[%s7966_s1 + $0x640] sm:$0xff]  ;;  %v264_v59 = vld [vmem:[%s7966_s1 + $0x7a8] sm:$0xff]  ;;  %v262_v60 = vld [vmem:[%s7966_s1 + $0x798] sm:$0xff] }
  0x54   :  { %3550 = vmatprep.subr.bf16.mxu1 %v3549_v7  ;;  %v225_v7 = vld [vmem:[%s7966_s1 + $0x670] sm:$0xff]  ;;  %v2959_v13 = vpack.c.bf16 %v223_v4, %v219_v3  ;;  %v263_v3 = vld [vmem:[%s7966_s1 + $0x7a0] sm:$0xff]  ;;  %v296_v48 = vld [vmem:[%s7966_s1 + $0x8a8] sm:$0xff] }
  0x55   :  { %v261_v4 = vld [vmem:[%s7966_s1 + $0x790] sm:$0xff] }
  0x56   :  { %2940 = vmatpush1.bf16.msra.mxu0 %v2939_v14  ;;  %v3571_v14 = vpack.c.bf16 %v225_v7, %v221_v5  ;;  %v3589_v5 = vpack.c.bf16 %v266_v62, %v262_v60  ;;  %v268_v7 = vld [vmem:[%s7966_s1 + $0x7c8] sm:$0xff]  ;;  %v302_v62 = vld [vmem:[%s7966_s1 + $0x8d8] sm:$0xff] }
  0x57   :  { %3552 = vmatpush1.bf16.msra.mxu1 %v3551_v15  ;;  %2942 = vmatprep.subr.bf16.mxu0 %v2941_v16  ;;  %v2961_v15 = vpack.c.bf16 %v232_v9, %v228_v8  ;;  %v227_v16 = vld [vmem:[%s7966_s1 + $0x680] sm:$0xff]  ;;  %v272_v8 = vld [vmem:[%s7966_s1 + $0x7e8] sm:$0xff]  ;;  %v270_v9 = vld [vmem:[%s7966_s1 + $0x7d8] sm:$0xff] }
  0x58   :  { %3554 = vmatprep.subr.bf16.mxu1 %v3553_v20  ;;  %v233_v20 = vld [vmem:[%s7966_s1 + $0x6b0] sm:$0xff]  ;;  %v2963_v27 = vpack.c.bf16 %v231_v17, %v227_v16  ;;  %v271_v16 = vld [vmem:[%s7966_s1 + $0x7e0] sm:$0xff]  ;;  %v304_v60 = vld [vmem:[%s7966_s1 + $0x8e8] sm:$0xff] }
  0x59   :  { %v269_v17 = vld [vmem:[%s7966_s1 + $0x7d0] sm:$0xff] }
  0x5a   :  { %2944 = vmatpush1.bf16.msra.mxu0 %v2943_v28  ;;  %v3575_v28 = vpack.c.bf16 %v233_v20, %v229_v18  ;;  %v3593_v18 = vpack.c.bf16 %v274_v10, %v270_v9  ;;  %v276_v20 = vld [vmem:[%s7966_s1 + $0x808] sm:$0xff]  ;;  %v310_v10 = vld [vmem:[%s7966_s1 + $0x918] sm:$0xff] }
  0x5b   :  { %3556 = vmatpush1.bf16.msra.mxu1 %v3555_v29  ;;  %2946 = vmatprep.subr.bf16.mxu0 %v2945_v30  ;;  %v2965_v29 = vpack.c.bf16 %v240_v22, %v236_v21  ;;  %v235_v30 = vld [vmem:[%s7966_s1 + $0x6c0] sm:$0xff]  ;;  %v280_v21 = vld [vmem:[%s7966_s1 + $0x828] sm:$0xff]  ;;  %v278_v22 = vld [vmem:[%s7966_s1 + $0x818] sm:$0xff] }
  0x5c   :  { %3558 = vmatprep.subr.bf16.mxu1 %v3557_v34  ;;  %v241_v34 = vld [vmem:[%s7966_s1 + $0x6f0] sm:$0xff]  ;;  %v2967_v39 = vpack.c.bf16 %v239_v31, %v235_v30  ;;  %v279_v30 = vld [vmem:[%s7966_s1 + $0x820] sm:$0xff]  ;;  %v312_v9 = vld [vmem:[%s7966_s1 + $0x928] sm:$0xff] }
  0x5d   :  { %v277_v31 = vld [vmem:[%s7966_s1 + $0x810] sm:$0xff] }
  0x5e   :  { %2948 = vmatpush1.bf16.msra.mxu0 %v2947_v40  ;;  %v3579_v40 = vpack.c.bf16 %v241_v34, %v237_v32  ;;  %v3597_v32 = vpack.c.bf16 %v282_v23, %v278_v22  ;;  %v284_v34 = vld [vmem:[%s7966_s1 + $0x848] sm:$0xff]  ;;  %v318_v23 = vld [vmem:[%s7966_s1 + $0x958] sm:$0xff] }
  0x5f   :  { %3560 = vmatpush1.bf16.msra.mxu1 %v3559_v41  ;;  %2950 = vmatprep.subr.bf16.mxu0 %v2949_v42  ;;  %v2969_v41 = vpack.c.bf16 %v248_v36, %v244_v35  ;;  %v243_v42 = vld [vmem:[%s7966_s1 + $0x700] sm:$0xff]  ;;  %v288_v35 = vld [vmem:[%s7966_s1 + $0x868] sm:$0xff]  ;;  %v286_v36 = vld [vmem:[%s7966_s1 + $0x858] sm:$0xff] }
  0x60   :  { %3562 = vmatprep.subr.bf16.mxu1 %v3561_v46  ;;  %v249_v46 = vld [vmem:[%s7966_s1 + $0x730] sm:$0xff]  ;;  %v2971_v50 = vpack.c.bf16 %v247_v43, %v243_v42  ;;  %v283_v42 = vld [vmem:[%s7966_s1 + $0x840] sm:$0xff]  ;;  %v320_v22 = vld [vmem:[%s7966_s1 + $0x968] sm:$0xff] }
  0x61   :  { %v287_v43 = vld [vmem:[%s7966_s1 + $0x860] sm:$0xff] }
  0x62   :  { %2952 = vmatpush1.bf16.msra.mxu0 %v2951_v51  ;;  %v3583_v51 = vpack.c.bf16 %v249_v46, %v245_v44  ;;  %v285_v44 = vld [vmem:[%s7966_s1 + $0x850] sm:$0xff]  ;;  %v3601_v46 = vpack.c.bf16 %v290_v37, %v286_v36  ;;  %v328_v36 = vld [vmem:[%s7966_s1 + $0x9a8] sm:$0xff]  ;;  %v326_v37 = vld [vmem:[%s7966_s1 + $0x998] sm:$0xff] }
  0x63   :  { %3564 = vmatpush1.bf16.msra.mxu1 %v3563_v52  ;;  %2954 = vmatprep.subr.bf16.mxu0 %v2953_v53  ;;  %v2973_v52 = vpack.c.bf16 %v256_v25, %v252_v47  ;;  %v251_v53 = vld [vmem:[%s7966_s1 + $0x740] sm:$0xff]  ;;  %v289_v47 = vld [vmem:[%s7966_s1 + $0x870] sm:$0xff]  ;;  %v292_v25 = vld [vmem:[%s7966_s1 + $0x888] sm:$0xff] }
  0x64   :  { %3566 = vmatprep.subr.bf16.mxu1 %v3565_v57  ;;  %v257_v57 = vld [vmem:[%s7966_s1 + $0x770] sm:$0xff]  ;;  %v2975_v63 = vpack.c.bf16 %v255_v54, %v251_v53  ;;  %v3603_v53 = vpack.c.bf16 %v289_v47, %v285_v44  ;;  %v2993_v54 = vpack.c.bf16 %v296_v48, %v292_v25  ;;  %v327_v44 = vld [vmem:[%s7966_s1 + $0x9a0] sm:$0xff]  ;;  %v332_v48 = vld [vmem:[%s7966_s1 + $0x9c8] sm:$0xff] }
  0x65   :  { %v329_v25 = vld [vmem:[%s7966_s1 + $0x9b0] sm:$0xff] }
  0x66   :  { %2956 = vmatpush1.bf16.msra.mxu0 %v2955_v0  ;;  %v3587_v0 = vpack.c.bf16 %v257_v57, %v253_v55  ;;  %v291_v55 = vld [vmem:[%s7966_s1 + $0x880] sm:$0xff]  ;;  %v293_v57 = vld [vmem:[%s7966_s1 + $0x890] sm:$0xff] }
  0x67   :  { %3568 = vmatpush1.bf16.msra.mxu1 %v3567_v1  ;;  %2958 = vmatprep.subr.bf16.mxu0 %v2957_v2  ;;  %v2977_v1 = vpack.c.bf16 %v264_v59, %v260_v58  ;;  %v259_v2 = vld [vmem:[%s7966_s1 + $0x780] sm:$0xff]  ;;  %v300_v59 = vld [vmem:[%s7966_s1 + $0x8c8] sm:$0xff] }
  0x68   :  { %3570 = vmatprep.subr.bf16.mxu1 %v3569_v6  ;;  %v265_v6 = vld [vmem:[%s7966_s1 + $0x7b0] sm:$0xff]  ;;  %v2979_v12 = vpack.c.bf16 %v263_v3, %v259_v2  ;;  %v2997_v2 = vpack.c.bf16 %v304_v60, %v300_v59  ;;  %v299_v3 = vld [vmem:[%s7966_s1 + $0x8c0] sm:$0xff]  ;;  %v340_v59 = vld [vmem:[%s7966_s1 + $0xa08] sm:$0xff] }
  0x69   :  { %v344_v60 = vld [vmem:[%s7966_s1 + $0xa28] sm:$0xff] }
  0x6a   :  { %2960 = vmatpush1.bf16.msra.mxu0 %v2959_v13  ;;  %v3591_v13 = vpack.c.bf16 %v265_v6, %v261_v4  ;;  %v303_v4 = vld [vmem:[%s7966_s1 + $0x8e0] sm:$0xff] }
  0x6b   :  { %3572 = vmatpush1.bf16.msra.mxu1 %v3571_v14  ;;  %2962 = vmatprep.subr.bf16.mxu0 %v2961_v15  ;;  %v2981_v14 = vpack.c.bf16 %v272_v8, %v268_v7  ;;  %v267_v15 = vld [vmem:[%s7966_s1 + $0x7c0] sm:$0xff]  ;;  %v305_v7 = vld [vmem:[%s7966_s1 + $0x8f0] sm:$0xff]  ;;  %v308_v8 = vld [vmem:[%s7966_s1 + $0x908] sm:$0xff] }
  0x6c   :  { %3574 = vmatprep.subr.bf16.mxu1 %v3573_v19  ;;  %v273_v19 = vld [vmem:[%s7966_s1 + $0x7f0] sm:$0xff]  ;;  %v2983_v26 = vpack.c.bf16 %v271_v16, %v267_v15  ;;  %v3001_v15 = vpack.c.bf16 %v312_v9, %v308_v8  ;;  %v307_v16 = vld [vmem:[%s7966_s1 + $0x900] sm:$0xff]  ;;  %v348_v8 = vld [vmem:[%s7966_s1 + $0xa48] sm:$0xff] }
  0x6d   :  { %v352_v9 = vld [vmem:[%s7966_s1 + $0xa68] sm:$0xff] }
  0x6e   :  { %2964 = vmatpush1.bf16.msra.mxu0 %v2963_v27  ;;  %v3595_v27 = vpack.c.bf16 %v273_v19, %v269_v17  ;;  %v311_v17 = vld [vmem:[%s7966_s1 + $0x920] sm:$0xff] }
  0x6f   :  { %3576 = vmatpush1.bf16.msra.mxu1 %v3575_v28  ;;  %2966 = vmatprep.subr.bf16.mxu0 %v2965_v29  ;;  %v2985_v28 = vpack.c.bf16 %v280_v21, %v276_v20  ;;  %v275_v29 = vld [vmem:[%s7966_s1 + $0x800] sm:$0xff]  ;;  %v313_v20 = vld [vmem:[%s7966_s1 + $0x930] sm:$0xff]  ;;  %v316_v21 = vld [vmem:[%s7966_s1 + $0x948] sm:$0xff] }
  0x70   :  { %3578 = vmatprep.subr.bf16.mxu1 %v3577_v33  ;;  %v281_v33 = vld [vmem:[%s7966_s1 + $0x830] sm:$0xff]  ;;  %v2987_v38 = vpack.c.bf16 %v279_v30, %v275_v29  ;;  %v3005_v29 = vpack.c.bf16 %v320_v22, %v316_v21  ;;  %v315_v30 = vld [vmem:[%s7966_s1 + $0x940] sm:$0xff]  ;;  %v356_v21 = vld [vmem:[%s7966_s1 + $0xa88] sm:$0xff] }
  0x71   :  { %v360_v22 = vld [vmem:[%s7966_s1 + $0xaa8] sm:$0xff] }
  0x72   :  { %2968 = vmatpush1.bf16.msra.mxu0 %v2967_v39  ;;  %v4980_v39 = vld [vmem:[%s7967_s0 + $0x8] sm:$0xff] }
  0x73   :  { %3580 = vmatpush1.bf16.msra.mxu1 %v3579_v40  ;;  %2970 = vmatprep.subr.bf16.mxu0 %v2969_v41  ;;  %v3599_v40 = vpack.c.bf16 %v281_v33, %v277_v31  ;;  %v2989_v41 = vpack.c.bf16 %v288_v35, %v284_v34  ;;  %v319_v31 = vld [vmem:[%s7966_s1 + $0x960] sm:$0xff]  ;;  %v321_v34 = vld [vmem:[%s7966_s1 + $0x970] sm:$0xff]  ;;  %v324_v35 = vld [vmem:[%s7966_s1 + $0x988] sm:$0xff] }
  0x74   :  { %3582 = vmatprep.subr.bf16.mxu1 %v3581_v45  ;;  %v4993_v45 = vrot.slane %v4980_v39, %v4427_v11 }
  0x76   :  { %2972 = vmatpush1.bf16.msra.mxu0 %v2971_v50  ;;  %v298_v50 = vld [vmem:[%s7966_s1 + $0x8b8] sm:$0xff] }
  0x77   :  { %3584 = vmatpush1.bf16.msra.mxu1 %v3583_v51  ;;  %2974 = vmatprep.subr.bf16.mxu0 %v2973_v52  ;;  %v1306_v51 = vcombine.high %v4993_v45, %v4993_v45  ;;  %v2991_v52 = vpack.c.bf16 %v287_v43, %v283_v42  ;;  %v3605_v58 = vpack.c.bf16 %v298_v50, %v294_v49  ;;  %v323_v43 = vld [vmem:[%s7966_s1 + $0x980] sm:$0xff]  ;;  %v336_v49 = vld [vmem:[%s7966_s1 + $0x9e8] sm:$0xff]  ;;  %v334_v50 = vld [vmem:[%s7966_s1 + $0x9d8] sm:$0xff] }
  0x78   :  { %3586 = vmatprep.subr.bf16.mxu1 %v3585_v56  ;;  %v295_v56 = vld [vmem:[%s7966_s1 + $0x8a0] sm:$0xff]  ;;  %v3009_v42 = vpack.c.bf16 %v328_v36, %v324_v35  ;;  %v364_v35 = vld [vmem:[%s7966_s1 + $0xac8] sm:$0xff] }
  0x79   :  { %v368_v36 = vld [vmem:[%s7966_s1 + $0xae8] sm:$0xff] }
  0x7a   :  { %2976 = vmatpush1.bf16.msra.mxu0 %v2975_v63  ;;  %v306_v63 = vld [vmem:[%s7966_s1 + $0x8f8] sm:$0xff] }
  0x7b   :  { %3588 = vmatpush1.bf16.msra.mxu1 %v3587_v0  ;;  %2978 = vmatprep.subr.bf16.mxu0 %v2977_v1  ;;  %v2995_v0 = vpack.c.bf16 %v295_v56, %v291_v55  ;;  %v3609_v6 = vpack.c.bf16 %v306_v63, %v302_v62  ;;  %v331_v55 = vld [vmem:[%s7966_s1 + $0x9c0] sm:$0xff]  ;;  %v342_v62 = vld [vmem:[%s7966_s1 + $0xa18] sm:$0xff] }
  0x7c   :  { %3590 = vmatprep.subr.bf16.mxu1 %v3589_v5  ;;  %v301_v5 = vld [vmem:[%s7966_s1 + $0x8d0] sm:$0xff]  ;;  %v335_v56 = vld [vmem:[%s7966_s1 + $0x9e0] sm:$0xff]  ;;  %v346_v63 = vld [vmem:[%s7966_s1 + $0xa38] sm:$0xff] }
  0x7e   :  { %2980 = vmatpush1.bf16.msra.mxu0 %v2979_v12  ;;  %v314_v12 = vld [vmem:[%s7966_s1 + $0x938] sm:$0xff] }
  0x7f   :  { %3592 = vmatpush1.bf16.msra.mxu1 %v3591_v13  ;;  %2982 = vmatprep.subr.bf16.mxu0 %v2981_v14  ;;  %v2999_v13 = vpack.c.bf16 %v303_v4, %v299_v3  ;;  %v3611_v14 = vpack.c.bf16 %v305_v7, %v301_v5  ;;  %v3613_v19 = vpack.c.bf16 %v314_v12, %v310_v10  ;;  %v339_v3 = vld [vmem:[%s7966_s1 + $0xa00] sm:$0xff]  ;;  %v341_v5 = vld [vmem:[%s7966_s1 + $0xa10] sm:$0xff]  ;;  %v350_v10 = vld [vmem:[%s7966_s1 + $0xa58] sm:$0xff] }
  0x80   :  { %3594 = vmatprep.subr.bf16.mxu1 %v3593_v18  ;;  %v309_v18 = vld [vmem:[%s7966_s1 + $0x910] sm:$0xff]  ;;  %v343_v4 = vld [vmem:[%s7966_s1 + $0xa20] sm:$0xff]  ;;  %v354_v12 = vld [vmem:[%s7966_s1 + $0xa78] sm:$0xff] }
  0x81   :  { %v345_v7 = vld [vmem:[%s7966_s1 + $0xa30] sm:$0xff] }
  0x82   :  { %2984 = vmatpush1.bf16.msra.mxu0 %v2983_v26  ;;  %v322_v26 = vld [vmem:[%s7966_s1 + $0x978] sm:$0xff] }
  0x83   :  { %3596 = vmatpush1.bf16.msra.mxu1 %v3595_v27  ;;  %2986 = vmatprep.subr.bf16.mxu0 %v2985_v28  ;;  %v3003_v27 = vpack.c.bf16 %v311_v17, %v307_v16  ;;  %v3615_v28 = vpack.c.bf16 %v313_v20, %v309_v18  ;;  %v3617_v33 = vpack.c.bf16 %v322_v26, %v318_v23  ;;  %v347_v16 = vld [vmem:[%s7966_s1 + $0xa40] sm:$0xff]  ;;  %v349_v18 = vld [vmem:[%s7966_s1 + $0xa50] sm:$0xff]  ;;  %v358_v23 = vld [vmem:[%s7966_s1 + $0xa98] sm:$0xff] }
  0x84   :  { %3598 = vmatprep.subr.bf16.mxu1 %v3597_v32  ;;  %v317_v32 = vld [vmem:[%s7966_s1 + $0x950] sm:$0xff]  ;;  %v351_v17 = vld [vmem:[%s7966_s1 + $0xa60] sm:$0xff]  ;;  %v362_v26 = vld [vmem:[%s7966_s1 + $0xab8] sm:$0xff] }
  0x85   :  { %1530 = vmatmul.mubr.f32.vlgmr.msra.gmra.mrb[0].mxu0 %v4581_v24  ;;  %v353_v20 = vld [vmem:[%s7966_s1 + $0xa70] sm:$0xff] }
  0x86   :  { %2988 = vmatpush1.bf16.msra.mxu0 %v2987_v38  ;;  %2240 = vmatmul.mubr.f32.vlgmr.msra.gmra.mrb[0].mxu1 %v4581_v24  ;;  %v297_v24 = vld [vmem:[%s7966_s1 + $0x8b0] sm:$0xff]  ;;  %v330_v38 = vld [vmem:[%s7966_s1 + $0x9b8] sm:$0xff] }
  0x87   :  { %3600 = vmatpush1.bf16.msra.mxu1 %v3599_v40  ;;  %2990 = vmatprep.subr.bf16.mxu0 %v2989_v41  ;;  %v3607_v1 = vpack.c.bf16 %v297_v24, %v293_v57  ;;  %v3007_v40 = vpack.c.bf16 %v319_v31, %v315_v30  ;;  %v3619_v41 = vpack.c.bf16 %v321_v34, %v317_v32  ;;  %v333_v57 = vld [vmem:[%s7966_s1 + $0x9d0] sm:$0xff]  ;;  %v355_v30 = vld [vmem:[%s7966_s1 + $0xa80] sm:$0xff] }
  0x88   :  { %3602 = vmatprep.subr.bf16.mxu1 %v3601_v46  ;;  %1600 = vmatprep.mubr.f32.mxu0 %v1306_v51  ;;  %v325_v46 = vld [vmem:[%s7966_s1 + $0x990] sm:$0xff]  ;;  %v3621_v47 = vpack.c.bf16 %v330_v38, %v326_v37  ;;  %v359_v31 = vld [vmem:[%s7966_s1 + $0xaa0] sm:$0xff]  ;;  %v366_v37 = vld [vmem:[%s7966_s1 + $0xad8] sm:$0xff] }
  0x89   :  { %2310 = vmatprep.mubr.f32.mxu1 %v1306_v51  ;;  %v338_v51 = vld [vmem:[%s7966_s1 + $0x9f8] sm:$0xff]  ;;  %v337_v24 = vld [vmem:[%s7966_s1 + $0x9f0] sm:$0xff] }
  0x8a   :  { %2992 = vmatpush1.bf16.msra.mxu0 %v2991_v52  ;;  %v3011_v52 = vpack.c.bf16 %v327_v44, %v323_v43  ;;  %v357_v32 = vld [vmem:[%s7966_s1 + $0xa90] sm:$0xff]  ;;  %v370_v38 = vld [vmem:[%s7966_s1 + $0xaf8] sm:$0xff]  ;;  %v363_v43 = vld [vmem:[%s7966_s1 + $0xac0] sm:$0xff] }
  0x8b   :  { %3604 = vmatpush1.bf16.msra.mxu1 %v3603_v53  ;;  %2994 = vmatprep.subr.bf16.mxu0 %v2993_v54  ;;  %v3623_v53 = vpack.c.bf16 %v329_v25, %v325_v46  ;;  %v3013_v54 = vpack.c.bf16 %v336_v49, %v332_v48  ;;  %v361_v34 = vld [vmem:[%s7966_s1 + $0xab0] sm:$0xff]  ;;  %v367_v44 = vld [vmem:[%s7966_s1 + $0xae0] sm:$0xff]  ;;  %v372_v48 = vld [vmem:[%s7966_s1 + $0xb08] sm:$0xff] }
  0x8c   :  { %3606 = vmatprep.subr.bf16.mxu1 %v3605_v58  ;;  %v3625_v58 = vpack.c.bf16 %v338_v51, %v334_v50  ;;  %v365_v46 = vld [vmem:[%s7966_s1 + $0xad0] sm:$0xff]  ;;  %v376_v49 = vld [vmem:[%s7966_s1 + $0xb28] sm:$0xff]  ;;  %v374_v50 = vld [vmem:[%s7966_s1 + $0xb18] sm:$0xff] }
  0x8d   :  { %v369_v25 = vld [vmem:[%s7966_s1 + $0xaf0] sm:$0xff]  ;;  %v378_v51 = vld [vmem:[%s7966_s1 + $0xb38] sm:$0xff] }
  0x8e   :  { %2996 = vmatpush1.bf16.msra.mxu0 %v2995_v0  ;;  %v3015_v0 = vpack.c.bf16 %v335_v56, %v331_v55  ;;  %v371_v55 = vld [vmem:[%s7966_s1 + $0xb00] sm:$0xff] }
  0x8f   :  { %3608 = vmatpush1.bf16.msra.mxu1 %v3607_v1  ;;  %2998 = vmatprep.subr.bf16.mxu0 %v2997_v2  ;;  %v3627_v1 = vpack.c.bf16 %v337_v24, %v333_v57  ;;  %v3017_v2 = vpack.c.bf16 %v344_v60, %v340_v59  ;;  %v375_v56 = vld [vmem:[%s7966_s1 + $0xb20] sm:$0xff]  ;;  %v373_v57 = vld [vmem:[%s7966_s1 + $0xb10] sm:$0xff]  ;;  %v380_v59 = vld [vmem:[%s7966_s1 + $0xb48] sm:$0xff] }
  0x90   :  { %3610 = vmatprep.subr.bf16.mxu1 %v3609_v6  ;;  %v3629_v6 = vpack.c.bf16 %v346_v63, %v342_v62  ;;  %v377_v24 = vld [vmem:[%s7966_s1 + $0xb30] sm:$0xff]  ;;  %v384_v60 = vld [vmem:[%s7966_s1 + $0xb68] sm:$0xff]  ;;  %v382_v62 = vld [vmem:[%s7966_s1 + $0xb58] sm:$0xff] }
  0x91   :  { %v386_v63 = vld [vmem:[%s7966_s1 + $0xb78] sm:$0xff] }
  0x92   :  { %3000 = vmatpush1.bf16.msra.mxu0 %v2999_v13  ;;  %v3019_v13 = vpack.c.bf16 %v343_v4, %v339_v3  ;;  %v379_v3 = vld [vmem:[%s7966_s1 + $0xb40] sm:$0xff] }
  0x93   :  { %3612 = vmatpush1.bf16.msra.mxu1 %v3611_v14  ;;  %3002 = vmatprep.subr.bf16.mxu0 %v3001_v15  ;;  %v3631_v14 = vpack.c.bf16 %v345_v7, %v341_v5  ;;  %v3021_v15 = vpack.c.bf16 %v352_v9, %v348_v8  ;;  %v383_v4 = vld [vmem:[%s7966_s1 + $0xb60] sm:$0xff]  ;;  %v381_v5 = vld [vmem:[%s7966_s1 + $0xb50] sm:$0xff]  ;;  %v388_v8 = vld [vmem:[%s7966_s1 + $0xb88] sm:$0xff] }
  0x94   :  { %3614 = vmatprep.subr.bf16.mxu1 %v3613_v19  ;;  %v3633_v19 = vpack.c.bf16 %v354_v12, %v350_v10  ;;  %v385_v7 = vld [vmem:[%s7966_s1 + $0xb70] sm:$0xff]  ;;  %v392_v9 = vld [vmem:[%s7966_s1 + $0xba8] sm:$0xff]  ;;  %v390_v10 = vld [vmem:[%s7966_s1 + $0xb98] sm:$0xff] }
  0x95   :  { %v394_v12 = vld [vmem:[%s7966_s1 + $0xbb8] sm:$0xff] }
  0x96   :  { %3004 = vmatpush1.bf16.msra.mxu0 %v3003_v27  ;;  %v3023_v27 = vpack.c.bf16 %v351_v17, %v347_v16  ;;  %v387_v16 = vld [vmem:[%s7966_s1 + $0xb80] sm:$0xff] }
  0x97   :  { %3616 = vmatpush1.bf16.msra.mxu1 %v3615_v28  ;;  %3006 = vmatprep.subr.bf16.mxu0 %v3005_v29  ;;  %v3635_v28 = vpack.c.bf16 %v353_v20, %v349_v18  ;;  %v3025_v29 = vpack.c.bf16 %v360_v22, %v356_v21  ;;  %v391_v17 = vld [vmem:[%s7966_s1 + $0xba0] sm:$0xff]  ;;  %v389_v18 = vld [vmem:[%s7966_s1 + $0xb90] sm:$0xff]  ;;  %v396_v21 = vld [vmem:[%s7966_s1 + $0xbc8] sm:$0xff] }
  0x98   :  { %3618 = vmatprep.subr.bf16.mxu1 %v3617_v33  ;;  %v3637_v33 = vpack.c.bf16 %v362_v26, %v358_v23  ;;  %v393_v20 = vld [vmem:[%s7966_s1 + $0xbb0] sm:$0xff]  ;;  %v400_v22 = vld [vmem:[%s7966_s1 + $0xbe8] sm:$0xff]  ;;  %v398_v23 = vld [vmem:[%s7966_s1 + $0xbd8] sm:$0xff] }
  0x99   :  { %v402_v26 = vld [vmem:[%s7966_s1 + $0xbf8] sm:$0xff] }
  0x9a   :  { %3008 = vmatpush1.bf16.msra.mxu0 %v3007_v40  ;;  %v3027_v40 = vpack.c.bf16 %v359_v31, %v355_v30  ;;  %v395_v30 = vld [vmem:[%s7966_s1 + $0xbc0] sm:$0xff] }
  0x9b   :  { %3620 = vmatpush1.bf16.msra.mxu1 %v3619_v41  ;;  %3010 = vmatprep.subr.bf16.mxu0 %v3009_v42  ;;  %v3639_v41 = vpack.c.bf16 %v361_v34, %v357_v32  ;;  %v3029_v42 = vpack.c.bf16 %v368_v36, %v364_v35  ;;  %v399_v31 = vld [vmem:[%s7966_s1 + $0xbe0] sm:$0xff]  ;;  %v397_v32 = vld [vmem:[%s7966_s1 + $0xbd0] sm:$0xff]  ;;  %v404_v35 = vld [vmem:[%s7966_s1 + $0xc08] sm:$0xff] }
  0x9c   :  { %3622 = vmatprep.subr.bf16.mxu1 %v3621_v47  ;;  %v3641_v47 = vpack.c.bf16 %v370_v38, %v366_v37  ;;  %v401_v34 = vld [vmem:[%s7966_s1 + $0xbf0] sm:$0xff]  ;;  %v408_v36 = vld [vmem:[%s7966_s1 + $0xc28] sm:$0xff]  ;;  %v1291_v37 = vcombine.high %v4980_v39, %v4980_v39  ;;  %v406_v38 = vld [vmem:[%s7966_s1 + $0xc18] sm:$0xff] }
  0x9d   :  { %v407_v39 = vld [vmem:[%s7966_s1 + $0xc20] sm:$0xff] }
  0x9e   :  { %3012 = vmatpush1.bf16.msra.mxu0 %v3011_v52  ;;  %v3031_v52 = vpack.c.bf16 %v367_v44, %v363_v43  ;;  %v3049_v43 = vpack.c.bf16 %v408_v36, %v404_v35  ;;  %v403_v44 = vld [vmem:[%s7966_s1 + $0xc00] sm:$0xff]  ;;  %v441_v35 = vld [vmem:[%s7966_s1 + $0xd30] sm:$0xff]  ;;  %v444_v36 = vld [vmem:[%s7966_s1 + $0xd48] sm:$0xff] }
  0x9f   :  { %3624 = vmatpush1.bf16.msra.mxu1 %v3623_v53  ;;  %3014 = vmatprep.subr.bf16.mxu0 %v3013_v54  ;;  %v3643_v53 = vpack.c.bf16 %v369_v25, %v365_v46  ;;  %v3033_v54 = vpack.c.bf16 %v376_v49, %v372_v48  ;;  %v405_v46 = vld [vmem:[%s7966_s1 + $0xc10] sm:$0xff]  ;;  %v412_v48 = vld [vmem:[%s7966_s1 + $0xc48] sm:$0xff] }
  0xa0   :  { %3626 = vmatprep.subr.bf16.mxu1 %v3625_v58  ;;  %v3645_v58 = vpack.c.bf16 %v378_v51, %v374_v50  ;;  %v409_v25 = vld [vmem:[%s7966_s1 + $0xc30] sm:$0xff]  ;;  %v416_v49 = vld [vmem:[%s7966_s1 + $0xc68] sm:$0xff]  ;;  %v5371_v50 = vrot.slane %v1291_v37, %v4427_v11  ;;  %v414_v51 = vld [vmem:[%s7966_s1 + $0xc58] sm:$0xff] }
  0xa1   :  { %v448_v37 = vld [vmem:[%s7966_s1 + $0xd68] sm:$0xff] }
  0xa2   :  { %3016 = vmatpush1.bf16.msra.mxu0 %v3015_v0  ;;  %v3035_v0 = vpack.c.bf16 %v375_v56, %v371_v55  ;;  %v3053_v55 = vpack.c.bf16 %v416_v49, %v412_v48  ;;  %v411_v56 = vld [vmem:[%s7966_s1 + $0xc40] sm:$0xff]  ;;  %v452_v48 = vld [vmem:[%s7966_s1 + $0xd88] sm:$0xff] }
  0xa3   :  { %3628 = vmatpush1.bf16.msra.mxu1 %v3627_v1  ;;  %3018 = vmatprep.subr.bf16.mxu0 %v3017_v2  ;;  %v3647_v1 = vpack.c.bf16 %v377_v24, %v373_v57  ;;  %v3037_v2 = vpack.c.bf16 %v384_v60, %v380_v59  ;;  %v415_v57 = vld [vmem:[%s7966_s1 + $0xc60] sm:$0xff]  ;;  %v417_v59 = vld [vmem:[%s7966_s1 + $0xc70] sm:$0xff]  ;;  %v420_v60 = vld [vmem:[%s7966_s1 + $0xc88] sm:$0xff] }
  0xa4   :  { %3630 = vmatprep.subr.bf16.mxu1 %v3629_v6  ;;  %v3649_v6 = vpack.c.bf16 %v386_v63, %v382_v62  ;;  %v424_v62 = vld [vmem:[%s7966_s1 + $0xca8] sm:$0xff]  ;;  %v1307_v63 = vcombine.high %v5371_v50, %v5371_v50 }
  0xa5   :  { %v456_v49 = vld [vmem:[%s7966_s1 + $0xda8] sm:$0xff] }
  0xa6   :  { %3020 = vmatpush1.bf16.msra.mxu0 %v3019_v13  ;;  %v3039_v13 = vpack.c.bf16 %v383_v4, %v379_v3  ;;  %v3057_v4 = vpack.c.bf16 %v424_v62, %v420_v60  ;;  %v460_v60 = vld [vmem:[%s7966_s1 + $0xdc8] sm:$0xff] }
  0xa7   :  { %3632 = vmatpush1.bf16.msra.mxu1 %v3631_v14  ;;  %3022 = vmatprep.subr.bf16.mxu0 %v3021_v15  ;;  %v3651_v14 = vpack.c.bf16 %v385_v7, %v381_v5  ;;  %v3041_v15 = vpack.c.bf16 %v392_v9, %v388_v8  ;;  %v419_v5 = vld [vmem:[%s7966_s1 + $0xc80] sm:$0xff]  ;;  %v421_v7 = vld [vmem:[%s7966_s1 + $0xc90] sm:$0xff]  ;;  %v428_v9 = vld [vmem:[%s7966_s1 + $0xcc8] sm:$0xff] }
  0xa8   :  { %3634 = vmatprep.subr.bf16.mxu1 %v3633_v19  ;;  %v3653_v19 = vpack.c.bf16 %v394_v12, %v390_v10  ;;  %v432_v10 = vld [vmem:[%s7966_s1 + $0xce8] sm:$0xff]  ;;  %v430_v12 = vld [vmem:[%s7966_s1 + $0xcd8] sm:$0xff] }
  0xa9   :  { %v464_v62 = vld [vmem:[%s7966_s1 + $0xde8] sm:$0xff] }
  0xaa   :  { %3024 = vmatpush1.bf16.msra.mxu0 %v3023_v27  ;;  %v3043_v27 = vpack.c.bf16 %v391_v17, %v387_v16  ;;  %v3061_v16 = vpack.c.bf16 %v432_v10, %v428_v9  ;;  %v427_v17 = vld [vmem:[%s7966_s1 + $0xcc0] sm:$0xff]  ;;  %v472_v9 = vld [vmem:[%s7966_s1 + $0xe28] sm:$0xff]  ;;  %v470_v10 = vld [vmem:[%s7966_s1 + $0xe18] sm:$0xff] }
  0xab   :  { %3636 = vmatpush1.bf16.msra.mxu1 %v3635_v28  ;;  %3026 = vmatprep.subr.bf16.mxu0 %v3025_v29  ;;  %v3655_v28 = vpack.c.bf16 %v393_v20, %v389_v18  ;;  %v3045_v29 = vpack.c.bf16 %v400_v22, %v396_v21  ;;  %v431_v18 = vld [vmem:[%s7966_s1 + $0xce0] sm:$0xff]  ;;  %v433_v21 = vld [vmem:[%s7966_s1 + $0xcf0] sm:$0xff]  ;;  %v436_v22 = vld [vmem:[%s7966_s1 + $0xd08] sm:$0xff] }
  0xac   :  { %3638 = vmatprep.subr.bf16.mxu1 %v3637_v33  ;;  %v3657_v33 = vpack.c.bf16 %v402_v26, %v398_v23  ;;  %v440_v23 = vld [vmem:[%s7966_s1 + $0xd28] sm:$0xff]  ;;  %v438_v26 = vld [vmem:[%s7966_s1 + $0xd18] sm:$0xff] }
  0xae   :  { %3028 = vmatpush1.bf16.msra.mxu0 %v3027_v40  ;;  %v410_v40 = vld [vmem:[%s7966_s1 + $0xc38] sm:$0xff] }
  0xaf   :  { %3640 = vmatpush1.bf16.msra.mxu1 %v3639_v41  ;;  %3030 = vmatprep.subr.bf16.mxu0 %v3029_v42  ;;  %v3047_v41 = vpack.c.bf16 %v399_v31, %v395_v30  ;;  %v3659_v42 = vpack.c.bf16 %v401_v34, %v397_v32  ;;  %v3065_v30 = vpack.c.bf16 %v440_v23, %v436_v22  ;;  %v435_v31 = vld [vmem:[%s7966_s1 + $0xd00] sm:$0xff]  ;;  %v480_v22 = vld [vmem:[%s7966_s1 + $0xe68] sm:$0xff]  ;;  %v478_v23 = vld [vmem:[%s7966_s1 + $0xe58] sm:$0xff] }
  0xb0   :  { %3642 = vmatprep.subr.bf16.mxu1 %v3641_v47  ;;  %v3661_v47 = vpack.c.bf16 %v410_v40, %v406_v38  ;;  %v439_v32 = vld [vmem:[%s7966_s1 + $0xd20] sm:$0xff]  ;;  %v446_v38 = vld [vmem:[%s7966_s1 + $0xd58] sm:$0xff] }
  0xb1   :  { %v450_v40 = vld [vmem:[%s7966_s1 + $0xd78] sm:$0xff] }
  0xb2   :  { %3032 = vmatpush1.bf16.msra.mxu0 %v3031_v52  ;;  %v418_v52 = vld [vmem:[%s7966_s1 + $0xc78] sm:$0xff] }
  0xb3   :  { %3644 = vmatpush1.bf16.msra.mxu1 %v3643_v53  ;;  %3034 = vmatprep.subr.bf16.mxu0 %v3033_v54  ;;  %v3051_v53 = vpack.c.bf16 %v407_v39, %v403_v44  ;;  %v3663_v54 = vpack.c.bf16 %v409_v25, %v405_v46  ;;  %v3665_v24 = vpack.c.bf16 %v418_v52, %v414_v51  ;;  %v443_v44 = vld [vmem:[%s7966_s1 + $0xd40] sm:$0xff]  ;;  %v445_v46 = vld [vmem:[%s7966_s1 + $0xd50] sm:$0xff]  ;;  %v454_v51 = vld [vmem:[%s7966_s1 + $0xd98] sm:$0xff] }
  0xb4   :  { %3646 = vmatprep.subr.bf16.mxu1 %v3645_v58  ;;  %v413_v58 = vld [vmem:[%s7966_s1 + $0xc50] sm:$0xff]  ;;  %v447_v39 = vld [vmem:[%s7966_s1 + $0xd60] sm:$0xff]  ;;  %v458_v52 = vld [vmem:[%s7966_s1 + $0xdb8] sm:$0xff] }
  0xb5   :  { %v3667_v3 = vpack.c.bf16 %v417_v59, %v413_v58  ;;  %v449_v25 = vld [vmem:[%s7966_s1 + $0xd70] sm:$0xff] }
  0xb6   :  { %3036 = vmatpush1.bf16.msra.mxu0 %v3035_v0  ;;  %v422_v0 = vld [vmem:[%s7966_s1 + $0xc98] sm:$0xff]  ;;  %v453_v58 = vld [vmem:[%s7966_s1 + $0xd90] sm:$0xff] }
  0xb7   :  { %3648 = vmatpush1.bf16.msra.mxu1 %v3647_v1  ;;  %3038 = vmatprep.subr.bf16.mxu0 %v3037_v2  ;;  %v426_v1 = vld [vmem:[%s7966_s1 + $0xcb8] sm:$0xff]  ;;  %v3055_v2 = vpack.c.bf16 %v415_v57, %v411_v56  ;;  %v451_v56 = vld [vmem:[%s7966_s1 + $0xd80] sm:$0xff]  ;;  %v457_v59 = vld [vmem:[%s7966_s1 + $0xdb0] sm:$0xff] }
  0xb8   :  { %3650 = vmatprep.subr.bf16.mxu1 %v3649_v6  ;;  %v423_v6 = vld [vmem:[%s7966_s1 + $0xca0] sm:$0xff]  ;;  %v3669_v8 = vpack.c.bf16 %v426_v1, %v422_v0  ;;  %v466_v0 = vld [vmem:[%s7966_s1 + $0xdf8] sm:$0xff] }
  0xb9   :  { %v455_v57 = vld [vmem:[%s7966_s1 + $0xda0] sm:$0xff] }
  0xba   :  { %3040 = vmatpush1.bf16.msra.mxu0 %v3039_v13  ;;  %v434_v13 = vld [vmem:[%s7966_s1 + $0xcf8] sm:$0xff]  ;;  %v3075_v1 = vpack.c.bf16 %v455_v57, %v451_v56  ;;  %v495_v56 = vld [vmem:[%s7966_s1 + $0xee0] sm:$0xff]  ;;  %v493_v57 = vld [vmem:[%s7966_s1 + $0xed0] sm:$0xff] }
  0xbb   :  { %3652 = vmatpush1.bf16.msra.mxu1 %v3651_v14  ;;  %3042 = vmatprep.subr.bf16.mxu0 %v3041_v15  ;;  %v3059_v14 = vpack.c.bf16 %v423_v6, %v419_v5  ;;  %v3673_v20 = vpack.c.bf16 %v434_v13, %v430_v12  ;;  %v463_v5 = vld [vmem:[%s7966_s1 + $0xde0] sm:$0xff]  ;;  %v461_v6 = vld [vmem:[%s7966_s1 + $0xdd0] sm:$0xff]  ;;  %v474_v12 = vld [vmem:[%s7966_s1 + $0xe38] sm:$0xff] }
  0xbc   :  { %3654 = vmatprep.subr.bf16.mxu1 %v3653_v19  ;;  %v429_v19 = vld [vmem:[%s7966_s1 + $0xcd0] sm:$0xff] }
  0xbe   :  { %3044 = vmatpush1.bf16.msra.mxu0 %v3043_v27  ;;  %v442_v27 = vld [vmem:[%s7966_s1 + $0xd38] sm:$0xff] }
  0xbf   :  { %3656 = vmatpush1.bf16.msra.mxu1 %v3655_v28  ;;  %3046 = vmatprep.subr.bf16.mxu0 %v3045_v29  ;;  %v3063_v28 = vpack.c.bf16 %v431_v18, %v427_v17  ;;  %v3675_v29 = vpack.c.bf16 %v433_v21, %v429_v19  ;;  %v3677_v34 = vpack.c.bf16 %v442_v27, %v438_v26  ;;  %v471_v17 = vld [vmem:[%s7966_s1 + $0xe20] sm:$0xff]  ;;  %v469_v18 = vld [vmem:[%s7966_s1 + $0xe10] sm:$0xff]  ;;  %v476_v21 = vld [vmem:[%s7966_s1 + $0xe48] sm:$0xff] }
  0xc0   :  { %3658 = vmatprep.subr.bf16.mxu1 %v3657_v33  ;;  %v437_v33 = vld [vmem:[%s7966_s1 + $0xd10] sm:$0xff]  ;;  %v3693_v19 = vpack.c.bf16 %v474_v12, %v470_v10  ;;  %v482_v26 = vld [vmem:[%s7966_s1 + $0xe78] sm:$0xff] }
  0xc1   :  { %v514_v10 = vld [vmem:[%s7966_s1 + $0xf78] sm:$0xff] }
  0xc2   :  { %3048 = vmatpush1.bf16.msra.mxu0 %v3047_v41  ;;  %v3067_v41 = vpack.c.bf16 %v439_v32, %v435_v31  ;;  %v479_v31 = vld [vmem:[%s7966_s1 + $0xe60] sm:$0xff]  ;;  %v477_v32 = vld [vmem:[%s7966_s1 + $0xe50] sm:$0xff] }
  0xc3   :  { %3660 = vmatpush1.bf16.msra.mxu1 %v3659_v42  ;;  %3050 = vmatprep.subr.bf16.mxu0 %v3049_v43  ;;  %v3679_v42 = vpack.c.bf16 %v441_v35, %v437_v33  ;;  %v3069_v43 = vpack.c.bf16 %v448_v37, %v444_v36  ;;  %v3697_v33 = vpack.c.bf16 %v482_v26, %v478_v23  ;;  %v484_v35 = vld [vmem:[%s7966_s1 + $0xe88] sm:$0xff]  ;;  %v486_v37 = vld [vmem:[%s7966_s1 + $0xe98] sm:$0xff] }
  0xc4   :  { %3662 = vmatprep.subr.bf16.mxu1 %v3661_v47  ;;  %v3681_v47 = vpack.c.bf16 %v450_v40, %v446_v38  ;;  %v488_v36 = vld [vmem:[%s7966_s1 + $0xea8] sm:$0xff]  ;;  %v490_v38 = vld [vmem:[%s7966_s1 + $0xeb8] sm:$0xff] }
  0xc5   :  { %1601 = vmatmul.mubr.f32.vlgmr.msra.gmra.mrb[0].mxu0 %v4993_v45  ;;  %v522_v23 = vld [vmem:[%s7966_s1 + $0xfb8] sm:$0xff] }
  0xc6   :  { %3052 = vmatpush1.bf16.msra.mxu0 %v3051_v53  ;;  %2311 = vmatmul.mubr.f32.vlgmr.msra.gmra.mrb[0].mxu1 %v4993_v45  ;;  %v425_v45 = vld [vmem:[%s7966_s1 + $0xcb0] sm:$0xff]  ;;  %v3071_v53 = vpack.c.bf16 %v447_v39, %v443_v44  ;;  %v487_v44 = vld [vmem:[%s7966_s1 + $0xea0] sm:$0xff] }
  0xc7   :  { %3664 = vmatpush1.bf16.msra.mxu1 %v3663_v54  ;;  %3054 = vmatprep.subr.bf16.mxu0 %v3053_v55  ;;  %v3671_v15 = vpack.c.bf16 %v425_v45, %v421_v7  ;;  %v3683_v54 = vpack.c.bf16 %v449_v25, %v445_v46  ;;  %v3073_v55 = vpack.c.bf16 %v456_v49, %v452_v48  ;;  %v468_v45 = vld [vmem:[%s7966_s1 + $0xe08] sm:$0xff]  ;;  %v485_v39 = vld [vmem:[%s7966_s1 + $0xe90] sm:$0xff]  ;;  %v494_v49 = vld [vmem:[%s7966_s1 + $0xed8] sm:$0xff] }
  0xc8   :  { %3666 = vmatprep.subr.bf16.mxu1 %v3665_v24  ;;  %1671 = vmatprep.mubr.f32.mxu0 %v1307_v63  ;;  %v3685_v24 = vpack.c.bf16 %v458_v52, %v454_v51  ;;  %v3701_v46 = vpack.c.bf16 %v490_v38, %v486_v37  ;;  %v492_v25 = vld [vmem:[%s7966_s1 + $0xec8] sm:$0xff]  ;;  %v498_v51 = vld [vmem:[%s7966_s1 + $0xef8] sm:$0xff] }
  0xc9   :  { %2381 = vmatprep.mubr.f32.mxu1 %v1307_v63  ;;  %v462_v63 = vld [vmem:[%s7966_s1 + $0xdd8] sm:$0xff]  ;;  %v496_v48 = vld [vmem:[%s7966_s1 + $0xee8] sm:$0xff] }
  0xca   :  { %3056 = vmatpush1.bf16.msra.mxu0 %v3055_v2  ;;  %v3687_v2 = vpack.c.bf16 %v457_v59, %v453_v58  ;;  %v3689_v7 = vpack.c.bf16 %v466_v0, %v462_v63  ;;  %v3705_v58 = vpack.c.bf16 %v498_v51, %v494_v49  ;;  %v500_v59 = vld [vmem:[%s7966_s1 + $0xf08] sm:$0xff]  ;;  %v506_v63 = vld [vmem:[%s7966_s1 + $0xf38] sm:$0xff]  ;;  %v5746_v51 = vld [vmem:[%s7967_s0 + $0x10] sm:$0xff] }
  0xcb   :  { %3668 = vmatpush1.bf16.msra.mxu1 %v3667_v3  ;;  %3058 = vmatprep.subr.bf16.mxu0 %v3057_v4  ;;  %v3077_v3 = vpack.c.bf16 %v464_v62, %v460_v60  ;;  %v459_v4 = vld [vmem:[%s7966_s1 + $0xdc0] sm:$0xff]  ;;  %v504_v60 = vld [vmem:[%s7966_s1 + $0xf28] sm:$0xff]  ;;  %v502_v62 = vld [vmem:[%s7966_s1 + $0xf18] sm:$0xff] }
  0xcc   :  { %3670 = vmatprep.subr.bf16.mxu1 %v3669_v8  ;;  %v465_v8 = vld [vmem:[%s7966_s1 + $0xdf0] sm:$0xff]  ;;  %v3079_v13 = vpack.c.bf16 %v463_v5, %v459_v4  ;;  %v503_v4 = vld [vmem:[%s7966_s1 + $0xf20] sm:$0xff]  ;;  %v530_v37 = vld [vmem:[%s7966_s1 + $0xff8] sm:$0xff] }
  0xcd   :  { %v501_v5 = vld [vmem:[%s7966_s1 + $0xf10] sm:$0xff]  ;;  %v538_v49 = vld [vmem:[%s7966_s1 + $0x1038] sm:$0xff] }
  0xce   :  { %3060 = vmatpush1.bf16.msra.mxu0 %v3059_v14  ;;  %v3691_v14 = vpack.c.bf16 %v465_v8, %v461_v6  ;;  %v3709_v6 = vpack.c.bf16 %v506_v63, %v502_v62  ;;  %v508_v8 = vld [vmem:[%s7966_s1 + $0xf48] sm:$0xff]  ;;  %v5768_v62 = vrot.slane %v5746_v51, %v4427_v11  ;;  %v542_v63 = vld [vmem:[%s7966_s1 + $0x1058] sm:$0xff] }
  0xcf   :  { %3672 = vmatpush1.bf16.msra.mxu1 %v3671_v15  ;;  %3062 = vmatprep.subr.bf16.mxu0 %v3061_v16  ;;  %v3081_v15 = vpack.c.bf16 %v472_v9, %v468_v45  ;;  %v467_v16 = vld [vmem:[%s7966_s1 + $0xe00] sm:$0xff]  ;;  %v512_v45 = vld [vmem:[%s7966_s1 + $0xf68] sm:$0xff]  ;;  %v510_v9 = vld [vmem:[%s7966_s1 + $0xf58] sm:$0xff] }
  0xd0   :  { %3674 = vmatprep.subr.bf16.mxu1 %v3673_v20  ;;  %v473_v20 = vld [vmem:[%s7966_s1 + $0xe30] sm:$0xff]  ;;  %v3083_v27 = vpack.c.bf16 %v471_v17, %v467_v16  ;;  %v511_v16 = vld [vmem:[%s7966_s1 + $0xf60] sm:$0xff] }
  0xd1   :  { %v509_v17 = vld [vmem:[%s7966_s1 + $0xf50] sm:$0xff] }
  0xd2   :  { %3064 = vmatpush1.bf16.msra.mxu0 %v3063_v28  ;;  %v3695_v28 = vpack.c.bf16 %v473_v20, %v469_v18  ;;  %v3713_v18 = vpack.c.bf16 %v514_v10, %v510_v9  ;;  %v516_v20 = vld [vmem:[%s7966_s1 + $0xf88] sm:$0xff]  ;;  %v1323_v10 = vcombine.high %v5768_v62, %v5768_v62 }
  0xd3   :  { %3676 = vmatpush1.bf16.msra.mxu1 %v3675_v29  ;;  %3066 = vmatprep.subr.bf16.mxu0 %v3065_v30  ;;  %v3085_v29 = vpack.c.bf16 %v480_v22, %v476_v21  ;;  %v475_v30 = vld [vmem:[%s7966_s1 + $0xe40] sm:$0xff]  ;;  %v520_v21 = vld [vmem:[%s7966_s1 + $0xfa8] sm:$0xff]  ;;  %v518_v22 = vld [vmem:[%s7966_s1 + $0xf98] sm:$0xff] }
  0xd4   :  { %3678 = vmatprep.subr.bf16.mxu1 %v3677_v34  ;;  %v481_v34 = vld [vmem:[%s7966_s1 + $0xe70] sm:$0xff]  ;;  %v3087_v40 = vpack.c.bf16 %v479_v31, %v475_v30  ;;  %v519_v30 = vld [vmem:[%s7966_s1 + $0xfa0] sm:$0xff]  ;;  %v552_v9 = vld [vmem:[%s7966_s1 + $0x10a8] sm:$0xff] }
  0xd5   :  { %v517_v31 = vld [vmem:[%s7966_s1 + $0xf90] sm:$0xff] }
  0xd6   :  { %3068 = vmatpush1.bf16.msra.mxu0 %v3067_v41  ;;  %v3699_v41 = vpack.c.bf16 %v481_v34, %v477_v32  ;;  %v3717_v32 = vpack.c.bf16 %v522_v23, %v518_v22  ;;  %v524_v34 = vld [vmem:[%s7966_s1 + $0xfc8] sm:$0xff]  ;;  %v558_v23 = vld [vmem:[%s7966_s1 + $0x10d8] sm:$0xff] }
  0xd7   :  { %3680 = vmatpush1.bf16.msra.mxu1 %v3679_v42  ;;  %3070 = vmatprep.subr.bf16.mxu0 %v3069_v43  ;;  %v3089_v42 = vpack.c.bf16 %v488_v36, %v484_v35  ;;  %v483_v43 = vld [vmem:[%s7966_s1 + $0xe80] sm:$0xff]  ;;  %v528_v35 = vld [vmem:[%s7966_s1 + $0xfe8] sm:$0xff]  ;;  %v526_v36 = vld [vmem:[%s7966_s1 + $0xfd8] sm:$0xff] }
  0xd8   :  { %3682 = vmatprep.subr.bf16.mxu1 %v3681_v47  ;;  %v489_v47 = vld [vmem:[%s7966_s1 + $0xeb0] sm:$0xff]  ;;  %v3091_v52 = vpack.c.bf16 %v487_v44, %v483_v43  ;;  %v527_v43 = vld [vmem:[%s7966_s1 + $0xfe0] sm:$0xff]  ;;  %v560_v22 = vld [vmem:[%s7966_s1 + $0x10e8] sm:$0xff] }
  0xd9   :  { %v525_v44 = vld [vmem:[%s7966_s1 + $0xfd0] sm:$0xff] }
  0xda   :  { %3072 = vmatpush1.bf16.msra.mxu0 %v3071_v53  ;;  %v3703_v53 = vpack.c.bf16 %v489_v47, %v485_v39  ;;  %v3721_v39 = vpack.c.bf16 %v530_v37, %v526_v36  ;;  %v532_v47 = vld [vmem:[%s7966_s1 + $0x1008] sm:$0xff]  ;;  %v566_v37 = vld [vmem:[%s7966_s1 + $0x1118] sm:$0xff] }
  0xdb   :  { %3684 = vmatpush1.bf16.msra.mxu1 %v3683_v54  ;;  %3074 = vmatprep.subr.bf16.mxu0 %v3073_v55  ;;  %v3093_v54 = vpack.c.bf16 %v496_v48, %v492_v25  ;;  %v491_v55 = vld [vmem:[%s7966_s1 + $0xec0] sm:$0xff]  ;;  %v536_v25 = vld [vmem:[%s7966_s1 + $0x1028] sm:$0xff]  ;;  %v534_v48 = vld [vmem:[%s7966_s1 + $0x1018] sm:$0xff] }
  0xdc   :  { %3686 = vmatprep.subr.bf16.mxu1 %v3685_v24  ;;  %v497_v24 = vld [vmem:[%s7966_s1 + $0xef0] sm:$0xff]  ;;  %v3095_v0 = vpack.c.bf16 %v495_v56, %v491_v55  ;;  %v531_v55 = vld [vmem:[%s7966_s1 + $0x1000] sm:$0xff]  ;;  %v568_v36 = vld [vmem:[%s7966_s1 + $0x1128] sm:$0xff] }
  0xdd   :  { %v535_v56 = vld [vmem:[%s7966_s1 + $0x1020] sm:$0xff] }
  0xde   :  { %3076 = vmatpush1.bf16.msra.mxu0 %v3075_v1  ;;  %v3707_v1 = vpack.c.bf16 %v497_v24, %v493_v57  ;;  %v533_v57 = vld [vmem:[%s7966_s1 + $0x1010] sm:$0xff] }
  0xdf   :  { %3688 = vmatpush1.bf16.msra.mxu1 %v3687_v2  ;;  %3078 = vmatprep.subr.bf16.mxu0 %v3077_v3  ;;  %v3097_v2 = vpack.c.bf16 %v504_v60, %v500_v59  ;;  %v499_v3 = vld [vmem:[%s7966_s1 + $0xf00] sm:$0xff]  ;;  %v537_v24 = vld [vmem:[%s7966_s1 + $0x1030] sm:$0xff]  ;;  %v540_v59 = vld [vmem:[%s7966_s1 + $0x1048] sm:$0xff] }
  0xe0   :  { %3690 = vmatprep.subr.bf16.mxu1 %v3689_v7  ;;  %v505_v7 = vld [vmem:[%s7966_s1 + $0xf30] sm:$0xff]  ;;  %v3099_v12 = vpack.c.bf16 %v503_v4, %v499_v3  ;;  %v544_v60 = vld [vmem:[%s7966_s1 + $0x1068] sm:$0xff]  ;;  %v539_v4 = vld [vmem:[%s7966_s1 + $0x1040] sm:$0xff] }
  0xe1   :  { %v3117_v3 = vpack.c.bf16 %v544_v60, %v540_v59  ;;  %v577_v59 = vld [vmem:[%s7966_s1 + $0x1170] sm:$0xff]  ;;  %v580_v60 = vld [vmem:[%s7966_s1 + $0x1188] sm:$0xff] }
  0xe2   :  { %3080 = vmatpush1.bf16.msra.mxu0 %v3079_v13  ;;  %v3711_v13 = vpack.c.bf16 %v505_v7, %v501_v5  ;;  %v543_v5 = vld [vmem:[%s7966_s1 + $0x1060] sm:$0xff] }
  0xe3   :  { %3692 = vmatpush1.bf16.msra.mxu1 %v3691_v14  ;;  %3082 = vmatprep.subr.bf16.mxu0 %v3081_v15  ;;  %v3101_v14 = vpack.c.bf16 %v512_v45, %v508_v8  ;;  %v507_v15 = vld [vmem:[%s7966_s1 + $0xf40] sm:$0xff]  ;;  %v545_v8 = vld [vmem:[%s7966_s1 + $0x1070] sm:$0xff]  ;;  %v548_v45 = vld [vmem:[%s7966_s1 + $0x1088] sm:$0xff] }
  0xe4   :  { %3694 = vmatprep.subr.bf16.mxu1 %v3693_v19  ;;  %v513_v19 = vld [vmem:[%s7966_s1 + $0xf70] sm:$0xff]  ;;  %v3103_v26 = vpack.c.bf16 %v511_v16, %v507_v15  ;;  %v3121_v16 = vpack.c.bf16 %v552_v9, %v548_v45  ;;  %v588_v9 = vld [vmem:[%s7966_s1 + $0x11c8] sm:$0xff] }
  0xe5   :  { %v585_v45 = vld [vmem:[%s7966_s1 + $0x11b0] sm:$0xff] }
  0xe6   :  { %3084 = vmatpush1.bf16.msra.mxu0 %v3083_v27  ;;  %v3715_v27 = vpack.c.bf16 %v513_v19, %v509_v17  ;;  %v547_v17 = vld [vmem:[%s7966_s1 + $0x1080] sm:$0xff]  ;;  %v549_v19 = vld [vmem:[%s7966_s1 + $0x1090] sm:$0xff] }
  0xe7   :  { %3696 = vmatpush1.bf16.msra.mxu1 %v3695_v28  ;;  %3086 = vmatprep.subr.bf16.mxu0 %v3085_v29  ;;  %v3105_v28 = vpack.c.bf16 %v520_v21, %v516_v20  ;;  %v515_v29 = vld [vmem:[%s7966_s1 + $0xf80] sm:$0xff]  ;;  %v556_v21 = vld [vmem:[%s7966_s1 + $0x10c8] sm:$0xff] }
  0xe8   :  { %3698 = vmatprep.subr.bf16.mxu1 %v3697_v33  ;;  %v521_v33 = vld [vmem:[%s7966_s1 + $0xfb0] sm:$0xff]  ;;  %v3107_v38 = vpack.c.bf16 %v519_v30, %v515_v29  ;;  %v3125_v29 = vpack.c.bf16 %v560_v22, %v556_v21  ;;  %v555_v30 = vld [vmem:[%s7966_s1 + $0x10c0] sm:$0xff]  ;;  %v596_v21 = vld [vmem:[%s7966_s1 + $0x1208] sm:$0xff] }
  0xe9   :  { %v600_v22 = vld [vmem:[%s7966_s1 + $0x1228] sm:$0xff] }
  0xea   :  { %3088 = vmatpush1.bf16.msra.mxu0 %v3087_v40  ;;  %v3719_v40 = vpack.c.bf16 %v521_v33, %v517_v31  ;;  %v559_v31 = vld [vmem:[%s7966_s1 + $0x10e0] sm:$0xff] }
  0xeb   :  { %3700 = vmatpush1.bf16.msra.mxu1 %v3699_v41  ;;  %3090 = vmatprep.subr.bf16.mxu0 %v3089_v42  ;;  %v3109_v41 = vpack.c.bf16 %v528_v35, %v524_v34  ;;  %v523_v42 = vld [vmem:[%s7966_s1 + $0xfc0] sm:$0xff]  ;;  %v561_v34 = vld [vmem:[%s7966_s1 + $0x10f0] sm:$0xff]  ;;  %v564_v35 = vld [vmem:[%s7966_s1 + $0x1108] sm:$0xff] }
  0xec   :  { %3702 = vmatprep.subr.bf16.mxu1 %v3701_v46  ;;  %v529_v46 = vld [vmem:[%s7966_s1 + $0xff0] sm:$0xff] }
  0xee   :  { %3092 = vmatpush1.bf16.msra.mxu0 %v3091_v52  ;;  %v3111_v52 = vpack.c.bf16 %v527_v43, %v523_v42  ;;  %v3129_v42 = vpack.c.bf16 %v568_v36, %v564_v35  ;;  %v563_v43 = vld [vmem:[%s7966_s1 + $0x1100] sm:$0xff]  ;;  %v604_v35 = vld [vmem:[%s7966_s1 + $0x1248] sm:$0xff] }
  0xef   :  { %3704 = vmatpush1.bf16.msra.mxu1 %v3703_v53  ;;  %3094 = vmatprep.subr.bf16.mxu0 %v3093_v54  ;;  %v3723_v53 = vpack.c.bf16 %v529_v46, %v525_v44  ;;  %v3113_v54 = vpack.c.bf16 %v536_v25, %v532_v47  ;;  %v567_v44 = vld [vmem:[%s7966_s1 + $0x1120] sm:$0xff]  ;;  %v569_v47 = vld [vmem:[%s7966_s1 + $0x1130] sm:$0xff]  ;;  %v572_v25 = vld [vmem:[%s7966_s1 + $0x1148] sm:$0xff] }
  0xf0   :  { %3706 = vmatprep.subr.bf16.mxu1 %v3705_v58  ;;  %v3725_v58 = vpack.c.bf16 %v538_v49, %v534_v48  ;;  %v576_v48 = vld [vmem:[%s7966_s1 + $0x1168] sm:$0xff]  ;;  %v574_v49 = vld [vmem:[%s7966_s1 + $0x1158] sm:$0xff] }
  0xf1   :  { %v608_v36 = vld [vmem:[%s7966_s1 + $0x1268] sm:$0xff] }
  0xf2   :  { %3096 = vmatpush1.bf16.msra.mxu0 %v3095_v0  ;;  %v546_v0 = vld [vmem:[%s7966_s1 + $0x1078] sm:$0xff] }
  0xf3   :  { %3708 = vmatpush1.bf16.msra.mxu1 %v3707_v1  ;;  %3098 = vmatprep.subr.bf16.mxu0 %v3097_v2  ;;  %v3115_v1 = vpack.c.bf16 %v535_v56, %v531_v55  ;;  %v3727_v2 = vpack.c.bf16 %v537_v24, %v533_v57  ;;  %v3729_v7 = vpack.c.bf16 %v546_v0, %v542_v63  ;;  %v571_v56 = vld [vmem:[%s7966_s1 + $0x1140] sm:$0xff]  ;;  %v584_v63 = vld [vmem:[%s7966_s1 + $0x11a8] sm:$0xff]  ;;  %v582_v0 = vld [vmem:[%s7966_s1 + $0x1198] sm:$0xff] }
  0xf4   :  { %3710 = vmatprep.subr.bf16.mxu1 %v3709_v6  ;;  %v541_v6 = vld [vmem:[%s7966_s1 + $0x1050] sm:$0xff]  ;;  %v3133_v55 = vpack.c.bf16 %v576_v48, %v572_v25  ;;  %v575_v57 = vld [vmem:[%s7966_s1 + $0x1160] sm:$0xff]  ;;  %v612_v25 = vld [vmem:[%s7966_s1 + $0x1288] sm:$0xff] }
  0xf5   :  { %v3731_v15 = vpack.c.bf16 %v545_v8, %v541_v6  ;;  %v583_v6 = vld [vmem:[%s7966_s1 + $0x11a0] sm:$0xff]  ;;  %v616_v48 = vld [vmem:[%s7966_s1 + $0x12a8] sm:$0xff] }
  0xf6   :  { %3100 = vmatpush1.bf16.msra.mxu0 %v3099_v12  ;;  %v550_v12 = vld [vmem:[%s7966_s1 + $0x1098] sm:$0xff] }
  0xf7   :  { %3712 = vmatpush1.bf16.msra.mxu1 %v3711_v13  ;;  %3102 = vmatprep.subr.bf16.mxu0 %v3101_v14  ;;  %v554_v13 = vld [vmem:[%s7966_s1 + $0x10b8] sm:$0xff]  ;;  %v3119_v14 = vpack.c.bf16 %v543_v5, %v539_v4  ;;  %v3137_v4 = vpack.c.bf16 %v584_v63, %v580_v60  ;;  %v579_v5 = vld [vmem:[%s7966_s1 + $0x1180] sm:$0xff]  ;;  %v620_v60 = vld [vmem:[%s7966_s1 + $0x12c8] sm:$0xff] }
  0xf8   :  { %3714 = vmatprep.subr.bf16.mxu1 %v3713_v18  ;;  %v551_v18 = vld [vmem:[%s7966_s1 + $0x10a0] sm:$0xff]  ;;  %v3733_v20 = vpack.c.bf16 %v554_v13, %v550_v12  ;;  %v590_v12 = vld [vmem:[%s7966_s1 + $0x11d8] sm:$0xff]  ;;  %v624_v63 = vld [vmem:[%s7966_s1 + $0x12e8] sm:$0xff] }
  0xf9   :  { %v594_v13 = vld [vmem:[%s7966_s1 + $0x11f8] sm:$0xff] }
  0xfa   :  { %3104 = vmatpush1.bf16.msra.mxu0 %v3103_v26  ;;  %v562_v26 = vld [vmem:[%s7966_s1 + $0x10f8] sm:$0xff] }
  0xfb   :  { %3716 = vmatpush1.bf16.msra.mxu1 %v3715_v27  ;;  %3106 = vmatprep.subr.bf16.mxu0 %v3105_v28  ;;  %v3123_v27 = vpack.c.bf16 %v551_v18, %v547_v17  ;;  %v3737_v33 = vpack.c.bf16 %v562_v26, %v558_v23  ;;  %v587_v17 = vld [vmem:[%s7966_s1 + $0x11c0] sm:$0xff]  ;;  %v598_v23 = vld [vmem:[%s7966_s1 + $0x1218] sm:$0xff] }
  0xfc   :  { %3718 = vmatprep.subr.bf16.mxu1 %v3717_v32  ;;  %v557_v32 = vld [vmem:[%s7966_s1 + $0x10d0] sm:$0xff]  ;;  %v591_v18 = vld [vmem:[%s7966_s1 + $0x11e0] sm:$0xff]  ;;  %v602_v26 = vld [vmem:[%s7966_s1 + $0x1238] sm:$0xff] }
  0xfe   :  { %3108 = vmatpush1.bf16.msra.mxu0 %v3107_v38  ;;  %v570_v38 = vld [vmem:[%s7966_s1 + $0x1138] sm:$0xff] }
  0xff   :  { %3720 = vmatpush1.bf16.msra.mxu1 %v3719_v40  ;;  %3110 = vmatprep.subr.bf16.mxu0 %v3109_v41  ;;  %v3127_v40 = vpack.c.bf16 %v559_v31, %v555_v30  ;;  %v3739_v41 = vpack.c.bf16 %v561_v34, %v557_v32  ;;  %v3741_v46 = vpack.c.bf16 %v570_v38, %v566_v37  ;;  %v595_v30 = vld [vmem:[%s7966_s1 + $0x1200] sm:$0xff]  ;;  %v597_v32 = vld [vmem:[%s7966_s1 + $0x1210] sm:$0xff]  ;;  %v606_v37 = vld [vmem:[%s7966_s1 + $0x1258] sm:$0xff] }
 0x100   :  { %3722 = vmatprep.subr.bf16.mxu1 %v3721_v39  ;;  %v565_v39 = vld [vmem:[%s7966_s1 + $0x1110] sm:$0xff]  ;;  %v599_v31 = vld [vmem:[%s7966_s1 + $0x1220] sm:$0xff]  ;;  %v610_v38 = vld [vmem:[%s7966_s1 + $0x1278] sm:$0xff] }
 0x101   :  { %v601_v34 = vld [vmem:[%s7966_s1 + $0x1230] sm:$0xff] }
 0x102   :  { %3112 = vmatpush1.bf16.msra.mxu0 %v3111_v52  ;;  %v578_v52 = vld [vmem:[%s7966_s1 + $0x1178] sm:$0xff] }
 0x103   :  { %3724 = vmatpush1.bf16.msra.mxu1 %v3723_v53  ;;  %3114 = vmatprep.subr.bf16.mxu0 %v3113_v54  ;;  %v3131_v53 = vpack.c.bf16 %v567_v44, %v563_v43  ;;  %v3743_v54 = vpack.c.bf16 %v569_v47, %v565_v39  ;;  %v3745_v24 = vpack.c.bf16 %v578_v52, %v574_v49  ;;  %v603_v43 = vld [vmem:[%s7966_s1 + $0x1240] sm:$0xff]  ;;  %v605_v39 = vld [vmem:[%s7966_s1 + $0x1250] sm:$0xff]  ;;  %v614_v49 = vld [vmem:[%s7966_s1 + $0x1298] sm:$0xff] }
 0x104   :  { %3726 = vmatprep.subr.bf16.mxu1 %v3725_v58  ;;  %v573_v58 = vld [vmem:[%s7966_s1 + $0x1150] sm:$0xff]  ;;  %v607_v44 = vld [vmem:[%s7966_s1 + $0x1260] sm:$0xff]  ;;  %v618_v52 = vld [vmem:[%s7966_s1 + $0x12b8] sm:$0xff] }
 0x105   :  { %1672 = vmatmul.mubr.f32.vlgmr.msra.gmra.mrb[0].mxu0 %v5371_v50  ;;  %v609_v47 = vld [vmem:[%s7966_s1 + $0x1270] sm:$0xff] }
 0x106   :  { %3116 = vmatpush1.bf16.msra.mxu0 %v3115_v1  ;;  %2382 = vmatmul.mubr.f32.vlgmr.msra.gmra.mrb[0].mxu1 %v5371_v50  ;;  %v553_v50 = vld [vmem:[%s7966_s1 + $0x10b0] sm:$0xff]  ;;  %v586_v1 = vld [vmem:[%s7966_s1 + $0x11b8] sm:$0xff] }
 0x107   :  { %3728 = vmatpush1.bf16.msra.mxu1 %v3727_v2  ;;  %3118 = vmatprep.subr.bf16.mxu0 %v3117_v3  ;;  %v3735_v28 = vpack.c.bf16 %v553_v50, %v549_v19  ;;  %v3135_v2 = vpack.c.bf16 %v575_v57, %v571_v56  ;;  %v3747_v3 = vpack.c.bf16 %v577_v59, %v573_v58  ;;  %v589_v19 = vld [vmem:[%s7966_s1 + $0x11d0] sm:$0xff]  ;;  %v611_v56 = vld [vmem:[%s7966_s1 + $0x1280] sm:$0xff] }
 0x108   :  { %3730 = vmatprep.subr.bf16.mxu1 %v3729_v7  ;;  %1742 = vmatprep.mubr.f32.mxu0 %v1323_v10  ;;  %v581_v7 = vld [vmem:[%s7966_s1 + $0x1190] sm:$0xff]  ;;  %v3749_v8 = vpack.c.bf16 %v586_v1, %v582_v0  ;;  %v615_v57 = vld [vmem:[%s7966_s1 + $0x12a0] sm:$0xff]  ;;  %v622_v0 = vld [vmem:[%s7966_s1 + $0x12d8] sm:$0xff] }
 0x109   :  { %2452 = vmatprep.mubr.f32.mxu1 %v1323_v10  ;;  %v592_v10 = vld [vmem:[%s7966_s1 + $0x11e8] sm:$0xff]  ;;  %v593_v50 = vld [vmem:[%s7966_s1 + $0x11f0] sm:$0xff]  ;;  %v626_v1 = vld [vmem:[%s7966_s1 + $0x12f8] sm:$0xff] }
 0x10a   :  { %3120 = vmatpush1.bf16.msra.mxu0 %v3119_v14  ;;  %v3139_v14 = vpack.c.bf16 %v583_v6, %v579_v5  ;;  %v613_v58 = vld [vmem:[%s7966_s1 + $0x1290] sm:$0xff]  ;;  %v619_v5 = vld [vmem:[%s7966_s1 + $0x12c0] sm:$0xff] }
 0x10b   :  { %3732 = vmatpush1.bf16.msra.mxu1 %v3731_v15  ;;  %3122 = vmatprep.subr.bf16.mxu0 %v3121_v16  ;;  %v3751_v15 = vpack.c.bf16 %v585_v45, %v581_v7  ;;  %v3141_v16 = vpack.c.bf16 %v592_v10, %v588_v9  ;;  %v617_v59 = vld [vmem:[%s7966_s1 + $0x12b0] sm:$0xff]  ;;  %v623_v6 = vld [vmem:[%s7966_s1 + $0x12e0] sm:$0xff]  ;;  %v628_v9 = vld [vmem:[%s7966_s1 + $0x1308] sm:$0xff] }
 0x10c   :  { %3734 = vmatprep.subr.bf16.mxu1 %v3733_v20  ;;  %v3753_v20 = vpack.c.bf16 %v594_v13, %v590_v12  ;;  %v621_v7 = vld [vmem:[%s7966_s1 + $0x12d0] sm:$0xff]  ;;  %v632_v10 = vld [vmem:[%s7966_s1 + $0x1328] sm:$0xff]  ;;  %v630_v12 = vld [vmem:[%s7966_s1 + $0x1318] sm:$0xff] }
 0x10d   :  { %v625_v45 = vld [vmem:[%s7966_s1 + $0x12f0] sm:$0xff]  ;;  %v634_v13 = vld [vmem:[%s7966_s1 + $0x1338] sm:$0xff] }
 0x10e   :  { %3124 = vmatpush1.bf16.msra.mxu0 %v3123_v27  ;;  %v3143_v27 = vpack.c.bf16 %v591_v18, %v587_v17  ;;  %v627_v17 = vld [vmem:[%s7966_s1 + $0x1300] sm:$0xff] }
 0x10f   :  { %3736 = vmatpush1.bf16.msra.mxu1 %v3735_v28  ;;  %3126 = vmatprep.subr.bf16.mxu0 %v3125_v29  ;;  %v3755_v28 = vpack.c.bf16 %v593_v50, %v589_v19  ;;  %v3145_v29 = vpack.c.bf16 %v600_v22, %v596_v21  ;;  %v631_v18 = vld [vmem:[%s7966_s1 + $0x1320] sm:$0xff]  ;;  %v629_v19 = vld [vmem:[%s7966_s1 + $0x1310] sm:$0xff]  ;;  %v636_v21 = vld [vmem:[%s7966_s1 + $0x1348] sm:$0xff] }
 0x110   :  { %3738 = vmatprep.subr.bf16.mxu1 %v3737_v33  ;;  %v3757_v33 = vpack.c.bf16 %v602_v26, %v598_v23  ;;  %v633_v50 = vld [vmem:[%s7966_s1 + $0x1330] sm:$0xff]  ;;  %v640_v22 = vld [vmem:[%s7966_s1 + $0x1368] sm:$0xff]  ;;  %v638_v23 = vld [vmem:[%s7966_s1 + $0x1358] sm:$0xff] }
 0x111   :  { %v642_v26 = vld [vmem:[%s7966_s1 + $0x1378] sm:$0xff] }
 0x112   :  { %3128 = vmatpush1.bf16.msra.mxu0 %v3127_v40  ;;  %v3147_v40 = vpack.c.bf16 %v599_v31, %v595_v30  ;;  %v635_v30 = vld [vmem:[%s7966_s1 + $0x1340] sm:$0xff] }
 0x113   :  { %3740 = vmatpush1.bf16.msra.mxu1 %v3739_v41  ;;  %3130 = vmatprep.subr.bf16.mxu0 %v3129_v42  ;;  %v3759_v41 = vpack.c.bf16 %v601_v34, %v597_v32  ;;  %v3149_v42 = vpack.c.bf16 %v608_v36, %v604_v35  ;;  %v639_v31 = vld [vmem:[%s7966_s1 + $0x1360] sm:$0xff]  ;;  %v637_v32 = vld [vmem:[%s7966_s1 + $0x1350] sm:$0xff]  ;;  %v644_v35 = vld [vmem:[%s7966_s1 + $0x1388] sm:$0xff] }
 0x114   :  { %3742 = vmatprep.subr.bf16.mxu1 %v3741_v46  ;;  %v3761_v46 = vpack.c.bf16 %v610_v38, %v606_v37  ;;  %v641_v34 = vld [vmem:[%s7966_s1 + $0x1370] sm:$0xff]  ;;  %v648_v36 = vld [vmem:[%s7966_s1 + $0x13a8] sm:$0xff]  ;;  %v646_v37 = vld [vmem:[%s7966_s1 + $0x1398] sm:$0xff] }
 0x115   :  { %v650_v38 = vld [vmem:[%s7966_s1 + $0x13b8] sm:$0xff] }
 0x116   :  { %3132 = vmatpush1.bf16.msra.mxu0 %v3131_v53  ;;  %v3151_v53 = vpack.c.bf16 %v607_v44, %v603_v43  ;;  %v643_v43 = vld [vmem:[%s7966_s1 + $0x1380] sm:$0xff] }
 0x117   :  { %3744 = vmatpush1.bf16.msra.mxu1 %v3743_v54  ;;  %3134 = vmatprep.subr.bf16.mxu0 %v3133_v55  ;;  %v3763_v54 = vpack.c.bf16 %v609_v47, %v605_v39  ;;  %v3153_v55 = vpack.c.bf16 %v616_v48, %v612_v25  ;;  %v647_v44 = vld [vmem:[%s7966_s1 + $0x13a0] sm:$0xff]  ;;  %v645_v39 = vld [vmem:[%s7966_s1 + $0x1390] sm:$0xff]  ;;  %v652_v25 = vld [vmem:[%s7966_s1 + $0x13c8] sm:$0xff] }
 0x118   :  { %3746 = vmatprep.subr.bf16.mxu1 %v3745_v24  ;;  %v3765_v24 = vpack.c.bf16 %v618_v52, %v614_v49  ;;  %v649_v47 = vld [vmem:[%s7966_s1 + $0x13b0] sm:$0xff]  ;;  %v656_v48 = vld [vmem:[%s7966_s1 + $0x13e8] sm:$0xff]  ;;  %v654_v49 = vld [vmem:[%s7966_s1 + $0x13d8] sm:$0xff] }
 0x119   :  { %v658_v52 = vld [vmem:[%s7966_s1 + $0x13f8] sm:$0xff] }
 0x11a   :  { %3136 = vmatpush1.bf16.msra.mxu0 %v3135_v2  ;;  %v3155_v2 = vpack.c.bf16 %v615_v57, %v611_v56  ;;  %v651_v56 = vld [vmem:[%s7966_s1 + $0x13c0] sm:$0xff] }
 0x11b   :  { %3748 = vmatpush1.bf16.msra.mxu1 %v3747_v3  ;;  %3138 = vmatprep.subr.bf16.mxu0 %v3137_v4  ;;  %v3767_v3 = vpack.c.bf16 %v617_v59, %v613_v58  ;;  %v3157_v4 = vpack.c.bf16 %v624_v63, %v620_v60  ;;  %v655_v57 = vld [vmem:[%s7966_s1 + $0x13e0] sm:$0xff]  ;;  %v653_v58 = vld [vmem:[%s7966_s1 + $0x13d0] sm:$0xff]  ;;  %v660_v60 = vld [vmem:[%s7966_s1 + $0x1408] sm:$0xff] }
 0x11c   :  { %3750 = vmatprep.subr.bf16.mxu1 %v3749_v8  ;;  %v3769_v8 = vpack.c.bf16 %v626_v1, %v622_v0  ;;  %v657_v59 = vld [vmem:[%s7966_s1 + $0x13f0] sm:$0xff]  ;;  %v664_v63 = vld [vmem:[%s7966_s1 + $0x1428] sm:$0xff]  ;;  %v1308_v0 = vcombine.high %v5746_v51, %v5746_v51  ;;  %v662_v1 = vld [vmem:[%s7966_s1 + $0x1418] sm:$0xff] }
 0x11d   :  { %v663_v51 = vld [vmem:[%s7966_s1 + $0x1420] sm:$0xff] }
 0x11e   :  { %3140 = vmatpush1.bf16.msra.mxu0 %v3139_v14  ;;  %v3159_v14 = vpack.c.bf16 %v623_v6, %v619_v5  ;;  %v3177_v5 = vpack.c.bf16 %v664_v63, %v660_v60  ;;  %v659_v6 = vld [vmem:[%s7966_s1 + $0x1400] sm:$0xff]  ;;  %v697_v60 = vld [vmem:[%s7966_s1 + $0x1530] sm:$0xff]  ;;  %v700_v63 = vld [vmem:[%s7966_s1 + $0x1548] sm:$0xff] }
 0x11f   :  { %3752 = vmatpush1.bf16.msra.mxu1 %v3751_v15  ;;  %3142 = vmatprep.subr.bf16.mxu0 %v3141_v16  ;;  %v3771_v15 = vpack.c.bf16 %v625_v45, %v621_v7  ;;  %v3161_v16 = vpack.c.bf16 %v632_v10, %v628_v9  ;;  %v661_v7 = vld [vmem:[%s7966_s1 + $0x1410] sm:$0xff]  ;;  %v668_v9 = vld [vmem:[%s7966_s1 + $0x1448] sm:$0xff] }
 0x120   :  { %3754 = vmatprep.subr.bf16.mxu1 %v3753_v20  ;;  %v3773_v20 = vpack.c.bf16 %v634_v13, %v630_v12  ;;  %v665_v45 = vld [vmem:[%s7966_s1 + $0x1430] sm:$0xff]  ;;  %v672_v10 = vld [vmem:[%s7966_s1 + $0x1468] sm:$0xff]  ;;  %v6161_v12 = vrot.slane %v1308_v0, %v4427_v11  ;;  %v670_v13 = vld [vmem:[%s7966_s1 + $0x1458] sm:$0xff] }
 0x121   :  { %v704_v0 = vld [vmem:[%s7966_s1 + $0x1568] sm:$0xff] }
 0x122   :  { %3144 = vmatpush1.bf16.msra.mxu0 %v3143_v27  ;;  %v3163_v27 = vpack.c.bf16 %v631_v18, %v627_v17  ;;  %v3181_v17 = vpack.c.bf16 %v672_v10, %v668_v9  ;;  %v667_v18 = vld [vmem:[%s7966_s1 + $0x1440] sm:$0xff]  ;;  %v708_v9 = vld [vmem:[%s7966_s1 + $0x1588] sm:$0xff] }
 0x123   :  { %3756 = vmatpush1.bf16.msra.mxu1 %v3755_v28  ;;  %3146 = vmatprep.subr.bf16.mxu0 %v3145_v29  ;;  %v3775_v28 = vpack.c.bf16 %v633_v50, %v629_v19  ;;  %v3165_v29 = vpack.c.bf16 %v640_v22, %v636_v21  ;;  %v671_v19 = vld [vmem:[%s7966_s1 + $0x1460] sm:$0xff]  ;;  %v673_v21 = vld [vmem:[%s7966_s1 + $0x1470] sm:$0xff]  ;;  %v676_v22 = vld [vmem:[%s7966_s1 + $0x1488] sm:$0xff] }
 0x124   :  { %3758 = vmatprep.subr.bf16.mxu1 %v3757_v33  ;;  %v3777_v33 = vpack.c.bf16 %v642_v26, %v638_v23  ;;  %v680_v23 = vld [vmem:[%s7966_s1 + $0x14a8] sm:$0xff]  ;;  %v1324_v26 = vcombine.high %v6161_v12, %v6161_v12 }
 0x125   :  { %v712_v10 = vld [vmem:[%s7966_s1 + $0x15a8] sm:$0xff] }
 0x126   :  { %3148 = vmatpush1.bf16.msra.mxu0 %v3147_v40  ;;  %v3167_v40 = vpack.c.bf16 %v639_v31, %v635_v30  ;;  %v3185_v31 = vpack.c.bf16 %v680_v23, %v676_v22  ;;  %v716_v22 = vld [vmem:[%s7966_s1 + $0x15c8] sm:$0xff] }
 0x127   :  { %3760 = vmatpush1.bf16.msra.mxu1 %v3759_v41  ;;  %3150 = vmatprep.subr.bf16.mxu0 %v3149_v42  ;;  %v3779_v41 = vpack.c.bf16 %v641_v34, %v637_v32  ;;  %v3169_v42 = vpack.c.bf16 %v648_v36, %v644_v35  ;;  %v675_v32 = vld [vmem:[%s7966_s1 + $0x1480] sm:$0xff]  ;;  %v677_v34 = vld [vmem:[%s7966_s1 + $0x1490] sm:$0xff]  ;;  %v684_v36 = vld [vmem:[%s7966_s1 + $0x14c8] sm:$0xff] }
 0x128   :  { %3762 = vmatprep.subr.bf16.mxu1 %v3761_v46  ;;  %v3781_v46 = vpack.c.bf16 %v650_v38, %v646_v37  ;;  %v688_v37 = vld [vmem:[%s7966_s1 + $0x14e8] sm:$0xff]  ;;  %v686_v38 = vld [vmem:[%s7966_s1 + $0x14d8] sm:$0xff] }
 0x129   :  { %v720_v23 = vld [vmem:[%s7966_s1 + $0x15e8] sm:$0xff] }
 0x12a   :  { %3152 = vmatpush1.bf16.msra.mxu0 %v3151_v53  ;;  %v3171_v53 = vpack.c.bf16 %v647_v44, %v643_v43  ;;  %v3189_v43 = vpack.c.bf16 %v688_v37, %v684_v36  ;;  %v683_v44 = vld [vmem:[%s7966_s1 + $0x14c0] sm:$0xff]  ;;  %v728_v36 = vld [vmem:[%s7966_s1 + $0x1628] sm:$0xff]  ;;  %v726_v37 = vld [vmem:[%s7966_s1 + $0x1618] sm:$0xff] }
 0x12b   :  { %3764 = vmatpush1.bf16.msra.mxu1 %v3763_v54  ;;  %3154 = vmatprep.subr.bf16.mxu0 %v3153_v55  ;;  %v3783_v54 = vpack.c.bf16 %v649_v47, %v645_v39  ;;  %v3173_v55 = vpack.c.bf16 %v656_v48, %v652_v25  ;;  %v687_v39 = vld [vmem:[%s7966_s1 + $0x14e0] sm:$0xff]  ;;  %v689_v25 = vld [vmem:[%s7966_s1 + $0x14f0] sm:$0xff]  ;;  %v692_v48 = vld [vmem:[%s7966_s1 + $0x1508] sm:$0xff] }
 0x12c   :  { %3766 = vmatprep.subr.bf16.mxu1 %v3765_v24  ;;  %v3785_v24 = vpack.c.bf16 %v658_v52, %v654_v49  ;;  %v696_v49 = vld [vmem:[%s7966_s1 + $0x1528] sm:$0xff]  ;;  %v694_v52 = vld [vmem:[%s7966_s1 + $0x1518] sm:$0xff] }
 0x12e   :  { %3156 = vmatpush1.bf16.msra.mxu0 %v3155_v2  ;;  %v666_v2 = vld [vmem:[%s7966_s1 + $0x1438] sm:$0xff] }
 0x12f   :  { %3768 = vmatpush1.bf16.msra.mxu1 %v3767_v3  ;;  %3158 = vmatprep.subr.bf16.mxu0 %v3157_v4  ;;  %v3175_v3 = vpack.c.bf16 %v655_v57, %v651_v56  ;;  %v3787_v4 = vpack.c.bf16 %v657_v59, %v653_v58  ;;  %v3193_v56 = vpack.c.bf16 %v696_v49, %v692_v48  ;;  %v691_v57 = vld [vmem:[%s7966_s1 + $0x1500] sm:$0xff]  ;;  %v736_v48 = vld [vmem:[%s7966_s1 + $0x1668] sm:$0xff]  ;;  %v734_v49 = vld [vmem:[%s7966_s1 + $0x1658] sm:$0xff] }
 0x130   :  { %3770 = vmatprep.subr.bf16.mxu1 %v3769_v8  ;;  %v3789_v8 = vpack.c.bf16 %v666_v2, %v662_v1  ;;  %v695_v58 = vld [vmem:[%s7966_s1 + $0x1520] sm:$0xff]  ;;  %v702_v1 = vld [vmem:[%s7966_s1 + $0x1558] sm:$0xff] }
 0x131   :  { %v706_v2 = vld [vmem:[%s7966_s1 + $0x1578] sm:$0xff] }
 0x132   :  { %3160 = vmatpush1.bf16.msra.mxu0 %v3159_v14  ;;  %v674_v14 = vld [vmem:[%s7966_s1 + $0x1478] sm:$0xff] }
 0x133   :  { %3772 = vmatpush1.bf16.msra.mxu1 %v3771_v15  ;;  %3162 = vmatprep.subr.bf16.mxu0 %v3161_v16  ;;  %v3179_v15 = vpack.c.bf16 %v663_v51, %v659_v6  ;;  %v3791_v16 = vpack.c.bf16 %v665_v45, %v661_v7  ;;  %v3793_v50 = vpack.c.bf16 %v674_v14, %v670_v13  ;;  %v699_v6 = vld [vmem:[%s7966_s1 + $0x1540] sm:$0xff]  ;;  %v701_v7 = vld [vmem:[%s7966_s1 + $0x1550] sm:$0xff]  ;;  %v710_v13 = vld [vmem:[%s7966_s1 + $0x1598] sm:$0xff] }
 0x134   :  { %3774 = vmatprep.subr.bf16.mxu1 %v3773_v20  ;;  %v669_v20 = vld [vmem:[%s7966_s1 + $0x1450] sm:$0xff]  ;;  %v703_v51 = vld [vmem:[%s7966_s1 + $0x1560] sm:$0xff]  ;;  %v714_v14 = vld [vmem:[%s7966_s1 + $0x15b8] sm:$0xff] }
 0x135   :  { %v3795_v30 = vpack.c.bf16 %v673_v21, %v669_v20  ;;  %v705_v45 = vld [vmem:[%s7966_s1 + $0x1570] sm:$0xff] }
 0x136   :  { %3164 = vmatpush1.bf16.msra.mxu0 %v3163_v27  ;;  %v678_v27 = vld [vmem:[%s7966_s1 + $0x1498] sm:$0xff]  ;;  %v709_v20 = vld [vmem:[%s7966_s1 + $0x1590] sm:$0xff] }
 0x137   :  { %3776 = vmatpush1.bf16.msra.mxu1 %v3775_v28  ;;  %3166 = vmatprep.subr.bf16.mxu0 %v3165_v29  ;;  %v682_v28 = vld [vmem:[%s7966_s1 + $0x14b8] sm:$0xff]  ;;  %v3183_v29 = vpack.c.bf16 %v671_v19, %v667_v18  ;;  %v707_v18 = vld [vmem:[%s7966_s1 + $0x1580] sm:$0xff]  ;;  %v713_v21 = vld [vmem:[%s7966_s1 + $0x15b0] sm:$0xff] }
 0x138   :  { %3778 = vmatprep.subr.bf16.mxu1 %v3777_v33  ;;  %v679_v33 = vld [vmem:[%s7966_s1 + $0x14a0] sm:$0xff]  ;;  %v3797_v35 = vpack.c.bf16 %v682_v28, %v678_v27  ;;  %v722_v27 = vld [vmem:[%s7966_s1 + $0x15f8] sm:$0xff] }
 0x139   :  { %v711_v19 = vld [vmem:[%s7966_s1 + $0x15a0] sm:$0xff] }
 0x13a   :  { %3168 = vmatpush1.bf16.msra.mxu0 %v3167_v40  ;;  %v690_v40 = vld [vmem:[%s7966_s1 + $0x14f8] sm:$0xff]  ;;  %v3203_v28 = vpack.c.bf16 %v711_v19, %v707_v18  ;;  %v751_v18 = vld [vmem:[%s7966_s1 + $0x16e0] sm:$0xff]  ;;  %v749_v19 = vld [vmem:[%s7966_s1 + $0x16d0] sm:$0xff] }
 0x13b   :  { %3780 = vmatpush1.bf16.msra.mxu1 %v3779_v41  ;;  %3170 = vmatprep.subr.bf16.mxu0 %v3169_v42  ;;  %v3187_v41 = vpack.c.bf16 %v679_v33, %v675_v32  ;;  %v3801_v47 = vpack.c.bf16 %v690_v40, %v686_v38  ;;  %v719_v32 = vld [vmem:[%s7966_s1 + $0x15e0] sm:$0xff]  ;;  %v717_v33 = vld [vmem:[%s7966_s1 + $0x15d0] sm:$0xff]  ;;  %v730_v38 = vld [vmem:[%s7966_s1 + $0x1638] sm:$0xff] }
 0x13c   :  { %3782 = vmatprep.subr.bf16.mxu1 %v3781_v46  ;;  %v685_v46 = vld [vmem:[%s7966_s1 + $0x14d0] sm:$0xff] }
 0x13e   :  { %3172 = vmatpush1.bf16.msra.mxu0 %v3171_v53  ;;  %v698_v53 = vld [vmem:[%s7966_s1 + $0x1538] sm:$0xff] }
 0x13f   :  { %3784 = vmatpush1.bf16.msra.mxu1 %v3783_v54  ;;  %3174 = vmatprep.subr.bf16.mxu0 %v3173_v55  ;;  %v3191_v54 = vpack.c.bf16 %v687_v39, %v683_v44  ;;  %v3803_v55 = vpack.c.bf16 %v689_v25, %v685_v46  ;;  %v3805_v59 = vpack.c.bf16 %v698_v53, %v694_v52  ;;  %v727_v44 = vld [vmem:[%s7966_s1 + $0x1620] sm:$0xff]  ;;  %v725_v39 = vld [vmem:[%s7966_s1 + $0x1610] sm:$0xff]  ;;  %v732_v25 = vld [vmem:[%s7966_s1 + $0x1648] sm:$0xff] }
 0x140   :  { %3786 = vmatprep.subr.bf16.mxu1 %v3785_v24  ;;  %v693_v24 = vld [vmem:[%s7966_s1 + $0x1510] sm:$0xff]  ;;  %v3821_v46 = vpack.c.bf16 %v730_v38, %v726_v37  ;;  %v738_v52 = vld [vmem:[%s7966_s1 + $0x1678] sm:$0xff] }
 0x141   :  { %v770_v37 = vld [vmem:[%s7966_s1 + $0x1778] sm:$0xff] }
 0x142   :  { %3176 = vmatpush1.bf16.msra.mxu0 %v3175_v3  ;;  %v3195_v3 = vpack.c.bf16 %v695_v58, %v691_v57  ;;  %v735_v57 = vld [vmem:[%s7966_s1 + $0x1660] sm:$0xff]  ;;  %v733_v58 = vld [vmem:[%s7966_s1 + $0x1650] sm:$0xff] }
 0x143   :  { %3788 = vmatpush1.bf16.msra.mxu1 %v3787_v4  ;;  %3178 = vmatprep.subr.bf16.mxu0 %v3177_v5  ;;  %v3807_v4 = vpack.c.bf16 %v697_v60, %v693_v24  ;;  %v3197_v5 = vpack.c.bf16 %v704_v0, %v700_v63  ;;  %v3825_v24 = vpack.c.bf16 %v738_v52, %v734_v49  ;;  %v740_v60 = vld [vmem:[%s7966_s1 + $0x1688] sm:$0xff]  ;;  %v742_v0 = vld [vmem:[%s7966_s1 + $0x1698] sm:$0xff] }
 0x144   :  { %3790 = vmatprep.subr.bf16.mxu1 %v3789_v8  ;;  %v3809_v8 = vpack.c.bf16 %v706_v2, %v702_v1  ;;  %v744_v63 = vld [vmem:[%s7966_s1 + $0x16a8] sm:$0xff]  ;;  %v746_v1 = vld [vmem:[%s7966_s1 + $0x16b8] sm:$0xff] }
 0x145   :  { %1743 = vmatmul.mubr.f32.vlgmr.msra.gmra.mrb[0].mxu0 %v5768_v62  ;;  %v778_v49 = vld [vmem:[%s7966_s1 + $0x17b8] sm:$0xff] }
 0x146   :  { %3180 = vmatpush1.bf16.msra.mxu0 %v3179_v15  ;;  %2453 = vmatmul.mubr.f32.vlgmr.msra.gmra.mrb[0].mxu1 %v5768_v62  ;;  %v681_v62 = vld [vmem:[%s7966_s1 + $0x14b0] sm:$0xff]  ;;  %v3199_v15 = vpack.c.bf16 %v703_v51, %v699_v6  ;;  %v743_v6 = vld [vmem:[%s7966_s1 + $0x16a0] sm:$0xff] }
 0x147   :  { %3792 = vmatpush1.bf16.msra.mxu1 %v3791_v16  ;;  %3182 = vmatprep.subr.bf16.mxu0 %v3181_v17  ;;  %v3799_v42 = vpack.c.bf16 %v681_v62, %v677_v34  ;;  %v3811_v16 = vpack.c.bf16 %v705_v45, %v701_v7  ;;  %v3201_v17 = vpack.c.bf16 %v712_v10, %v708_v9  ;;  %v724_v62 = vld [vmem:[%s7966_s1 + $0x1608] sm:$0xff]  ;;  %v741_v51 = vld [vmem:[%s7966_s1 + $0x1690] sm:$0xff]  ;;  %v750_v10 = vld [vmem:[%s7966_s1 + $0x16d8] sm:$0xff] }
 0x148   :  { %3794 = vmatprep.subr.bf16.mxu1 %v3793_v50  ;;  %1813 = vmatprep.mubr.f32.mxu0 %v1324_v26  ;;  %v3813_v50 = vpack.c.bf16 %v714_v14, %v710_v13  ;;  %v3829_v7 = vpack.c.bf16 %v746_v1, %v742_v0  ;;  %v748_v45 = vld [vmem:[%s7966_s1 + $0x16c8] sm:$0xff]  ;;  %v754_v13 = vld [vmem:[%s7966_s1 + $0x16f8] sm:$0xff] }
 0x149   :  { %2523 = vmatprep.mubr.f32.mxu1 %v1324_v26  ;;  %v718_v26 = vld [vmem:[%s7966_s1 + $0x15d8] sm:$0xff]  ;;  %v752_v9 = vld [vmem:[%s7966_s1 + $0x16e8] sm:$0xff] }
 0x14a   :  { %3184 = vmatpush1.bf16.msra.mxu0 %v3183_v29  ;;  %v3815_v29 = vpack.c.bf16 %v713_v21, %v709_v20  ;;  %v3817_v34 = vpack.c.bf16 %v722_v27, %v718_v26  ;;  %v3833_v20 = vpack.c.bf16 %v754_v13, %v750_v10  ;;  %v756_v21 = vld [vmem:[%s7966_s1 + $0x1708] sm:$0xff]  ;;  %v762_v26 = vld [vmem:[%s7966_s1 + $0x1738] sm:$0xff] }
 0x14b   :  { %3796 = vmatpush1.bf16.msra.mxu1 %v3795_v30  ;;  %3186 = vmatprep.subr.bf16.mxu0 %v3185_v31  ;;  %v3205_v30 = vpack.c.bf16 %v720_v23, %v716_v22  ;;  %v715_v31 = vld [vmem:[%s7966_s1 + $0x15c0] sm:$0xff]  ;;  %v760_v22 = vld [vmem:[%s7966_s1 + $0x1728] sm:$0xff]  ;;  %v758_v23 = vld [vmem:[%s7966_s1 + $0x1718] sm:$0xff] }
 0x14c   :  { %3798 = vmatprep.subr.bf16.mxu1 %v3797_v35  ;;  %v721_v35 = vld [vmem:[%s7966_s1 + $0x15f0] sm:$0xff]  ;;  %v3207_v40 = vpack.c.bf16 %v719_v32, %v715_v31  ;;  %v759_v31 = vld [vmem:[%s7966_s1 + $0x1720] sm:$0xff]  ;;  %v786_v0 = vld [vmem:[%s7966_s1 + $0x17f8] sm:$0xff] }
 0x14d   :  { %v757_v32 = vld [vmem:[%s7966_s1 + $0x1710] sm:$0xff]  ;;  %v794_v10 = vld [vmem:[%s7966_s1 + $0x1838] sm:$0xff] }
 0x14e   :  { %3188 = vmatpush1.bf16.msra.mxu0 %v3187_v41  ;;  %v3819_v41 = vpack.c.bf16 %v721_v35, %v717_v33  ;;  %v3837_v33 = vpack.c.bf16 %v762_v26, %v758_v23  ;;  %v764_v35 = vld [vmem:[%s7966_s1 + $0x1748] sm:$0xff]  ;;  %v6536_v13 = vld [vmem:[%s7967_s0 + $0x18] sm:$0xff] }
 0x14f   :  { %3800 = vmatpush1.bf16.msra.mxu1 %v3799_v42  ;;  %3190 = vmatprep.subr.bf16.mxu0 %v3189_v43  ;;  %v3209_v42 = vpack.c.bf16 %v728_v36, %v724_v62  ;;  %v723_v43 = vld [vmem:[%s7966_s1 + $0x1600] sm:$0xff]  ;;  %v768_v62 = vld [vmem:[%s7966_s1 + $0x1768] sm:$0xff]  ;;  %v766_v36 = vld [vmem:[%s7966_s1 + $0x1758] sm:$0xff]  ;;  %v6558_v23 = vrot.slane %v6536_v13, %v4427_v11 }
 0x150   :  { %3802 = vmatprep.subr.bf16.mxu1 %v3801_v47  ;;  %v729_v47 = vld [vmem:[%s7966_s1 + $0x1630] sm:$0xff]  ;;  %v3211_v53 = vpack.c.bf16 %v727_v44, %v723_v43  ;;  %v767_v43 = vld [vmem:[%s7966_s1 + $0x1760] sm:$0xff]  ;;  %v798_v26 = vld [vmem:[%s7966_s1 + $0x1858] sm:$0xff] }
 0x151   :  { %v765_v44 = vld [vmem:[%s7966_s1 + $0x1750] sm:$0xff] }
 0x152   :  { %3192 = vmatpush1.bf16.msra.mxu0 %v3191_v54  ;;  %v3823_v54 = vpack.c.bf16 %v729_v47, %v725_v39  ;;  %v3841_v39 = vpack.c.bf16 %v770_v37, %v766_v36  ;;  %v772_v47 = vld [vmem:[%s7966_s1 + $0x1788] sm:$0xff]  ;;  %v1340_v37 = vcombine.high %v6558_v23, %v6558_v23 }
 0x153   :  { %3804 = vmatpush1.bf16.msra.mxu1 %v3803_v55  ;;  %3194 = vmatprep.subr.bf16.mxu0 %v3193_v56  ;;  %v3213_v55 = vpack.c.bf16 %v736_v48, %v732_v25  ;;  %v731_v56 = vld [vmem:[%s7966_s1 + $0x1640] sm:$0xff]  ;;  %v776_v25 = vld [vmem:[%s7966_s1 + $0x17a8] sm:$0xff]  ;;  %v774_v48 = vld [vmem:[%s7966_s1 + $0x1798] sm:$0xff] }
 0x154   :  { %3806 = vmatprep.subr.bf16.mxu1 %v3805_v59  ;;  %v737_v59 = vld [vmem:[%s7966_s1 + $0x1670] sm:$0xff]  ;;  %v3215_v2 = vpack.c.bf16 %v735_v57, %v731_v56  ;;  %v775_v56 = vld [vmem:[%s7966_s1 + $0x17a0] sm:$0xff]  ;;  %v808_v36 = vld [vmem:[%s7966_s1 + $0x18a8] sm:$0xff] }
 0x155   :  { %v773_v57 = vld [vmem:[%s7966_s1 + $0x1790] sm:$0xff] }
 0x156   :  { %3196 = vmatpush1.bf16.msra.mxu0 %v3195_v3  ;;  %v3827_v3 = vpack.c.bf16 %v737_v59, %v733_v58  ;;  %v3845_v58 = vpack.c.bf16 %v778_v49, %v774_v48  ;;  %v780_v59 = vld [vmem:[%s7966_s1 + $0x17c8] sm:$0xff]  ;;  %v814_v49 = vld [vmem:[%s7966_s1 + $0x18d8] sm:$0xff] }
 0x157   :  { %3808 = vmatpush1.bf16.msra.mxu1 %v3807_v4  ;;  %3198 = vmatprep.subr.bf16.mxu0 %v3197_v5  ;;  %v3217_v4 = vpack.c.bf16 %v744_v63, %v740_v60  ;;  %v739_v5 = vld [vmem:[%s7966_s1 + $0x1680] sm:$0xff]  ;;  %v784_v60 = vld [vmem:[%s7966_s1 + $0x17e8] sm:$0xff]  ;;  %v782_v63 = vld [vmem:[%s7966_s1 + $0x17d8] sm:$0xff] }
 0x158   :  { %3810 = vmatprep.subr.bf16.mxu1 %v3809_v8  ;;  %v745_v8 = vld [vmem:[%s7966_s1 + $0x16b0] sm:$0xff]  ;;  %v3219_v14 = vpack.c.bf16 %v743_v6, %v739_v5  ;;  %v783_v5 = vld [vmem:[%s7966_s1 + $0x17e0] sm:$0xff]  ;;  %v816_v48 = vld [vmem:[%s7966_s1 + $0x18e8] sm:$0xff] }
 0x159   :  { %v781_v6 = vld [vmem:[%s7966_s1 + $0x17d0] sm:$0xff] }
 0x15a   :  { %3200 = vmatpush1.bf16.msra.mxu0 %v3199_v15  ;;  %v3831_v15 = vpack.c.bf16 %v745_v8, %v741_v51  ;;  %v3849_v51 = vpack.c.bf16 %v786_v0, %v782_v63  ;;  %v788_v8 = vld [vmem:[%s7966_s1 + $0x1808] sm:$0xff]  ;;  %v822_v0 = vld [vmem:[%s7966_s1 + $0x1918] sm:$0xff] }
 0x15b   :  { %3812 = vmatpush1.bf16.msra.mxu1 %v3811_v16  ;;  %3202 = vmatprep.subr.bf16.mxu0 %v3201_v17  ;;  %v3221_v16 = vpack.c.bf16 %v752_v9, %v748_v45  ;;  %v747_v17 = vld [vmem:[%s7966_s1 + $0x16c0] sm:$0xff]  ;;  %v792_v45 = vld [vmem:[%s7966_s1 + $0x1828] sm:$0xff]  ;;  %v790_v9 = vld [vmem:[%s7966_s1 + $0x1818] sm:$0xff] }
 0x15c   :  { %3814 = vmatprep.subr.bf16.mxu1 %v3813_v50  ;;  %v753_v50 = vld [vmem:[%s7966_s1 + $0x16f0] sm:$0xff]  ;;  %v3223_v27 = vpack.c.bf16 %v751_v18, %v747_v17  ;;  %v787_v17 = vld [vmem:[%s7966_s1 + $0x1800] sm:$0xff]  ;;  %v824_v63 = vld [vmem:[%s7966_s1 + $0x1928] sm:$0xff] }
 0x15d   :  { %v791_v18 = vld [vmem:[%s7966_s1 + $0x1820] sm:$0xff] }
 0x15e   :  { %3204 = vmatpush1.bf16.msra.mxu0 %v3203_v28  ;;  %v3835_v28 = vpack.c.bf16 %v753_v50, %v749_v19  ;;  %v789_v19 = vld [vmem:[%s7966_s1 + $0x1810] sm:$0xff] }
 0x15f   :  { %3816 = vmatpush1.bf16.msra.mxu1 %v3815_v29  ;;  %3206 = vmatprep.subr.bf16.mxu0 %v3205_v30  ;;  %v3225_v29 = vpack.c.bf16 %v760_v22, %v756_v21  ;;  %v755_v30 = vld [vmem:[%s7966_s1 + $0x1700] sm:$0xff]  ;;  %v793_v50 = vld [vmem:[%s7966_s1 + $0x1830] sm:$0xff]  ;;  %v796_v21 = vld [vmem:[%s7966_s1 + $0x1848] sm:$0xff] }
 0x160   :  { %3818 = vmatprep.subr.bf16.mxu1 %v3817_v34  ;;  %v761_v34 = vld [vmem:[%s7966_s1 + $0x1730] sm:$0xff]  ;;  %v3227_v38 = vpack.c.bf16 %v759_v31, %v755_v30  ;;  %v800_v22 = vld [vmem:[%s7966_s1 + $0x1868] sm:$0xff]  ;;  %v795_v31 = vld [vmem:[%s7966_s1 + $0x1840] sm:$0xff] }
 0x161   :  { %v3245_v30 = vpack.c.bf16 %v800_v22, %v796_v21  ;;  %v833_v21 = vld [vmem:[%s7966_s1 + $0x1970] sm:$0xff]  ;;  %v836_v22 = vld [vmem:[%s7966_s1 + $0x1988] sm:$0xff] }
 0x162   :  { %3208 = vmatpush1.bf16.msra.mxu0 %v3207_v40  ;;  %v3839_v40 = vpack.c.bf16 %v761_v34, %v757_v32  ;;  %v799_v32 = vld [vmem:[%s7966_s1 + $0x1860] sm:$0xff] }
 0x163   :  { %3820 = vmatpush1.bf16.msra.mxu1 %v3819_v41  ;;  %3210 = vmatprep.subr.bf16.mxu0 %v3209_v42  ;;  %v3229_v41 = vpack.c.bf16 %v768_v62, %v764_v35  ;;  %v763_v42 = vld [vmem:[%s7966_s1 + $0x1740] sm:$0xff]  ;;  %v801_v35 = vld [vmem:[%s7966_s1 + $0x1870] sm:$0xff]  ;;  %v804_v62 = vld [vmem:[%s7966_s1 + $0x1888] sm:$0xff] }
 0x164   :  { %3822 = vmatprep.subr.bf16.mxu1 %v3821_v46  ;;  %v769_v46 = vld [vmem:[%s7966_s1 + $0x1770] sm:$0xff]  ;;  %v3231_v52 = vpack.c.bf16 %v767_v43, %v763_v42  ;;  %v3249_v43 = vpack.c.bf16 %v808_v36, %v804_v62  ;;  %v844_v36 = vld [vmem:[%s7966_s1 + $0x19c8] sm:$0xff] }
 0x165   :  { %v841_v62 = vld [vmem:[%s7966_s1 + $0x19b0] sm:$0xff] }
 0x166   :  { %3212 = vmatpush1.bf16.msra.mxu0 %v3211_v53  ;;  %v3843_v53 = vpack.c.bf16 %v769_v46, %v765_v44  ;;  %v803_v44 = vld [vmem:[%s7966_s1 + $0x1880] sm:$0xff]  ;;  %v805_v46 = vld [vmem:[%s7966_s1 + $0x1890] sm:$0xff] }
 0x167   :  { %3824 = vmatpush1.bf16.msra.mxu1 %v3823_v54  ;;  %3214 = vmatprep.subr.bf16.mxu0 %v3213_v55  ;;  %v3233_v54 = vpack.c.bf16 %v776_v25, %v772_v47  ;;  %v771_v55 = vld [vmem:[%s7966_s1 + $0x1780] sm:$0xff]  ;;  %v812_v25 = vld [vmem:[%s7966_s1 + $0x18c8] sm:$0xff] }
 0x168   :  { %3826 = vmatprep.subr.bf16.mxu1 %v3825_v24  ;;  %v777_v24 = vld [vmem:[%s7966_s1 + $0x17b0] sm:$0xff]  ;;  %v3235_v1 = vpack.c.bf16 %v775_v56, %v771_v55  ;;  %v3253_v55 = vpack.c.bf16 %v816_v48, %v812_v25  ;;  %v811_v56 = vld [vmem:[%s7966_s1 + $0x18c0] sm:$0xff]  ;;  %v852_v25 = vld [vmem:[%s7966_s1 + $0x1a08] sm:$0xff] }
 0x169   :  { %v856_v48 = vld [vmem:[%s7966_s1 + $0x1a28] sm:$0xff] }
 0x16a   :  { %3216 = vmatpush1.bf16.msra.mxu0 %v3215_v2  ;;  %v3847_v2 = vpack.c.bf16 %v777_v24, %v773_v57  ;;  %v815_v57 = vld [vmem:[%s7966_s1 + $0x18e0] sm:$0xff] }
 0x16b   :  { %3828 = vmatpush1.bf16.msra.mxu1 %v3827_v3  ;;  %3218 = vmatprep.subr.bf16.mxu0 %v3217_v4  ;;  %v3237_v3 = vpack.c.bf16 %v784_v60, %v780_v59  ;;  %v779_v4 = vld [vmem:[%s7966_s1 + $0x17c0] sm:$0xff]  ;;  %v817_v59 = vld [vmem:[%s7966_s1 + $0x18f0] sm:$0xff]  ;;  %v820_v60 = vld [vmem:[%s7966_s1 + $0x1908] sm:$0xff] }
 0x16c   :  { %3830 = vmatprep.subr.bf16.mxu1 %v3829_v7  ;;  %v785_v7 = vld [vmem:[%s7966_s1 + $0x17f0] sm:$0xff] }
 0x16e   :  { %3220 = vmatpush1.bf16.msra.mxu0 %v3219_v14  ;;  %v3239_v14 = vpack.c.bf16 %v783_v5, %v779_v4  ;;  %v3257_v4 = vpack.c.bf16 %v824_v63, %v820_v60  ;;  %v819_v5 = vld [vmem:[%s7966_s1 + $0x1900] sm:$0xff]  ;;  %v860_v60 = vld [vmem:[%s7966_s1 + $0x1a48] sm:$0xff] }
 0x16f   :  { %3832 = vmatpush1.bf16.msra.mxu1 %v3831_v15  ;;  %3222 = vmatprep.subr.bf16.mxu0 %v3221_v16  ;;  %v3851_v15 = vpack.c.bf16 %v785_v7, %v781_v6  ;;  %v3241_v16 = vpack.c.bf16 %v792_v45, %v788_v8  ;;  %v823_v6 = vld [vmem:[%s7966_s1 + $0x1920] sm:$0xff]  ;;  %v825_v8 = vld [vmem:[%s7966_s1 + $0x1930] sm:$0xff]  ;;  %v828_v45 = vld [vmem:[%s7966_s1 + $0x1948] sm:$0xff] }
 0x170   :  { %3834 = vmatprep.subr.bf16.mxu1 %v3833_v20  ;;  %v3853_v20 = vpack.c.bf16 %v794_v10, %v790_v9  ;;  %v832_v9 = vld [vmem:[%s7966_s1 + $0x1968] sm:$0xff]  ;;  %v830_v10 = vld [vmem:[%s7966_s1 + $0x1958] sm:$0xff] }
 0x171   :  { %v864_v63 = vld [vmem:[%s7966_s1 + $0x1a68] sm:$0xff] }
 0x172   :  { %3224 = vmatpush1.bf16.msra.mxu0 %v3223_v27  ;;  %v802_v27 = vld [vmem:[%s7966_s1 + $0x1878] sm:$0xff] }
 0x173   :  { %3836 = vmatpush1.bf16.msra.mxu1 %v3835_v28  ;;  %3226 = vmatprep.subr.bf16.mxu0 %v3225_v29  ;;  %v3243_v28 = vpack.c.bf16 %v791_v18, %v787_v17  ;;  %v3855_v29 = vpack.c.bf16 %v793_v50, %v789_v19  ;;  %v3857_v34 = vpack.c.bf16 %v802_v27, %v798_v26  ;;  %v827_v18 = vld [vmem:[%s7966_s1 + $0x1940] sm:$0xff]  ;;  %v840_v26 = vld [vmem:[%s7966_s1 + $0x19a8] sm:$0xff]  ;;  %v838_v27 = vld [vmem:[%s7966_s1 + $0x1998] sm:$0xff] }
 0x174   :  { %3838 = vmatprep.subr.bf16.mxu1 %v3837_v33  ;;  %v797_v33 = vld [vmem:[%s7966_s1 + $0x1850] sm:$0xff]  ;;  %v3261_v17 = vpack.c.bf16 %v832_v9, %v828_v45  ;;  %v831_v19 = vld [vmem:[%s7966_s1 + $0x1960] sm:$0xff]  ;;  %v868_v45 = vld [vmem:[%s7966_s1 + $0x1a88] sm:$0xff] }
 0x175   :  { %v3859_v42 = vpack.c.bf16 %v801_v35, %v797_v33  ;;  %v839_v33 = vld [vmem:[%s7966_s1 + $0x19a0] sm:$0xff]  ;;  %v872_v9 = vld [vmem:[%s7966_s1 + $0x1aa8] sm:$0xff] }
 0x176   :  { %3228 = vmatpush1.bf16.msra.mxu0 %v3227_v38  ;;  %v806_v38 = vld [vmem:[%s7966_s1 + $0x1898] sm:$0xff] }
 0x177   :  { %3840 = vmatpush1.bf16.msra.mxu1 %v3839_v40  ;;  %3230 = vmatprep.subr.bf16.mxu0 %v3229_v41  ;;  %v810_v40 = vld [vmem:[%s7966_s1 + $0x18b8] sm:$0xff]  ;;  %v3247_v41 = vpack.c.bf16 %v799_v32, %v795_v31  ;;  %v3265_v31 = vpack.c.bf16 %v840_v26, %v836_v22  ;;  %v835_v32 = vld [vmem:[%s7966_s1 + $0x1980] sm:$0xff]  ;;  %v876_v22 = vld [vmem:[%s7966_s1 + $0x1ac8] sm:$0xff] }
 0x178   :  { %3842 = vmatprep.subr.bf16.mxu1 %v3841_v39  ;;  %v807_v39 = vld [vmem:[%s7966_s1 + $0x18a0] sm:$0xff]  ;;  %v3861_v47 = vpack.c.bf16 %v810_v40, %v806_v38  ;;  %v846_v38 = vld [vmem:[%s7966_s1 + $0x19d8] sm:$0xff]  ;;  %v880_v26 = vld [vmem:[%s7966_s1 + $0x1ae8] sm:$0xff] }
 0x179   :  { %v850_v40 = vld [vmem:[%s7966_s1 + $0x19f8] sm:$0xff] }
 0x17a   :  { %3232 = vmatpush1.bf16.msra.mxu0 %v3231_v52  ;;  %v818_v52 = vld [vmem:[%s7966_s1 + $0x18f8] sm:$0xff] }
 0x17b   :  { %3844 = vmatpush1.bf16.msra.mxu1 %v3843_v53  ;;  %3234 = vmatprep.subr.bf16.mxu0 %v3233_v54  ;;  %v3251_v53 = vpack.c.bf16 %v807_v39, %v803_v44  ;;  %v3865_v24 = vpack.c.bf16 %v818_v52, %v814_v49  ;;  %v843_v44 = vld [vmem:[%s7966_s1 + $0x19c0] sm:$0xff]  ;;  %v854_v49 = vld [vmem:[%s7966_s1 + $0x1a18] sm:$0xff] }
 0x17c   :  { %3846 = vmatprep.subr.bf16.mxu1 %v3845_v58  ;;  %v813_v58 = vld [vmem:[%s7966_s1 + $0x18d0] sm:$0xff]  ;;  %v847_v39 = vld [vmem:[%s7966_s1 + $0x19e0] sm:$0xff]  ;;  %v858_v52 = vld [vmem:[%s7966_s1 + $0x1a38] sm:$0xff] }
 0x17e   :  { %3236 = vmatpush1.bf16.msra.mxu0 %v3235_v1  ;;  %v826_v1 = vld [vmem:[%s7966_s1 + $0x1938] sm:$0xff] }
 0x17f   :  { %3848 = vmatpush1.bf16.msra.mxu1 %v3847_v2  ;;  %3238 = vmatprep.subr.bf16.mxu0 %v3237_v3  ;;  %v3255_v2 = vpack.c.bf16 %v815_v57, %v811_v56  ;;  %v3867_v3 = vpack.c.bf16 %v817_v59, %v813_v58  ;;  %v3869_v7 = vpack.c.bf16 %v826_v1, %v822_v0  ;;  %v851_v56 = vld [vmem:[%s7966_s1 + $0x1a00] sm:$0xff]  ;;  %v853_v58 = vld [vmem:[%s7966_s1 + $0x1a10] sm:$0xff]  ;;  %v862_v0 = vld [vmem:[%s7966_s1 + $0x1a58] sm:$0xff] }
 0x180   :  { %3850 = vmatprep.subr.bf16.mxu1 %v3849_v51  ;;  %v821_v51 = vld [vmem:[%s7966_s1 + $0x1910] sm:$0xff]  ;;  %v855_v57 = vld [vmem:[%s7966_s1 + $0x1a20] sm:$0xff]  ;;  %v866_v1 = vld [vmem:[%s7966_s1 + $0x1a78] sm:$0xff] }
 0x181   :  { %v857_v59 = vld [vmem:[%s7966_s1 + $0x1a30] sm:$0xff] }
 0x182   :  { %3240 = vmatpush1.bf16.msra.mxu0 %v3239_v14  ;;  %v834_v14 = vld [vmem:[%s7966_s1 + $0x1978] sm:$0xff] }
 0x183   :  { %3852 = vmatpush1.bf16.msra.mxu1 %v3851_v15  ;;  %3242 = vmatprep.subr.bf16.mxu0 %v3241_v16  ;;  %v3259_v15 = vpack.c.bf16 %v823_v6, %v819_v5  ;;  %v3871_v16 = vpack.c.bf16 %v825_v8, %v821_v51  ;;  %v3873_v50 = vpack.c.bf16 %v834_v14, %v830_v10  ;;  %v859_v5 = vld [vmem:[%s7966_s1 + $0x1a40] sm:$0xff]  ;;  %v861_v51 = vld [vmem:[%s7966_s1 + $0x1a50] sm:$0xff]  ;;  %v870_v10 = vld [vmem:[%s7966_s1 + $0x1a98] sm:$0xff] }
 0x184   :  { %3854 = vmatprep.subr.bf16.mxu1 %v3853_v20  ;;  %v829_v20 = vld [vmem:[%s7966_s1 + $0x1950] sm:$0xff]  ;;  %v863_v6 = vld [vmem:[%s7966_s1 + $0x1a60] sm:$0xff]  ;;  %v874_v14 = vld [vmem:[%s7966_s1 + $0x1ab8] sm:$0xff] }
 0x185   :  { %1814 = vmatmul.mubr.f32.vlgmr.msra.gmra.mrb[0].mxu0 %v6161_v12  ;;  %v865_v8 = vld [vmem:[%s7966_s1 + $0x1a70] sm:$0xff] }
 0x186   :  { %3244 = vmatpush1.bf16.msra.mxu0 %v3243_v28  ;;  %2524 = vmatmul.mubr.f32.vlgmr.msra.gmra.mrb[0].mxu1 %v6161_v12  ;;  %v809_v12 = vld [vmem:[%s7966_s1 + $0x18b0] sm:$0xff]  ;;  %v842_v28 = vld [vmem:[%s7966_s1 + $0x19b8] sm:$0xff] }
 0x187   :  { %3856 = vmatpush1.bf16.msra.mxu1 %v3855_v29  ;;  %3246 = vmatprep.subr.bf16.mxu0 %v3245_v30  ;;  %v3863_v54 = vpack.c.bf16 %v809_v12, %v805_v46  ;;  %v3263_v29 = vpack.c.bf16 %v831_v19, %v827_v18  ;;  %v3875_v30 = vpack.c.bf16 %v833_v21, %v829_v20  ;;  %v845_v46 = vld [vmem:[%s7966_s1 + $0x19d0] sm:$0xff]  ;;  %v867_v18 = vld [vmem:[%s7966_s1 + $0x1a80] sm:$0xff] }
 0x188   :  { %3858 = vmatprep.subr.bf16.mxu1 %v3857_v34  ;;  %1884 = vmatprep.mubr.f32.mxu0 %v1340_v37  ;;  %v837_v34 = vld [vmem:[%s7966_s1 + $0x1990] sm:$0xff]  ;;  %v3877_v35 = vpack.c.bf16 %v842_v28, %v838_v27  ;;  %v871_v19 = vld [vmem:[%s7966_s1 + $0x1aa0] sm:$0xff]  ;;  %v878_v27 = vld [vmem:[%s7966_s1 + $0x1ad8] sm:$0xff] }
 0x189   :  { %2594 = vmatprep.mubr.f32.mxu1 %v1340_v37  ;;  %v848_v37 = vld [vmem:[%s7966_s1 + $0x19e8] sm:$0xff]  ;;  %v849_v12 = vld [vmem:[%s7966_s1 + $0x19f0] sm:$0xff]  ;;  %v882_v28 = vld [vmem:[%s7966_s1 + $0x1af8] sm:$0xff] }
 0x18a   :  { %3248 = vmatpush1.bf16.msra.mxu0 %v3247_v41  ;;  %v3267_v41 = vpack.c.bf16 %v839_v33, %v835_v32  ;;  %v869_v20 = vld [vmem:[%s7966_s1 + $0x1a90] sm:$0xff]  ;;  %v875_v32 = vld [vmem:[%s7966_s1 + $0x1ac0] sm:$0xff] }
 0x18b   :  { %3860 = vmatpush1.bf16.msra.mxu1 %v3859_v42  ;;  %3250 = vmatprep.subr.bf16.mxu0 %v3249_v43  ;;  %v3879_v42 = vpack.c.bf16 %v841_v62, %v837_v34  ;;  %v3269_v43 = vpack.c.bf16 %v848_v37, %v844_v36  ;;  %v873_v21 = vld [vmem:[%s7966_s1 + $0x1ab0] sm:$0xff]  ;;  %v879_v33 = vld [vmem:[%s7966_s1 + $0x1ae0] sm:$0xff]  ;;  %v884_v36 = vld [vmem:[%s7966_s1 + $0x1b08] sm:$0xff] }
 0x18c   :  { %3862 = vmatprep.subr.bf16.mxu1 %v3861_v47  ;;  %v3881_v47 = vpack.c.bf16 %v850_v40, %v846_v38  ;;  %v877_v34 = vld [vmem:[%s7966_s1 + $0x1ad0] sm:$0xff]  ;;  %v888_v37 = vld [vmem:[%s7966_s1 + $0x1b28] sm:$0xff]  ;;  %v886_v38 = vld [vmem:[%s7966_s1 + $0x1b18] sm:$0xff] }
 0x18d   :  { %v881_v62 = vld [vmem:[%s7966_s1 + $0x1af0] sm:$0xff]  ;;  %v890_v40 = vld [vmem:[%s7966_s1 + $0x1b38] sm:$0xff] }
 0x18e   :  { %3252 = vmatpush1.bf16.msra.mxu0 %v3251_v53  ;;  %v3271_v53 = vpack.c.bf16 %v847_v39, %v843_v44  ;;  %v883_v44 = vld [vmem:[%s7966_s1 + $0x1b00] sm:$0xff] }
 0x18f   :  { %3864 = vmatpush1.bf16.msra.mxu1 %v3863_v54  ;;  %3254 = vmatprep.subr.bf16.mxu0 %v3253_v55  ;;  %v3883_v54 = vpack.c.bf16 %v849_v12, %v845_v46  ;;  %v3273_v55 = vpack.c.bf16 %v856_v48, %v852_v25  ;;  %v887_v39 = vld [vmem:[%s7966_s1 + $0x1b20] sm:$0xff]  ;;  %v885_v46 = vld [vmem:[%s7966_s1 + $0x1b10] sm:$0xff]  ;;  %v892_v25 = vld [vmem:[%s7966_s1 + $0x1b48] sm:$0xff] }
 0x190   :  { %3866 = vmatprep.subr.bf16.mxu1 %v3865_v24  ;;  %v3885_v24 = vpack.c.bf16 %v858_v52, %v854_v49  ;;  %v889_v12 = vld [vmem:[%s7966_s1 + $0x1b30] sm:$0xff]  ;;  %v896_v48 = vld [vmem:[%s7966_s1 + $0x1b68] sm:$0xff]  ;;  %v894_v49 = vld [vmem:[%s7966_s1 + $0x1b58] sm:$0xff] }
 0x191   :  { %v898_v52 = vld [vmem:[%s7966_s1 + $0x1b78] sm:$0xff] }
 0x192   :  { %3256 = vmatpush1.bf16.msra.mxu0 %v3255_v2  ;;  %v3275_v2 = vpack.c.bf16 %v855_v57, %v851_v56  ;;  %v891_v56 = vld [vmem:[%s7966_s1 + $0x1b40] sm:$0xff] }
 0x193   :  { %3868 = vmatpush1.bf16.msra.mxu1 %v3867_v3  ;;  %3258 = vmatprep.subr.bf16.mxu0 %v3257_v4  ;;  %v3887_v3 = vpack.c.bf16 %v857_v59, %v853_v58  ;;  %v3277_v4 = vpack.c.bf16 %v864_v63, %v860_v60  ;;  %v895_v57 = vld [vmem:[%s7966_s1 + $0x1b60] sm:$0xff]  ;;  %v893_v58 = vld [vmem:[%s7966_s1 + $0x1b50] sm:$0xff]  ;;  %v900_v60 = vld [vmem:[%s7966_s1 + $0x1b88] sm:$0xff] }
 0x194   :  { %3870 = vmatprep.subr.bf16.mxu1 %v3869_v7  ;;  %v3889_v7 = vpack.c.bf16 %v866_v1, %v862_v0  ;;  %v897_v59 = vld [vmem:[%s7966_s1 + $0x1b70] sm:$0xff]  ;;  %v904_v63 = vld [vmem:[%s7966_s1 + $0x1ba8] sm:$0xff]  ;;  %v902_v0 = vld [vmem:[%s7966_s1 + $0x1b98] sm:$0xff] }
 0x195   :  { %v906_v1 = vld [vmem:[%s7966_s1 + $0x1bb8] sm:$0xff] }
 0x196   :  { %3260 = vmatpush1.bf16.msra.mxu0 %v3259_v15  ;;  %v3279_v15 = vpack.c.bf16 %v863_v6, %v859_v5  ;;  %v899_v5 = vld [vmem:[%s7966_s1 + $0x1b80] sm:$0xff] }
 0x197   :  { %3872 = vmatpush1.bf16.msra.mxu1 %v3871_v16  ;;  %3262 = vmatprep.subr.bf16.mxu0 %v3261_v17  ;;  %v3891_v16 = vpack.c.bf16 %v865_v8, %v861_v51  ;;  %v3281_v17 = vpack.c.bf16 %v872_v9, %v868_v45  ;;  %v903_v6 = vld [vmem:[%s7966_s1 + $0x1ba0] sm:$0xff]  ;;  %v901_v51 = vld [vmem:[%s7966_s1 + $0x1b90] sm:$0xff]  ;;  %v908_v45 = vld [vmem:[%s7966_s1 + $0x1bc8] sm:$0xff] }
 0x198   :  { %3874 = vmatprep.subr.bf16.mxu1 %v3873_v50  ;;  %v3893_v50 = vpack.c.bf16 %v874_v14, %v870_v10  ;;  %v905_v8 = vld [vmem:[%s7966_s1 + $0x1bb0] sm:$0xff]  ;;  %v912_v9 = vld [vmem:[%s7966_s1 + $0x1be8] sm:$0xff]  ;;  %v910_v10 = vld [vmem:[%s7966_s1 + $0x1bd8] sm:$0xff] }
 0x199   :  { %v914_v14 = vld [vmem:[%s7966_s1 + $0x1bf8] sm:$0xff] }
 0x19a   :  { %3264 = vmatpush1.bf16.msra.mxu0 %v3263_v29  ;;  %v3283_v29 = vpack.c.bf16 %v871_v19, %v867_v18  ;;  %v907_v18 = vld [vmem:[%s7966_s1 + $0x1bc0] sm:$0xff] }
 0x19b   :  { %3876 = vmatpush1.bf16.msra.mxu1 %v3875_v30  ;;  %3266 = vmatprep.subr.bf16.mxu0 %v3265_v31  ;;  %v3895_v30 = vpack.c.bf16 %v873_v21, %v869_v20  ;;  %v3285_v31 = vpack.c.bf16 %v880_v26, %v876_v22  ;;  %v911_v19 = vld [vmem:[%s7966_s1 + $0x1be0] sm:$0xff]  ;;  %v909_v20 = vld [vmem:[%s7966_s1 + $0x1bd0] sm:$0xff]  ;;  %v916_v22 = vld [vmem:[%s7966_s1 + $0x1c08] sm:$0xff] }
 0x19c   :  { %3878 = vmatprep.subr.bf16.mxu1 %v3877_v35  ;;  %v3897_v35 = vpack.c.bf16 %v882_v28, %v878_v27  ;;  %v913_v21 = vld [vmem:[%s7966_s1 + $0x1bf0] sm:$0xff]  ;;  %v920_v26 = vld [vmem:[%s7966_s1 + $0x1c28] sm:$0xff]  ;;  %v1325_v27 = vcombine.high %v6536_v13, %v6536_v13  ;;  %v918_v28 = vld [vmem:[%s7966_s1 + $0x1c18] sm:$0xff] }
 0x19d   :  { %v919_v13 = vld [vmem:[%s7966_s1 + $0x1c20] sm:$0xff] }
 0x19e   :  { %3268 = vmatpush1.bf16.msra.mxu0 %v3267_v41  ;;  %v3287_v41 = vpack.c.bf16 %v879_v33, %v875_v32  ;;  %v3305_v32 = vpack.c.bf16 %v920_v26, %v916_v22  ;;  %v915_v33 = vld [vmem:[%s7966_s1 + $0x1c00] sm:$0xff]  ;;  %v953_v22 = vld [vmem:[%s7966_s1 + $0x1d30] sm:$0xff]  ;;  %v956_v26 = vld [vmem:[%s7966_s1 + $0x1d48] sm:$0xff] }
 0x19f   :  { %3880 = vmatpush1.bf16.msra.mxu1 %v3879_v42  ;;  %3270 = vmatprep.subr.bf16.mxu0 %v3269_v43  ;;  %v3899_v42 = vpack.c.bf16 %v881_v62, %v877_v34  ;;  %v3289_v43 = vpack.c.bf16 %v888_v37, %v884_v36  ;;  %v917_v34 = vld [vmem:[%s7966_s1 + $0x1c10] sm:$0xff]  ;;  %v924_v36 = vld [vmem:[%s7966_s1 + $0x1c48] sm:$0xff] }
 0x1a0   :  { %3882 = vmatprep.subr.bf16.mxu1 %v3881_v47  ;;  %v3901_v47 = vpack.c.bf16 %v890_v40, %v886_v38  ;;  %v921_v62 = vld [vmem:[%s7966_s1 + $0x1c30] sm:$0xff]  ;;  %v928_v37 = vld [vmem:[%s7966_s1 + $0x1c68] sm:$0xff]  ;;  %v6951_v38 = vrot.slane %v1325_v27, %v4427_v11  ;;  %v926_v40 = vld [vmem:[%s7966_s1 + $0x1c58] sm:$0xff] }
 0x1a1   :  { %v960_v27 = vld [vmem:[%s7966_s1 + $0x1d68] sm:$0xff] }
 0x1a2   :  { %3272 = vmatpush1.bf16.msra.mxu0 %v3271_v53  ;;  %v3291_v53 = vpack.c.bf16 %v887_v39, %v883_v44  ;;  %v3309_v44 = vpack.c.bf16 %v928_v37, %v924_v36  ;;  %v923_v39 = vld [vmem:[%s7966_s1 + $0x1c40] sm:$0xff]  ;;  %v964_v36 = vld [vmem:[%s7966_s1 + $0x1d88] sm:$0xff] }
 0x1a3   :  { %3884 = vmatpush1.bf16.msra.mxu1 %v3883_v54  ;;  %3274 = vmatprep.subr.bf16.mxu0 %v3273_v55  ;;  %v3903_v54 = vpack.c.bf16 %v889_v12, %v885_v46  ;;  %v3293_v55 = vpack.c.bf16 %v896_v48, %v892_v25  ;;  %v927_v46 = vld [vmem:[%s7966_s1 + $0x1c60] sm:$0xff]  ;;  %v929_v25 = vld [vmem:[%s7966_s1 + $0x1c70] sm:$0xff]  ;;  %v932_v48 = vld [vmem:[%s7966_s1 + $0x1c88] sm:$0xff] }
 0x1a4   :  { %3886 = vmatprep.subr.bf16.mxu1 %v3885_v24  ;;  %v3905_v24 = vpack.c.bf16 %v898_v52, %v894_v49  ;;  %v936_v49 = vld [vmem:[%s7966_s1 + $0x1ca8] sm:$0xff]  ;;  %v1341_v52 = vcombine.high %v6951_v38, %v6951_v38 }
 0x1a5   :  { %v968_v37 = vld [vmem:[%s7966_s1 + $0x1da8] sm:$0xff] }
 0x1a6   :  { %3276 = vmatpush1.bf16.msra.mxu0 %v3275_v2  ;;  %v3295_v2 = vpack.c.bf16 %v895_v57, %v891_v56  ;;  %v3313_v57 = vpack.c.bf16 %v936_v49, %v932_v48  ;;  %v972_v48 = vld [vmem:[%s7966_s1 + $0x1dc8] sm:$0xff] }
 0x1a7   :  { %3888 = vmatpush1.bf16.msra.mxu1 %v3887_v3  ;;  %3278 = vmatprep.subr.bf16.mxu0 %v3277_v4  ;;  %v3907_v3 = vpack.c.bf16 %v897_v59, %v893_v58  ;;  %v3297_v4 = vpack.c.bf16 %v904_v63, %v900_v60  ;;  %v931_v58 = vld [vmem:[%s7966_s1 + $0x1c80] sm:$0xff]  ;;  %v933_v59 = vld [vmem:[%s7966_s1 + $0x1c90] sm:$0xff]  ;;  %v940_v63 = vld [vmem:[%s7966_s1 + $0x1cc8] sm:$0xff] }
 0x1a8   :  { %3890 = vmatprep.subr.bf16.mxu1 %v3889_v7  ;;  %v3909_v7 = vpack.c.bf16 %v906_v1, %v902_v0  ;;  %v944_v0 = vld [vmem:[%s7966_s1 + $0x1ce8] sm:$0xff]  ;;  %v942_v1 = vld [vmem:[%s7966_s1 + $0x1cd8] sm:$0xff] }
 0x1a9   :  { %v976_v49 = vld [vmem:[%s7966_s1 + $0x1de8] sm:$0xff] }
 0x1aa   :  { %3280 = vmatpush1.bf16.msra.mxu0 %v3279_v15  ;;  %v3299_v15 = vpack.c.bf16 %v903_v6, %v899_v5  ;;  %v3317_v5 = vpack.c.bf16 %v944_v0, %v940_v63  ;;  %v939_v6 = vld [vmem:[%s7966_s1 + $0x1cc0] sm:$0xff]  ;;  %v984_v63 = vld [vmem:[%s7966_s1 + $0x1e28] sm:$0xff]  ;;  %v982_v0 = vld [vmem:[%s7966_s1 + $0x1e18] sm:$0xff] }
 0x1ab   :  { %3892 = vmatpush1.bf16.msra.mxu1 %v3891_v16  ;;  %3282 = vmatprep.subr.bf16.mxu0 %v3281_v17  ;;  %v3911_v16 = vpack.c.bf16 %v905_v8, %v901_v51  ;;  %v3301_v17 = vpack.c.bf16 %v912_v9, %v908_v45  ;;  %v943_v51 = vld [vmem:[%s7966_s1 + $0x1ce0] sm:$0xff]  ;;  %v945_v45 = vld [vmem:[%s7966_s1 + $0x1cf0] sm:$0xff]  ;;  %v948_v9 = vld [vmem:[%s7966_s1 + $0x1d08] sm:$0xff] }
 0x1ac   :  { %3894 = vmatprep.subr.bf16.mxu1 %v3893_v50  ;;  %v3913_v50 = vpack.c.bf16 %v914_v14, %v910_v10  ;;  %v952_v10 = vld [vmem:[%s7966_s1 + $0x1d28] sm:$0xff]  ;;  %v950_v14 = vld [vmem:[%s7966_s1 + $0x1d18] sm:$0xff] }
 0x1ae   :  { %3284 = vmatpush1.bf16.msra.mxu0 %v3283_v29  ;;  %v922_v29 = vld [vmem:[%s7966_s1 + $0x1c38] sm:$0xff] }
 0x1af   :  { %3896 = vmatpush1.bf16.msra.mxu1 %v3895_v30  ;;  %3286 = vmatprep.subr.bf16.mxu0 %v3285_v31  ;;  %v3303_v30 = vpack.c.bf16 %v911_v19, %v907_v18  ;;  %v3915_v31 = vpack.c.bf16 %v913_v21, %v909_v20  ;;  %v3321_v18 = vpack.c.bf16 %v952_v10, %v948_v9  ;;  %v947_v19 = vld [vmem:[%s7966_s1 + $0x1d00] sm:$0xff]  ;;  %v992_v9 = vld [vmem:[%s7966_s1 + $0x1e68] sm:$0xff]  ;;  %v990_v10 = vld [vmem:[%s7966_s1 + $0x1e58] sm:$0xff] }
 0x1b0   :  { %3898 = vmatprep.subr.bf16.mxu1 %v3897_v35  ;;  %v3917_v35 = vpack.c.bf16 %v922_v29, %v918_v28  ;;  %v951_v20 = vld [vmem:[%s7966_s1 + $0x1d20] sm:$0xff]  ;;  %v958_v28 = vld [vmem:[%s7966_s1 + $0x1d58] sm:$0xff] }
 0x1b1   :  { %v962_v29 = vld [vmem:[%s7966_s1 + $0x1d78] sm:$0xff] }
 0x1b2   :  { %3288 = vmatpush1.bf16.msra.mxu0 %v3287_v41  ;;  %v930_v41 = vld [vmem:[%s7966_s1 + $0x1c78] sm:$0xff] }
 0x1b3   :  { %3900 = vmatpush1.bf16.msra.mxu1 %v3899_v42  ;;  %3290 = vmatprep.subr.bf16.mxu0 %v3289_v43  ;;  %v3307_v42 = vpack.c.bf16 %v919_v13, %v915_v33  ;;  %v3919_v43 = vpack.c.bf16 %v921_v62, %v917_v34  ;;  %v3921_v12 = vpack.c.bf16 %v930_v41, %v926_v40  ;;  %v955_v33 = vld [vmem:[%s7966_s1 + $0x1d40] sm:$0xff]  ;;  %v957_v34 = vld [vmem:[%s7966_s1 + $0x1d50] sm:$0xff]  ;;  %v966_v40 = vld [vmem:[%s7966_s1 + $0x1d98] sm:$0xff] }
 0x1b4   :  { %3902 = vmatprep.subr.bf16.mxu1 %v3901_v47  ;;  %v925_v47 = vld [vmem:[%s7966_s1 + $0x1c50] sm:$0xff]  ;;  %v959_v13 = vld [vmem:[%s7966_s1 + $0x1d60] sm:$0xff]  ;;  %v970_v41 = vld [vmem:[%s7966_s1 + $0x1db8] sm:$0xff] }
 0x1b5   :  { %v3923_v56 = vpack.c.bf16 %v929_v25, %v925_v47  ;;  %v961_v62 = vld [vmem:[%s7966_s1 + $0x1d70] sm:$0xff] }
 0x1b6   :  { %3292 = vmatpush1.bf16.msra.mxu0 %v3291_v53  ;;  %v934_v53 = vld [vmem:[%s7966_s1 + $0x1c98] sm:$0xff]  ;;  %v965_v47 = vld [vmem:[%s7966_s1 + $0x1d90] sm:$0xff] }
 0x1b7   :  { %3904 = vmatpush1.bf16.msra.mxu1 %v3903_v54  ;;  %3294 = vmatprep.subr.bf16.mxu0 %v3293_v55  ;;  %v938_v54 = vld [vmem:[%s7966_s1 + $0x1cb8] sm:$0xff]  ;;  %v3311_v55 = vpack.c.bf16 %v927_v46, %v923_v39  ;;  %v963_v39 = vld [vmem:[%s7966_s1 + $0x1d80] sm:$0xff]  ;;  %v969_v25 = vld [vmem:[%s7966_s1 + $0x1db0] sm:$0xff] }
 0x1b8   :  { %3906 = vmatprep.subr.bf16.mxu1 %v3905_v24  ;;  %v935_v24 = vld [vmem:[%s7966_s1 + $0x1ca0] sm:$0xff]  ;;  %v3925_v60 = vpack.c.bf16 %v938_v54, %v934_v53  ;;  %v978_v53 = vld [vmem:[%s7966_s1 + $0x1df8] sm:$0xff] }
 0x1b9   :  { %v967_v46 = vld [vmem:[%s7966_s1 + $0x1da0] sm:$0xff] }
 0x1ba   :  { %3296 = vmatpush1.bf16.msra.mxu0 %v3295_v2  ;;  %v946_v2 = vld [vmem:[%s7966_s1 + $0x1cf8] sm:$0xff]  ;;  %v3331_v54 = vpack.c.bf16 %v967_v46, %v963_v39  ;;  %v1007_v39 = vld [vmem:[%s7966_s1 + $0x1ee0] sm:$0xff]  ;;  %v1005_v46 = vld [vmem:[%s7966_s1 + $0x1ed0] sm:$0xff] }
 0x1bb   :  { %3908 = vmatpush1.bf16.msra.mxu1 %v3907_v3  ;;  %3298 = vmatprep.subr.bf16.mxu0 %v3297_v4  ;;  %v3315_v3 = vpack.c.bf16 %v935_v24, %v931_v58  ;;  %v3929_v8 = vpack.c.bf16 %v946_v2, %v942_v1  ;;  %v975_v58 = vld [vmem:[%s7966_s1 + $0x1de0] sm:$0xff]  ;;  %v973_v24 = vld [vmem:[%s7966_s1 + $0x1dd0] sm:$0xff]  ;;  %v986_v1 = vld [vmem:[%s7966_s1 + $0x1e38] sm:$0xff] }
 0x1bc   :  { %3910 = vmatprep.subr.bf16.mxu1 %v3909_v7  ;;  %v941_v7 = vld [vmem:[%s7966_s1 + $0x1cd0] sm:$0xff] }
 0x1be   :  { %3300 = vmatpush1.bf16.msra.mxu0 %v3299_v15  ;;  %v954_v15 = vld [vmem:[%s7966_s1 + $0x1d38] sm:$0xff] }
 0x1bf   :  { %3912 = vmatpush1.bf16.msra.mxu1 %v3911_v16  ;;  %3302 = vmatprep.subr.bf16.mxu0 %v3301_v17  ;;  %v3319_v16 = vpack.c.bf16 %v943_v51, %v939_v6  ;;  %v3931_v17 = vpack.c.bf16 %v945_v45, %v941_v7  ;;  %v3933_v21 = vpack.c.bf16 %v954_v15, %v950_v14  ;;  %v983_v6 = vld [vmem:[%s7966_s1 + $0x1e20] sm:$0xff]  ;;  %v981_v51 = vld [vmem:[%s7966_s1 + $0x1e10] sm:$0xff]  ;;  %v988_v45 = vld [vmem:[%s7966_s1 + $0x1e48] sm:$0xff] }
 0x1c0   :  { %3914 = vmatprep.subr.bf16.mxu1 %v3913_v50  ;;  %v949_v50 = vld [vmem:[%s7966_s1 + $0x1d10] sm:$0xff]  ;;  %v3949_v7 = vpack.c.bf16 %v986_v1, %v982_v0  ;;  %v994_v14 = vld [vmem:[%s7966_s1 + $0x1e78] sm:$0xff] }
 0x1c1   :  { %v1026_v0 = vld [vmem:[%s7966_s1 + $0x1f78] sm:$0xff] }
 0x1c2   :  { %3304 = vmatpush1.bf16.msra.mxu0 %v3303_v30  ;;  %v3323_v30 = vpack.c.bf16 %v951_v20, %v947_v19  ;;  %v991_v19 = vld [vmem:[%s7966_s1 + $0x1e60] sm:$0xff]  ;;  %v989_v20 = vld [vmem:[%s7966_s1 + $0x1e50] sm:$0xff] }
 0x1c3   :  { %3916 = vmatpush1.bf16.msra.mxu1 %v3915_v31  ;;  %3306 = vmatprep.subr.bf16.mxu0 %v3305_v32  ;;  %v3935_v31 = vpack.c.bf16 %v953_v22, %v949_v50  ;;  %v3325_v32 = vpack.c.bf16 %v960_v27, %v956_v26  ;;  %v3953_v50 = vpack.c.bf16 %v994_v14, %v990_v10  ;;  %v996_v22 = vld [vmem:[%s7966_s1 + $0x1e88] sm:$0xff]  ;;  %v998_v27 = vld [vmem:[%s7966_s1 + $0x1e98] sm:$0xff] }
 0x1c4   :  { %3918 = vmatprep.subr.bf16.mxu1 %v3917_v35  ;;  %v3937_v35 = vpack.c.bf16 %v962_v29, %v958_v28  ;;  %v1000_v26 = vld [vmem:[%s7966_s1 + $0x1ea8] sm:$0xff]  ;;  %v1002_v28 = vld [vmem:[%s7966_s1 + $0x1eb8] sm:$0xff] }
 0x1c5   :  { %1885 = vmatmul.mubr.f32.vlgmr.msra.gmra.mrb[0].mxu0 %v6558_v23  ;;  %v1034_v10 = vld [vmem:[%s7966_s1 + $0x1fb8] sm:$0xff] }
 0x1c6   :  { %3308 = vmatpush1.bf16.msra.mxu0 %v3307_v42  ;;  %2595 = vmatmul.mubr.f32.vlgmr.msra.gmra.mrb[0].mxu1 %v6558_v23  ;;  %v937_v23 = vld [vmem:[%s7966_s1 + $0x1cb0] sm:$0xff]  ;;  %v3327_v42 = vpack.c.bf16 %v959_v13, %v955_v33  ;;  %v999_v33 = vld [vmem:[%s7966_s1 + $0x1ea0] sm:$0xff] }
 0x1c7   :  { %3920 = vmatpush1.bf16.msra.mxu1 %v3919_v43  ;;  %3310 = vmatprep.subr.bf16.mxu0 %v3309_v44  ;;  %v3927_v4 = vpack.c.bf16 %v937_v23, %v933_v59  ;;  %v3939_v43 = vpack.c.bf16 %v961_v62, %v957_v34  ;;  %v3329_v44 = vpack.c.bf16 %v968_v37, %v964_v36  ;;  %v980_v23 = vld [vmem:[%s7966_s1 + $0x1e08] sm:$0xff]  ;;  %v997_v13 = vld [vmem:[%s7966_s1 + $0x1e90] sm:$0xff]  ;;  %v1006_v37 = vld [vmem:[%s7966_s1 + $0x1ed8] sm:$0xff] }
 0x1c8   :  { %3922 = vmatprep.subr.bf16.mxu1 %v3921_v12  ;;  %1955 = vmatprep.mubr.f32.mxu0 %v1341_v52  ;;  %v3941_v12 = vpack.c.bf16 %v970_v41, %v966_v40  ;;  %v3957_v34 = vpack.c.bf16 %v1002_v28, %v998_v27  ;;  %v1004_v62 = vld [vmem:[%s7966_s1 + $0x1ec8] sm:$0xff]  ;;  %v1010_v40 = vld [vmem:[%s7966_s1 + $0x1ef8] sm:$0xff] }
 0x1c9   :  { %2665 = vmatprep.mubr.f32.mxu1 %v1341_v52  ;;  %v974_v52 = vld [vmem:[%s7966_s1 + $0x1dd8] sm:$0xff]  ;;  %v1008_v36 = vld [vmem:[%s7966_s1 + $0x1ee8] sm:$0xff] }
 0x1ca   :  { %3312 = vmatpush1.bf16.msra.mxu0 %v3311_v55  ;;  %v3943_v55 = vpack.c.bf16 %v969_v25, %v965_v47  ;;  %v3945_v59 = vpack.c.bf16 %v978_v53, %v974_v52  ;;  %v3961_v47 = vpack.c.bf16 %v1010_v40, %v1006_v37  ;;  %v1012_v25 = vld [vmem:[%s7966_s1 + $0x1f08] sm:$0xff]  ;;  %v1018_v52 = vld [vmem:[%s7966_s1 + $0x1f38] sm:$0xff]  ;;  %v7326_v40 = vld [vmem:[%s7967_s0 + $0x20] sm:$0xff] }
 0x1cb   :  { %3924 = vmatpush1.bf16.msra.mxu1 %v3923_v56  ;;  %3314 = vmatprep.subr.bf16.mxu0 %v3313_v57  ;;  %v3333_v56 = vpack.c.bf16 %v976_v49, %v972_v48  ;;  %v971_v57 = vld [vmem:[%s7966_s1 + $0x1dc0] sm:$0xff]  ;;  %v1016_v48 = vld [vmem:[%s7966_s1 + $0x1f28] sm:$0xff]  ;;  %v1014_v49 = vld [vmem:[%s7966_s1 + $0x1f18] sm:$0xff] }
 0x1cc   :  { %3926 = vmatprep.subr.bf16.mxu1 %v3925_v60  ;;  %v977_v60 = vld [vmem:[%s7966_s1 + $0x1df0] sm:$0xff]  ;;  %v3335_v2 = vpack.c.bf16 %v975_v58, %v971_v57  ;;  %v1015_v57 = vld [vmem:[%s7966_s1 + $0x1f20] sm:$0xff]  ;;  %v1042_v27 = vld [vmem:[%s7966_s1 + $0x1ff8] sm:$0xff] }
 0x1cd   :  { %v1013_v58 = vld [vmem:[%s7966_s1 + $0x1f10] sm:$0xff]  ;;  %v1050_v37 = vld [vmem:[%s7966_s1 + $0x2038] sm:$0xff] }
 0x1ce   :  { %3316 = vmatpush1.bf16.msra.mxu0 %v3315_v3  ;;  %v3947_v3 = vpack.c.bf16 %v977_v60, %v973_v24  ;;  %v3965_v24 = vpack.c.bf16 %v1018_v52, %v1014_v49  ;;  %v1020_v60 = vld [vmem:[%s7966_s1 + $0x1f48] sm:$0xff]  ;;  %v7348_v49 = vrot.slane %v7326_v40, %v4427_v11  ;;  %v1054_v52 = vld [vmem:[%s7966_s1 + $0x2058] sm:$0xff] }
 0x1cf   :  { %3928 = vmatpush1.bf16.msra.mxu1 %v3927_v4  ;;  %3318 = vmatprep.subr.bf16.mxu0 %v3317_v5  ;;  %v3337_v4 = vpack.c.bf16 %v984_v63, %v980_v23  ;;  %v979_v5 = vld [vmem:[%s7966_s1 + $0x1e00] sm:$0xff]  ;;  %v1024_v23 = vld [vmem:[%s7966_s1 + $0x1f68] sm:$0xff]  ;;  %v1022_v63 = vld [vmem:[%s7966_s1 + $0x1f58] sm:$0xff] }
 0x1d0   :  { %3930 = vmatprep.subr.bf16.mxu1 %v3929_v8  ;;  %v985_v8 = vld [vmem:[%s7966_s1 + $0x1e30] sm:$0xff]  ;;  %v3339_v15 = vpack.c.bf16 %v983_v6, %v979_v5  ;;  %v1023_v5 = vld [vmem:[%s7966_s1 + $0x1f60] sm:$0xff] }
 0x1d1   :  { %v1021_v6 = vld [vmem:[%s7966_s1 + $0x1f50] sm:$0xff] }
 0x1d2   :  { %3320 = vmatpush1.bf16.msra.mxu0 %v3319_v16  ;;  %v3951_v16 = vpack.c.bf16 %v985_v8, %v981_v51  ;;  %v3969_v51 = vpack.c.bf16 %v1026_v0, %v1022_v63  ;;  %v1028_v8 = vld [vmem:[%s7966_s1 + $0x1f88] sm:$0xff]  ;;  %v1357_v0 = vcombine.high %v7348_v49, %v7348_v49 }
 0x1d3   :  { %3932 = vmatpush1.bf16.msra.mxu1 %v3931_v17  ;;  %3322 = vmatprep.subr.bf16.mxu0 %v3321_v18  ;;  %v3341_v17 = vpack.c.bf16 %v992_v9, %v988_v45  ;;  %v987_v18 = vld [vmem:[%s7966_s1 + $0x1e40] sm:$0xff]  ;;  %v1032_v45 = vld [vmem:[%s7966_s1 + $0x1fa8] sm:$0xff]  ;;  %v1030_v9 = vld [vmem:[%s7966_s1 + $0x1f98] sm:$0xff] }
 0x1d4   :  { %3934 = vmatprep.subr.bf16.mxu1 %v3933_v21  ;;  %v993_v21 = vld [vmem:[%s7966_s1 + $0x1e70] sm:$0xff]  ;;  %v3343_v29 = vpack.c.bf16 %v991_v19, %v987_v18  ;;  %v1031_v18 = vld [vmem:[%s7966_s1 + $0x1fa0] sm:$0xff]  ;;  %v1064_v63 = vld [vmem:[%s7966_s1 + $0x20a8] sm:$0xff] }
 0x1d5   :  { %v1029_v19 = vld [vmem:[%s7966_s1 + $0x1f90] sm:$0xff] }
 0x1d6   :  { %3324 = vmatpush1.bf16.msra.mxu0 %v3323_v30  ;;  %v3955_v30 = vpack.c.bf16 %v993_v21, %v989_v20  ;;  %v3973_v20 = vpack.c.bf16 %v1034_v10, %v1030_v9  ;;  %v1036_v21 = vld [vmem:[%s7966_s1 + $0x1fc8] sm:$0xff]  ;;  %v1070_v10 = vld [vmem:[%s7966_s1 + $0x20d8] sm:$0xff] }
 0x1d7   :  { %3936 = vmatpush1.bf16.msra.mxu1 %v3935_v31  ;;  %3326 = vmatprep.subr.bf16.mxu0 %v3325_v32  ;;  %v3345_v31 = vpack.c.bf16 %v1000_v26, %v996_v22  ;;  %v995_v32 = vld [vmem:[%s7966_s1 + $0x1e80] sm:$0xff]  ;;  %v1040_v22 = vld [vmem:[%s7966_s1 + $0x1fe8] sm:$0xff]  ;;  %v1038_v26 = vld [vmem:[%s7966_s1 + $0x1fd8] sm:$0xff] }
 0x1d8   :  { %3938 = vmatprep.subr.bf16.mxu1 %v3937_v35  ;;  %v1001_v35 = vld [vmem:[%s7966_s1 + $0x1eb0] sm:$0xff]  ;;  %v3347_v41 = vpack.c.bf16 %v999_v33, %v995_v32  ;;  %v1039_v32 = vld [vmem:[%s7966_s1 + $0x1fe0] sm:$0xff]  ;;  %v1072_v9 = vld [vmem:[%s7966_s1 + $0x20e8] sm:$0xff] }
 0x1d9   :  { %v1037_v33 = vld [vmem:[%s7966_s1 + $0x1fd0] sm:$0xff] }
 0x1da   :  { %3328 = vmatpush1.bf16.msra.mxu0 %v3327_v42  ;;  %v3959_v42 = vpack.c.bf16 %v1001_v35, %v997_v13  ;;  %v3977_v13 = vpack.c.bf16 %v1042_v27, %v1038_v26  ;;  %v1044_v35 = vld [vmem:[%s7966_s1 + $0x2008] sm:$0xff]  ;;  %v1078_v27 = vld [vmem:[%s7966_s1 + $0x2118] sm:$0xff] }
 0x1db   :  { %3940 = vmatpush1.bf16.msra.mxu1 %v3939_v43  ;;  %3330 = vmatprep.subr.bf16.mxu0 %v3329_v44  ;;  %v3349_v43 = vpack.c.bf16 %v1008_v36, %v1004_v62  ;;  %v1003_v44 = vld [vmem:[%s7966_s1 + $0x1ec0] sm:$0xff]  ;;  %v1048_v62 = vld [vmem:[%s7966_s1 + $0x2028] sm:$0xff]  ;;  %v1046_v36 = vld [vmem:[%s7966_s1 + $0x2018] sm:$0xff] }
 0x1dc   :  { %3942 = vmatprep.subr.bf16.mxu1 %v3941_v12  ;;  %v1009_v12 = vld [vmem:[%s7966_s1 + $0x1ef0] sm:$0xff]  ;;  %v3351_v53 = vpack.c.bf16 %v1007_v39, %v1003_v44  ;;  %v1043_v44 = vld [vmem:[%s7966_s1 + $0x2000] sm:$0xff]  ;;  %v1080_v26 = vld [vmem:[%s7966_s1 + $0x2128] sm:$0xff] }
 0x1dd   :  { %v1047_v39 = vld [vmem:[%s7966_s1 + $0x2020] sm:$0xff] }
 0x1de   :  { %3332 = vmatpush1.bf16.msra.mxu0 %v3331_v54  ;;  %v3963_v54 = vpack.c.bf16 %v1009_v12, %v1005_v46  ;;  %v1045_v46 = vld [vmem:[%s7966_s1 + $0x2010] sm:$0xff] }
 0x1df   :  { %3944 = vmatpush1.bf16.msra.mxu1 %v3943_v55  ;;  %3334 = vmatprep.subr.bf16.mxu0 %v3333_v56  ;;  %v3353_v55 = vpack.c.bf16 %v1016_v48, %v1012_v25  ;;  %v1011_v56 = vld [vmem:[%s7966_s1 + $0x1f00] sm:$0xff]  ;;  %v1049_v12 = vld [vmem:[%s7966_s1 + $0x2030] sm:$0xff]  ;;  %v1052_v25 = vld [vmem:[%s7966_s1 + $0x2048] sm:$0xff] }
 0x1e0   :  { %3946 = vmatprep.subr.bf16.mxu1 %v3945_v59  ;;  %v1017_v59 = vld [vmem:[%s7966_s1 + $0x1f30] sm:$0xff]  ;;  %v3355_v1 = vpack.c.bf16 %v1015_v57, %v1011_v56  ;;  %v1056_v48 = vld [vmem:[%s7966_s1 + $0x2068] sm:$0xff]  ;;  %v1051_v57 = vld [vmem:[%s7966_s1 + $0x2040] sm:$0xff] }
 0x1e1   :  { %v3373_v56 = vpack.c.bf16 %v1056_v48, %v1052_v25  ;;  %v1089_v25 = vld [vmem:[%s7966_s1 + $0x2170] sm:$0xff]  ;;  %v1092_v48 = vld [vmem:[%s7966_s1 + $0x2188] sm:$0xff] }
 0x1e2   :  { %3336 = vmatpush1.bf16.msra.mxu0 %v3335_v2  ;;  %v3967_v2 = vpack.c.bf16 %v1017_v59, %v1013_v58  ;;  %v1055_v58 = vld [vmem:[%s7966_s1 + $0x2060] sm:$0xff] }
 0x1e3   :  { %3948 = vmatpush1.bf16.msra.mxu1 %v3947_v3  ;;  %3338 = vmatprep.subr.bf16.mxu0 %v3337_v4  ;;  %v3357_v3 = vpack.c.bf16 %v1024_v23, %v1020_v60  ;;  %v1019_v4 = vld [vmem:[%s7966_s1 + $0x1f40] sm:$0xff]  ;;  %v1057_v60 = vld [vmem:[%s7966_s1 + $0x2070] sm:$0xff]  ;;  %v1060_v23 = vld [vmem:[%s7966_s1 + $0x2088] sm:$0xff] }
 0x1e4   :  { %3950 = vmatprep.subr.bf16.mxu1 %v3949_v7  ;;  %v1025_v7 = vld [vmem:[%s7966_s1 + $0x1f70] sm:$0xff]  ;;  %v3359_v14 = vpack.c.bf16 %v1023_v5, %v1019_v4  ;;  %v3377_v5 = vpack.c.bf16 %v1064_v63, %v1060_v23  ;;  %v1100_v63 = vld [vmem:[%s7966_s1 + $0x21c8] sm:$0xff] }
 0x1e5   :  { %v1097_v23 = vld [vmem:[%s7966_s1 + $0x21b0] sm:$0xff] }
 0x1e6   :  { %3340 = vmatpush1.bf16.msra.mxu0 %v3339_v15  ;;  %v3971_v15 = vpack.c.bf16 %v1025_v7, %v1021_v6  ;;  %v1059_v6 = vld [vmem:[%s7966_s1 + $0x2080] sm:$0xff]  ;;  %v1061_v7 = vld [vmem:[%s7966_s1 + $0x2090] sm:$0xff] }
 0x1e7   :  { %3952 = vmatpush1.bf16.msra.mxu1 %v3951_v16  ;;  %3342 = vmatprep.subr.bf16.mxu0 %v3341_v17  ;;  %v3361_v16 = vpack.c.bf16 %v1032_v45, %v1028_v8  ;;  %v1027_v17 = vld [vmem:[%s7966_s1 + $0x1f80] sm:$0xff]  ;;  %v1068_v45 = vld [vmem:[%s7966_s1 + $0x20c8] sm:$0xff] }
 0x1e8   :  { %3954 = vmatprep.subr.bf16.mxu1 %v3953_v50  ;;  %v1033_v50 = vld [vmem:[%s7966_s1 + $0x1fb0] sm:$0xff]  ;;  %v3363_v28 = vpack.c.bf16 %v1031_v18, %v1027_v17  ;;  %v3381_v17 = vpack.c.bf16 %v1072_v9, %v1068_v45  ;;  %v1067_v18 = vld [vmem:[%s7966_s1 + $0x20c0] sm:$0xff]  ;;  %v1108_v45 = vld [vmem:[%s7966_s1 + $0x2208] sm:$0xff] }
 0x1e9   :  { %v1112_v9 = vld [vmem:[%s7966_s1 + $0x2228] sm:$0xff] }
 0x1ea   :  { %3344 = vmatpush1.bf16.msra.mxu0 %v3343_v29  ;;  %v3975_v29 = vpack.c.bf16 %v1033_v50, %v1029_v19  ;;  %v1071_v19 = vld [vmem:[%s7966_s1 + $0x20e0] sm:$0xff] }
 0x1eb   :  { %3956 = vmatpush1.bf16.msra.mxu1 %v3955_v30  ;;  %3346 = vmatprep.subr.bf16.mxu0 %v3345_v31  ;;  %v3365_v30 = vpack.c.bf16 %v1040_v22, %v1036_v21  ;;  %v1035_v31 = vld [vmem:[%s7966_s1 + $0x1fc0] sm:$0xff]  ;;  %v1073_v21 = vld [vmem:[%s7966_s1 + $0x20f0] sm:$0xff]  ;;  %v1076_v22 = vld [vmem:[%s7966_s1 + $0x2108] sm:$0xff] }
 0x1ec   :  { %3958 = vmatprep.subr.bf16.mxu1 %v3957_v34  ;;  %v1041_v34 = vld [vmem:[%s7966_s1 + $0x1ff0] sm:$0xff] }
 0x1ee   :  { %3348 = vmatpush1.bf16.msra.mxu0 %v3347_v41  ;;  %v3367_v41 = vpack.c.bf16 %v1039_v32, %v1035_v31  ;;  %v3385_v31 = vpack.c.bf16 %v1080_v26, %v1076_v22  ;;  %v1075_v32 = vld [vmem:[%s7966_s1 + $0x2100] sm:$0xff]  ;;  %v1116_v22 = vld [vmem:[%s7966_s1 + $0x2248] sm:$0xff] }
 0x1ef   :  { %3960 = vmatpush1.bf16.msra.mxu1 %v3959_v42  ;;  %3350 = vmatprep.subr.bf16.mxu0 %v3349_v43  ;;  %v3979_v42 = vpack.c.bf16 %v1041_v34, %v1037_v33  ;;  %v3369_v43 = vpack.c.bf16 %v1048_v62, %v1044_v35  ;;  %v1079_v33 = vld [vmem:[%s7966_s1 + $0x2120] sm:$0xff]  ;;  %v1081_v35 = vld [vmem:[%s7966_s1 + $0x2130] sm:$0xff]  ;;  %v1084_v62 = vld [vmem:[%s7966_s1 + $0x2148] sm:$0xff] }
 0x1f0   :  { %3962 = vmatprep.subr.bf16.mxu1 %v3961_v47  ;;  %v3981_v47 = vpack.c.bf16 %v1050_v37, %v1046_v36  ;;  %v1088_v36 = vld [vmem:[%s7966_s1 + $0x2168] sm:$0xff]  ;;  %v1086_v37 = vld [vmem:[%s7966_s1 + $0x2158] sm:$0xff] }
 0x1f1   :  { %v1120_v26 = vld [vmem:[%s7966_s1 + $0x2268] sm:$0xff] }
 0x1f2   :  { %3352 = vmatpush1.bf16.msra.mxu0 %v3351_v53  ;;  %v1058_v53 = vld [vmem:[%s7966_s1 + $0x2078] sm:$0xff] }
 0x1f3   :  { %3964 = vmatpush1.bf16.msra.mxu1 %v3963_v54  ;;  %3354 = vmatprep.subr.bf16.mxu0 %v3353_v55  ;;  %v3371_v54 = vpack.c.bf16 %v1047_v39, %v1043_v44  ;;  %v3983_v55 = vpack.c.bf16 %v1049_v12, %v1045_v46  ;;  %v3985_v59 = vpack.c.bf16 %v1058_v53, %v1054_v52  ;;  %v1083_v39 = vld [vmem:[%s7966_s1 + $0x2140] sm:$0xff]  ;;  %v1096_v52 = vld [vmem:[%s7966_s1 + $0x21a8] sm:$0xff]  ;;  %v1094_v53 = vld [vmem:[%s7966_s1 + $0x2198] sm:$0xff] }
 0x1f4   :  { %3966 = vmatprep.subr.bf16.mxu1 %v3965_v24  ;;  %v1053_v24 = vld [vmem:[%s7966_s1 + $0x2050] sm:$0xff]  ;;  %v3389_v44 = vpack.c.bf16 %v1088_v36, %v1084_v62  ;;  %v1087_v46 = vld [vmem:[%s7966_s1 + $0x2160] sm:$0xff]  ;;  %v1124_v62 = vld [vmem:[%s7966_s1 + $0x2288] sm:$0xff] }
 0x1f5   :  { %v3987_v4 = vpack.c.bf16 %v1057_v60, %v1053_v24  ;;  %v1095_v24 = vld [vmem:[%s7966_s1 + $0x21a0] sm:$0xff]  ;;  %v1128_v36 = vld [vmem:[%s7966_s1 + $0x22a8] sm:$0xff] }
 0x1f6   :  { %3356 = vmatpush1.bf16.msra.mxu0 %v3355_v1  ;;  %v1062_v1 = vld [vmem:[%s7966_s1 + $0x2098] sm:$0xff] }
 0x1f7   :  { %3968 = vmatpush1.bf16.msra.mxu1 %v3967_v2  ;;  %3358 = vmatprep.subr.bf16.mxu0 %v3357_v3  ;;  %v1066_v2 = vld [vmem:[%s7966_s1 + $0x20b8] sm:$0xff]  ;;  %v3375_v3 = vpack.c.bf16 %v1055_v58, %v1051_v57  ;;  %v3393_v57 = vpack.c.bf16 %v1096_v52, %v1092_v48  ;;  %v1091_v58 = vld [vmem:[%s7966_s1 + $0x2180] sm:$0xff]  ;;  %v1132_v48 = vld [vmem:[%s7966_s1 + $0x22c8] sm:$0xff] }
 0x1f8   :  { %3970 = vmatprep.subr.bf16.mxu1 %v3969_v51  ;;  %v1063_v51 = vld [vmem:[%s7966_s1 + $0x20a0] sm:$0xff]  ;;  %v3989_v8 = vpack.c.bf16 %v1066_v2, %v1062_v1  ;;  %v1102_v1 = vld [vmem:[%s7966_s1 + $0x21d8] sm:$0xff]  ;;  %v1136_v52 = vld [vmem:[%s7966_s1 + $0x22e8] sm:$0xff] }
 0x1f9   :  { %v1106_v2 = vld [vmem:[%s7966_s1 + $0x21f8] sm:$0xff] }
 0x1fa   :  { %3360 = vmatpush1.bf16.msra.mxu0 %v3359_v14  ;;  %v1074_v14 = vld [vmem:[%s7966_s1 + $0x20f8] sm:$0xff] }
 0x1fb   :  { %3972 = vmatpush1.bf16.msra.mxu1 %v3971_v15  ;;  %3362 = vmatprep.subr.bf16.mxu0 %v3361_v16  ;;  %v3379_v15 = vpack.c.bf16 %v1063_v51, %v1059_v6  ;;  %v3993_v50 = vpack.c.bf16 %v1074_v14, %v1070_v10  ;;  %v1099_v6 = vld [vmem:[%s7966_s1 + $0x21c0] sm:$0xff]  ;;  %v1110_v10 = vld [vmem:[%s7966_s1 + $0x2218] sm:$0xff] }
 0x1fc   :  { %3974 = vmatprep.subr.bf16.mxu1 %v3973_v20  ;;  %v1069_v20 = vld [vmem:[%s7966_s1 + $0x20d0] sm:$0xff]  ;;  %v1103_v51 = vld [vmem:[%s7966_s1 + $0x21e0] sm:$0xff]  ;;  %v1114_v14 = vld [vmem:[%s7966_s1 + $0x2238] sm:$0xff] }
 0x1fe   :  { %3364 = vmatpush1.bf16.msra.mxu0 %v3363_v28  ;;  %v1082_v28 = vld [vmem:[%s7966_s1 + $0x2138] sm:$0xff] }
 0x1ff   :  { %3976 = vmatpush1.bf16.msra.mxu1 %v3975_v29  ;;  %3366 = vmatprep.subr.bf16.mxu0 %v3365_v30  ;;  %v3383_v29 = vpack.c.bf16 %v1071_v19, %v1067_v18  ;;  %v3995_v30 = vpack.c.bf16 %v1073_v21, %v1069_v20  ;;  %v3997_v34 = vpack.c.bf16 %v1082_v28, %v1078_v27  ;;  %v1107_v18 = vld [vmem:[%s7966_s1 + $0x2200] sm:$0xff]  ;;  %v1109_v20 = vld [vmem:[%s7966_s1 + $0x2210] sm:$0xff]  ;;  %v1118_v27 = vld [vmem:[%s7966_s1 + $0x2258] sm:$0xff] }
 0x200   :  { %3978 = vmatprep.subr.bf16.mxu1 %v3977_v13  ;;  %v1077_v13 = vld [vmem:[%s7966_s1 + $0x2110] sm:$0xff]  ;;  %v1111_v19 = vld [vmem:[%s7966_s1 + $0x2220] sm:$0xff]  ;;  %v1122_v28 = vld [vmem:[%s7966_s1 + $0x2278] sm:$0xff] }
 0x201   :  { %v1113_v21 = vld [vmem:[%s7966_s1 + $0x2230] sm:$0xff] }
 0x202   :  { %3368 = vmatpush1.bf16.msra.mxu0 %v3367_v41  ;;  %v1090_v41 = vld [vmem:[%s7966_s1 + $0x2178] sm:$0xff] }
 0x203   :  { %3980 = vmatpush1.bf16.msra.mxu1 %v3979_v42  ;;  %3370 = vmatprep.subr.bf16.mxu0 %v3369_v43  ;;  %v3387_v42 = vpack.c.bf16 %v1079_v33, %v1075_v32  ;;  %v3999_v43 = vpack.c.bf16 %v1081_v35, %v1077_v13  ;;  %v4001_v12 = vpack.c.bf16 %v1090_v41, %v1086_v37  ;;  %v1115_v32 = vld [vmem:[%s7966_s1 + $0x2240] sm:$0xff]  ;;  %v1117_v13 = vld [vmem:[%s7966_s1 + $0x2250] sm:$0xff]  ;;  %v1126_v37 = vld [vmem:[%s7966_s1 + $0x2298] sm:$0xff] }
 0x204   :  { %3982 = vmatprep.subr.bf16.mxu1 %v3981_v47  ;;  %v1085_v47 = vld [vmem:[%s7966_s1 + $0x2150] sm:$0xff]  ;;  %v1119_v33 = vld [vmem:[%s7966_s1 + $0x2260] sm:$0xff]  ;;  %v1130_v41 = vld [vmem:[%s7966_s1 + $0x22b8] sm:$0xff] }
 0x205   :  { %1956 = vmatmul.mubr.f32.vlgmr.msra.gmra.mrb[0].mxu0 %v6951_v38  ;;  %v1121_v35 = vld [vmem:[%s7966_s1 + $0x2270] sm:$0xff] }
 0x206   :  { %3372 = vmatpush1.bf16.msra.mxu0 %v3371_v54  ;;  %2666 = vmatmul.mubr.f32.vlgmr.msra.gmra.mrb[0].mxu1 %v6951_v38  ;;  %v1065_v38 = vld [vmem:[%s7966_s1 + $0x20b0] sm:$0xff]  ;;  %v1098_v54 = vld [vmem:[%s7966_s1 + $0x21b8] sm:$0xff] }
 0x207   :  { %3984 = vmatpush1.bf16.msra.mxu1 %v3983_v55  ;;  %3374 = vmatprep.subr.bf16.mxu0 %v3373_v56  ;;  %v3991_v16 = vpack.c.bf16 %v1065_v38, %v1061_v7  ;;  %v3391_v55 = vpack.c.bf16 %v1087_v46, %v1083_v39  ;;  %v4003_v56 = vpack.c.bf16 %v1089_v25, %v1085_v47  ;;  %v1101_v7 = vld [vmem:[%s7966_s1 + $0x21d0] sm:$0xff]  ;;  %v1123_v39 = vld [vmem:[%s7966_s1 + $0x2280] sm:$0xff] }
 0x208   :  { %3986 = vmatprep.subr.bf16.mxu1 %v3985_v59  ;;  %2026 = vmatprep.mubr.f32.mxu0 %v1357_v0  ;;  %v1093_v59 = vld [vmem:[%s7966_s1 + $0x2190] sm:$0xff]  ;;  %v4005_v60 = vpack.c.bf16 %v1098_v54, %v1094_v53  ;;  %v1127_v46 = vld [vmem:[%s7966_s1 + $0x22a0] sm:$0xff]  ;;  %v1134_v53 = vld [vmem:[%s7966_s1 + $0x22d8] sm:$0xff] }
 0x209   :  { %2736 = vmatprep.mubr.f32.mxu1 %v1357_v0  ;;  %v1104_v0 = vld [vmem:[%s7966_s1 + $0x21e8] sm:$0xff]  ;;  %v1105_v38 = vld [vmem:[%s7966_s1 + $0x21f0] sm:$0xff]  ;;  %v1138_v54 = vld [vmem:[%s7966_s1 + $0x22f8] sm:$0xff] }
 0x20a   :  { %3376 = vmatpush1.bf16.msra.mxu0 %v3375_v3  ;;  %v3395_v3 = vpack.c.bf16 %v1095_v24, %v1091_v58  ;;  %v1125_v47 = vld [vmem:[%s7966_s1 + $0x2290] sm:$0xff]  ;;  %v1131_v58 = vld [vmem:[%s7966_s1 + $0x22c0] sm:$0xff] }
 0x20b   :  { %3988 = vmatpush1.bf16.msra.mxu1 %v3987_v4  ;;  %3378 = vmatprep.subr.bf16.mxu0 %v3377_v5  ;;  %v4007_v4 = vpack.c.bf16 %v1097_v23, %v1093_v59  ;;  %v3397_v5 = vpack.c.bf16 %v1104_v0, %v1100_v63  ;;  %v1129_v25 = vld [vmem:[%s7966_s1 + $0x22b0] sm:$0xff]  ;;  %v1135_v24 = vld [vmem:[%s7966_s1 + $0x22e0] sm:$0xff]  ;;  %v1140_v63 = vld [vmem:[%s7966_s1 + $0x2308] sm:$0xff] }
 0x20c   :  { %3990 = vmatprep.subr.bf16.mxu1 %v3989_v8  ;;  %v4009_v8 = vpack.c.bf16 %v1106_v2, %v1102_v1  ;;  %v1133_v59 = vld [vmem:[%s7966_s1 + $0x22d0] sm:$0xff]  ;;  %v1144_v0 = vld [vmem:[%s7966_s1 + $0x2328] sm:$0xff]  ;;  %v1142_v1 = vld [vmem:[%s7966_s1 + $0x2318] sm:$0xff] }
 0x20d   :  { %v1137_v23 = vld [vmem:[%s7966_s1 + $0x22f0] sm:$0xff]  ;;  %v1146_v2 = vld [vmem:[%s7966_s1 + $0x2338] sm:$0xff] }
 0x20e   :  { %3380 = vmatpush1.bf16.msra.mxu0 %v3379_v15  ;;  %v3399_v15 = vpack.c.bf16 %v1103_v51, %v1099_v6  ;;  %v1139_v6 = vld [vmem:[%s7966_s1 + $0x2300] sm:$0xff] }
 0x20f   :  { %3992 = vmatpush1.bf16.msra.mxu1 %v3991_v16  ;;  %3382 = vmatprep.subr.bf16.mxu0 %v3381_v17  ;;  %v4011_v16 = vpack.c.bf16 %v1105_v38, %v1101_v7  ;;  %v3401_v17 = vpack.c.bf16 %v1112_v9, %v1108_v45  ;;  %v1143_v51 = vld [vmem:[%s7966_s1 + $0x2320] sm:$0xff]  ;;  %v1141_v7 = vld [vmem:[%s7966_s1 + $0x2310] sm:$0xff]  ;;  %v1148_v45 = vld [vmem:[%s7966_s1 + $0x2348] sm:$0xff] }
 0x210   :  { %3994 = vmatprep.subr.bf16.mxu1 %v3993_v50  ;;  %v4013_v50 = vpack.c.bf16 %v1114_v14, %v1110_v10  ;;  %v1145_v38 = vld [vmem:[%s7966_s1 + $0x2330] sm:$0xff]  ;;  %v1152_v9 = vld [vmem:[%s7966_s1 + $0x2368] sm:$0xff]  ;;  %v1150_v10 = vld [vmem:[%s7966_s1 + $0x2358] sm:$0xff] }
 0x211   :  { %v1154_v14 = vld [vmem:[%s7966_s1 + $0x2378] sm:$0xff] }
 0x212   :  { %3384 = vmatpush1.bf16.msra.mxu0 %v3383_v29  ;;  %v3403_v29 = vpack.c.bf16 %v1111_v19, %v1107_v18  ;;  %v1147_v18 = vld [vmem:[%s7966_s1 + $0x2340] sm:$0xff] }
 0x213   :  { %3996 = vmatpush1.bf16.msra.mxu1 %v3995_v30  ;;  %3386 = vmatprep.subr.bf16.mxu0 %v3385_v31  ;;  %v4015_v30 = vpack.c.bf16 %v1113_v21, %v1109_v20  ;;  %v3405_v31 = vpack.c.bf16 %v1120_v26, %v1116_v22  ;;  %v1151_v19 = vld [vmem:[%s7966_s1 + $0x2360] sm:$0xff]  ;;  %v1149_v20 = vld [vmem:[%s7966_s1 + $0x2350] sm:$0xff]  ;;  %v1156_v22 = vld [vmem:[%s7966_s1 + $0x2388] sm:$0xff] }
 0x214   :  { %3998 = vmatprep.subr.bf16.mxu1 %v3997_v34  ;;  %v4017_v34 = vpack.c.bf16 %v1122_v28, %v1118_v27  ;;  %v1153_v21 = vld [vmem:[%s7966_s1 + $0x2370] sm:$0xff]  ;;  %v1160_v26 = vld [vmem:[%s7966_s1 + $0x23a8] sm:$0xff]  ;;  %v1158_v27 = vld [vmem:[%s7966_s1 + $0x2398] sm:$0xff] }
 0x215   :  { %v1162_v28 = vld [vmem:[%s7966_s1 + $0x23b8] sm:$0xff] }
 0x216   :  { %3388 = vmatpush1.bf16.msra.mxu0 %v3387_v42  ;;  %v3407_v42 = vpack.c.bf16 %v1119_v33, %v1115_v32  ;;  %v1155_v32 = vld [vmem:[%s7966_s1 + $0x2380] sm:$0xff] }
 0x217   :  { %4000 = vmatpush1.bf16.msra.mxu1 %v3999_v43  ;;  %3390 = vmatprep.subr.bf16.mxu0 %v3389_v44  ;;  %v4019_v43 = vpack.c.bf16 %v1121_v35, %v1117_v13  ;;  %v3409_v44 = vpack.c.bf16 %v1128_v36, %v1124_v62  ;;  %v1159_v33 = vld [vmem:[%s7966_s1 + $0x23a0] sm:$0xff]  ;;  %v1157_v13 = vld [vmem:[%s7966_s1 + $0x2390] sm:$0xff]  ;;  %v1164_v62 = vld [vmem:[%s7966_s1 + $0x23c8] sm:$0xff] }
 0x218   :  { %4002 = vmatprep.subr.bf16.mxu1 %v4001_v12  ;;  %v4021_v12 = vpack.c.bf16 %v1130_v41, %v1126_v37  ;;  %v1161_v35 = vld [vmem:[%s7966_s1 + $0x23b0] sm:$0xff]  ;;  %v1168_v36 = vld [vmem:[%s7966_s1 + $0x23e8] sm:$0xff]  ;;  %v1166_v37 = vld [vmem:[%s7966_s1 + $0x23d8] sm:$0xff] }
 0x219   :  { %v1170_v41 = vld [vmem:[%s7966_s1 + $0x23f8] sm:$0xff] }
 0x21a   :  { %3392 = vmatpush1.bf16.msra.mxu0 %v3391_v55  ;;  %v3411_v55 = vpack.c.bf16 %v1127_v46, %v1123_v39  ;;  %v1163_v39 = vld [vmem:[%s7966_s1 + $0x23c0] sm:$0xff] }
 0x21b   :  { %4004 = vmatpush1.bf16.msra.mxu1 %v4003_v56  ;;  %3394 = vmatprep.subr.bf16.mxu0 %v3393_v57  ;;  %v4023_v56 = vpack.c.bf16 %v1129_v25, %v1125_v47  ;;  %v3413_v57 = vpack.c.bf16 %v1136_v52, %v1132_v48  ;;  %v1167_v46 = vld [vmem:[%s7966_s1 + $0x23e0] sm:$0xff]  ;;  %v1165_v47 = vld [vmem:[%s7966_s1 + $0x23d0] sm:$0xff]  ;;  %v1342_v48 = vcombine.high %v7326_v40, %v7326_v40  ;;  %v1172_v52 = vld [vmem:[%s7966_s1 + $0x2408] sm:$0xff] }
 0x21c   :  { %4006 = vmatprep.subr.bf16.mxu1 %v4005_v60  ;;  %v4025_v60 = vpack.c.bf16 %v1138_v54, %v1134_v53  ;;  %v1169_v25 = vld [vmem:[%s7966_s1 + $0x23f0] sm:$0xff]  ;;  %v1176_v53 = vld [vmem:[%s7966_s1 + $0x2428] sm:$0xff]  ;;  %v1174_v54 = vld [vmem:[%s7966_s1 + $0x2418] sm:$0xff] }
 0x21d   :  { %v4043_v40 = vpack.c.bf16 %v1169_v25, %v1165_v47  ;;  %v1207_v47 = vld [vmem:[%s7966_s1 + $0x2520] sm:$0xff] }
 0x21e   :  { %3396 = vmatpush1.bf16.msra.mxu0 %v3395_v3  ;;  %v3415_v3 = vpack.c.bf16 %v1135_v24, %v1131_v58  ;;  %v1171_v58 = vld [vmem:[%s7966_s1 + $0x2400] sm:$0xff] }
 0x21f   :  { %4008 = vmatpush1.bf16.msra.mxu1 %v4007_v4  ;;  %3398 = vmatprep.subr.bf16.mxu0 %v3397_v5  ;;  %v4027_v4 = vpack.c.bf16 %v1137_v23, %v1133_v59  ;;  %v3417_v5 = vpack.c.bf16 %v1144_v0, %v1140_v63  ;;  %v1175_v24 = vld [vmem:[%s7966_s1 + $0x2420] sm:$0xff]  ;;  %v1173_v59 = vld [vmem:[%s7966_s1 + $0x2410] sm:$0xff]  ;;  %v1180_v63 = vld [vmem:[%s7966_s1 + $0x2448] sm:$0xff] }
 0x220   :  { %4010 = vmatprep.subr.bf16.mxu1 %v4009_v8  ;;  %v4029_v8 = vpack.c.bf16 %v1146_v2, %v1142_v1  ;;  %v1177_v23 = vld [vmem:[%s7966_s1 + $0x2430] sm:$0xff]  ;;  %v1184_v0 = vld [vmem:[%s7966_s1 + $0x2468] sm:$0xff]  ;;  %v7741_v1 = vrot.slane %v1342_v48, %v4427_v11  ;;  %v1182_v2 = vld [vmem:[%s7966_s1 + $0x2458] sm:$0xff] }
 0x221   :  { %v1209_v48 = vld [vmem:[%s7966_s1 + $0x2530] sm:$0xff] }
 0x222   :  { %3400 = vmatpush1.bf16.msra.mxu0 %v3399_v15  ;;  %v3419_v15 = vpack.c.bf16 %v1143_v51, %v1139_v6  ;;  %v3437_v6 = vpack.c.bf16 %v1184_v0, %v1180_v63  ;;  %v1179_v51 = vld [vmem:[%s7966_s1 + $0x2440] sm:$0xff]  ;;  %v1220_v63 = vld [vmem:[%s7966_s1 + $0x2588] sm:$0xff] }
 0x223   :  { %4012 = vmatpush1.bf16.msra.mxu1 %v4011_v16  ;;  %3402 = vmatprep.subr.bf16.mxu0 %v3401_v17  ;;  %v4031_v16 = vpack.c.bf16 %v1145_v38, %v1141_v7  ;;  %v3421_v17 = vpack.c.bf16 %v1152_v9, %v1148_v45  ;;  %v1183_v7 = vld [vmem:[%s7966_s1 + $0x2460] sm:$0xff]  ;;  %v1185_v45 = vld [vmem:[%s7966_s1 + $0x2470] sm:$0xff]  ;;  %v1188_v9 = vld [vmem:[%s7966_s1 + $0x2488] sm:$0xff] }
 0x224   :  { %4014 = vmatprep.subr.bf16.mxu1 %v4013_v50  ;;  %v4033_v50 = vpack.c.bf16 %v1154_v14, %v1150_v10  ;;  %v1192_v10 = vld [vmem:[%s7966_s1 + $0x24a8] sm:$0xff]  ;;  %v1358_v14 = vcombine.high %v7741_v1, %v7741_v1 }
 0x225   :  { %v1224_v0 = vld [vmem:[%s7966_s1 + $0x25a8] sm:$0xff] }
 0x226   :  { %3404 = vmatpush1.bf16.msra.mxu0 %v3403_v29  ;;  %v3423_v29 = vpack.c.bf16 %v1151_v19, %v1147_v18  ;;  %v3441_v19 = vpack.c.bf16 %v1192_v10, %v1188_v9  ;;  %v1228_v9 = vld [vmem:[%s7966_s1 + $0x25c8] sm:$0xff] }
 0x227   :  { %4016 = vmatpush1.bf16.msra.mxu1 %v4015_v30  ;;  %3406 = vmatprep.subr.bf16.mxu0 %v3405_v31  ;;  %v4035_v30 = vpack.c.bf16 %v1153_v21, %v1149_v20  ;;  %v3425_v31 = vpack.c.bf16 %v1160_v26, %v1156_v22  ;;  %v1187_v20 = vld [vmem:[%s7966_s1 + $0x2480] sm:$0xff]  ;;  %v1189_v21 = vld [vmem:[%s7966_s1 + $0x2490] sm:$0xff]  ;;  %v1196_v26 = vld [vmem:[%s7966_s1 + $0x24c8] sm:$0xff] }
 0x228   :  { %4018 = vmatprep.subr.bf16.mxu1 %v4017_v34  ;;  %v4037_v34 = vpack.c.bf16 %v1162_v28, %v1158_v27  ;;  %v1200_v27 = vld [vmem:[%s7966_s1 + $0x24e8] sm:$0xff]  ;;  %v1198_v28 = vld [vmem:[%s7966_s1 + $0x24d8] sm:$0xff] }
 0x229   :  { %v1232_v10 = vld [vmem:[%s7966_s1 + $0x25e8] sm:$0xff] }
 0x22a   :  { %3408 = vmatpush1.bf16.msra.mxu0 %v3407_v42  ;;  %v3427_v42 = vpack.c.bf16 %v1159_v33, %v1155_v32  ;;  %v3445_v32 = vpack.c.bf16 %v1200_v27, %v1196_v26  ;;  %v1195_v33 = vld [vmem:[%s7966_s1 + $0x24c0] sm:$0xff]  ;;  %v1240_v26 = vld [vmem:[%s7966_s1 + $0x2628] sm:$0xff]  ;;  %v1238_v27 = vld [vmem:[%s7966_s1 + $0x2618] sm:$0xff] }
 0x22b   :  { %4020 = vmatpush1.bf16.msra.mxu1 %v4019_v43  ;;  %3410 = vmatprep.subr.bf16.mxu0 %v3409_v44  ;;  %v4039_v43 = vpack.c.bf16 %v1161_v35, %v1157_v13  ;;  %v3429_v44 = vpack.c.bf16 %v1168_v36, %v1164_v62  ;;  %v1199_v13 = vld [vmem:[%s7966_s1 + $0x24e0] sm:$0xff]  ;;  %v1201_v62 = vld [vmem:[%s7966_s1 + $0x24f0] sm:$0xff]  ;;  %v1204_v36 = vld [vmem:[%s7966_s1 + $0x2508] sm:$0xff] }
 0x22c   :  { %4022 = vmatprep.subr.bf16.mxu1 %v4021_v12  ;;  %v4041_v12 = vpack.c.bf16 %v1170_v41, %v1166_v37  ;;  %v1208_v37 = vld [vmem:[%s7966_s1 + $0x2528] sm:$0xff]  ;;  %v1206_v41 = vld [vmem:[%s7966_s1 + $0x2518] sm:$0xff] }
 0x22e   :  { %3412 = vmatpush1.bf16.msra.mxu0 %v3411_v55  ;;  %v1178_v55 = vld [vmem:[%s7966_s1 + $0x2438] sm:$0xff] }
 0x22f   :  { %4024 = vmatpush1.bf16.msra.mxu1 %v4023_v56  ;;  %3414 = vmatprep.subr.bf16.mxu0 %v3413_v57  ;;  %v3431_v56 = vpack.c.bf16 %v1167_v46, %v1163_v39  ;;  %v3433_v57 = vpack.c.bf16 %v1176_v53, %v1172_v52  ;;  %v3449_v39 = vpack.c.bf16 %v1208_v37, %v1204_v36  ;;  %v1203_v46 = vld [vmem:[%s7966_s1 + $0x2500] sm:$0xff]  ;;  %v1212_v52 = vld [vmem:[%s7966_s1 + $0x2548] sm:$0xff] }
 0x230   :  { %4026 = vmatprep.subr.bf16.mxu1 %v4025_v60  ;;  %v4045_v60 = vpack.c.bf16 %v1178_v55, %v1174_v54  ;;  %v1216_v53 = vld [vmem:[%s7966_s1 + $0x2568] sm:$0xff]  ;;  %v1214_v54 = vld [vmem:[%s7966_s1 + $0x2558] sm:$0xff] }
 0x231   :  { %v1218_v55 = vld [vmem:[%s7966_s1 + $0x2578] sm:$0xff]  ;;  %v1244_v37 = vld [vmem:[%s7966_s1 + $0x2648] sm:$0x3] }
 0x232   :  { %3416 = vmatpush1.bf16.msra.mxu0 %v3415_v3  ;;  %v1186_v3 = vld [vmem:[%s7966_s1 + $0x2478] sm:$0xff] }
 0x233   :  { %4028 = vmatpush1.bf16.msra.mxu1 %v4027_v4  ;;  %3418 = vmatprep.subr.bf16.mxu0 %v3417_v5  ;;  %v3435_v4 = vpack.c.bf16 %v1175_v24, %v1171_v58  ;;  %v4047_v5 = vpack.c.bf16 %v1177_v23, %v1173_v59  ;;  %v4049_v38 = vpack.c.bf16 %v1186_v3, %v1182_v2  ;;  %v1211_v58 = vld [vmem:[%s7966_s1 + $0x2540] sm:$0xff]  ;;  %v1213_v59 = vld [vmem:[%s7966_s1 + $0x2550] sm:$0xff]  ;;  %v1222_v2 = vld [vmem:[%s7966_s1 + $0x2598] sm:$0xff] }
 0x234   :  { %4030 = vmatprep.subr.bf16.mxu1 %v4029_v8  ;;  %v1181_v8 = vld [vmem:[%s7966_s1 + $0x2450] sm:$0xff]  ;;  %v1215_v24 = vld [vmem:[%s7966_s1 + $0x2560] sm:$0xff]  ;;  %v1226_v3 = vld [vmem:[%s7966_s1 + $0x25b8] sm:$0xff] }
 0x235   :  { %v4051_v18 = vpack.c.bf16 %v1185_v45, %v1181_v8  ;;  %v1217_v23 = vld [vmem:[%s7966_s1 + $0x2570] sm:$0xff] }
 0x236   :  { %3420 = vmatpush1.bf16.msra.mxu0 %v3419_v15  ;;  %v1190_v15 = vld [vmem:[%s7966_s1 + $0x2498] sm:$0xff]  ;;  %v1221_v8 = vld [vmem:[%s7966_s1 + $0x2590] sm:$0xff] }
 0x237   :  { %4032 = vmatpush1.bf16.msra.mxu1 %v4031_v16  ;;  %3422 = vmatprep.subr.bf16.mxu0 %v3421_v17  ;;  %v1194_v16 = vld [vmem:[%s7966_s1 + $0x24b8] sm:$0xff]  ;;  %v3439_v17 = vpack.c.bf16 %v1183_v7, %v1179_v51  ;;  %v1219_v51 = vld [vmem:[%s7966_s1 + $0x2580] sm:$0xff]  ;;  %v1225_v45 = vld [vmem:[%s7966_s1 + $0x25b0] sm:$0xff] }
 0x238   :  { %4034 = vmatprep.subr.bf16.mxu1 %v4033_v50  ;;  %v1191_v50 = vld [vmem:[%s7966_s1 + $0x24a0] sm:$0xff]  ;;  %v4053_v22 = vpack.c.bf16 %v1194_v16, %v1190_v15  ;;  %v1234_v15 = vld [vmem:[%s7966_s1 + $0x25f8] sm:$0xff] }
 0x239   :  { %v1223_v7 = vld [vmem:[%s7966_s1 + $0x25a0] sm:$0xff] }
 0x23a   :  { %3424 = vmatpush1.bf16.msra.mxu0 %v3423_v29  ;;  %v1202_v29 = vld [vmem:[%s7966_s1 + $0x24f8] sm:$0xff]  ;;  %v3459_v16 = vpack.c.bf16 %v1223_v7, %v1219_v51 }
 0x23b   :  { %4036 = vmatpush1.bf16.msra.mxu1 %v4035_v30  ;;  %3426 = vmatprep.subr.bf16.mxu0 %v3425_v31  ;;  %v3443_v30 = vpack.c.bf16 %v1191_v50, %v1187_v20  ;;  %v4057_v35 = vpack.c.bf16 %v1202_v29, %v1198_v28  ;;  %v1231_v20 = vld [vmem:[%s7966_s1 + $0x25e0] sm:$0xff]  ;;  %v1229_v50 = vld [vmem:[%s7966_s1 + $0x25d0] sm:$0xff]  ;;  %v1242_v28 = vld [vmem:[%s7966_s1 + $0x2638] sm:$0xff] }
 0x23c   :  { %4038 = vmatprep.subr.bf16.mxu1 %v4037_v34  ;;  %v1197_v34 = vld [vmem:[%s7966_s1 + $0x24d0] sm:$0xff] }
 0x23e   :  { %3428 = vmatpush1.bf16.msra.mxu0 %v3427_v42  ;;  %v1210_v42 = vld [vmem:[%s7966_s1 + $0x2538] sm:$0xff] }
 0x23f   :  { %4040 = vmatpush1.bf16.msra.mxu1 %v4039_v43  ;;  %3430 = vmatprep.subr.bf16.mxu0 %v3429_v44  ;;  %v3447_v43 = vpack.c.bf16 %v1199_v13, %v1195_v33  ;;  %v4059_v44 = vpack.c.bf16 %v1201_v62, %v1197_v34  ;;  %v4061_v25 = vpack.c.bf16 %v1210_v42, %v1206_v41  ;;  %v1239_v33 = vld [vmem:[%s7966_s1 + $0x2620] sm:$0xff]  ;;  %v1237_v34 = vld [vmem:[%s7966_s1 + $0x2610] sm:$0xff]  ;;  %v1246_v41 = vld [vmem:[%s7966_s1 + $0x2658] sm:$0x3] }
 0x240   :  { %4042 = vmatprep.subr.bf16.mxu1 %v4041_v12  ;;  %v1205_v12 = vld [vmem:[%s7966_s1 + $0x2510] sm:$0xff]  ;;  %v4077_v13 = vpack.c.bf16 %v1242_v28, %v1238_v27  ;;  %v1243_v42 = vld [vmem:[%s7966_s1 + $0x2640] sm:$0x3] }
 0x242   :  { %3432 = vmatpush1.bf16.msra.mxu0 %v3431_v56  ;;  %v3451_v56 = vpack.c.bf16 %v1207_v47, %v1203_v46  ;;  %v1259_v46 = vsub.s32 2, %v4400_v61  ;;  %v1255_v47 = vsub.s32 1, %v4400_v61 }
 0x243   :  { %4044 = vmatpush1.bf16.msra.mxu1 %v4043_v40  ;;  %3434 = vmatprep.subr.bf16.mxu0 %v3433_v57  ;;  %v4063_v40 = vpack.c.bf16 %v1209_v48, %v1205_v12  ;;  %v3453_v57 = vpack.c.bf16 %v1216_v53, %v1212_v52  ;;  %v1263_v12 = vsub.s32 3, %v4400_v61 }
 0x244   :  { %4046 = vmatprep.subr.bf16.mxu1 %v4045_v60  ;;  %v4065_v60 = vpack.c.bf16 %v1218_v55, %v1214_v54 }
 0x245   :  { %2027 = vmatmul.mubr.f32.vlgmr.msra.gmra.mrb[0].mxu0 %v7348_v49 }
 0x246   :  { %3436 = vmatpush1.bf16.msra.mxu0 %v3435_v4  ;;  %2737 = vmatmul.mubr.f32.vlgmr.msra.gmra.mrb[0].mxu1 %v7348_v49  ;;  %v1193_v49 = vld [vmem:[%s7966_s1 + $0x24b0] sm:$0xff]  ;;  %v3455_v4 = vpack.c.bf16 %v1215_v24, %v1211_v58 }
 0x247   :  { %4048 = vmatpush1.bf16.msra.mxu1 %v4047_v5  ;;  %3438 = vmatprep.subr.bf16.mxu0 %v3437_v6  ;;  %v4055_v31 = vpack.c.bf16 %v1193_v49, %v1189_v21  ;;  %v4067_v5 = vpack.c.bf16 %v1217_v23, %v1213_v59  ;;  %v3457_v6 = vpack.c.bf16 %v1224_v0, %v1220_v63  ;;  %v1236_v49 = vld [vmem:[%s7966_s1 + $0x2608] sm:$0xff] }
 0x248   :  { %4050 = vmatprep.subr.bf16.mxu1 %v4049_v38  ;;  %2853 = vmatprep.mubr.msk.f32.mxu0 %vm1378_vm0, %v1358_v14  ;;  %v4069_v38 = vpack.c.bf16 %v1226_v3, %v1222_v2 }
 0x249   :  { %2856 = vmatprep.mubr.msk.f32.mxu1 %vm1378_vm0, %v1358_v14  ;;  %v1230_v14 = vld [vmem:[%s7966_s1 + $0x25d8] sm:$0xff] }
 0x24a   :  { %3440 = vmatpush1.bf16.msra.mxu0 %v3439_v17  ;;  %v4071_v17 = vpack.c.bf16 %v1225_v45, %v1221_v8  ;;  %v4073_v21 = vpack.c.bf16 %v1234_v15, %v1230_v14 }
 0x24b   :  { %4052 = vmatpush1.bf16.msra.mxu1 %v4051_v18  ;;  %3442 = vmatprep.subr.bf16.mxu0 %v3441_v19  ;;  %v3461_v18 = vpack.c.bf16 %v1232_v10, %v1228_v9  ;;  %v1227_v19 = vld [vmem:[%s7966_s1 + $0x25c0] sm:$0xff] }
 0x24c   :  { %4054 = vmatprep.subr.bf16.mxu1 %v4053_v22  ;;  %v1233_v22 = vld [vmem:[%s7966_s1 + $0x25f0] sm:$0xff]  ;;  %v3463_v29 = vpack.c.bf16 %v1231_v20, %v1227_v19 }
 0x24e   :  { %3444 = vmatpush1.bf16.msra.mxu0 %v3443_v30  ;;  %v4075_v30 = vpack.c.bf16 %v1233_v22, %v1229_v50 }
 0x24f   :  { %4056 = vmatpush1.bf16.msra.mxu1 %v4055_v31  ;;  %3446 = vmatprep.subr.bf16.mxu0 %v3445_v32  ;;  %v3465_v31 = vpack.c.bf16 %v1240_v26, %v1236_v49  ;;  %v1235_v32 = vld [vmem:[%s7966_s1 + $0x2600] sm:$0xff] }
 0x250   :  { %4058 = vmatprep.subr.bf16.mxu1 %v4057_v35  ;;  %v1241_v35 = vld [vmem:[%s7966_s1 + $0x2630] sm:$0xff]  ;;  %v3467_v62 = vpack.c.bf16 %v1239_v33, %v1235_v32 }
 0x251   :  { %v4079_v36 = vpack.c.bf16 %v1241_v35, %v1237_v34 }
 0x252   :  { %3448 = vmatpush1.bf16.msra.mxu0 %v3447_v43  ;;  %v1245_v43 = vld [vmem:[%s7966_s1 + $0x2650] sm:$0x3] }
 0x253   :  { %4060 = vmatpush1.bf16.msra.mxu1 %v4059_v44  ;;  %3450 = vmatprep.subr.bf16.mxu0 %v3449_v39  ;;  %v1251_v44 = vsub.s32 0, %v4400_v61  ;;  %v1247_v39 = vld [vmem:[%s7968_s2] sm:$0xf] }
 0x254   :  { %4062 = vmatprep.subr.bf16.mxu1 %v4061_v25  ;;  %v1260_v48 = vrot.slane %v1247_v39, %v1259_v46  ;;  %v1256_v52 = vrot.slane %v1247_v39, %v1255_v47  ;;  %v1264_v53 = vrot.slane %v1247_v39, %v1263_v12 }
 0x255   :  { %v1252_v25 = vrot.slane %v1247_v39, %v1251_v44 }
 0x256   :  { %3452 = vmatpush1.bf16.msra.mxu0 %v3451_v56 }
 0x257   :  { %4064 = vmatpush1.bf16.msra.mxu1 %v4063_v40  ;;  %3454 = vmatprep.subr.bf16.mxu0 %v3453_v57 }
 0x258   :  { %4066 = vmatprep.subr.bf16.mxu1 %v4065_v60 }
 0x25a   :  { %3456 = vmatpush1.bf16.msra.mxu0 %v3455_v4 }
 0x25b   :  { %4068 = vmatpush1.bf16.msra.mxu1 %v4067_v5  ;;  %3458 = vmatprep.subr.bf16.mxu0 %v3457_v6 }
 0x25c   :  { %4070 = vmatprep.subr.bf16.mxu1 %v4069_v38 }
 0x25e   :  { %3460 = vmatpush1.bf16.msra.mxu0 %v3459_v16 }
 0x25f   :  { %4072 = vmatpush1.bf16.msra.mxu1 %v4071_v17  ;;  %3462 = vmatprep.subr.bf16.mxu0 %v3461_v18 }
 0x260   :  { %4074 = vmatprep.subr.bf16.mxu1 %v4073_v21 }
 0x262   :  { %3464 = vmatpush1.bf16.msra.mxu0 %v3463_v29 }
 0x263   :  { %4076 = vmatpush1.bf16.msra.mxu1 %v4075_v30  ;;  %3466 = vmatprep.subr.bf16.mxu0 %v3465_v31 }
 0x264   :  { %4078 = vmatprep.subr.bf16.mxu1 %v4077_v13 }
 0x266   :  { %3468 = vmatpush1.bf16.msra.mxu0 %v3467_v62 }
 0x267   :  { %4080 = vmatpush1.bf16.msra.mxu1 %v4079_v36  ;;  %2851 = vmatprep.subr.msk.mxu0 %vm1381_vm1, %v1244_v37 }
 0x268   :  { %2854 = vmatprep.subr.msk.mxu1 %vm1381_vm1, %v1246_v41 }
 0x26a   :  { %2852 = vmatpush1.msk.msra.mxu0 %vm1381_vm1, %v1243_v42 }
 0x26b   :  { %2855 = vmatpush1.msk.msra.mxu1 %vm1381_vm1, %v1245_v43  ;;  %2098 = vmatmul.mubr.f32.vlgmr.msra.gmra.mrb[0].mxu0 %v7741_v1 }
 0x26c   :  { %2808 = vmatmul.mubr.f32.vlgmr.msra.gmra.mrb[0].mxu1 %v7741_v1 }
 0x33e   :  { %v2099_v54 = vpop.f32.mrb[0].mxu0 }
 0x33f   :  { %v4081_v55 = vadd.f32 %v2099_v54, %v1252_v25  ;;  %v2809_v1 = vpop.f32.mrb[0].mxu1  ;;  %v2101_v56 = vpop.f32.mrb[1].mxu0 }
 0x340   :  { %v4083_v40 = vadd.f32 %v2809_v1, %v1260_v48  ;;  %v4082_v57 = vadd.f32 %v2101_v56, %v1256_v52  ;;  %v2811_v58 = vpop.f32.mrb[1].mxu1 }
 0x341   :  { %v2814_v24 = vmax.f32 %v4081_v55, 0.0  ;;  %v4084_v59 = vadd.f32 %v2811_v58, %v1264_v53 }
 0x342   :  { %v2816_v60 = vmax.f32 %v4083_v40, 0.0  ;;  %v2815_v23 = vmax.f32 %v4082_v57, 0.0 }
 0x343   :  { %v2817_v61 = vmax.f32 %v4084_v59, 0.0 }
 0x344   :  { %v2822_v63 = vcombine.low %v2814_v24, %v2815_v23 }
 0x345   :  { %v2823_v0 = vcombine.low %v2816_v60, %v2817_v61 }
 0x346   :  { %v2830_v2 = vrot.slane %v2822_v63, %v4427_v11 }
 0x347   :  { %v2837_v3 = vrot.slane %v2823_v0, %v4427_v11 }
 0x349   :  { %v2838_v4 = vcombine.low %v2830_v2, %v2837_v3 }
 0x34b   :  { %2846 = vst.msk [vmem:[%s7969_s3] sm:$0xff] %vm2845_vm7, %v2838_v4 }

</bundles_post_ra>
